<compile_context>
chip_gen: v7x
topology: tpu7x:2x2x1
jax: 0.10.0
libtpu: 0.0.40
codegen_flags: <defaults>
</compile_context>

<pallas_src>
import functools

import jax
import jax.numpy as jnp
from jax.experimental import pallas as pl
from jax.experimental.pallas import tpu as pltpu


def attention_kernel(x_ref, wqkv_ref, *refs, num_heads, has_qkv_bias):
    """One batch element per grid step.

    x_ref    : (C, N)        input, channel-first (N = H*W on the lane axis)
    wqkv_ref : (3C, C)       rows = [Q | K | V], head-major; Q rows pre-scaled
    bqkv_ref : (3C, 1)       optional qkv bias (only when has_qkv_bias)
    wp_ref   : (C, C)        output-projection weight (C_out, C_in)
    bp_ref   : (C, 1)        output-projection bias
    out_ref  : (C, N)
    o_scr    : (C, N) f32    VMEM scratch holding the per-head outputs
    """
    if has_qkv_bias:
        bqkv_ref, wp_ref, bp_ref, out_ref, o_scr = refs
    else:
        wp_ref, bp_ref, out_ref, o_scr = refs
        bqkv_ref = None

    x = x_ref[...]                                     # (C, N)
    c, n = x.shape
    hd = c // num_heads

    # ---- fused QKV projection: (3C, C) @ (C, N) -> (3C, N) ------------------
    qkv = jnp.dot(wqkv_ref[...], x, preferred_element_type=jnp.float32)
    if has_qkv_bias:
        qkv = qkv + bqkv_ref[...]                      # (3C, 1) broadcast over N

    # ---- per-head attention core (short static loop; 2-D MXU ops only) ------
    for h in range(num_heads):
        q_h = qkv[h * hd:(h + 1) * hd]                       # (hd, N), pre-scaled
        k_h = qkv[c + h * hd:c + (h + 1) * hd]               # (hd, N)
        v_h = qkv[2 * c + h * hd:2 * c + (h + 1) * hd]       # (hd, N)

        # logits[i, j] = sum_d k[d, i] * (scale*q)[d, j]   -> (N_k, N_q)
        logits = jnp.dot(k_h.T, q_h, preferred_element_type=jnp.float32)

        # softmax over the key axis (axis 0 == torch softmax(dim=-2)), all f32
        m = jnp.max(logits, axis=0, keepdims=True)           # (1, N_q)
        e = jnp.exp(logits - m)                              # (N_k, N_q)
        s = jnp.sum(e, axis=0, keepdims=True)                # (1, N_q)

        # deferred normalization: V @ e first, scale only the (hd, N) result
        o_h = jnp.dot(v_h, e, preferred_element_type=jnp.float32)   # (hd, N_q)
        o_scr[h * hd:(h + 1) * hd, :] = o_h * pl.reciprocal(s, approx=False)

    # ---- fused output projection + bias: (C, C) @ (C, N) + (C, 1) -----------
    y = jnp.dot(wp_ref[...], o_scr[...], preferred_element_type=jnp.float32)
    out_ref[...] = (y + bp_ref[...]).astype(out_ref.dtype)


def attention_pallas(x, w_qkv, w_proj, b_proj, b_qkv=None, *, num_heads,
                     qk_scale=None):
    """Forward of the PyTorch `Attention` module.

    x      : (B, C, H, W)
    w_qkv  : (3C, C, 1, 1) or (3C, C)  -- nn.Conv2d(dim, 3*dim, 1) weight
    w_proj : (C, C, 1, 1)  or (C, C)   -- nn.Conv2d(dim, dim, 1) weight
    b_proj : (C,)                      -- proj bias
    b_qkv  : (3C,) or None             -- qkv bias (module default: None)
    """
    B, C, H, W = x.shape
    N = H * W
    hd = C // num_heads
    scale = qk_scale if qk_scale is not None else hd ** (-0.5)
    has_qkv_bias = b_qkv is not None

    x_cn = x.reshape(B, C, N)            # channel-first: no transpose needed

    # qkv conv weight rows are interleaved per head as [h: q(hd), k(hd), v(hd)];
    # repack as [Q | K | V] (head-major inside each group) and fold the softmax
    # scale into the Q rows (constant-folded at trace time).
    w4 = w_qkv.reshape(num_heads, 3, hd, C)
    wqkv = jnp.concatenate(
        [(w4[:, 0] * scale).reshape(C, C),       # Q (pre-scaled)
         w4[:, 1].reshape(C, C),                 # K
         w4[:, 2].reshape(C, C)],                # V
        axis=0).astype(x.dtype)                  # (3C, C), lane-dense

    wp = w_proj.reshape(C, C).astype(x.dtype)    # (C_out, C_in) == head-major C_in
    bp = b_proj.reshape(C, 1).astype(jnp.float32)

    operands = [x_cn, wqkv]
    in_specs = [
        pl.BlockSpec((None, C, N), lambda b: (b, 0, 0)),   # x: (C, N) per step
        pl.BlockSpec((3 * C, C), lambda b: (0, 0)),        # qkv slab (resident)
    ]
    if has_qkv_bias:
        b4 = b_qkv.reshape(num_heads, 3, hd)
        bqkv = jnp.concatenate([b4[:, 0] * scale, b4[:, 1], b4[:, 2]], axis=0)
        bqkv = bqkv.reshape(3 * C, 1).astype(jnp.float32)
        operands.append(bqkv)
        in_specs.append(pl.BlockSpec((3 * C, 1), lambda b: (0, 0)))
    operands += [wp, bp]
    in_specs += [
        pl.BlockSpec((C, C), lambda b: (0, 0)),            # proj weight (resident)
        pl.BlockSpec((C, 1), lambda b: (0, 0)),            # proj bias
    ]

    out_cn = pl.pallas_call(
        functools.partial(attention_kernel, num_heads=num_heads,
                          has_qkv_bias=has_qkv_bias),
        out_shape=jax.ShapeDtypeStruct((B, C, N), x.dtype),
        grid=(B,),
        in_specs=in_specs,
        out_specs=pl.BlockSpec((None, C, N), lambda b: (b, 0, 0)),
        scratch_shapes=[pltpu.VMEM((C, N), jnp.float32)],  # per-head output slab
        compiler_params=pltpu.CompilerParams(
            dimension_semantics=("parallel",)),            # batch axis -> megacore
    )(*operands)

    return out_cn.reshape(B, C, H, W)


# ------------------- pure-JAX reference (mirrors the torch code) -------------------
def attention_ref(x, w_qkv, w_proj, b_proj, b_qkv=None, *, num_heads, qk_scale=None):
    B, C, H, W = x.shape
    N = H * W
    hd = C // num_heads
    scale = qk_scale if qk_scale is not None else hd ** (-0.5)

    xf = x.reshape(B, C, N)
    w2 = w_qkv.reshape(3 * C, C)
    qkv = jnp.einsum('oc,bcn->bon', w2, xf)                  # 1x1 conv
    if b_qkv is not None:
        qkv = qkv + b_qkv[None, :, None]
    qkv = qkv.reshape(B, num_heads, 3 * hd, N)
    q = qkv[:, :, 0:hd, :]
    k = qkv[:, :, hd:2 * hd, :]
    v = qkv[:, :, 2 * hd:3 * hd, :]

    attn = jnp.einsum('bhdn,bhdm->bhnm', k, q) * scale       # k^T @ q
    attn = jax.nn.softmax(attn, axis=-2)
    o = jnp.einsum('bhdn,bhnm->bhdm', v, attn).reshape(B, C, N)

    y = jnp.einsum('oc,bcn->bon', w_proj.reshape(C, C), o) + b_proj[None, :, None]
    return y.reshape(B, C, H, W)


if __name__ == "__main__":
    # dim=128 (lane-aligned), 8 heads (head_dim=16), 16x16 spatial -> N=256, batch=2.
    B, C, H, W, NUM_HEADS = 2, 128, 16, 16, 8

    root = jax.random.PRNGKey(0)
    k_x, k_wqkv, k_bqkv, k_wproj, k_bproj = jax.random.split(root, 5)

    x = jax.random.normal(k_x, (B, C, H, W), jnp.float32)

    s0 = 1.0 / (C ** 0.5)   # ~ PyTorch Conv2d default init bound
    w_qkv = jax.random.uniform(k_wqkv, (3 * C, C, 1, 1), jnp.float32, -s0, s0)
    w_proj = jax.random.uniform(k_wproj, (C, C, 1, 1), jnp.float32, -s0, s0)
    b_proj = jax.random.uniform(k_bproj, (C,), jnp.float32, -s0, s0)
    b_qkv = jax.random.uniform(k_bqkv, (3 * C,), jnp.float32, -s0, s0)

    # default module config: qkv_bias=False
    out = attention_pallas(x, w_qkv, w_proj, b_proj, num_heads=NUM_HEADS)
    out = jax.block_until_ready(out)
    ref = attention_ref(x, w_qkv, w_proj, b_proj, num_heads=NUM_HEADS)
    assert out.shape == (B, C, H, W)
    max_err = float(jnp.max(jnp.abs(out - ref)))
    assert jnp.allclose(out, ref, rtol=1e-4, atol=1e-4), max_err

    # qkv_bias=True config
    out_b = attention_pallas(x, w_qkv, w_proj, b_proj, b_qkv=b_qkv,
                             num_heads=NUM_HEADS)
    out_b = jax.block_until_ready(out_b)
    ref_b = attention_ref(x, w_qkv, w_proj, b_proj, b_qkv=b_qkv,
                          num_heads=NUM_HEADS)
    max_err_b = float(jnp.max(jnp.abs(out_b - ref_b)))
    assert jnp.allclose(out_b, ref_b, rtol=1e-4, atol=1e-4), max_err_b

    print("KERNEL_OK")
</pallas_src>

<mosaic_0001>
module attributes {stable_mosaic.version = 11 : i64} {
  func.func @attention_kernel(%arg0: i32, %arg1: memref<1x128x256xf32, #tpu.memory_space<vmem>>, %arg2: memref<384x128xf32, #tpu.memory_space<vmem>>, %arg3: memref<128x128xf32, #tpu.memory_space<vmem>>, %arg4: memref<128x1xf32, #tpu.memory_space<vmem>>, %arg5: memref<1x128x256xf32, #tpu.memory_space<vmem>>, %arg6: memref<128x256xf32, #tpu.memory_space<vmem>>) attributes {dimension_semantics = [#tpu.dimension_semantics<parallel>], iteration_bounds = array<i64: 2>, scalar_prefetch = 0 : i64, scratch_operands = 1 : i64, tpu.core_type = #tpu.core_type<tc>, window_params = [{transform_indices = @transform_0, window_bounds = array<i64: 1, 128, 256>}, {pipeline_mode = #tpu.pipeline_mode<synchronous>, transform_indices = @transform_1, window_bounds = array<i64: 384, 128>}, {pipeline_mode = #tpu.pipeline_mode<synchronous>, transform_indices = @transform_2, window_bounds = array<i64: 128, 128>}, {pipeline_mode = #tpu.pipeline_mode<synchronous>, transform_indices = @transform_3, window_bounds = array<i64: 128, 1>}, {transform_indices = @transform_4, window_bounds = array<i64: 1, 128, 256>}]} {
    %c0 = arith.constant 0 : index
    %c0_0 = arith.constant 0 : index
    %c0_1 = arith.constant 0 : index
    %0 = vector.load %arg1[%c0, %c0_0, %c0_1] : memref<1x128x256xf32, #tpu.memory_space<vmem>>, vector<1x128x256xf32>
    %1 = vector.shape_cast %0 : vector<1x128x256xf32> to vector<128x256xf32>
    %c0_2 = arith.constant 0 : index
    %c0_3 = arith.constant 0 : index
    %2 = vector.load %arg2[%c0_2, %c0_3] : memref<384x128xf32, #tpu.memory_space<vmem>>, vector<384x128xf32>
    %cst = arith.constant dense<0.000000e+00> : vector<384x256xf32>
    %3 = tpu.matmul %2, %1, %cst {dimension_numbers = #tpu.dot_dimension_numbers<[1], [0], [0], [1], [0, 0, 1, 1], [], []>} : vector<384x128xf32>, vector<128x256xf32>, vector<384x256xf32> -> vector<384x256xf32>
    %4 = vector.extract_strided_slice %3 {offsets = [0, 0], sizes = [16, 256], strides = [1, 1]} : vector<384x256xf32> to vector<16x256xf32>
    %5 = vector.extract_strided_slice %3 {offsets = [128, 0], sizes = [16, 256], strides = [1, 1]} : vector<384x256xf32> to vector<16x256xf32>
    %6 = vector.extract_strided_slice %3 {offsets = [256, 0], sizes = [16, 256], strides = [1, 1]} : vector<384x256xf32> to vector<16x256xf32>
    %7 = tpu.transpose %5, [1, 0] : vector<16x256xf32> -> vector<256x16xf32>
    %cst_4 = arith.constant dense<0.000000e+00> : vector<256x256xf32>
    %8 = tpu.matmul %7, %4, %cst_4 {dimension_numbers = #tpu.dot_dimension_numbers<[1], [0], [0], [1], [0, 0, 1, 1], [], []>} : vector<256x16xf32>, vector<16x256xf32>, vector<256x256xf32> -> vector<256x256xf32>
    %cst_5 = arith.constant dense<0xFF800000> : vector<256xf32>
    %9 = vector.multi_reduction <maximumf>, %8, %cst_5 [0] : vector<256x256xf32> to vector<256xf32>
    %10 = vector.shape_cast %9 : vector<256xf32> to vector<1x256xf32>
    %11 = vector.broadcast %10 : vector<1x256xf32> to vector<256x256xf32>
    %12 = arith.subf %8, %11 : vector<256x256xf32>
    %13 = math.exp %12 : vector<256x256xf32>
    %cst_6 = arith.constant dense<0.000000e+00> : vector<256xf32>
    %14 = vector.multi_reduction <add>, %13, %cst_6 [0] : vector<256x256xf32> to vector<256xf32>
    %15 = vector.shape_cast %14 : vector<256xf32> to vector<1x256xf32>
    %cst_7 = arith.constant dense<0.000000e+00> : vector<16x256xf32>
    %16 = tpu.matmul %6, %13, %cst_7 {dimension_numbers = #tpu.dot_dimension_numbers<[1], [0], [0], [1], [0, 0, 1, 1], [], []>} : vector<16x256xf32>, vector<256x256xf32>, vector<16x256xf32> -> vector<16x256xf32>
    %17 = tpu.reciprocal %15 : vector<1x256xf32> -> vector<1x256xf32>
    %18 = vector.broadcast %17 : vector<1x256xf32> to vector<16x256xf32>
    %19 = arith.mulf %16, %18 : vector<16x256xf32>
    %c0_8 = arith.constant 0 : index
    %c0_9 = arith.constant 0 : index
    %20 = vector.load %arg6[%c0_8, %c0_9] : memref<128x256xf32, #tpu.memory_space<vmem>>, vector<16x256xf32>
    tpu.vector_store %arg6[%c0_8, %c0_9], %19 {strides = array<i32>} : memref<128x256xf32, #tpu.memory_space<vmem>>, vector<16x256xf32>,
    %21 = vector.extract_strided_slice %3 {offsets = [16, 0], sizes = [16, 256], strides = [1, 1]} : vector<384x256xf32> to vector<16x256xf32>
    %22 = vector.extract_strided_slice %3 {offsets = [144, 0], sizes = [16, 256], strides = [1, 1]} : vector<384x256xf32> to vector<16x256xf32>
    %23 = vector.extract_strided_slice %3 {offsets = [272, 0], sizes = [16, 256], strides = [1, 1]} : vector<384x256xf32> to vector<16x256xf32>
    %24 = tpu.transpose %22, [1, 0] : vector<16x256xf32> -> vector<256x16xf32>
    %cst_10 = arith.constant dense<0.000000e+00> : vector<256x256xf32>
    %25 = tpu.matmul %24, %21, %cst_10 {dimension_numbers = #tpu.dot_dimension_numbers<[1], [0], [0], [1], [0, 0, 1, 1], [], []>} : vector<256x16xf32>, vector<16x256xf32>, vector<256x256xf32> -> vector<256x256xf32>
    %cst_11 = arith.constant dense<0xFF800000> : vector<256xf32>
    %26 = vector.multi_reduction <maximumf>, %25, %cst_11 [0] : vector<256x256xf32> to vector<256xf32>
    %27 = vector.shape_cast %26 : vector<256xf32> to vector<1x256xf32>
    %28 = vector.broadcast %27 : vector<1x256xf32> to vector<256x256xf32>
    %29 = arith.subf %25, %28 : vector<256x256xf32>
    %30 = math.exp %29 : vector<256x256xf32>
    %cst_12 = arith.constant dense<0.000000e+00> : vector<256xf32>
    %31 = vector.multi_reduction <add>, %30, %cst_12 [0] : vector<256x256xf32> to vector<256xf32>
    %32 = vector.shape_cast %31 : vector<256xf32> to vector<1x256xf32>
    %cst_13 = arith.constant dense<0.000000e+00> : vector<16x256xf32>
    %33 = tpu.matmul %23, %30, %cst_13 {dimension_numbers = #tpu.dot_dimension_numbers<[1], [0], [0], [1], [0, 0, 1, 1], [], []>} : vector<16x256xf32>, vector<256x256xf32>, vector<16x256xf32> -> vector<16x256xf32>
    %34 = tpu.reciprocal %32 : vector<1x256xf32> -> vector<1x256xf32>
    %35 = vector.broadcast %34 : vector<1x256xf32> to vector<16x256xf32>
    %36 = arith.mulf %33, %35 : vector<16x256xf32>
    %c16 = arith.constant 16 : index
    %c0_14 = arith.constant 0 : index
    %37 = vector.load %arg6[%c16, %c0_14] : memref<128x256xf32, #tpu.memory_space<vmem>>, vector<16x256xf32>
    tpu.vector_store %arg6[%c16, %c0_14], %36 {strides = array<i32>} : memref<128x256xf32, #tpu.memory_space<vmem>>, vector<16x256xf32>,
    %38 = vector.extract_strided_slice %3 {offsets = [32, 0], sizes = [16, 256], strides = [1, 1]} : vector<384x256xf32> to vector<16x256xf32>
    %39 = vector.extract_strided_slice %3 {offsets = [160, 0], sizes = [16, 256], strides = [1, 1]} : vector<384x256xf32> to vector<16x256xf32>
    %40 = vector.extract_strided_slice %3 {offsets = [288, 0], sizes = [16, 256], strides = [1, 1]} : vector<384x256xf32> to vector<16x256xf32>
    %41 = tpu.transpose %39, [1, 0] : vector<16x256xf32> -> vector<256x16xf32>
    %cst_15 = arith.constant dense<0.000000e+00> : vector<256x256xf32>
    %42 = tpu.matmul %41, %38, %cst_15 {dimension_numbers = #tpu.dot_dimension_numbers<[1], [0], [0], [1], [0, 0, 1, 1], [], []>} : vector<256x16xf32>, vector<16x256xf32>, vector<256x256xf32> -> vector<256x256xf32>
    %cst_16 = arith.constant dense<0xFF800000> : vector<256xf32>
    %43 = vector.multi_reduction <maximumf>, %42, %cst_16 [0] : vector<256x256xf32> to vector<256xf32>
    %44 = vector.shape_cast %43 : vector<256xf32> to vector<1x256xf32>
    %45 = vector.broadcast %44 : vector<1x256xf32> to vector<256x256xf32>
    %46 = arith.subf %42, %45 : vector<256x256xf32>
    %47 = math.exp %46 : vector<256x256xf32>
    %cst_17 = arith.constant dense<0.000000e+00> : vector<256xf32>
    %48 = vector.multi_reduction <add>, %47, %cst_17 [0] : vector<256x256xf32> to vector<256xf32>
    %49 = vector.shape_cast %48 : vector<256xf32> to vector<1x256xf32>
    %cst_18 = arith.constant dense<0.000000e+00> : vector<16x256xf32>
    %50 = tpu.matmul %40, %47, %cst_18 {dimension_numbers = #tpu.dot_dimension_numbers<[1], [0], [0], [1], [0, 0, 1, 1], [], []>} : vector<16x256xf32>, vector<256x256xf32>, vector<16x256xf32> -> vector<16x256xf32>
    %51 = tpu.reciprocal %49 : vector<1x256xf32> -> vector<1x256xf32>
    %52 = vector.broadcast %51 : vector<1x256xf32> to vector<16x256xf32>
    %53 = arith.mulf %50, %52 : vector<16x256xf32>
    %c32 = arith.constant 32 : index
    %c0_19 = arith.constant 0 : index
    %54 = vector.load %arg6[%c32, %c0_19] : memref<128x256xf32, #tpu.memory_space<vmem>>, vector<16x256xf32>
    tpu.vector_store %arg6[%c32, %c0_19], %53 {strides = array<i32>} : memref<128x256xf32, #tpu.memory_space<vmem>>, vector<16x256xf32>,
    %55 = vector.extract_strided_slice %3 {offsets = [48, 0], sizes = [16, 256], strides = [1, 1]} : vector<384x256xf32> to vector<16x256xf32>
    %56 = vector.extract_strided_slice %3 {offsets = [176, 0], sizes = [16, 256], strides = [1, 1]} : vector<384x256xf32> to vector<16x256xf32>
    %57 = vector.extract_strided_slice %3 {offsets = [304, 0], sizes = [16, 256], strides = [1, 1]} : vector<384x256xf32> to vector<16x256xf32>
    %58 = tpu.transpose %56, [1, 0] : vector<16x256xf32> -> vector<256x16xf32>
    %cst_20 = arith.constant dense<0.000000e+00> : vector<256x256xf32>
    %59 = tpu.matmul %58, %55, %cst_20 {dimension_numbers = #tpu.dot_dimension_numbers<[1], [0], [0], [1], [0, 0, 1, 1], [], []>} : vector<256x16xf32>, vector<16x256xf32>, vector<256x256xf32> -> vector<256x256xf32>
    %cst_21 = arith.constant dense<0xFF800000> : vector<256xf32>
    %60 = vector.multi_reduction <maximumf>, %59, %cst_21 [0] : vector<256x256xf32> to vector<256xf32>
    %61 = vector.shape_cast %60 : vector<256xf32> to vector<1x256xf32>
    %62 = vector.broadcast %61 : vector<1x256xf32> to vector<256x256xf32>
    %63 = arith.subf %59, %62 : vector<256x256xf32>
    %64 = math.exp %63 : vector<256x256xf32>
    %cst_22 = arith.constant dense<0.000000e+00> : vector<256xf32>
    %65 = vector.multi_reduction <add>, %64, %cst_22 [0] : vector<256x256xf32> to vector<256xf32>
    %66 = vector.shape_cast %65 : vector<256xf32> to vector<1x256xf32>
    %cst_23 = arith.constant dense<0.000000e+00> : vector<16x256xf32>
    %67 = tpu.matmul %57, %64, %cst_23 {dimension_numbers = #tpu.dot_dimension_numbers<[1], [0], [0], [1], [0, 0, 1, 1], [], []>} : vector<16x256xf32>, vector<256x256xf32>, vector<16x256xf32> -> vector<16x256xf32>
    %68 = tpu.reciprocal %66 : vector<1x256xf32> -> vector<1x256xf32>
    %69 = vector.broadcast %68 : vector<1x256xf32> to vector<16x256xf32>
    %70 = arith.mulf %67, %69 : vector<16x256xf32>
    %c48 = arith.constant 48 : index
    %c0_24 = arith.constant 0 : index
    %71 = vector.load %arg6[%c48, %c0_24] : memref<128x256xf32, #tpu.memory_space<vmem>>, vector<16x256xf32>
    tpu.vector_store %arg6[%c48, %c0_24], %70 {strides = array<i32>} : memref<128x256xf32, #tpu.memory_space<vmem>>, vector<16x256xf32>,
    %72 = vector.extract_strided_slice %3 {offsets = [64, 0], sizes = [16, 256], strides = [1, 1]} : vector<384x256xf32> to vector<16x256xf32>
    %73 = vector.extract_strided_slice %3 {offsets = [192, 0], sizes = [16, 256], strides = [1, 1]} : vector<384x256xf32> to vector<16x256xf32>
    %74 = vector.extract_strided_slice %3 {offsets = [320, 0], sizes = [16, 256], strides = [1, 1]} : vector<384x256xf32> to vector<16x256xf32>
    %75 = tpu.transpose %73, [1, 0] : vector<16x256xf32> -> vector<256x16xf32>
    %cst_25 = arith.constant dense<0.000000e+00> : vector<256x256xf32>
    %76 = tpu.matmul %75, %72, %cst_25 {dimension_numbers = #tpu.dot_dimension_numbers<[1], [0], [0], [1], [0, 0, 1, 1], [], []>} : vector<256x16xf32>, vector<16x256xf32>, vector<256x256xf32> -> vector<256x256xf32>
    %cst_26 = arith.constant dense<0xFF800000> : vector<256xf32>
    %77 = vector.multi_reduction <maximumf>, %76, %cst_26 [0] : vector<256x256xf32> to vector<256xf32>
    %78 = vector.shape_cast %77 : vector<256xf32> to vector<1x256xf32>
    %79 = vector.broadcast %78 : vector<1x256xf32> to vector<256x256xf32>
    %80 = arith.subf %76, %79 : vector<256x256xf32>
    %81 = math.exp %80 : vector<256x256xf32>
    %cst_27 = arith.constant dense<0.000000e+00> : vector<256xf32>
    %82 = vector.multi_reduction <add>, %81, %cst_27 [0] : vector<256x256xf32> to vector<256xf32>
    %83 = vector.shape_cast %82 : vector<256xf32> to vector<1x256xf32>
    %cst_28 = arith.constant dense<0.000000e+00> : vector<16x256xf32>
    %84 = tpu.matmul %74, %81, %cst_28 {dimension_numbers = #tpu.dot_dimension_numbers<[1], [0], [0], [1], [0, 0, 1, 1], [], []>} : vector<16x256xf32>, vector<256x256xf32>, vector<16x256xf32> -> vector<16x256xf32>
    %85 = tpu.reciprocal %83 : vector<1x256xf32> -> vector<1x256xf32>
    %86 = vector.broadcast %85 : vector<1x256xf32> to vector<16x256xf32>
    %87 = arith.mulf %84, %86 : vector<16x256xf32>
    %c64 = arith.constant 64 : index
    %c0_29 = arith.constant 0 : index
    %88 = vector.load %arg6[%c64, %c0_29] : memref<128x256xf32, #tpu.memory_space<vmem>>, vector<16x256xf32>
    tpu.vector_store %arg6[%c64, %c0_29], %87 {strides = array<i32>} : memref<128x256xf32, #tpu.memory_space<vmem>>, vector<16x256xf32>,
    %89 = vector.extract_strided_slice %3 {offsets = [80, 0], sizes = [16, 256], strides = [1, 1]} : vector<384x256xf32> to vector<16x256xf32>
    %90 = vector.extract_strided_slice %3 {offsets = [208, 0], sizes = [16, 256], strides = [1, 1]} : vector<384x256xf32> to vector<16x256xf32>
    %91 = vector.extract_strided_slice %3 {offsets = [336, 0], sizes = [16, 256], strides = [1, 1]} : vector<384x256xf32> to vector<16x256xf32>
    %92 = tpu.transpose %90, [1, 0] : vector<16x256xf32> -> vector<256x16xf32>
    %cst_30 = arith.constant dense<0.000000e+00> : vector<256x256xf32>
    %93 = tpu.matmul %92, %89, %cst_30 {dimension_numbers = #tpu.dot_dimension_numbers<[1], [0], [0], [1], [0, 0, 1, 1], [], []>} : vector<256x16xf32>, vector<16x256xf32>, vector<256x256xf32> -> vector<256x256xf32>
    %cst_31 = arith.constant dense<0xFF800000> : vector<256xf32>
    %94 = vector.multi_reduction <maximumf>, %93, %cst_31 [0] : vector<256x256xf32> to vector<256xf32>
    %95 = vector.shape_cast %94 : vector<256xf32> to vector<1x256xf32>
    %96 = vector.broadcast %95 : vector<1x256xf32> to vector<256x256xf32>
    %97 = arith.subf %93, %96 : vector<256x256xf32>
    %98 = math.exp %97 : vector<256x256xf32>
    %cst_32 = arith.constant dense<0.000000e+00> : vector<256xf32>
    %99 = vector.multi_reduction <add>, %98, %cst_32 [0] : vector<256x256xf32> to vector<256xf32>
    %100 = vector.shape_cast %99 : vector<256xf32> to vector<1x256xf32>
    %cst_33 = arith.constant dense<0.000000e+00> : vector<16x256xf32>
    %101 = tpu.matmul %91, %98, %cst_33 {dimension_numbers = #tpu.dot_dimension_numbers<[1], [0], [0], [1], [0, 0, 1, 1], [], []>} : vector<16x256xf32>, vector<256x256xf32>, vector<16x256xf32> -> vector<16x256xf32>
    %102 = tpu.reciprocal %100 : vector<1x256xf32> -> vector<1x256xf32>
    %103 = vector.broadcast %102 : vector<1x256xf32> to vector<16x256xf32>
    %104 = arith.mulf %101, %103 : vector<16x256xf32>
    %c80 = arith.constant 80 : index
    %c0_34 = arith.constant 0 : index
    %105 = vector.load %arg6[%c80, %c0_34] : memref<128x256xf32, #tpu.memory_space<vmem>>, vector<16x256xf32>
    tpu.vector_store %arg6[%c80, %c0_34], %104 {strides = array<i32>} : memref<128x256xf32, #tpu.memory_space<vmem>>, vector<16x256xf32>,
    %106 = vector.extract_strided_slice %3 {offsets = [96, 0], sizes = [16, 256], strides = [1, 1]} : vector<384x256xf32> to vector<16x256xf32>
    %107 = vector.extract_strided_slice %3 {offsets = [224, 0], sizes = [16, 256], strides = [1, 1]} : vector<384x256xf32> to vector<16x256xf32>
    %108 = vector.extract_strided_slice %3 {offsets = [352, 0], sizes = [16, 256], strides = [1, 1]} : vector<384x256xf32> to vector<16x256xf32>
    %109 = tpu.transpose %107, [1, 0] : vector<16x256xf32> -> vector<256x16xf32>
    %cst_35 = arith.constant dense<0.000000e+00> : vector<256x256xf32>
    %110 = tpu.matmul %109, %106, %cst_35 {dimension_numbers = #tpu.dot_dimension_numbers<[1], [0], [0], [1], [0, 0, 1, 1], [], []>} : vector<256x16xf32>, vector<16x256xf32>, vector<256x256xf32> -> vector<256x256xf32>
    %cst_36 = arith.constant dense<0xFF800000> : vector<256xf32>
    %111 = vector.multi_reduction <maximumf>, %110, %cst_36 [0] : vector<256x256xf32> to vector<256xf32>
    %112 = vector.shape_cast %111 : vector<256xf32> to vector<1x256xf32>
    %113 = vector.broadcast %112 : vector<1x256xf32> to vector<256x256xf32>
    %114 = arith.subf %110, %113 : vector<256x256xf32>
    %115 = math.exp %114 : vector<256x256xf32>
    %cst_37 = arith.constant dense<0.000000e+00> : vector<256xf32>
    %116 = vector.multi_reduction <add>, %115, %cst_37 [0] : vector<256x256xf32> to vector<256xf32>
    %117 = vector.shape_cast %116 : vector<256xf32> to vector<1x256xf32>
    %cst_38 = arith.constant dense<0.000000e+00> : vector<16x256xf32>
    %118 = tpu.matmul %108, %115, %cst_38 {dimension_numbers = #tpu.dot_dimension_numbers<[1], [0], [0], [1], [0, 0, 1, 1], [], []>} : vector<16x256xf32>, vector<256x256xf32>, vector<16x256xf32> -> vector<16x256xf32>
    %119 = tpu.reciprocal %117 : vector<1x256xf32> -> vector<1x256xf32>
    %120 = vector.broadcast %119 : vector<1x256xf32> to vector<16x256xf32>
    %121 = arith.mulf %118, %120 : vector<16x256xf32>
    %c96 = arith.constant 96 : index
    %c0_39 = arith.constant 0 : index
    %122 = vector.load %arg6[%c96, %c0_39] : memref<128x256xf32, #tpu.memory_space<vmem>>, vector<16x256xf32>
    tpu.vector_store %arg6[%c96, %c0_39], %121 {strides = array<i32>} : memref<128x256xf32, #tpu.memory_space<vmem>>, vector<16x256xf32>,
    %123 = vector.extract_strided_slice %3 {offsets = [112, 0], sizes = [16, 256], strides = [1, 1]} : vector<384x256xf32> to vector<16x256xf32>
    %124 = vector.extract_strided_slice %3 {offsets = [240, 0], sizes = [16, 256], strides = [1, 1]} : vector<384x256xf32> to vector<16x256xf32>
    %125 = vector.extract_strided_slice %3 {offsets = [368, 0], sizes = [16, 256], strides = [1, 1]} : vector<384x256xf32> to vector<16x256xf32>
    %126 = tpu.transpose %124, [1, 0] : vector<16x256xf32> -> vector<256x16xf32>
    %cst_40 = arith.constant dense<0.000000e+00> : vector<256x256xf32>
    %127 = tpu.matmul %126, %123, %cst_40 {dimension_numbers = #tpu.dot_dimension_numbers<[1], [0], [0], [1], [0, 0, 1, 1], [], []>} : vector<256x16xf32>, vector<16x256xf32>, vector<256x256xf32> -> vector<256x256xf32>
    %cst_41 = arith.constant dense<0xFF800000> : vector<256xf32>
    %128 = vector.multi_reduction <maximumf>, %127, %cst_41 [0] : vector<256x256xf32> to vector<256xf32>
    %129 = vector.shape_cast %128 : vector<256xf32> to vector<1x256xf32>
    %130 = vector.broadcast %129 : vector<1x256xf32> to vector<256x256xf32>
    %131 = arith.subf %127, %130 : vector<256x256xf32>
    %132 = math.exp %131 : vector<256x256xf32>
    %cst_42 = arith.constant dense<0.000000e+00> : vector<256xf32>
    %133 = vector.multi_reduction <add>, %132, %cst_42 [0] : vector<256x256xf32> to vector<256xf32>
    %134 = vector.shape_cast %133 : vector<256xf32> to vector<1x256xf32>
    %cst_43 = arith.constant dense<0.000000e+00> : vector<16x256xf32>
    %135 = tpu.matmul %125, %132, %cst_43 {dimension_numbers = #tpu.dot_dimension_numbers<[1], [0], [0], [1], [0, 0, 1, 1], [], []>} : vector<16x256xf32>, vector<256x256xf32>, vector<16x256xf32> -> vector<16x256xf32>
    %136 = tpu.reciprocal %134 : vector<1x256xf32> -> vector<1x256xf32>
    %137 = vector.broadcast %136 : vector<1x256xf32> to vector<16x256xf32>
    %138 = arith.mulf %135, %137 : vector<16x256xf32>
    %c112 = arith.constant 112 : index
    %c0_44 = arith.constant 0 : index
    %139 = vector.load %arg6[%c112, %c0_44] : memref<128x256xf32, #tpu.memory_space<vmem>>, vector<16x256xf32>
    tpu.vector_store %arg6[%c112, %c0_44], %138 {strides = array<i32>} : memref<128x256xf32, #tpu.memory_space<vmem>>, vector<16x256xf32>,
    %c0_45 = arith.constant 0 : index
    %c0_46 = arith.constant 0 : index
    %140 = vector.load %arg3[%c0_45, %c0_46] : memref<128x128xf32, #tpu.memory_space<vmem>>, vector<128x128xf32>
    %c0_47 = arith.constant 0 : index
    %c0_48 = arith.constant 0 : index
    %141 = vector.load %arg6[%c0_47, %c0_48] : memref<128x256xf32, #tpu.memory_space<vmem>>, vector<128x256xf32>
    %cst_49 = arith.constant dense<0.000000e+00> : vector<128x256xf32>
    %142 = tpu.matmul %140, %141, %cst_49 {dimension_numbers = #tpu.dot_dimension_numbers<[1], [0], [0], [1], [0, 0, 1, 1], [], []>} : vector<128x128xf32>, vector<128x256xf32>, vector<128x256xf32> -> vector<128x256xf32>
    %c0_50 = arith.constant 0 : index
    %c0_51 = arith.constant 0 : index
    %143 = vector.load %arg4[%c0_50, %c0_51] : memref<128x1xf32, #tpu.memory_space<vmem>>, vector<128x1xf32>
    %144 = vector.broadcast %143 : vector<128x1xf32> to vector<128x256xf32>
    %145 = arith.addf %142, %144 : vector<128x256xf32>
    %c0_52 = arith.constant 0 : index
    %c0_53 = arith.constant 0 : index
    %c0_54 = arith.constant 0 : index
    %146 = vector.load %arg5[%c0_52, %c0_53, %c0_54] : memref<1x128x256xf32, #tpu.memory_space<vmem>>, vector<1x128x256xf32>
    %147 = vector.shape_cast %146 : vector<1x128x256xf32> to vector<128x256xf32>
    %148 = vector.shape_cast %145 : vector<128x256xf32> to vector<1x128x256xf32>
    tpu.vector_store %arg5[%c0_52, %c0_53, %c0_54], %148 {strides = array<i32>} : memref<1x128x256xf32, #tpu.memory_space<vmem>>, vector<1x128x256xf32>,
    return
  }
  func.func @transform_0(%arg0: i32) -> (i32, i32, i32) {
    %c0_i32 = arith.constant 0 : i32
    %c0_i32_0 = arith.constant 0 : i32
    %c0_i32_1 = arith.constant 0 : i32
    return %arg0, %c0_i32, %c0_i32_0 : i32, i32, i32
  }
  func.func @transform_1(%arg0: i32) -> (i32, i32) {
    %c0_i32 = arith.constant 0 : i32
    %c0_i32_0 = arith.constant 0 : i32
    %c0_i32_1 = arith.constant 0 : i32
    return %c0_i32, %c0_i32_0 : i32, i32
  }
  func.func @transform_2(%arg0: i32) -> (i32, i32) {
    %c0_i32 = arith.constant 0 : i32
    %c0_i32_0 = arith.constant 0 : i32
    %c0_i32_1 = arith.constant 0 : i32
    return %c0_i32, %c0_i32_0 : i32, i32
  }
  func.func @transform_3(%arg0: i32) -> (i32, i32) {
    %c0_i32 = arith.constant 0 : i32
    %c0_i32_0 = arith.constant 0 : i32
    %c0_i32_1 = arith.constant 0 : i32
    return %c0_i32, %c0_i32_0 : i32, i32
  }
  func.func @transform_4(%arg0: i32) -> (i32, i32, i32) {
    %c0_i32 = arith.constant 0 : i32
    %c0_i32_0 = arith.constant 0 : i32
    %c0_i32_1 = arith.constant 0 : i32
    return %arg0, %c0_i32, %c0_i32_0 : i32, i32, i32
  }
}

</mosaic_0001>

<bundles_post_ra>
// kernel: tpu_custom_call.1
= control target key start
LH: loop header
LB: loop body
LE: loop exit
PB: predicated region body
PF: predicated region fallthrough
CT: control target
= control target key end

     0   :  { %9 = vsyncpa [#allocation4], 0  ;;  %s16813_s0 = inlined_call_operand.hbm [shape: f32[2,128,256], index: 0, kind: input, shape index: {}]   ;;  %s16814_s1 = inlined_call_operand.hbm [shape: f32[384,128], index: 1, kind: input, shape index: {}]   ;;  %s16815_s2 = inlined_call_operand.vmem [shape: f32[128,128], index: 2, kind: input, shape index: {}]   ;;  %s16816_s3 = inlined_call_operand.vmem [shape: f32[128,1], index: 3, kind: input, shape index: {}]   ;;  %s16817_s4 = inlined_call_operand.hbm [shape: f32[2,128,256], index: 4, kind: output, shape index: {}]  }
   0x1   :  { %11 = vsyncpa [#allocation4 + $0x1], 0 }
   0x2   :  { %12 = vsyncpa [#allocation7], 0 }
   0x3   :  { %13 = vsyncpa [#allocation5], 0 }
   0x4   :  { %15 = vsyncpa [#allocation5 + $0x1], 0  ;;  %s10022_s15 = smov 0   ;;  %s10024_s16 = smov 0  }
   0x5   :  { %s10026_s17 = smov 0   ;;  %s10028_s18 = smov 0  }
   0x6 LB: > { %s10043_s19 = sadd.s32 4294967295, %s9984_s18   ;;  %s7851_s20 = sadd.s32 4294967294, %s9984_s18   ;;  %s9984_s18 = sphi %s10028_s18, %s18472_s18   ;;  %s9980_s17 = sphi %s10026_s17, %s18471_s17   ;;  %s9976_s16 = sphi %s10024_s16, %s18470_s16   ;;  %s9972_s15 = sphi %s10022_s15, %s18469_s15  }
   0x7   : > { %p41_p0 = scmp.ne.s32.totalorder %s9976_s16, %s9972_s15  ;;  %p16818_p1 = scmp.eq.s32.totalorder %s10043_s19, 0 }
   0x8   : > { %p134_p3 = scmp.eq.s32.totalorder %s7851_s20, 1  ;;  %p7852_p5 = scmp.ge.s32.totalorder %s9984_s18, 1 }
   0x9   : > { %p10052_p4 = por %p16818_p1, %p41_p0  ;;  %p141_p7 = scmp.lt.s32.totalorder %s9984_s18, 3 }
   0xa   : > { %p10057_p6 = por %p134_p3, %p41_p0  ;;  %s9986_s24 = smov [#allocation6]  }
   0xb   : > { %s17209_s21 = scalar_select %p10052_p4, 1, 0 }
   0xc   : > { %s17210_s22 = scalar_select %p10057_p6, 1, 0 }
   0xd   : > { %p10062_p8 = pnand %p7852_p5, %p141_p7  ;;  %s153_s25 = sshll.u32 %s9986_s24, 4  ;;  %s10066_s25 = int_to_ptr.vmem [resolvable:$true] %s153_s25 }
   0xe   : > { %s10078_s27 = sadd.s32 1, %s9984_s18   ;;  %s28_s28 = sadd.s32 1, %s9980_s17 }
   0xf   : > { %s17211_s23 = scalar_select %p10062_p8, 1, 0 }
  0x10   : > { %p8741_p9 = pneg %p10062_p8  ;;  %s25_s29 = ssub.s32 %s9984_s18, %s10078_s27 }
  0x11   : > { %s9856_s6 = scalar_lea.hbm %s16814_s1, 6144 }
  0x12   : > { %p10073_p11 = pnand %p8741_p9, %p16818_p1  ;;  %p9857_p12 = scmp.ne.s32.totalorder %s16814_s1, %s9856_s6 }
  0x13   : > { %p9863_p5 = scmp.lt.u32.totalorder %s9856_s6, %s16814_s1 }
  0x14   : > { %p9858_p13 = pneg %p10073_p11 }
  0x16   : > { %p9859_p0 = pnand %p9858_p13, %p9857_p12 }
  0x18   : > { %p9860_p3 = pneg %p9859_p0 }
  0x1a   : > { %p9865_p7 = pnand %p9863_p5, %p9860_p3 }
  0x1c   : > { %9868 = shalt.err (!%p9865_p7)
}
  0x1d   : > { %s9869_s11 = scalar_lea.vmem %s10066_s25, 6144  ;;  %p9877_p2 = scmp.lt.s32.totalorder %s10066_s25, %s10066_s25 }
  0x1e   : > { %p9870_p9 = scmp.ne.s32.totalorder %s10066_s25, %s9869_s11  ;;  %p9878_p6 = scmp.lt.s32.totalorder %s9869_s11, %s9869_s11 }
  0x20   : > { %p9872_p10 = pnand %p9870_p9, %p9858_p13  ;;  %p9879_p4 = por %p9878_p6, %p9877_p2 }
  0x22   : > { %p9873_p1 = pneg %p9872_p10 }
  0x24   : > { %p9880_p8 = pnand %p9879_p4, %p9873_p1 }
  0x26   : > { %9883 = shalt.err (!%p9880_p8)
}
  0x27   : > { %s9987_s12 = smov 128   ;;  %s9988_s13 = smov 8  }
  0x28   : > { %8744 = dma.hbm_to_vmem [thread:$0]  (!%p10073_p11), %s16814_s1, 6144, %s10066_s25, [#allocation7], %s9987_s12, %s9987_s12, %s9988_s13  }
  0x29   : > { %p26_p2 = scmp.eq.s32.totalorder %s25_s29, 0  ;;  %p35_p1 = scmp.ne.s32.totalorder %s9980_s17, %s9976_s16 }
  0x2a   : > { %p36_p4 = scmp.eq.s32.totalorder %s9984_s18, 0  ;;  %p8754_p6 = scmp.lt.s32.totalorder %s9984_s18, 2 }
  0x2b   : > { %s10109_s24 = scalar_select %p26_p2, %s9980_s17, %s28_s28  }
  0x2c   : > { %p37_p8 = por %p36_p4, %p35_p1  ;;  %p17213_p10 = scmp.eq.s32.totalorder %s10043_s19, 1 }
  0x2d   : > { %s173_s5 = sand.u32 1, %s9980_s17   ;;  %s8123_s6 = sshll.u32 %s9984_s18, 12 }
  0x2e   : > { %p10113_p12 = por %p17213_p10, %p35_p1  ;;  %s7855_s7 = sshll.u32 %s173_s5, 8 }
  0x2f   : > { %s10122_s9 = scalar_lea.hbm %s16813_s0, %s8123_s6  ;;  %s177_s25 = scalar_lea.vmem [#allocation3], %s7855_s7 }
  0x30   : > { %s184_s28 = sshll.u32 %s177_s25, 4  ;;  %p10124_p11 = pnand %p8754_p6, %p37_p8  ;;  %s10128_s28 = int_to_ptr.vmem [resolvable:$true] %s184_s28 }
  0x31   : > { %s10130_s10 = scalar_lea.sflag [#allocation4], %s173_s5  ;;  %s9884_s11 = scalar_lea.hbm %s10122_s9, 4096 }
  0x32   : > { %p9885_p13 = scmp.ne.s32.totalorder %s10122_s9, %s9884_s11  ;;  %p9886_p0 = pneg %p10124_p11 }
  0x33   : > { %s9889_s14 = scalar_lea.hbm %s16813_s0, 8192  ;;  %p9890_p7 = scmp.lt.u32.totalorder %s10122_s9, %s16813_s0 }
  0x34   : > { %p9887_p3 = pnand %p9886_p0, %p9885_p13  ;;  %p9891_p9 = scmp.lt.u32.totalorder %s9889_s14, %s9884_s11 }
  0x35   : > { %p9893_p1 = scmp.lt.u32.totalorder %s9884_s11, %s10122_s9 }
  0x36   : > { %p9888_p5 = pneg %p9887_p3  ;;  %p9892_p2 = por %p9891_p9, %p9890_p7 }
  0x38   : > { %p9894_p4 = por %p9893_p1, %p9892_p2 }
  0x3a   : > { %p9895_p6 = pnand %p9894_p4, %p9888_p5 }
  0x3c   : > { %9898 = shalt.err (!%p9895_p6)
}
  0x3d   : > { %s9899_s5 = scalar_lea.vmem %s10128_s28, 4096  ;;  %s9989_s7 = smov [#allocation3]  }
  0x3e   : > { %p9900_p8 = scmp.ne.s32.totalorder %s10128_s28, %s9899_s5  ;;  %s9904_s26 = sshll.u32 %s9989_s7, 4  ;;  %s9905_s26 = int_to_ptr.vmem [resolvable:$false] %s9904_s26 }
  0x3f   : > { %s9906_s8 = scalar_lea.vmem %s9905_s26, 8192  ;;  %p9907_p3 = scmp.lt.s32.totalorder %s10128_s28, %s9905_s26 }
  0x40   : > { %p9902_p10 = pnand %p9900_p8, %p9886_p0  ;;  %p9908_p7 = scmp.lt.s32.totalorder %s9906_s8, %s9899_s5 }
  0x42   : > { %p9903_p13 = pneg %p9902_p10  ;;  %p9909_p9 = por %p9908_p7, %p9907_p3 }
  0x44   : > { %p9910_p2 = pnand %p9909_p9, %p9903_p13 }
  0x46   : > { %9913 = shalt.err (!%p9910_p2)
}
  0x47   : > { %s9990_s25 = smov 256   ;;  %s9991_s11 = smov 16  }
  0x48   : > { %8748 = dma.hbm_to_vmem [thread:$0]  (!%p10124_p11), %s10122_s9, 4096, %s10128_s28, %s10130_s10, %s9990_s25, %s9990_s25, %s9991_s11  }
  0x49   : > { %p17216_p0 = scmp.ne.s32.totalorder %s17211_s23, 0 }
  0x4b   : > { %196 = sbr.rel (%p17216_p0) target bundleno = 4884 (0x1314), region = 36 }
  0x52   : > { %s10161_s12 = sand.u32 1, %s9976_s16   ;;  %p17217_p5 = scmp.ne.s32.totalorder %s17209_s21, 0 }
  0x53   : > { %s7859_s13 = sshll.u32 %s10161_s12, 8  ;;  %s199_s14 = scalar_lea.sflag [#allocation4], %s10161_s12 }
  0x54   : > { %s10167_s20 = scalar_lea.vmem [#allocation3], %s7859_s13 }
  0x55   : > { %9959 = dma.done.wait (%p17217_p5), %s199_s14, 4096  }
  0x56   : > { %9961 = vsyncadd (%p17217_p5), %s199_s14, 4294963200  ;;  %p17218_p11 = scmp.eq.s32.totalorder %s10043_s19, 0 }
  0x58   : > { %9963 = dma.done.wait (%p17218_p11), [#allocation7], 6144   ;;  %p17219_p1 = pmov %p17218_p11 }
  0x59   : > { %v16826_v0 = vmov 0.0   ;;  %v232_v1 = vld [vmem:[%s10167_s20 + $0x8] sm:$0xff]  ;;  %v234_v2 = vld [vmem:[%s10167_s20 + $0x18] sm:$0xff]  ;;  %v231_v3 = vld [vmem:[%s10167_s20] sm:$0xff]  ;;  %vm728_vm0 = vcmask 130048   ;;  %s16728_s29 = scalar_lea.vmem [#allocation8], %s7859_s13 }
  0x5a   : > { %9965 = vsyncadd (%p17219_p1), [#allocation7], 4294961152  ;;  %375 = vmatprep.mubr.f32.mxu0 %v16826_v0  ;;  %889 = vmatprep.mubr.f32.mxu1 %v16826_v0  ;;  %v8125_v4 = vpack.c.bf16 %v234_v2, %v232_v1  ;;  %v233_v5 = vld [vmem:[%s10167_s20 + $0x10] sm:$0xff]  ;;  %v236_v6 = vld [vmem:[%s10167_s20 + $0x28] sm:$0xff]  ;;  %s8124_s13 = sshll.u32 %s10043_s19, 12  ;;  %s7768_s10 = sshll.u32 %s16728_s29, 4  ;;  %s16767_s10 = int_to_ptr.vmem [resolvable:$true] %s7768_s10 }
  0x5b   : > { %v238_v7 = vld [vmem:[%s10167_s20 + $0x38] sm:$0xff]  ;;  %v8127_v8 = vpack.c.bf16 %v233_v5, %v231_v3  ;;  %v235_v10 = vld [vmem:[%s10167_s20 + $0x20] sm:$0xff]  ;;  %v237_v11 = vld [vmem:[%s10167_s20 + $0x30] sm:$0xff]  ;;  %s16765_s7 = scalar_lea.hbm %s16817_s4, %s8124_s13  ;;  %s7755_s19 = scalar_lea.sflag [#allocation5], %s10161_s12 }
  0x5c   : > { %v8129_v9 = vpack.c.bf16 %v238_v7, %v236_v6  ;;  %v240_v12 = vld [vmem:[%s10167_s20 + $0x48] sm:$0xff]  ;;  %8126 = vmatprep.subr.bf16.mxu0 %v8125_v4  ;;  %v242_v13 = vld [vmem:[%s10167_s20 + $0x58] sm:$0xff]  ;;  %v8131_v14 = vpack.c.bf16 %v237_v11, %v235_v10  ;;  %v239_v16 = vld [vmem:[%s10167_s20 + $0x40] sm:$0xff]  ;;  %s9914_s26 = scalar_lea.vmem %s16767_s10, 4096  ;;  %s9994_s8 = smov [#allocation8]  }
  0x5d   : > { %8128 = vmatpush1.bf16.msra.mxu0 %v8127_v8  ;;  %v8133_v15 = vpack.c.bf16 %v242_v13, %v240_v12  ;;  %v241_v17 = vld [vmem:[%s10167_s20 + $0x50] sm:$0xff]  ;;  %v244_v18 = vld [vmem:[%s10167_s20 + $0x68] sm:$0xff]  ;;  %v246_v19 = vld [vmem:[%s10167_s20 + $0x78] sm:$0xff]  ;;  %p9915_p4 = scmp.ne.s32.totalorder %s16767_s10, %s9914_s26  ;;  %s9918_s25 = sshll.u32 %s9994_s8, 4  ;;  %s9919_s25 = int_to_ptr.vmem [resolvable:$false] %s9918_s25 }
  0x5e   : > { %8130 = vmatprep.subr.bf16.mxu0 %v8129_v9  ;;  %v8135_v20 = vpack.c.bf16 %v241_v17, %v239_v16  ;;  %v8137_v21 = vpack.c.bf16 %v246_v19, %v244_v18  ;;  %v243_v22 = vld [vmem:[%s10167_s20 + $0x60] sm:$0xff]  ;;  %v245_v23 = vld [vmem:[%s10167_s20 + $0x70] sm:$0xff]  ;;  %v248_v24 = vld [vmem:[%s10167_s20 + $0x88] sm:$0xff]  ;;  %s9920_s11 = scalar_lea.vmem %s9919_s25, 8192  ;;  %p9921_p10 = scmp.lt.s32.totalorder %s16767_s10, %s9919_s25 }
  0x5f   : > { %v250_v25 = vld [vmem:[%s10167_s20 + $0x98] sm:$0xff]  ;;  %v8139_v26 = vpack.c.bf16 %v245_v23, %v243_v22  ;;  %v247_v28 = vld [vmem:[%s10167_s20 + $0x80] sm:$0xff]  ;;  %v249_v29 = vld [vmem:[%s10167_s20 + $0x90] sm:$0xff]  ;;  %p9916_p6 = pnand %p9915_p4, %p10113_p12  ;;  %p9922_p13 = scmp.lt.s32.totalorder %s9920_s11, %s9914_s26 }
  0x60   : > { %v8141_v27 = vpack.c.bf16 %v250_v25, %v248_v24  ;;  %v252_v30 = vld [vmem:[%s10167_s20 + $0xa8] sm:$0xff]  ;;  %v254_v31 = vld [vmem:[%s10167_s20 + $0xb8] sm:$0xff]  ;;  %v8143_v32 = vpack.c.bf16 %v249_v29, %v247_v28  ;;  %v251_v34 = vld [vmem:[%s10167_s20 + $0xa0] sm:$0xff] }
  0x61   : > { %8132 = vmatpush1.bf16.msra.mxu0 %v8131_v14  ;;  %v8145_v33 = vpack.c.bf16 %v254_v31, %v252_v30  ;;  %v253_v35 = vld [vmem:[%s10167_s20 + $0xb0] sm:$0xff]  ;;  %v256_v36 = vld [vmem:[%s10167_s20 + $0xc8] sm:$0xff]  ;;  %v258_v37 = vld [vmem:[%s10167_s20 + $0xd8] sm:$0xff]  ;;  %p9917_p8 = pneg %p9916_p6  ;;  %p9923_p3 = por %p9922_p13, %p9921_p10 }
  0x62   : > { %8134 = vmatprep.subr.bf16.mxu0 %v8133_v15  ;;  %v8147_v38 = vpack.c.bf16 %v253_v35, %v251_v34  ;;  %v8149_v39 = vpack.c.bf16 %v258_v37, %v256_v36  ;;  %v255_v40 = vld [vmem:[%s10167_s20 + $0xc0] sm:$0xff]  ;;  %v257_v41 = vld [vmem:[%s10167_s20 + $0xd0] sm:$0xff]  ;;  %v260_v42 = vld [vmem:[%s10167_s20 + $0xe8] sm:$0xff] }
  0x63   : > { %v262_v43 = vld [vmem:[%s10167_s20 + $0xf8] sm:$0xff]  ;;  %v8151_v44 = vpack.c.bf16 %v257_v41, %v255_v40  ;;  %v259_v46 = vld [vmem:[%s10167_s20 + $0xe0] sm:$0xff]  ;;  %v261_v47 = vld [vmem:[%s10167_s20 + $0xf0] sm:$0xff]  ;;  %p9924_p7 = pnand %p9923_p3, %p9917_p8 }
  0x64   : > { %v8153_v45 = vpack.c.bf16 %v262_v43, %v260_v42  ;;  %v8155_v48 = vpack.c.bf16 %v261_v47, %v259_v46  ;;  %v263_v49 = vld [vmem:[#allocation6] sm:$0xff]  ;;  %v264_v50 = vld [vmem:[#allocation6 + $0x8] sm:$0xff]  ;;  %v265_v51 = vld [vmem:[#allocation6 + $0x10] sm:$0xff] }
  0x65   : > { %8136 = vmatpush1.bf16.msra.mxu0 %v8135_v20  ;;  %v266_v52 = vld [vmem:[#allocation6 + $0x18] sm:$0xff]  ;;  %v267_v53 = vld [vmem:[#allocation6 + $0x20] sm:$0xff]  ;;  %v268_v54 = vld [vmem:[#allocation6 + $0x28] sm:$0xff] }
  0x66   : > { %8138 = vmatprep.subr.bf16.mxu0 %v8137_v21  ;;  %v269_v55 = vld [vmem:[#allocation6 + $0x30] sm:$0xff]  ;;  %v270_v56 = vld [vmem:[#allocation6 + $0x38] sm:$0xff]  ;;  %v271_v57 = vld [vmem:[#allocation6 + $0x40] sm:$0xff] }
  0x67   : > { %v272_v58 = vld [vmem:[#allocation6 + $0x48] sm:$0xff]  ;;  %v273_v59 = vld [vmem:[#allocation6 + $0x50] sm:$0xff]  ;;  %v274_v60 = vld [vmem:[#allocation6 + $0x58] sm:$0xff] }
  0x68   : > { %v275_v61 = vld [vmem:[#allocation6 + $0x60] sm:$0xff]  ;;  %v276_v62 = vld [vmem:[#allocation6 + $0x68] sm:$0xff]  ;;  %v277_v63 = vld [vmem:[#allocation6 + $0x70] sm:$0xff] }
  0x69   : > { %8140 = vmatpush1.bf16.msra.mxu0 %v8139_v26  ;;  %v278_v1 = vld [vmem:[#allocation6 + $0x78] sm:$0xff]  ;;  %v279_v2 = vld [vmem:[#allocation6 + $0x80] sm:$0xff]  ;;  %v280_v3 = vld [vmem:[#allocation6 + $0x88] sm:$0xff] }
  0x6a   : > { %8142 = vmatprep.subr.bf16.mxu0 %v8141_v27  ;;  %v281_v4 = vld [vmem:[#allocation6 + $0x90] sm:$0xff]  ;;  %v282_v5 = vld [vmem:[#allocation6 + $0x98] sm:$0xff]  ;;  %v283_v6 = vld [vmem:[#allocation6 + $0xa0] sm:$0xff] }
  0x6b   : > { %v284_v7 = vld [vmem:[#allocation6 + $0xa8] sm:$0xff]  ;;  %v285_v8 = vld [vmem:[#allocation6 + $0xb0] sm:$0xff]  ;;  %v286_v9 = vld [vmem:[#allocation6 + $0xb8] sm:$0xff] }
  0x6c   : > { %v296_v37 = vld [vmem:[#allocation6 + $0x108] sm:$0xff] }
  0x6d   : > { %8144 = vmatpush1.bf16.msra.mxu0 %v8143_v32 }
  0x6e   : > { %8146 = vmatprep.subr.bf16.mxu0 %v8145_v33 }
  0x71   : > { %8148 = vmatpush1.bf16.msra.mxu0 %v8147_v38 }
  0x72   : > { %8150 = vmatprep.subr.bf16.mxu0 %v8149_v39 }
  0x75   : > { %8152 = vmatpush1.bf16.msra.mxu0 %v8151_v44 }
  0x76   : > { %8154 = vmatprep.subr.bf16.mxu0 %v8153_v45  ;;  %v295_v45 = vld [vmem:[#allocation6 + $0x100] sm:$0xff] }
  0x79   : > { %8156 = vmatpush1.bf16.msra.mxu0 %v8155_v48 }
  0x7c   : > { %376 = vmatmul.mubr.f32.vlgmr.msra.gmra.mrb[0].mxu0 %v263_v49 }
  0x7d   : > { %381 = vmatprep.mubr.f32.mxu0 %v16826_v0 }
  0x80   : > { %382 = vmatmul.mubr.f32.gmra.mrb[2].mxu0 %v264_v50 }
  0x81   : > { %387 = vmatprep.mubr.f32.mxu0 %v16826_v0 }
  0x84   : > { %388 = vmatmul.mubr.f32.gmra.mrb[4].mxu0 %v265_v51 }
  0x85   : > { %393 = vmatprep.mubr.f32.mxu0 %v16826_v0 }
  0x88   : > { %394 = vmatmul.mubr.f32.gmra.mrb[6].mxu0 %v266_v52 }
  0x89   : > { %399 = vmatprep.mubr.f32.mxu0 %v16826_v0 }
  0x8c   : > { %400 = vmatmul.mubr.f32.gmra.mrb[8].mxu0 %v267_v53 }
  0x8d   : > { %405 = vmatprep.mubr.f32.mxu0 %v16826_v0 }
  0x90   : > { %406 = vmatmul.mubr.f32.gmra.mrb[10].mxu0 %v268_v54 }
  0x91   : > { %411 = vmatprep.mubr.f32.mxu0 %v16826_v0 }
  0x94   : > { %412 = vmatmul.mubr.f32.gmra.mrb[12].mxu0 %v269_v55 }
  0x95   : > { %417 = vmatprep.mubr.f32.mxu0 %v16826_v0 }
  0x98   : > { %418 = vmatmul.mubr.f32.gmra.mrb[14].mxu0 %v270_v56 }
  0x99   : > { %423 = vmatprep.mubr.f32.mxu0 %v16826_v0 }
  0x9c   : > { %424 = vmatmul.mubr.f32.gmra.mrb[16].mxu0 %v271_v57 }
  0x9d   : > { %429 = vmatprep.mubr.f32.mxu0 %v16826_v0 }
  0xa0   : > { %430 = vmatmul.mubr.f32.gmra.mrb[18].mxu0 %v272_v58 }
  0xa1   : > { %435 = vmatprep.mubr.f32.mxu0 %v16826_v0 }
  0xa4   : > { %436 = vmatmul.mubr.f32.gmra.mrb[20].mxu0 %v273_v59 }
  0xa5   : > { %441 = vmatprep.mubr.f32.mxu0 %v16826_v0 }
  0xa8   : > { %442 = vmatmul.mubr.f32.gmra.mrb[22].mxu0 %v274_v60 }
  0xa9   : > { %447 = vmatprep.mubr.f32.mxu0 %v16826_v0 }
  0xac   : > { %448 = vmatmul.mubr.f32.gmra.mrb[24].mxu0 %v275_v61 }
  0xad   : > { %453 = vmatprep.mubr.f32.mxu0 %v16826_v0 }
  0xb0   : > { %454 = vmatmul.mubr.f32.gmra.mrb[26].mxu0 %v276_v62  ;;  %v287_v62 = vld [vmem:[#allocation6 + $0xc0] sm:$0xff] }
  0xb1   : > { %459 = vmatprep.mubr.f32.mxu0 %v16826_v0 }
  0xb4   : > { %460 = vmatmul.mubr.f32.gmra.mrb[28].mxu0 %v277_v63  ;;  %v288_v63 = vld [vmem:[#allocation6 + $0xc8] sm:$0xff] }
  0xb5   : > { %465 = vmatprep.mubr.f32.mxu0 %v16826_v0 }
  0xb8   : > { %466 = vmatmul.mubr.f32.gmra.mrb[30].mxu0 %v278_v1 }
  0xb9   : > { %471 = vmatprep.mubr.f32.mxu0 %v16826_v0 }
  0xbc   : > { %472 = vmatmul.mubr.f32.gmra.mrb[32].mxu0 %v279_v2 }
  0xbd   : > { %477 = vmatprep.mubr.f32.mxu0 %v16826_v0 }
  0xc0   : > { %478 = vmatmul.mubr.f32.gmra.mrb[34].mxu0 %v280_v3 }
  0xc1   : > { %483 = vmatprep.mubr.f32.mxu0 %v16826_v0 }
  0xc4   : > { %484 = vmatmul.mubr.f32.gmra.mrb[36].mxu0 %v281_v4 }
  0xc5   : > { %489 = vmatprep.mubr.f32.mxu0 %v16826_v0 }
  0xc8   : > { %490 = vmatmul.mubr.f32.gmra.mrb[38].mxu0 %v282_v5  ;;  %v289_v5 = vld [vmem:[#allocation6 + $0xd0] sm:$0xff] }
  0xc9   : > { %495 = vmatprep.mubr.f32.mxu0 %v16826_v0 }
  0xcc   : > { %496 = vmatmul.mubr.f32.gmra.mrb[40].mxu0 %v283_v6  ;;  %v290_v6 = vld [vmem:[#allocation6 + $0xd8] sm:$0xff] }
  0xcd   : > { %501 = vmatprep.mubr.f32.mxu0 %v16826_v0 }
  0xd0   : > { %502 = vmatmul.mubr.f32.gmra.mrb[42].mxu0 %v284_v7 }
  0xd1   : > { %507 = vmatprep.mubr.f32.mxu0 %v16826_v0 }
  0xd4   : > { %508 = vmatmul.mubr.f32.gmra.mrb[44].mxu0 %v285_v8 }
  0xd5   : > { %513 = vmatprep.mubr.f32.mxu0 %v16826_v0 }
  0xd8   : > { %514 = vmatmul.mubr.f32.gmra.mrb[46].mxu0 %v286_v9 }
  0xd9   : > { %519 = vmatprep.mubr.f32.mxu0 %v16826_v0 }
  0xdc   : > { %520 = vmatmul.mubr.f32.gmra.mrb[48].mxu0 %v287_v62 }
  0xdd   : > { %525 = vmatprep.mubr.f32.mxu0 %v16826_v0 }
  0xe0   : > { %526 = vmatmul.mubr.f32.gmra.mrb[50].mxu0 %v288_v63 }
  0xe1   : > { %531 = vmatprep.mubr.f32.mxu0 %v16826_v0 }
  0xe4   : > { %532 = vmatmul.mubr.f32.gmra.mrb[52].mxu0 %v289_v5 }
  0xe5   : > { %537 = vmatprep.mubr.f32.mxu0 %v16826_v0 }
  0xe8   : > { %538 = vmatmul.mubr.f32.gmra.mrb[54].mxu0 %v290_v6 }
  0xe9   : > { %543 = vmatprep.mubr.f32.mxu0 %v16826_v0 }
 0x14f   : > { %v377_v10 = vpop.f32.mrb[0].mxu0 }
 0x150   : > { %v379_v11 = vpop.f32.mrb[1].mxu0 }
 0x153   : > { %v383_v12 = vpop.f32.mrb[2].mxu0 }
 0x154   : > { %v385_v13 = vpop.f32.mrb[3].mxu0  ;;  %v8159_v14 = vpack.c.bf16 %v383_v12, %v377_v10 }
 0x155   : > { %v8157_v15 = vpack.c.bf16 %v385_v13, %v379_v11  ;;  %v291_v11 = vld [vmem:[#allocation6 + $0xe0] sm:$0xff] }
 0x156   : > { %544 = vmatmul.mubr.f32.gmra.mrb[56].mxu0 %v291_v11 }
 0x157   : > { %v10235_v16 = vpop.f32.mrb[4].mxu0  ;;  %8158 = vmatprep.subr.bf16.mxu1 %v8157_v15  ;;  %549 = vmatprep.mubr.f32.mxu0 %v16826_v0 }
 0x158   : > { %17220 = vst [vmem:[#allocation12_spill] sm:$0xff] %v10235_v16  ;;  %v10237_v17 = vpop.f32.mrb[5].mxu0  ;;  %8160 = vmatpush1.bf16.msra.mxu1 %v8159_v14  ;;  %v292_v14 = vld [vmem:[#allocation6 + $0xe8] sm:$0xff] }
 0x159   : > { %17221 = vst [vmem:[#allocation13_spill] sm:$0xff] %v10237_v17 }
 0x15a   : > { %550 = vmatmul.mubr.f32.gmra.mrb[58].mxu0 %v292_v14 }
 0x15b   : > { %v10239_v18 = vpop.f32.mrb[6].mxu0  ;;  %555 = vmatprep.mubr.f32.mxu0 %v16826_v0 }
 0x15c   : > { %17222 = vst [vmem:[#allocation14_spill] sm:$0xff] %v10239_v18  ;;  %v10243_v20 = vpop.f32.mrb[7].mxu0 }
 0x15d   : > { %17223 = vst [vmem:[#allocation15_spill] sm:$0xff] %v10243_v20 }
 0x15f   : > { %v10247_v22 = vpop.f32.mrb[8].mxu0 }
 0x160   : > { %17224 = vst [vmem:[#allocation16_spill] sm:$0xff] %v10247_v22  ;;  %v10249_v23 = vpop.f32.mrb[9].mxu0 }
 0x161   : > { %17225 = vst [vmem:[#allocation17_spill] sm:$0xff] %v10249_v23 }
 0x163   : > { %v10251_v24 = vpop.f32.mrb[10].mxu0 }
 0x164   : > { %17226 = vst [vmem:[#allocation18_spill] sm:$0xff] %v10251_v24  ;;  %v10255_v26 = vpop.f32.mrb[11].mxu0 }
 0x165   : > { %17227 = vst [vmem:[#allocation19_spill] sm:$0xff] %v10255_v26 }
 0x167   : > { %v10259_v28 = vpop.f32.mrb[12].mxu0 }
 0x168   : > { %17228 = vst [vmem:[#allocation20_spill] sm:$0xff] %v10259_v28  ;;  %v10261_v29 = vpop.f32.mrb[13].mxu0 }
 0x169   : > { %17229 = vst [vmem:[#allocation21_spill] sm:$0xff] %v10261_v29 }
 0x16b   : > { %v10263_v30 = vpop.f32.mrb[14].mxu0 }
 0x16c   : > { %17230 = vst [vmem:[#allocation22_spill] sm:$0xff] %v10263_v30  ;;  %v10267_v32 = vpop.f32.mrb[15].mxu0 }
 0x16d   : > { %17231 = vst [vmem:[#allocation23_spill] sm:$0xff] %v10267_v32 }
 0x16f   : > { %v10271_v34 = vpop.f32.mrb[16].mxu0 }
 0x170   : > { %17232 = vst [vmem:[#allocation24_spill] sm:$0xff] %v10271_v34  ;;  %v10273_v35 = vpop.f32.mrb[17].mxu0 }
 0x171   : > { %17233 = vst [vmem:[#allocation25_spill] sm:$0xff] %v10273_v35 }
 0x173   : > { %v10275_v36 = vpop.f32.mrb[18].mxu0 }
 0x174   : > { %17234 = vst [vmem:[#allocation26_spill] sm:$0xff] %v10275_v36  ;;  %v10279_v38 = vpop.f32.mrb[19].mxu0 }
 0x175   : > { %17235 = vst [vmem:[#allocation27_spill] sm:$0xff] %v10279_v38 }
 0x177   : > { %v10283_v40 = vpop.f32.mrb[20].mxu0 }
 0x178   : > { %17236 = vst [vmem:[#allocation28_spill] sm:$0xff] %v10283_v40  ;;  %v10285_v41 = vpop.f32.mrb[21].mxu0 }
 0x179   : > { %17237 = vst [vmem:[#allocation29_spill] sm:$0xff] %v10285_v41 }
 0x17b   : > { %v10287_v42 = vpop.f32.mrb[22].mxu0 }
 0x17c   : > { %17238 = vst [vmem:[#allocation30_spill] sm:$0xff] %v10287_v42  ;;  %v10291_v44 = vpop.f32.mrb[23].mxu0 }
 0x17d   : > { %17239 = vst [vmem:[#allocation31_spill] sm:$0xff] %v10291_v44 }
 0x17f   : > { %v10295_v46 = vpop.f32.mrb[24].mxu0 }
 0x180   : > { %17240 = vst [vmem:[#allocation32_spill] sm:$0xff] %v10295_v46  ;;  %v10297_v47 = vpop.f32.mrb[25].mxu0 }
 0x181   : > { %17241 = vst [vmem:[#allocation33_spill] sm:$0xff] %v10297_v47 }
 0x183   : > { %v10299_v48 = vpop.f32.mrb[26].mxu0 }
 0x184   : > { %17242 = vst [vmem:[#allocation34_spill] sm:$0xff] %v10299_v48  ;;  %v10303_v50 = vpop.f32.mrb[27].mxu0 }
 0x185   : > { %17243 = vst [vmem:[#allocation35_spill] sm:$0xff] %v10303_v50 }
 0x187   : > { %v10307_v52 = vpop.f32.mrb[28].mxu0 }
 0x188   : > { %17244 = vst [vmem:[#allocation36_spill] sm:$0xff] %v10307_v52  ;;  %v10309_v53 = vpop.f32.mrb[29].mxu0 }
 0x189   : > { %17245 = vst [vmem:[#allocation37_spill] sm:$0xff] %v10309_v53 }
 0x18b   : > { %v10311_v54 = vpop.f32.mrb[30].mxu0 }
 0x18c   : > { %17246 = vst [vmem:[#allocation38_spill] sm:$0xff] %v10311_v54  ;;  %v10315_v56 = vpop.f32.mrb[31].mxu0 }
 0x18d   : > { %17247 = vst [vmem:[#allocation39_spill] sm:$0xff] %v10315_v56 }
 0x18f   : > { %v473_v58 = vpop.f32.mrb[32].mxu0 }
 0x190   : > { %664 = vxpose.xlu0.b32.start [1/2] (short) %v473_v58, 128  ;;  %v475_v59 = vpop.f32.mrb[33].mxu0 }
 0x191   : > { %696 = vxpose.xlu1.b32.start [1/2] (short) %v475_v59, 128 }
 0x193   : > { %v479_v60 = vpop.f32.mrb[34].mxu0 }
 0x194   : > { %665 = vxpose.xlu0.b32.end [2/2] (short) %v479_v60, 128  ;;  %v481_v61 = vpop.f32.mrb[35].mxu0 }
 0x195   : > { %697 = vxpose.xlu1.b32.end [2/2] (short) %v481_v61, 128  ;;  %v293_v61 = vld [vmem:[#allocation6 + $0xf0] sm:$0xff] }
 0x196   : > { %556 = vmatmul.mubr.f32.gmra.mrb[60].mxu0 %v293_v61 }
 0x197   : > { %v485_v1 = vpop.f32.mrb[36].mxu0  ;;  %561 = vmatprep.mubr.f32.mxu0 %v16826_v0 }
 0x198   : > { %v487_v2 = vpop.f32.mrb[37].mxu0 }
 0x19b   : > { %v491_v3 = vpop.f32.mrb[38].mxu0 }
 0x19c   : > { %v493_v4 = vpop.f32.mrb[39].mxu0 }
 0x19f   : > { %v497_v7 = vpop.f32.mrb[40].mxu0 }
 0x1a0   : > { %v499_v8 = vpop.f32.mrb[41].mxu0 }
 0x1a3   : > { %v503_v9 = vpop.f32.mrb[42].mxu0 }
 0x1a4   : > { %v505_v10 = vpop.f32.mrb[43].mxu0 }
 0x1a7   : > { %v10323_v12 = vpop.f32.mrb[44].mxu0 }
 0x1a8   : > { %v10325_v13 = vpop.f32.mrb[45].mxu0 }
 0x1ab   : > { %v10328_v15 = vpop.f32.mrb[46].mxu0 }
 0x1ac   : > { %v10330_v59 = vpop.f32.mrb[47].mxu0 }
 0x1cd   : > { %1509 = vxpose.xlu0.b32.start [1/2] (short) %v485_v1, 128 }
 0x1ce   : > { %1541 = vxpose.xlu1.b32.start [1/2] (short) %v487_v2, 128 }
 0x1d1   : > { %1510 = vxpose.xlu0.b32.end [2/2] (short) %v491_v3, 128 }
 0x1d2   : > { %1542 = vxpose.xlu1.b32.end [2/2] (short) %v493_v4, 128 }
 0x20a   : > { %2353 = vxpose.xlu0.b32.start [1/2] (short) %v497_v7, 128 }
 0x20b   : > { %2385 = vxpose.xlu1.b32.start [1/2] (short) %v499_v8, 128 }
 0x20e   : > { %2354 = vxpose.xlu0.b32.end [2/2] (short) %v503_v9, 128 }
 0x20f   : > { %2386 = vxpose.xlu1.b32.end [2/2] (short) %v505_v10, 128 }
 0x210   : > { %v680_v58 = vpop.trf.xlu0 }
 0x211   : > { %7862 = vmatmul.mubr.msk.f32.vlgmr.msra.gmra.mrb[0].mxu1 %vm728_vm0, %v680_v58  ;;  %v10333_v60 = vpop.trf.xlu1 }
 0x212   : > { %895 = vmatprep.mubr.f32.mxu1 %v16826_v0 }
 0x214   : > { %v681_v62 = vpop.trf.xlu0 }
 0x215   : > { %7863 = vmatmul.mubr.msk.f32.gmra.mrb[2].mxu1 %vm728_vm0, %v681_v62  ;;  %v10338_v63 = vpop.trf.xlu1 }
 0x216   : > { %901 = vmatprep.mubr.f32.mxu1 %v16826_v0 }
 0x218   : > { %v682_v1 = vpop.trf.xlu0 }
 0x219   : > { %7864 = vmatmul.mubr.msk.f32.gmra.mrb[4].mxu1 %vm728_vm0, %v682_v1  ;;  %v10343_v2 = vpop.trf.xlu1 }
 0x21a   : > { %907 = vmatprep.mubr.f32.mxu1 %v16826_v0 }
 0x21c   : > { %v683_v3 = vpop.trf.xlu0 }
 0x21d   : > { %7865 = vmatmul.mubr.msk.f32.gmra.mrb[6].mxu1 %vm728_vm0, %v683_v3  ;;  %v10347_v4 = vpop.trf.xlu1 }
 0x21e   : > { %913 = vmatprep.mubr.f32.mxu1 %v16826_v0 }
 0x220   : > { %v684_v5 = vpop.trf.xlu0 }
 0x221   : > { %7866 = vmatmul.mubr.msk.f32.gmra.mrb[8].mxu1 %vm728_vm0, %v684_v5  ;;  %v10351_v6 = vpop.trf.xlu1 }
 0x222   : > { %919 = vmatprep.mubr.f32.mxu1 %v16826_v0 }
 0x224   : > { %v685_v7 = vpop.trf.xlu0 }
 0x225   : > { %7867 = vmatmul.mubr.msk.f32.gmra.mrb[10].mxu1 %vm728_vm0, %v685_v7  ;;  %v10355_v8 = vpop.trf.xlu1 }
 0x226   : > { %925 = vmatprep.mubr.f32.mxu1 %v16826_v0 }
 0x228   : > { %v686_v9 = vpop.trf.xlu0 }
 0x229   : > { %7868 = vmatmul.mubr.msk.f32.gmra.mrb[12].mxu1 %vm728_vm0, %v686_v9  ;;  %v10359_v10 = vpop.trf.xlu1 }
 0x22a   : > { %931 = vmatprep.mubr.f32.mxu1 %v16826_v0 }
 0x22c   : > { %v687_v11 = vpop.trf.xlu0 }
 0x22d   : > { %7869 = vmatmul.mubr.msk.f32.gmra.mrb[14].mxu1 %vm728_vm0, %v687_v11  ;;  %v10363_v14 = vpop.trf.xlu1 }
 0x22e   : > { %937 = vmatprep.mubr.f32.mxu1 %v16826_v0 }
 0x230   : > { %v688_v58 = vpop.trf.xlu0 }
 0x231   : > { %7870 = vmatmul.mubr.msk.f32.gmra.mrb[16].mxu1 %vm728_vm0, %v688_v58  ;;  %v10367_v61 = vpop.trf.xlu1 }
 0x232   : > { %943 = vmatprep.mubr.f32.mxu1 %v16826_v0 }
 0x234   : > { %v689_v62 = vpop.trf.xlu0 }
 0x235   : > { %7871 = vmatmul.mubr.msk.f32.gmra.mrb[18].mxu1 %vm728_vm0, %v689_v62  ;;  %v10371_v1 = vpop.trf.xlu1 }
 0x236   : > { %949 = vmatprep.mubr.f32.mxu1 %v16826_v0 }
 0x238   : > { %v690_v3 = vpop.trf.xlu0 }
 0x239   : > { %7872 = vmatmul.mubr.msk.f32.gmra.mrb[20].mxu1 %vm728_vm0, %v690_v3  ;;  %v10375_v5 = vpop.trf.xlu1 }
 0x23a   : > { %955 = vmatprep.mubr.f32.mxu1 %v16826_v0 }
 0x23c   : > { %v691_v7 = vpop.trf.xlu0 }
 0x23d   : > { %7873 = vmatmul.mubr.msk.f32.gmra.mrb[22].mxu1 %vm728_vm0, %v691_v7  ;;  %v10379_v9 = vpop.trf.xlu1 }
 0x23e   : > { %961 = vmatprep.mubr.f32.mxu1 %v16826_v0 }
 0x240   : > { %v692_v11 = vpop.trf.xlu0 }
 0x241   : > { %7874 = vmatmul.mubr.msk.f32.gmra.mrb[24].mxu1 %vm728_vm0, %v692_v11  ;;  %v10383_v58 = vpop.trf.xlu1 }
 0x242   : > { %967 = vmatprep.mubr.f32.mxu1 %v16826_v0 }
 0x244   : > { %v693_v62 = vpop.trf.xlu0 }
 0x245   : > { %7875 = vmatmul.mubr.msk.f32.gmra.mrb[26].mxu1 %vm728_vm0, %v693_v62  ;;  %v10387_v3 = vpop.trf.xlu1 }
 0x246   : > { %973 = vmatprep.mubr.f32.mxu1 %v16826_v0 }
 0x248   : > { %v694_v55 = vpop.trf.xlu0  ;;  %3197 = vxpose.xlu0.b32.start [1/2] (short) %v10323_v12, 128 }
 0x249   : > { %7876 = vmatmul.mubr.msk.f32.gmra.mrb[28].mxu1 %vm728_vm0, %v694_v55  ;;  %v10392_v7 = vpop.trf.xlu1  ;;  %3229 = vxpose.xlu1.b32.start [1/2] (short) %v10325_v13, 128 }
 0x24a   : > { %979 = vmatprep.mubr.f32.mxu1 %v16826_v0 }
 0x24c   : > { %v695_v11 = vpop.trf.xlu0  ;;  %3198 = vxpose.xlu0.b32.end [2/2] (short) %v10328_v15, 128 }
 0x24d   : > { %7877 = vmatmul.mubr.msk.f32.gmra.mrb[30].mxu1 %vm728_vm0, %v695_v11  ;;  %v10398_v62 = vpop.trf.xlu1  ;;  %3230 = vxpose.xlu1.b32.end [2/2] (short) %v10330_v59, 128 }
 0x24e   : > { %985 = vmatprep.mubr.f32.mxu1 %v16826_v0 }
 0x250   : > { %v10402_v12 = vpop.trf.xlu0 }
 0x251   : > { %17248 = vst [vmem:[#allocation40_spill] sm:$0xff] %v10402_v12  ;;  %7878 = vmatmul.mubr.msk.f32.gmra.mrb[32].mxu1 %vm728_vm0, %v10333_v60  ;;  %v10406_v55 = vpop.trf.xlu1 }
 0x252   : > { %17249 = vst [vmem:[#allocation41_spill] sm:$0xff] %v10406_v55  ;;  %991 = vmatprep.mubr.f32.mxu1 %v16826_v0 }
 0x254   : > { %v10409_v13 = vpop.trf.xlu0 }
 0x255   : > { %17250 = vst [vmem:[#allocation42_spill] sm:$0xff] %v10409_v13  ;;  %7879 = vmatmul.mubr.msk.f32.gmra.mrb[34].mxu1 %vm728_vm0, %v10338_v63  ;;  %v10413_v15 = vpop.trf.xlu1 }
 0x256   : > { %17251 = vst [vmem:[#allocation43_spill] sm:$0xff] %v10413_v15  ;;  %997 = vmatprep.mubr.f32.mxu1 %v16826_v0 }
 0x258   : > { %v10416_v59 = vpop.trf.xlu0 }
 0x259   : > { %17252 = vst [vmem:[#allocation44_spill] sm:$0xff] %v10416_v59  ;;  %7880 = vmatmul.mubr.msk.f32.gmra.mrb[36].mxu1 %vm728_vm0, %v10343_v2  ;;  %v10420_v11 = vpop.trf.xlu1 }
 0x25a   : > { %17253 = vst [vmem:[#allocation45_spill] sm:$0xff] %v10420_v11  ;;  %1003 = vmatprep.mubr.f32.mxu1 %v16826_v0 }
 0x25c   : > { %v10423_v60 = vpop.trf.xlu0 }
 0x25d   : > { %17254 = vst [vmem:[#allocation46_spill] sm:$0xff] %v10423_v60  ;;  %7881 = vmatmul.mubr.msk.f32.gmra.mrb[38].mxu1 %vm728_vm0, %v10347_v4  ;;  %v10427_v57 = vpop.trf.xlu1  ;;  %v294_v4 = vld [vmem:[#allocation6 + $0xf8] sm:$0xff] }
 0x25e   : > { %17255 = vst [vmem:[#allocation47_spill] sm:$0xff] %v10427_v57  ;;  %1009 = vmatprep.mubr.f32.mxu1 %v16826_v0  ;;  %562 = vmatmul.mubr.f32.gmra.mrb[62].mxu0 %v294_v4 }
 0x25f   : > { %567 = vmatprep.mubr.f32.mxu0 %v16826_v0 }
 0x260   : > { %v10430_v63 = vpop.trf.xlu0 }
 0x261   : > { %17256 = vst [vmem:[#allocation48_spill] sm:$0xff] %v10430_v63  ;;  %7882 = vmatmul.mubr.msk.f32.gmra.mrb[40].mxu1 %vm728_vm0, %v10351_v6  ;;  %v10434_v49 = vpop.trf.xlu1 }
 0x262   : > { %17257 = vst [vmem:[#allocation49_spill] sm:$0xff] %v10434_v49  ;;  %1015 = vmatprep.mubr.f32.mxu1 %v16826_v0  ;;  %568 = vmatmul.mubr.f32.gmra.mrb[64].mxu0 %v295_v45 }
 0x263   : > { %573 = vmatprep.mubr.f32.mxu0 %v16826_v0 }
 0x264   : > { %v10437_v2 = vpop.trf.xlu0 }
 0x265   : > { %17258 = vst [vmem:[#allocation50_spill] sm:$0xff] %v10437_v2  ;;  %7883 = vmatmul.mubr.msk.f32.gmra.mrb[42].mxu1 %vm728_vm0, %v10355_v8  ;;  %v10441_v51 = vpop.trf.xlu1 }
 0x266   : > { %17259 = vst [vmem:[#allocation51_spill] sm:$0xff] %v10441_v51  ;;  %1021 = vmatprep.mubr.f32.mxu1 %v16826_v0  ;;  %574 = vmatmul.mubr.f32.gmra.mrb[66].mxu0 %v296_v37 }
 0x267   : > { %579 = vmatprep.mubr.f32.mxu0 %v16826_v0 }
 0x268   : > { %v10445_v43 = vpop.trf.xlu0 }
 0x269   : > { %17260 = vst [vmem:[#allocation52_spill] sm:$0xff] %v10445_v43  ;;  %7884 = vmatmul.mubr.msk.f32.gmra.mrb[44].mxu1 %vm728_vm0, %v10359_v10  ;;  %v10449_v6 = vpop.trf.xlu1 }
 0x26a   : > { %17261 = vst [vmem:[#allocation53_spill] sm:$0xff] %v10449_v6  ;;  %1027 = vmatprep.mubr.f32.mxu1 %v16826_v0 }
 0x26c   : > { %v10453_v8 = vpop.trf.xlu0 }
 0x26d   : > { %17262 = vst [vmem:[#allocation54_spill] sm:$0xff] %v10453_v8  ;;  %7885 = vmatmul.mubr.msk.f32.gmra.mrb[46].mxu1 %vm728_vm0, %v10363_v14  ;;  %v10457_v4 = vpop.trf.xlu1 }
 0x26e   : > { %17263 = vst [vmem:[#allocation55_spill] sm:$0xff] %v10457_v4  ;;  %1033 = vmatprep.mubr.f32.mxu1 %v16826_v0 }
 0x270   : > { %v10460_v10 = vpop.trf.xlu0 }
 0x271   : > { %17264 = vst [vmem:[#allocation56_spill] sm:$0xff] %v10460_v10  ;;  %7886 = vmatmul.mubr.msk.f32.gmra.mrb[48].mxu1 %vm728_vm0, %v10367_v61  ;;  %v10465_v45 = vpop.trf.xlu1 }
 0x272   : > { %17265 = vst [vmem:[#allocation57_spill] sm:$0xff] %v10465_v45  ;;  %1039 = vmatprep.mubr.f32.mxu1 %v16826_v0 }
 0x274   : > { %v10468_v39 = vpop.trf.xlu0 }
 0x275   : > { %17266 = vst [vmem:[#allocation58_spill] sm:$0xff] %v10468_v39  ;;  %7887 = vmatmul.mubr.msk.f32.gmra.mrb[50].mxu1 %vm728_vm0, %v10371_v1  ;;  %v10472_v14 = vpop.trf.xlu1  ;;  %v521_v1 = vpop.f32.mrb[48].mxu0 }
 0x276   : > { %17267 = vst [vmem:[#allocation59_spill] sm:$0xff] %v10472_v14  ;;  %1045 = vmatprep.mubr.f32.mxu1 %v16826_v0  ;;  %v523_v25 = vpop.f32.mrb[49].mxu0 }
 0x277   : > { %v527_v19 = vpop.f32.mrb[50].mxu0 }
 0x278   : > { %v10475_v37 = vpop.trf.xlu0  ;;  %v529_v21 = vpop.f32.mrb[51].mxu0 }
 0x279   : > { %17268 = vst [vmem:[#allocation60_spill] sm:$0xff] %v10475_v37  ;;  %7888 = vmatmul.mubr.msk.f32.gmra.mrb[52].mxu1 %vm728_vm0, %v10375_v5  ;;  %v10479_v31 = vpop.trf.xlu1 }
 0x27a   : > { %17269 = vst [vmem:[#allocation61_spill] sm:$0xff] %v10479_v31  ;;  %1051 = vmatprep.mubr.f32.mxu1 %v16826_v0 }
 0x27c   : > { %v10482_v61 = vpop.trf.xlu0 }
 0x27d   : > { %17270 = vst [vmem:[#allocation62_spill] sm:$0xff] %v10482_v61  ;;  %7889 = vmatmul.mubr.msk.f32.gmra.mrb[54].mxu1 %vm728_vm0, %v10379_v9  ;;  %v10486_v33 = vpop.trf.xlu1 }
 0x27e   : > { %17271 = vst [vmem:[#allocation63_spill] sm:$0xff] %v10486_v33  ;;  %1057 = vmatprep.mubr.f32.mxu1 %v16826_v0 }
 0x280   : > { %v10489_v27 = vpop.trf.xlu0 }
 0x281   : > { %17272 = vst [vmem:[#allocation64_spill] sm:$0xff] %v10489_v27  ;;  %7890 = vmatmul.mubr.msk.f32.gmra.mrb[56].mxu1 %vm728_vm0, %v10383_v58  ;;  %v10493_v5 = vpop.trf.xlu1 }
 0x282   : > { %17273 = vst [vmem:[#allocation65_spill] sm:$0xff] %v10493_v5  ;;  %1063 = vmatprep.mubr.f32.mxu1 %v16826_v0 }
 0x284   : > { %v10496_v52 = vpop.trf.xlu0 }
 0x285   : > { %17274 = vst [vmem:[#allocation66_spill] sm:$0xff] %v10496_v52  ;;  %7891 = vmatmul.mubr.msk.f32.gmra.mrb[58].mxu1 %vm728_vm0, %v10387_v3  ;;  %v10500_v9 = vpop.trf.xlu1 }
 0x286   : > { %17275 = vst [vmem:[#allocation67_spill] sm:$0xff] %v10500_v9  ;;  %1069 = vmatprep.mubr.f32.mxu1 %v16826_v0 }
 0x288   : > { %v10503_v54 = vpop.trf.xlu0  ;;  %4041 = vxpose.xlu0.b32.start [1/2] (short) %v521_v1, 128 }
 0x289   : > { %17276 = vst [vmem:[#allocation68_spill] sm:$0xff] %v10503_v54  ;;  %7892 = vmatmul.mubr.msk.f32.gmra.mrb[60].mxu1 %vm728_vm0, %v10392_v7  ;;  %v10507_v58 = vpop.trf.xlu1  ;;  %4073 = vxpose.xlu1.b32.start [1/2] (short) %v523_v25, 128 }
 0x28a   : > { %17277 = vst [vmem:[#allocation69_spill] sm:$0xff] %v10507_v58  ;;  %1075 = vmatprep.mubr.f32.mxu1 %v16826_v0 }
 0x28c   : > { %v10510_v53 = vpop.trf.xlu0  ;;  %4042 = vxpose.xlu0.b32.end [2/2] (short) %v527_v19, 128 }
 0x28d   : > { %17278 = vst [vmem:[#allocation70_spill] sm:$0xff] %v10510_v53  ;;  %7893 = vmatmul.mubr.msk.f32.gmra.mrb[62].mxu1 %vm728_vm0, %v10398_v62  ;;  %v10514_v3 = vpop.trf.xlu1  ;;  %4074 = vxpose.xlu1.b32.end [2/2] (short) %v529_v21, 128 }
 0x28e   : > { %17279 = vst [vmem:[#allocation71_spill] sm:$0xff] %v10514_v3 }
 0x290   : > { %v10516_v56 = vpop.trf.xlu0 }
 0x291   : > { %17280 = vst [vmem:[#allocation72_spill] sm:$0xff] %v10516_v56  ;;  %v10518_v1 = vpop.trf.xlu1 }
 0x292   : > { %17281 = vst [vmem:[#allocation73_spill] sm:$0xff] %v10518_v1 }
 0x294   : > { %v10520_v46 = vpop.trf.xlu0 }
 0x295   : > { %17282 = vst [vmem:[#allocation74_spill] sm:$0xff] %v10520_v46  ;;  %v10522_v7 = vpop.trf.xlu1 }
 0x296   : > { %17283 = vst [vmem:[#allocation75_spill] sm:$0xff] %v10522_v7 }
 0x298   : > { %v10524_v25 = vpop.trf.xlu0 }
 0x299   : > { %17284 = vst [vmem:[#allocation76_spill] sm:$0xff] %v10524_v25  ;;  %v10526_v0 = vpop.trf.xlu1 }
 0x29a   : > { %17285 = vst [vmem:[#allocation77_spill] sm:$0xff] %v10526_v0 }
 0x29c   : > { %v10528_v48 = vpop.trf.xlu0 }
 0x29d   : > { %17286 = vst [vmem:[#allocation78_spill] sm:$0xff] %v10528_v48  ;;  %v10530_v19 = vpop.trf.xlu1 }
 0x29e   : > { %17287 = vst [vmem:[#allocation79_spill] sm:$0xff] %v10530_v19 }
 0x2a0   : > { %v10532_v62 = vpop.trf.xlu0 }
 0x2a1   : > { %17288 = vst [vmem:[#allocation80_spill] sm:$0xff] %v10532_v62  ;;  %v10534_v47 = vpop.trf.xlu1 }
 0x2a2   : > { %17289 = vst [vmem:[#allocation81_spill] sm:$0xff] %v10534_v47 }
 0x2a4   : > { %v10536_v21 = vpop.trf.xlu0 }
 0x2a5   : > { %17290 = vst [vmem:[#allocation82_spill] sm:$0xff] %v10536_v21  ;;  %v10538_v50 = vpop.trf.xlu1 }
 0x2a6   : > { %17291 = vst [vmem:[#allocation83_spill] sm:$0xff] %v10538_v50 }
 0x2a8   : > { %v10540_v40 = vpop.trf.xlu0 }
 0x2a9   : > { %17292 = vst [vmem:[#allocation84_spill] sm:$0xff] %v10540_v40  ;;  %v10542_v42 = vpop.trf.xlu1 }
 0x2aa   : > { %17293 = vst [vmem:[#allocation85_spill] sm:$0xff] %v10542_v42  ;;  %v533_v42 = vpop.f32.mrb[52].mxu0 }
 0x2ab   : > { %v535_v50 = vpop.f32.mrb[53].mxu0 }
 0x2ac   : > { %v10544_v41 = vpop.trf.xlu0  ;;  %v539_v19 = vpop.f32.mrb[54].mxu0 }
 0x2ad   : > { %17294 = vst [vmem:[#allocation86_spill] sm:$0xff] %v10544_v41  ;;  %v10546_v44 = vpop.trf.xlu1 }
 0x2ae   : > { %17295 = vst [vmem:[#allocation87_spill] sm:$0xff] %v10546_v44 }
 0x2b0   : > { %v10548_v34 = vpop.trf.xlu0 }
 0x2b1   : > { %17296 = vst [vmem:[#allocation88_spill] sm:$0xff] %v10548_v34  ;;  %v10550_v36 = vpop.trf.xlu1 }
 0x2b2   : > { %17297 = vst [vmem:[#allocation89_spill] sm:$0xff] %v10550_v36  ;;  %v541_v36 = vpop.f32.mrb[55].mxu0 }
 0x2b4   : > { %v10552_v35 = vpop.trf.xlu0 }
 0x2b5   : > { %17298 = vst [vmem:[#allocation90_spill] sm:$0xff] %v10552_v35  ;;  %v10554_v38 = vpop.trf.xlu1 }
 0x2b6   : > { %17299 = vst [vmem:[#allocation91_spill] sm:$0xff] %v10554_v38 }
 0x2b8   : > { %v10556_v28 = vpop.trf.xlu0 }
 0x2b9   : > { %17300 = vst [vmem:[#allocation92_spill] sm:$0xff] %v10556_v28  ;;  %v10558_v30 = vpop.trf.xlu1 }
 0x2ba   : > { %17301 = vst [vmem:[#allocation93_spill] sm:$0xff] %v10558_v30 }
 0x2bc   : > { %v10560_v29 = vpop.trf.xlu0 }
 0x2bd   : > { %17302 = vst [vmem:[#allocation94_spill] sm:$0xff] %v10560_v29  ;;  %v10562_v32 = vpop.trf.xlu1 }
 0x2be   : > { %17303 = vst [vmem:[#allocation95_spill] sm:$0xff] %v10562_v32 }
 0x2c0   : > { %v10564_v47 = vpop.trf.xlu0 }
 0x2c1   : > { %17304 = vst [vmem:[#allocation96_spill] sm:$0xff] %v10564_v47  ;;  %v10566_v44 = vpop.trf.xlu1 }
 0x2c2   : > { %17305 = vst [vmem:[#allocation97_spill] sm:$0xff] %v10566_v44 }
 0x2c4   : > { %v10568_v0 = vpop.trf.xlu0 }
 0x2c5   : > { %17306 = vst [vmem:[#allocation98_spill] sm:$0xff] %v10568_v0  ;;  %v10570_v7 = vpop.trf.xlu1 }
 0x2c6   : > { %17307 = vst [vmem:[#allocation99_spill] sm:$0xff] %v10570_v7 }
 0x2c8   : > { %v10572_v38 = vpop.trf.xlu0  ;;  %4885 = vxpose.xlu0.b32.start [1/2] (short) %v533_v42, 128 }
 0x2c9   : > { %17308 = vst [vmem:[#allocation100_spill] sm:$0xff] %v10572_v38  ;;  %v10574_v30 = vpop.trf.xlu1  ;;  %4917 = vxpose.xlu1.b32.start [1/2] (short) %v535_v50, 128 }
 0x2ca   : > { %17309 = vst [vmem:[#allocation101_spill] sm:$0xff] %v10574_v30 }
 0x2cc   : > { %4886 = vxpose.xlu0.b32.end [2/2] (short) %v539_v19, 128  ;;  %v10592_v50 = vpop.trf.xlu0 }
 0x2cd   : > { %4918 = vxpose.xlu1.b32.end [2/2] (short) %v541_v36, 128  ;;  %17310 = vst [vmem:[#allocation102_spill] sm:$0xff] %v10592_v50  ;;  %v10596_v19 = vpop.trf.xlu1 }
 0x2ce   : > { %17311 = vst [vmem:[#allocation103_spill] sm:$0xff] %v10596_v19 }
 0x2d0   : > { %v10609_v40 = vpop.trf.xlu0 }
 0x2d1   : > { %17312 = vst [vmem:[#allocation104_spill] sm:$0xff] %v10609_v40  ;;  %v10612_v21 = vpop.trf.xlu1 }
 0x2d2   : > { %17313 = vst [vmem:[#allocation105_spill] sm:$0xff] %v10612_v21 }
 0x2d4   : > { %v10620_v46 = vpop.trf.xlu0 }
 0x2d5   : > { %17314 = vst [vmem:[#allocation106_spill] sm:$0xff] %v10620_v46 }
 0x2d8   : > { %v10635_v23 = vpop.trf.xlu0 }
 0x2d9   : > { %17316 = vst [vmem:[#allocation108_spill] sm:$0xff] %v10635_v23 }
 0x2dc   : > { %v10646_v3 = vpop.trf.xlu0 }
 0x2dd   : > { %17318 = vst [vmem:[#allocation110_spill] sm:$0xff] %v10646_v3 }
 0x2e0   : > { %v10661_v33 = vpop.trf.xlu0 }
 0x2e1   : > { %17320 = vst [vmem:[#allocation112_spill] sm:$0xff] %v10661_v33 }
 0x2e4   : > { %v10576_v32 = vpop.f32.mrb[0].mxu1  ;;  %v10672_v14 = vpop.trf.xlu0 }
 0x2e5   : > { %v10578_v1 = vpop.f32.mrb[1].mxu1  ;;  %17322 = vst [vmem:[#allocation114_spill] sm:$0xff] %v10672_v14 }
 0x2e8   : > { %v10580_v47 = vpop.f32.mrb[2].mxu1  ;;  %v10687_v51 = vpop.trf.xlu0 }
 0x2e9   : > { %v10582_v44 = vpop.f32.mrb[3].mxu1  ;;  %17326 = vst [vmem:[#allocation118_spill] sm:$0xff] %v10687_v51 }
 0x2ec   : > { %v10584_v29 = vpop.f32.mrb[4].mxu1  ;;  %v10698_v57 = vpop.trf.xlu0 }
 0x2ed   : > { %v1082_v7 = vmax.f32 %v10576_v32, %v10584_v29  ;;  %v10588_v38 = vpop.f32.mrb[5].mxu1  ;;  %17329 = vst [vmem:[#allocation121_spill] sm:$0xff] %v10698_v57 }
 0x2ee   : > { %v1119_v42 = vmax.f32 %v10578_v1, %v10588_v38 }
 0x2f0   : > { %v10594_v36 = vpop.f32.mrb[6].mxu1  ;;  %v10713_v53 = vpop.trf.xlu0 }
 0x2f1   : > { %v1083_v30 = vmax.f32 %v10580_v47, %v10594_v36  ;;  %v10600_v0 = vpop.f32.mrb[7].mxu1  ;;  %17333 = vst [vmem:[#allocation125_spill] sm:$0xff] %v10713_v53 }
 0x2f2   : > { %v1120_v28 = vmax.f32 %v10582_v44, %v10600_v0 }
 0x2f4   : > { %v10604_v35 = vpop.f32.mrb[8].mxu1  ;;  %v10723_v52 = vpop.trf.xlu0 }
 0x2f5   : > { %v1084_v34 = vmax.f32 %v1082_v7, %v10604_v35  ;;  %v10607_v41 = vpop.f32.mrb[9].mxu1  ;;  %v10624_v7 = vpop.trf.xlu1  ;;  %17336 = vst [vmem:[#allocation128_spill] sm:$0xff] %v10723_v52 }
 0x2f6   : > { %v1121_v50 = vmax.f32 %v1119_v42, %v10607_v41  ;;  %17315 = vst [vmem:[#allocation107_spill] sm:$0xff] %v10624_v7 }
 0x2f8   : > { %v10614_v19 = vpop.f32.mrb[10].mxu1 }
 0x2f9   : > { %v1085_v62 = vmax.f32 %v1083_v30, %v10614_v19  ;;  %v10617_v48 = vpop.f32.mrb[11].mxu1  ;;  %v10638_v46 = vpop.trf.xlu1 }
 0x2fa   : > { %v1122_v25 = vmax.f32 %v1120_v28, %v10617_v48  ;;  %17317 = vst [vmem:[#allocation109_spill] sm:$0xff] %v10638_v46 }
 0x2fc   : > { %v10622_v56 = vpop.f32.mrb[12].mxu1 }
 0x2fd   : > { %v1086_v40 = vmax.f32 %v1084_v34, %v10622_v56  ;;  %v10627_v22 = vpop.f32.mrb[13].mxu1 }
 0x2fe   : > { %v1123_v42 = vmax.f32 %v1121_v50, %v10627_v22 }
 0x300   : > { %v10630_v21 = vpop.f32.mrb[14].mxu1 }
 0x301   : > { %v1087_v30 = vmax.f32 %v1085_v62, %v10630_v21  ;;  %v10633_v24 = vpop.f32.mrb[15].mxu1  ;;  %v10650_v62 = vpop.trf.xlu1 }
 0x302   : > { %v1124_v28 = vmax.f32 %v1122_v25, %v10633_v24  ;;  %17319 = vst [vmem:[#allocation111_spill] sm:$0xff] %v10650_v62 }
 0x304   : > { %v10640_v26 = vpop.f32.mrb[16].mxu1 }
 0x305   : > { %v1088_v34 = vmax.f32 %v1086_v40, %v10640_v26  ;;  %v10643_v7 = vpop.f32.mrb[17].mxu1  ;;  %v10664_v3 = vpop.trf.xlu1 }
 0x306   : > { %v1125_v50 = vmax.f32 %v1123_v42, %v10643_v7  ;;  %17321 = vst [vmem:[#allocation113_spill] sm:$0xff] %v10664_v3 }
 0x308   : > { %v10648_v58 = vpop.f32.mrb[18].mxu1 }
 0x309   : > { %v1089_v23 = vmax.f32 %v1087_v30, %v10648_v58  ;;  %v10653_v9 = vpop.f32.mrb[19].mxu1 }
 0x30a   : > { %v1126_v25 = vmax.f32 %v1124_v28, %v10653_v9 }
 0x30c   : > { %v10656_v46 = vpop.f32.mrb[20].mxu1 }
 0x30d   : > { %v1090_v40 = vmax.f32 %v1088_v34, %v10656_v46  ;;  %v10659_v5 = vpop.f32.mrb[21].mxu1  ;;  %v10676_v34 = vpop.trf.xlu1 }
 0x30e   : > { %v1127_v42 = vmax.f32 %v1125_v50, %v10659_v5  ;;  %17323 = vst [vmem:[#allocation115_spill] sm:$0xff] %v10676_v34 }
 0x310   : > { %v10666_v31 = vpop.f32.mrb[22].mxu1 }
 0x311   : > { %v1091_v30 = vmax.f32 %v1089_v23, %v10666_v31  ;;  %v10669_v62 = vpop.f32.mrb[23].mxu1  ;;  %v10690_v14 = vpop.trf.xlu1 }
 0x312   : > { %v1128_v28 = vmax.f32 %v1126_v25, %v10669_v62  ;;  %17327 = vst [vmem:[#allocation119_spill] sm:$0xff] %v10690_v14 }
 0x314   : > { %v10674_v45 = vpop.f32.mrb[24].mxu1 }
 0x315   : > { %v1092_v33 = vmax.f32 %v1090_v40, %v10674_v45  ;;  %v10679_v4 = vpop.f32.mrb[25].mxu1 }
 0x316   : > { %17324 = vst [vmem:[#allocation116_spill] sm:$0xff] %v10679_v4  ;;  %v1129_v50 = vmax.f32 %v1127_v42, %v10679_v4 }
 0x318   : > { %v10682_v3 = vpop.f32.mrb[26].mxu1 }
 0x319   : > { %v1093_v23 = vmax.f32 %v1091_v30, %v10682_v3  ;;  %v10685_v6 = vpop.f32.mrb[27].mxu1  ;;  %v10702_v30 = vpop.trf.xlu1 }
 0x31a   : > { %17325 = vst [vmem:[#allocation117_spill] sm:$0xff] %v10685_v6  ;;  %v1130_v25 = vmax.f32 %v1128_v28, %v10685_v6  ;;  %17330 = vst [vmem:[#allocation122_spill] sm:$0xff] %v10702_v30 }
 0x31c   : > { %v10692_v49 = vpop.f32.mrb[28].mxu1 }
 0x31d   : > { %v1094_v40 = vmax.f32 %v1092_v33, %v10692_v49  ;;  %v10695_v34 = vpop.f32.mrb[29].mxu1  ;;  %v10716_v57 = vpop.trf.xlu1 }
 0x31e   : > { %17328 = vst [vmem:[#allocation120_spill] sm:$0xff] %v10695_v34  ;;  %v1131_v42 = vmax.f32 %v1129_v50, %v10695_v34  ;;  %17334 = vst [vmem:[#allocation126_spill] sm:$0xff] %v10716_v57 }
 0x320   : > { %v10700_v11 = vpop.f32.mrb[30].mxu1 }
 0x321   : > { %v1095_v51 = vmax.f32 %v1093_v23, %v10700_v11  ;;  %v10705_v15 = vpop.f32.mrb[31].mxu1  ;;  %v10726_v27 = vpop.trf.xlu1 }
 0x322   : > { %17331 = vst [vmem:[#allocation123_spill] sm:$0xff] %v10705_v15  ;;  %v1132_v28 = vmax.f32 %v1130_v25, %v10705_v15  ;;  %17337 = vst [vmem:[#allocation129_spill] sm:$0xff] %v10726_v27 }
 0x324   : > { %v10708_v14 = vpop.f32.mrb[32].mxu1 }
 0x325   : > { %v1096_v33 = vmax.f32 %v1094_v40, %v10708_v14  ;;  %v10711_v55 = vpop.f32.mrb[33].mxu1  ;;  %v10736_v37 = vpop.trf.xlu1 }
 0x326   : > { %17332 = vst [vmem:[#allocation124_spill] sm:$0xff] %v10711_v55  ;;  %v1133_v50 = vmax.f32 %v1131_v42, %v10711_v55  ;;  %v10733_v42 = vpop.trf.xlu0  ;;  %17340 = vst [vmem:[#allocation132_spill] sm:$0xff] %v10736_v37 }
 0x327   : > { %17339 = vst [vmem:[#allocation131_spill] sm:$0xff] %v10733_v42 }
 0x328   : > { %v10718_v54 = vpop.f32.mrb[34].mxu1 }
 0x329   : > { %v1097_v23 = vmax.f32 %v1095_v51, %v10718_v54  ;;  %v10721_v30 = vpop.f32.mrb[35].mxu1  ;;  %v10746_v10 = vpop.trf.xlu1 }
 0x32a   : > { %17335 = vst [vmem:[#allocation127_spill] sm:$0xff] %v10721_v30  ;;  %v1134_v25 = vmax.f32 %v1132_v28, %v10721_v30  ;;  %v10743_v28 = vpop.trf.xlu0  ;;  %17343 = vst [vmem:[#allocation135_spill] sm:$0xff] %v10746_v10 }
 0x32b   : > { %17342 = vst [vmem:[#allocation134_spill] sm:$0xff] %v10743_v28 }
 0x32c   : > { %v10728_v40 = vpop.f32.mrb[36].mxu1 }
 0x32d   : > { %v1098_v53 = vmax.f32 %v1096_v33, %v10728_v40  ;;  %v10731_v61 = vpop.f32.mrb[37].mxu1  ;;  %v10756_v43 = vpop.trf.xlu1 }
 0x32e   : > { %17338 = vst [vmem:[#allocation130_spill] sm:$0xff] %v10731_v61  ;;  %v1135_v57 = vmax.f32 %v1133_v50, %v10731_v61  ;;  %v10753_v50 = vpop.trf.xlu0  ;;  %17346 = vst [vmem:[#allocation138_spill] sm:$0xff] %v10756_v43 }
 0x32f   : > { %17345 = vst [vmem:[#allocation137_spill] sm:$0xff] %v10753_v50 }
 0x330   : > { %v10738_v51 = vpop.f32.mrb[38].mxu1 }
 0x331   : > { %v1099_v52 = vmax.f32 %v1097_v23, %v10738_v51  ;;  %v10741_v39 = vpop.f32.mrb[39].mxu1  ;;  %v10766_v63 = vpop.trf.xlu1 }
 0x332   : > { %17341 = vst [vmem:[#allocation133_spill] sm:$0xff] %v10741_v39  ;;  %v1136_v27 = vmax.f32 %v1134_v25, %v10741_v39  ;;  %v10763_v25 = vpop.trf.xlu0  ;;  %17349 = vst [vmem:[#allocation141_spill] sm:$0xff] %v10766_v63 }
 0x333   : > { %17348 = vst [vmem:[#allocation140_spill] sm:$0xff] %v10763_v25 }
 0x334   : > { %v10748_v33 = vpop.f32.mrb[40].mxu1 }
 0x335   : > { %v1100_v42 = vmax.f32 %v1098_v53, %v10748_v33  ;;  %v10751_v8 = vpop.f32.mrb[41].mxu1  ;;  %v10776_v59 = vpop.trf.xlu1 }
 0x336   : > { %17344 = vst [vmem:[#allocation136_spill] sm:$0xff] %v10751_v8  ;;  %v1137_v37 = vmax.f32 %v1135_v57, %v10751_v8  ;;  %v10773_v57 = vpop.trf.xlu0  ;;  %17352 = vst [vmem:[#allocation144_spill] sm:$0xff] %v10776_v59 }
 0x337   : > { %17351 = vst [vmem:[#allocation143_spill] sm:$0xff] %v10773_v57 }
 0x338   : > { %v10758_v23 = vpop.f32.mrb[42].mxu1 }
 0x339   : > { %v1101_v28 = vmax.f32 %v1099_v52, %v10758_v23  ;;  %v10761_v2 = vpop.f32.mrb[43].mxu1  ;;  %v545_v52 = vpop.f32.mrb[56].mxu0 }
 0x33a   : > { %17347 = vst [vmem:[#allocation139_spill] sm:$0xff] %v10761_v2  ;;  %v1138_v10 = vmax.f32 %v1136_v27, %v10761_v2  ;;  %v547_v13 = vpop.f32.mrb[57].mxu0  ;;  %5729 = vxpose.xlu0.b32.start [1/2] (short) %v545_v52, 128  ;;  %v10783_v12 = vpop.trf.xlu0 }
 0x33b   : > { %5761 = vxpose.xlu1.b32.start [1/2] (short) %v547_v13, 128  ;;  %17354 = vst [vmem:[#allocation146_spill] sm:$0xff] %v10783_v12  ;;  %v10786_v16 = vpop.trf.xlu1  ;;  %v551_v57 = vpop.f32.mrb[58].mxu0 }
 0x33c   : > { %v10768_v53 = vpop.f32.mrb[44].mxu1  ;;  %17355 = vst [vmem:[#allocation147_spill] sm:$0xff] %v10786_v16 }
 0x33d   : > { %v1102_v50 = vmax.f32 %v1100_v42, %v10768_v53  ;;  %v10771_v60 = vpop.f32.mrb[45].mxu1 }
 0x33e   : > { %17350 = vst [vmem:[#allocation142_spill] sm:$0xff] %v10771_v60  ;;  %v1139_v43 = vmax.f32 %v1137_v37, %v10771_v60  ;;  %v553_v37 = vpop.f32.mrb[59].mxu0  ;;  %5730 = vxpose.xlu0.b32.end [2/2] (short) %v551_v57, 128  ;;  %v10793_v13 = vpop.trf.xlu0 }
 0x33f   : > { %5762 = vxpose.xlu1.b32.end [2/2] (short) %v553_v37, 128  ;;  %17357 = vst [vmem:[#allocation149_spill] sm:$0xff] %v10793_v13  ;;  %v10796_v17 = vpop.trf.xlu1 }
 0x340   : > { %v10778_v25 = vpop.f32.mrb[46].mxu1  ;;  %17358 = vst [vmem:[#allocation150_spill] sm:$0xff] %v10796_v17 }
 0x341   : > { %v1103_v27 = vmax.f32 %v1101_v28, %v10778_v25  ;;  %v10781_v63 = vpop.f32.mrb[47].mxu1 }
 0x342   : > { %17353 = vst [vmem:[#allocation145_spill] sm:$0xff] %v10781_v63  ;;  %v1140_v42 = vmax.f32 %v1138_v10, %v10781_v63  ;;  %v10803_v57 = vpop.trf.xlu0 }
 0x343   : > { %17360 = vst [vmem:[#allocation152_spill] sm:$0xff] %v10803_v57  ;;  %v10806_v20 = vpop.trf.xlu1 }
 0x344   : > { %v10788_v59 = vpop.f32.mrb[48].mxu1  ;;  %17361 = vst [vmem:[#allocation153_spill] sm:$0xff] %v10806_v20 }
 0x345   : > { %v1104_v52 = vmax.f32 %v1102_v50, %v10788_v59  ;;  %v10791_v18 = vpop.f32.mrb[49].mxu1 }
 0x346   : > { %17356 = vst [vmem:[#allocation148_spill] sm:$0xff] %v10791_v18  ;;  %v1141_v28 = vmax.f32 %v1139_v43, %v10791_v18  ;;  %v10813_v43 = vpop.trf.xlu0 }
 0x347   : > { %17363 = vst [vmem:[#allocation155_spill] sm:$0xff] %v10813_v43  ;;  %v10816_v18 = vpop.trf.xlu1 }
 0x348   : > { %v10798_v12 = vpop.f32.mrb[50].mxu1  ;;  %17364 = vst [vmem:[#allocation156_spill] sm:$0xff] %v10816_v18 }
 0x349   : > { %v1105_v10 = vmax.f32 %v1103_v27, %v10798_v12  ;;  %v10801_v16 = vpop.f32.mrb[51].mxu1 }
 0x34a   : > { %17359 = vst [vmem:[#allocation151_spill] sm:$0xff] %v10801_v16  ;;  %v1142_v37 = vmax.f32 %v1140_v42, %v10801_v16  ;;  %v10823_v42 = vpop.trf.xlu0 }
 0x34b   : > { %17366 = vst [vmem:[#allocation158_spill] sm:$0xff] %v10823_v42  ;;  %v10826_v16 = vpop.trf.xlu1 }
 0x34c   : > { %v10808_v50 = vpop.f32.mrb[52].mxu1  ;;  %17367 = vst [vmem:[#allocation159_spill] sm:$0xff] %v10826_v16 }
 0x34d   : > { %v1106_v13 = vmax.f32 %v1104_v52, %v10808_v50  ;;  %v10811_v63 = vpop.f32.mrb[53].mxu1 }
 0x34e   : > { %17362 = vst [vmem:[#allocation154_spill] sm:$0xff] %v10811_v63  ;;  %v1143_v17 = vmax.f32 %v1141_v28, %v10811_v63  ;;  %v10833_v28 = vpop.trf.xlu0 }
 0x34f   : > { %17369 = vst [vmem:[#allocation161_spill] sm:$0xff] %v10833_v28  ;;  %v10836_v63 = vpop.trf.xlu1 }
 0x350   : > { %v10818_v27 = vpop.f32.mrb[54].mxu1  ;;  %17370 = vst [vmem:[#allocation162_spill] sm:$0xff] %v10836_v63 }
 0x351   : > { %v1107_v57 = vmax.f32 %v1105_v10, %v10818_v27  ;;  %v10821_v60 = vpop.f32.mrb[55].mxu1 }
 0x352   : > { %17365 = vst [vmem:[#allocation157_spill] sm:$0xff] %v10821_v60  ;;  %v1144_v20 = vmax.f32 %v1142_v37, %v10821_v60  ;;  %v10843_v37 = vpop.trf.xlu0 }
 0x353   : > { %17372 = vst [vmem:[#allocation164_spill] sm:$0xff] %v10843_v37  ;;  %v10846_v60 = vpop.trf.xlu1 }
 0x354   : > { %v10828_v52 = vpop.f32.mrb[56].mxu1  ;;  %17373 = vst [vmem:[#allocation165_spill] sm:$0xff] %v10846_v60 }
 0x355   : > { %v1108_v43 = vmax.f32 %v1106_v13, %v10828_v52  ;;  %v10831_v2 = vpop.f32.mrb[57].mxu1 }
 0x356   : > { %17368 = vst [vmem:[#allocation160_spill] sm:$0xff] %v10831_v2  ;;  %v1145_v18 = vmax.f32 %v1143_v17, %v10831_v2  ;;  %v10853_v17 = vpop.trf.xlu0 }
 0x357   : > { %17375 = vst [vmem:[#allocation167_spill] sm:$0xff] %v10853_v17  ;;  %v10856_v2 = vpop.trf.xlu1 }
 0x358   : > { %v10838_v10 = vpop.f32.mrb[58].mxu1  ;;  %17376 = vst [vmem:[#allocation168_spill] sm:$0xff] %v10856_v2 }
 0x359   : > { %v1109_v42 = vmax.f32 %v1107_v57, %v10838_v10  ;;  %v10841_v8 = vpop.f32.mrb[59].mxu1 }
 0x35a   : > { %17371 = vst [vmem:[#allocation163_spill] sm:$0xff] %v10841_v8  ;;  %v1146_v16 = vmax.f32 %v1144_v20, %v10841_v8  ;;  %v10863_v20 = vpop.trf.xlu0 }
 0x35b   : > { %17378 = vst [vmem:[#allocation170_spill] sm:$0xff] %v10863_v20  ;;  %v10866_v8 = vpop.trf.xlu1 }
 0x35c   : > { %v10848_v13 = vpop.f32.mrb[60].mxu1  ;;  %17379 = vst [vmem:[#allocation171_spill] sm:$0xff] %v10866_v8 }
 0x35d   : > { %v1110_v28 = vmax.f32 %v1108_v43, %v10848_v13  ;;  %v10851_v39 = vpop.f32.mrb[61].mxu1 }
 0x35e   : > { %17374 = vst [vmem:[#allocation166_spill] sm:$0xff] %v10851_v39  ;;  %v1147_v63 = vmax.f32 %v1145_v18, %v10851_v39  ;;  %v10868_v17 = vpop.trf.xlu0  ;;  %v10870_v18 = vpop.f32.mrb[60].mxu0 }
 0x35f   : > { %17380 = vst [vmem:[#allocation172_spill] sm:$0xff] %v10868_v17  ;;  %v10872_v39 = vpop.trf.xlu1  ;;  %v10874_v15 = vpop.f32.mrb[61].mxu0 }
 0x360   : > { %v10858_v57 = vpop.f32.mrb[62].mxu1  ;;  %17381 = vst [vmem:[#allocation173_spill] sm:$0xff] %v10872_v39  ;;  %v10876_v34 = vpop.f32.mrb[62].mxu0 }
 0x361   : > { %v1111_v37 = vmax.f32 %v1109_v42, %v10858_v57  ;;  %v10861_v61 = vpop.f32.mrb[63].mxu1  ;;  %v10878_v6 = vpop.f32.mrb[63].mxu0 }
 0x362   : > { %17377 = vst [vmem:[#allocation169_spill] sm:$0xff] %v10861_v61  ;;  %v1148_v60 = vmax.f32 %v1146_v16, %v10861_v61  ;;  %v10880_v8 = vpop.trf.xlu0 }
 0x363   : > { %v1112_v43 = vmax.f32 %v1110_v28, %v1111_v37  ;;  %17382 = vst [vmem:[#allocation174_spill] sm:$0xff] %v10880_v8  ;;  %v10884_v28 = vpop.trf.xlu1 }
 0x364   : > { %v1149_v30 = vmax.f32 %v1147_v63, %v1148_v60  ;;  %v10882_v60 = vpop.f32.mrb[64].mxu0  ;;  %17384 = vst [vmem:[#allocation176_spill] sm:$0xff] %v10884_v28 }
 0x365   : > { %v1113_v55 = vrot.slane %v1112_v43, 4  ;;  %17383 = vst [vmem:[#allocation175_spill] sm:$0xff] %v10882_v60  ;;  %v571_v37 = vpop.f32.mrb[65].mxu0 }
 0x366   : > { %v1150_v2 = vrot.slane %v1149_v30, 4  ;;  %1486 = vmatprep.mubr.f32.mxu1 %v571_v37  ;;  %v10886_v39 = vpop.f32.mrb[66].mxu0 }
 0x367   : > { %v1114_v42 = vmax.f32 %v1112_v43, %v1113_v55  ;;  %17385 = vst [vmem:[#allocation177_spill] sm:$0xff] %v10886_v39  ;;  %v10888_v55 = vpop.f32.mrb[67].mxu0  ;;  %v10892_v4 = vpop.trf.xlu1  ;;  %v17415_v39 = vld [vmem:[#allocation166_spill] sm:$0xff] }
 0x368   : > { %v1151_v20 = vmax.f32 %v1149_v30, %v1150_v2  ;;  %17386 = vst [vmem:[#allocation178_spill] sm:$0xff] %v10888_v55  ;;  %v10890_v2 = vpop.trf.xlu0  ;;  %17388 = vst [vmem:[#allocation180_spill] sm:$0xff] %v10892_v4 }
 0x369   : > { %v1115_v16 = vrot.slane %v1114_v42, 2  ;;  %17387 = vst [vmem:[#allocation179_spill] sm:$0xff] %v10890_v2 }
 0x36a   : > { %v1152_v63 = vrot.slane %v1151_v20, 2 }
 0x36b   : > { %v1116_v17 = vmax.f32 %v1114_v42, %v1115_v16  ;;  %v10916_v37 = vpop.trf.xlu1 }
 0x36c   : > { %v1153_v61 = vmax.f32 %v1151_v20, %v1152_v63  ;;  %v10906_v63 = vpop.trf.xlu0  ;;  %17390 = vst [vmem:[#allocation182_spill] sm:$0xff] %v10916_v37 }
 0x36d   : > { %v1117_v43 = vrot.slane %v1116_v17, 1  ;;  %17389 = vst [vmem:[#allocation181_spill] sm:$0xff] %v10906_v63 }
 0x36e   : > { %v1154_v30 = vrot.slane %v1153_v61, 1 }
 0x36f   : > { %v10894_v8 = vmax.f32 %v1116_v17, %v1117_v43 }
 0x370   : > { %v10896_v60 = vmax.f32 %v1153_v61, %v1154_v30  ;;  %v10942_v30 = vpop.trf.xlu0 }
 0x371   : > { %v1156_v28 = vsub.f32 %v10576_v32, %v10894_v8  ;;  %v1158_v42 = vsub.f32 %v10580_v47, %v10894_v8  ;;  %v1160_v20 = vsub.f32 %v10584_v29, %v10894_v8  ;;  %v1162_v16 = vsub.f32 %v10594_v36, %v10894_v8  ;;  %17391 = vst [vmem:[#allocation183_spill] sm:$0xff] %v10942_v30 }
 0x372   : > { %v1164_v17 = vsub.f32 %v10604_v35, %v10894_v8  ;;  %v1166_v61 = vsub.f32 %v10614_v19, %v10894_v8  ;;  %v1168_v32 = vsub.f32 %v10622_v56, %v10894_v8  ;;  %v1170_v47 = vsub.f32 %v10630_v21, %v10894_v8 }
 0x373   : > { %v1172_v29 = vsub.f32 %v10640_v26, %v10894_v8  ;;  %v1174_v36 = vsub.f32 %v10648_v58, %v10894_v8  ;;  %v1176_v35 = vsub.f32 %v10656_v46, %v10894_v8  ;;  %v1178_v19 = vsub.f32 %v10666_v31, %v10894_v8 }
 0x374   : > { %v1180_v56 = vsub.f32 %v10674_v45, %v10894_v8  ;;  %v1182_v21 = vsub.f32 %v10682_v3, %v10894_v8  ;;  %v1184_v43 = vsub.f32 %v10692_v49, %v10894_v8  ;;  %v1186_v26 = vsub.f32 %v10700_v11, %v10894_v8  ;;  %v10952_v3 = vpop.trf.xlu1  ;;  %v10972_v30 = vpop.trf.xlu0 }
 0x375   : > { %v1188_v58 = vsub.f32 %v10708_v14, %v10894_v8  ;;  %v1190_v46 = vsub.f32 %v10718_v54, %v10894_v8  ;;  %v1192_v31 = vsub.f32 %v10728_v40, %v10894_v8  ;;  %v1194_v45 = vsub.f32 %v10738_v51, %v10894_v8  ;;  %17392 = vst [vmem:[#allocation184_spill] sm:$0xff] %v10952_v3 }
 0x376   : > { %v1196_v49 = vsub.f32 %v10748_v33, %v10894_v8  ;;  %v1198_v11 = vsub.f32 %v10758_v23, %v10894_v8  ;;  %v1200_v14 = vsub.f32 %v10768_v53, %v10894_v8  ;;  %v1202_v54 = vsub.f32 %v10778_v25, %v10894_v8  ;;  %17393 = vst [vmem:[#allocation185_spill] sm:$0xff] %v10972_v30 }
 0x377   : > { %v1220_v37 = vmul.f32 1.442695, %v1156_v28  ;;  %v1224_v51 = vmul.f32 1.442695, %v1158_v42  ;;  %v1228_v4 = vmul.f32 1.442695, %v1160_v20 }
 0x378   : > { %v1232_v23 = vmul.f32 1.442695, %v1162_v16  ;;  %v10976_v63 = vpop.trf.xlu1  ;;  %v1236_v25 = vmul.f32 1.442695, %v1164_v17  ;;  %v1240_v3 = vmul.f32 1.442695, %v1166_v61  ;;  %v10978_v28 = vpop.trf.xlu0  ;;  %6573 = vxpose.xlu0.b32.start [1/2] (short) %v10870_v18, 128 }
 0x379   : > { %17394 = vst [vmem:[#allocation186_spill] sm:$0xff] %v10976_v63  ;;  %8800 = vpow2.f32 %v1220_v37  ;;  %v1244_v40 = vmul.f32 1.442695, %v1168_v32  ;;  %17395 = vst [vmem:[#allocation187_spill] sm:$0xff] %v10978_v28  ;;  %v1248_v42 = vmul.f32 1.442695, %v1170_v47 }
 0x37a   : > { %8802 = vpow2.f32 %v1224_v51  ;;  %v1252_v20 = vmul.f32 1.442695, %v1172_v29  ;;  %v1256_v33 = vmul.f32 1.442695, %v1174_v36  ;;  %v1260_v53 = vmul.f32 1.442695, %v1176_v35 }
 0x37b   : > { %8804 = vpow2.f32 %v1228_v4  ;;  %v1264_v37 = vmul.f32 1.442695, %v1178_v19  ;;  %v1268_v17 = vmul.f32 1.442695, %v1180_v56  ;;  %v1272_v61 = vmul.f32 1.442695, %v1182_v21 }
 0x37c   : > { %8806 = vpow2.f32 %v1232_v23  ;;  %v10981_v16 = vpop.trf.xlu1  ;;  %6605 = vxpose.xlu1.b32.start [1/2] (short) %v10874_v15, 128  ;;  %v1276_v4 = vmul.f32 1.442695, %v1184_v43  ;;  %v1280_v32 = vmul.f32 1.442695, %v1186_v26  ;;  %v1284_v51 = vmul.f32 1.442695, %v1188_v58  ;;  %6574 = vxpose.xlu0.b32.end [2/2] (short) %v10876_v34, 128 }
 0x37d   : > { %17396 = vst [vmem:[#allocation188_spill] sm:$0xff] %v10981_v16  ;;  %8808 = vpow2.f32 %v1236_v25  ;;  %v1288_v63 = vmul.f32 1.442695, %v1190_v46  ;;  %v1292_v18 = vmul.f32 1.442695, %v1192_v31  ;;  %v17403_v31 = vld [vmem:[#allocation130_spill] sm:$0xff] }
 0x37e   : > { %8810 = vpow2.f32 %v1240_v3  ;;  %v1296_v47 = vmul.f32 1.442695, %v1194_v45  ;;  %v1300_v29 = vmul.f32 1.442695, %v1196_v49  ;;  %v10985_v36 = vmul.f32 1.442695, %v1198_v11 }
 0x37f   : > { %8812 = vpow2.f32 %v1244_v40  ;;  %v10988_v15 = vmul.f32 1.442695, %v1200_v14  ;;  %v10990_v35 = vmul.f32 1.442695, %v1202_v54  ;;  %v17397_v54 = vld [vmem:[#allocation116_spill] sm:$0xff]  ;;  %v17398_v40 = vld [vmem:[#allocation117_spill] sm:$0xff] }
 0x380   : > { %8814 = vpow2.f32 %v1248_v42  ;;  %6606 = vxpose.xlu1.b32.end [2/2] (short) %v10878_v6, 128  ;;  %v17400_v42 = vld [vmem:[#allocation123_spill] sm:$0xff]  ;;  %v17404_v25 = vld [vmem:[#allocation133_spill] sm:$0xff]  ;;  %v17405_v26 = vld [vmem:[#allocation136_spill] sm:$0xff] }
 0x381   : > { %8816 = vpow2.f32 %v1252_v20  ;;  %v17402_v45 = vld [vmem:[#allocation127_spill] sm:$0xff]  ;;  %v17408_v34 = vld [vmem:[#allocation145_spill] sm:$0xff]  ;;  %v17409_v20 = vld [vmem:[#allocation148_spill] sm:$0xff] }
 0x382   : > { %8818 = vpow2.f32 %v1256_v33  ;;  %v17406_v6 = vld [vmem:[#allocation139_spill] sm:$0xff]  ;;  %v17407_v33 = vld [vmem:[#allocation142_spill] sm:$0xff] }
 0x383   : > { %v11000_v43 = vpop.eup %8800  ;;  %8820 = vpow2.f32 %v1260_v53  ;;  %v17399_v53 = vld [vmem:[#allocation120_spill] sm:$0xff]  ;;  %v17410_v19 = vld [vmem:[#allocation151_spill] sm:$0xff] }
 0x384   : > { %v11008_v46 = vpop.eup %8802  ;;  %8822 = vpow2.f32 %v1264_v37  ;;  %v17401_v37 = vld [vmem:[#allocation124_spill] sm:$0xff] }
 0x385   : > { %v11016_v11 = vpop.eup %8804  ;;  %8824 = vpow2.f32 %v1268_v17  ;;  %v1348_v14 = vadd.f32 %v11008_v46, %v11000_v43  ;;  %v17414_v17 = vld [vmem:[#allocation163_spill] sm:$0xff] }
 0x386   : > { %v11024_v23 = vpop.eup %8806  ;;  %8826 = vpow2.f32 %v1272_v61  ;;  %v17412_v61 = vld [vmem:[#allocation157_spill] sm:$0xff] }
 0x387   : > { %v11032_v49 = vpop.eup %8808  ;;  %8828 = vpow2.f32 %v1276_v4  ;;  %v1349_v3 = vadd.f32 %v11016_v11, %v1348_v14 }
 0x388   : > { %v11039_v58 = vpop.eup %8810  ;;  %8830 = vpow2.f32 %v1280_v32 }
 0x389   : > { %v11047_v21 = vpop.eup %8812  ;;  %8832 = vpow2.f32 %v1284_v51  ;;  %v1350_v14 = vadd.f32 %v11024_v23, %v1349_v3 }
 0x38a   : > { %v11054_v56 = vpop.eup %8814  ;;  %8834 = vpow2.f32 %v1288_v63 }
 0x38b   : > { %v11062_v28 = vpop.eup %8816  ;;  %8836 = vpow2.f32 %v1292_v18  ;;  %v1351_v3 = vadd.f32 %v11032_v49, %v1350_v14  ;;  %v17417_v14 = vsub.f32 %v10788_v59, %v10894_v8 }
 0x38c   : > { %v11069_v2 = vpop.eup %8818  ;;  %8838 = vpow2.f32 %v1296_v47  ;;  %v17418_v47 = vsub.f32 %v10798_v12, %v10894_v8 }
 0x38d   : > { %v11077_v16 = vpop.eup %8820  ;;  %8840 = vpow2.f32 %v1300_v29  ;;  %v1316_v32 = vmul.f32 1.442695, %v17417_v14  ;;  %v1352_v63 = vadd.f32 %v11039_v58, %v1351_v3  ;;  %v17419_v29 = vsub.f32 %v10808_v50, %v10894_v8 }
 0x38e   : > { %v11083_v30 = vpop.eup %8822  ;;  %8842 = vpow2.f32 %v10985_v36  ;;  %v1320_v51 = vmul.f32 1.442695, %v17418_v47  ;;  %v17420_v36 = vsub.f32 %v10818_v27, %v10894_v8  ;;  %v17424_v27 = vsub.f32 %v10848_v13, %v10894_v8 }
 0x38f   : > { %v11089_v4 = vpop.eup %8824  ;;  %8844 = vpow2.f32 %v10988_v15  ;;  %v1324_v18 = vmul.f32 1.442695, %v17419_v29  ;;  %v1353_v59 = vadd.f32 %v11047_v21, %v1352_v63  ;;  %v17421_v15 = vsub.f32 %v10828_v52, %v10894_v8 }
 0x390   : > { %v11096_v14 = vpop.eup %8826  ;;  %8846 = vpow2.f32 %v10990_v35  ;;  %v1328_v3 = vmul.f32 1.442695, %v17420_v36  ;;  %v17422_v63 = vsub.f32 %v10838_v10, %v10894_v8 }
 0x391   : > { %v11102_v12 = vpop.eup %8828  ;;  %8848 = vpow2.f32 %v1316_v32  ;;  %v1332_v47 = vmul.f32 1.442695, %v17421_v15  ;;  %v1354_v50 = vadd.f32 %v11054_v56, %v1353_v59  ;;  %v1340_v32 = vmul.f32 1.442695, %v17424_v27 }
 0x392   : > { %v11108_v29 = vpop.eup %8830  ;;  %8850 = vpow2.f32 %v1320_v51  ;;  %v1336_v35 = vmul.f32 1.442695, %v17422_v63  ;;  %v17425_v59 = vsub.f32 %v10858_v57, %v10894_v8  ;;  %v17428_v8 = vsub.f32 %v10588_v38, %v10896_v60 }
 0x393   : > { %v11113_v55 = vpop.eup %8832  ;;  %8852 = vpow2.f32 %v1324_v18  ;;  %v1355_v36 = vadd.f32 %v11062_v28, %v1354_v50  ;;  %v17426_v18 = vsub.f32 %v10578_v1, %v10896_v60  ;;  %v17427_v50 = vsub.f32 %v10582_v44, %v10896_v60 }
 0x394   : > { %17423 = vst [vmem:[#allocation116_spill] sm:$0xff] %v11113_v55  ;;  %v11119_v52 = vpop.eup %8834  ;;  %8854 = vpow2.f32 %v1328_v3  ;;  %v1344_v51 = vmul.f32 1.442695, %v17425_v59  ;;  %v1230_v57 = vmul.f32 1.442695, %v17428_v8  ;;  %v17429_v1 = vsub.f32 %v10600_v0, %v10896_v60 }
 0x395   : > { %v11124_v15 = vpop.eup %8836  ;;  %8856 = vpow2.f32 %v1332_v47  ;;  %v1356_v10 = vadd.f32 %v11069_v2, %v1355_v36  ;;  %v1222_v63 = vmul.f32 1.442695, %v17426_v18  ;;  %v1226_v3 = vmul.f32 1.442695, %v17427_v50 }
 0x396   : > { %v11130_v13 = vpop.eup %8838  ;;  %8858 = vpow2.f32 %v1336_v35  ;;  %v1234_v36 = vmul.f32 1.442695, %v17429_v1  ;;  %v17430_v35 = vsub.f32 %v10607_v41, %v10896_v60  ;;  %v17431_v38 = vsub.f32 %v10617_v48, %v10896_v60 }
 0x397   : > { %v11138_v27 = vpop.eup %8840  ;;  %8860 = vpow2.f32 %v1340_v32  ;;  %v1357_v47 = vadd.f32 %v11077_v16, %v1356_v10  ;;  %v17432_v32 = vsub.f32 %v10627_v22, %v10896_v60  ;;  %v17433_v10 = vsub.f32 %v10633_v24, %v10896_v60 }
 0x398   : > { %v1238_v59 = vmul.f32 1.442695, %v17430_v35  ;;  %v11147_v18 = vpop.eup %8842  ;;  %8862 = vpow2.f32 %v1344_v51  ;;  %v1242_v44 = vmul.f32 1.442695, %v17431_v38  ;;  %v17434_v51 = vsub.f32 %v10643_v7, %v10896_v60 }
 0x399   : > { %v1246_v50 = vmul.f32 1.442695, %v17432_v32  ;;  %v1250_v0 = vmul.f32 1.442695, %v17433_v10  ;;  %v11158_v8 = vpop.eup %8844  ;;  %v1358_v41 = vadd.f32 %v11083_v30, %v1357_v47  ;;  %8864 = vpow2.f32 %v1222_v63 }
 0x39a   : > { %v1254_v1 = vmul.f32 1.442695, %v17434_v51  ;;  %v17435_v48 = vsub.f32 %v10653_v9, %v10896_v60  ;;  %v11167_v38 = vpop.eup %8846  ;;  %8866 = vpow2.f32 %v1226_v3 }
 0x39b   : > { %v11175_v47 = vpop.eup %8848  ;;  %v1359_v7 = vadd.f32 %v11089_v4, %v1358_v41  ;;  %8868 = vpow2.f32 %v1230_v57 }
 0x39c   : > { %v1258_v35 = vmul.f32 1.442695, %v17435_v48  ;;  %v11182_v32 = vpop.eup %8850  ;;  %8870 = vpow2.f32 %v1234_v36  ;;  %v17436_v36 = vsub.f32 %v10659_v5, %v10896_v60  ;;  %v17437_v48 = vsub.f32 %v10669_v62, %v10896_v60 }
 0x39d   : > { %v11190_v41 = vpop.eup %8852  ;;  %v1360_v57 = vadd.f32 %v11096_v14, %v1359_v7  ;;  %8872 = vpow2.f32 %v1238_v59 }
 0x39e   : > { %v11197_v9 = vpop.eup %8854  ;;  %8874 = vpow2.f32 %v1242_v44  ;;  %v1262_v3 = vmul.f32 1.442695, %v17436_v36  ;;  %v1266_v51 = vmul.f32 1.442695, %v17437_v48 }
 0x39f   : > { %v11205_v7 = vpop.eup %8856  ;;  %v1361_v59 = vadd.f32 %v11102_v12, %v1360_v57  ;;  %8876 = vpow2.f32 %v1246_v50  ;;  %v17438_v50 = vsub.f32 %v17397_v54, %v10896_v60  ;;  %v17443_v54 = vsub.f32 %v17402_v45, %v10896_v60 }
 0x3a0   : > { %v11213_v63 = vpop.eup %8858  ;;  %8878 = vpow2.f32 %v1250_v0  ;;  %v17439_v0 = vsub.f32 %v17398_v40, %v10896_v60  ;;  %v17442_v40 = vsub.f32 %v17401_v37, %v10896_v60  ;;  %v17446_v45 = vsub.f32 %v17405_v26, %v10896_v60 }
 0x3a1   : > { %v11218_v10 = vpop.eup %8860  ;;  %v1362_v24 = vadd.f32 %v11108_v29, %v1361_v59  ;;  %8880 = vpow2.f32 %v1254_v1  ;;  %v1270_v5 = vmul.f32 1.442695, %v17438_v50  ;;  %v17440_v1 = vsub.f32 %v17399_v53, %v10896_v60 }
 0x3a2   : > { %v11226_v36 = vpop.eup %8862  ;;  %8882 = vpow2.f32 %v1258_v35  ;;  %v1274_v62 = vmul.f32 1.442695, %v17439_v0  ;;  %v17441_v35 = vsub.f32 %v17400_v42, %v10896_v60  ;;  %v1286_v0 = vmul.f32 1.442695, %v17442_v40 }
 0x3a3   : > { %v8865_v48 = vpop.eup %8864  ;;  %v1363_v44 = vadd.f32 %v11113_v55, %v1362_v24  ;;  %8884 = vpow2.f32 %v1262_v3  ;;  %v1278_v59 = vmul.f32 1.442695, %v17440_v1  ;;  %v17444_v42 = vsub.f32 %v17403_v31, %v10896_v60 }
 0x3a4   : > { %v8867_v50 = vpop.eup %8866  ;;  %8886 = vpow2.f32 %v1266_v51  ;;  %v1282_v57 = vmul.f32 1.442695, %v17441_v35  ;;  %v1290_v51 = vmul.f32 1.442695, %v17443_v54  ;;  %v1302_v54 = vmul.f32 1.442695, %v17446_v45 }
 0x3a5   : > { %v8869_v22 = vpop.eup %8868  ;;  %v1364_v24 = vadd.f32 %v11119_v52, %v1363_v44  ;;  %8888 = vpow2.f32 %v1270_v5  ;;  %v1385_v3 = vadd.f32 %v8867_v50, %v8865_v48  ;;  %v8161_v53 = vpack.c.bf16 %v8867_v50, %v8865_v48 }
 0x3a6   : > { %v8871_v1 = vpop.eup %8870  ;;  %8890 = vpow2.f32 %v1274_v62  ;;  %v1294_v35 = vmul.f32 1.442695, %v17444_v42  ;;  %v17445_v62 = vsub.f32 %v17404_v25, %v10896_v60  ;;  %v17447_v31 = vpack.c.bf16 %v11008_v46, %v11000_v43 }
 0x3a7   : > { %v8873_v55 = vpop.eup %8872  ;;  %v1365_v37 = vadd.f32 %v11124_v15, %v1364_v24  ;;  %8892 = vpow2.f32 %v1278_v59  ;;  %v1386_v40 = vadd.f32 %v8869_v22, %v1385_v3  ;;  %8162 = vmatprep.subr.bf16.mxu1 %v8161_v53  ;;  %v8165_v44 = vpack.c.bf16 %v8871_v1, %v8869_v22 }
 0x3a8   : > { %v8875_v5 = vpop.eup %8874  ;;  %8894 = vpow2.f32 %v1282_v57  ;;  %v1298_v48 = vmul.f32 1.442695, %v17445_v62  ;;  %8164 = vmatpush1.bf16.msra.mxu1 %v17447_v31  ;;  %v17448_v25 = vsub.f32 %v17406_v6, %v10896_v60  ;;  %v17449_v26 = vsub.f32 %v17407_v33, %v10896_v60  ;;  %v17454_v31 = vld [vmem:[#allocation154_spill] sm:$0xff] }
 0x3a9   : > { %v8877_v50 = vpop.eup %8876  ;;  %v1366_v59 = vadd.f32 %v11130_v13, %v1365_v37  ;;  %8896 = vpow2.f32 %v1286_v0  ;;  %v1387_v24 = vadd.f32 %v8871_v1, %v1386_v40  ;;  %8166 = vmatprep.subr.bf16.mxu1 %v8165_v44  ;;  %v8169_v22 = vpack.c.bf16 %v8875_v5, %v8873_v55 }
 0x3aa   : > { %v8879_v57 = vpop.eup %8878  ;;  %8898 = vpow2.f32 %v1290_v51  ;;  %v1306_v3 = vmul.f32 1.442695, %v17448_v25  ;;  %v1310_v53 = vmul.f32 1.442695, %v17449_v26  ;;  %v17450_v1 = vsub.f32 %v17408_v34, %v10896_v60 }
 0x3ab   : > { %v8881_v42 = vpop.eup %8880  ;;  %v1367_v43 = vadd.f32 %v11138_v27, %v1366_v59  ;;  %8900 = vpow2.f32 %v1294_v35  ;;  %v1388_v46 = vadd.f32 %v8873_v55, %v1387_v24  ;;  %v8173_v37 = vpack.c.bf16 %v8879_v57, %v8877_v50 }
 0x3ac   : > { %v8883_v0 = vpop.eup %8882  ;;  %8902 = vpow2.f32 %v1298_v48  ;;  %v1314_v51 = vmul.f32 1.442695, %v17450_v1  ;;  %v17451_v6 = vsub.f32 %v17409_v20, %v10896_v60  ;;  %v17452_v33 = vpack.c.bf16 %v11024_v23, %v11016_v11 }
 0x3ad   : > { %v8885_v44 = vpop.eup %8884  ;;  %v1368_v62 = vadd.f32 %v11147_v18, %v1367_v43  ;;  %8904 = vpow2.f32 %v1302_v54  ;;  %v1389_v55 = vadd.f32 %v8875_v5, %v1388_v46  ;;  %v8177_v35 = vpack.c.bf16 %v8883_v0, %v8881_v42 }
 0x3ae   : > { %v1318_v40 = vmul.f32 1.442695, %v17451_v6  ;;  %8168 = vmatpush1.bf16.msra.mxu1 %v17452_v33  ;;  %v8887_v48 = vpop.eup %8886  ;;  %8906 = vpow2.f32 %v1306_v3  ;;  %v17453_v34 = vsub.f32 %v17410_v19, %v10896_v60  ;;  %v17455_v20 = vsub.f32 %v17454_v31, %v10896_v60  ;;  %v17457_v3 = vld [vmem:[#allocation160_spill] sm:$0xff] }
 0x3af   : > { %8170 = vmatprep.subr.bf16.mxu1 %v8169_v22  ;;  %v8889_v24 = vpop.eup %8888  ;;  %v1369_v11 = vadd.f32 %v11158_v8, %v1368_v62  ;;  %8908 = vpow2.f32 %v1310_v53  ;;  %v1390_v23 = vadd.f32 %v8877_v50, %v1389_v55  ;;  %v8181_v25 = vpack.c.bf16 %v8887_v48, %v8885_v44 }
 0x3b0   : > { %v1322_v45 = vmul.f32 1.442695, %v17453_v34  ;;  %v1326_v59 = vmul.f32 1.442695, %v17455_v20  ;;  %v8891_v54 = vpop.eup %8890  ;;  %8910 = vpow2.f32 %v1314_v51  ;;  %v17456_v5 = vsub.f32 %v17412_v61, %v10896_v60 }
 0x3b1   : > { %v17458_v19 = vsub.f32 %v17457_v3, %v10896_v60  ;;  %v17459_v43 = vpack.c.bf16 %v11039_v58, %v11032_v49  ;;  %v8893_v46 = vpop.eup %8892  ;;  %v1370_v1 = vadd.f32 %v11167_v38, %v1369_v11  ;;  %8912 = vpow2.f32 %v1318_v40 }
 0x3b2   : > { %v1330_v22 = vmul.f32 1.442695, %v17456_v5  ;;  %v1391_v50 = vadd.f32 %v8879_v57, %v1390_v23  ;;  %v8185_v53 = vpack.c.bf16 %v8891_v54, %v8889_v24  ;;  %v8895_v51 = vpop.eup %8894  ;;  %8914 = vpow2.f32 %v1322_v45  ;;  %v17462_v57 = vld [vmem:[#allocation169_spill] sm:$0xff] }
 0x3b3   : > { %v1334_v26 = vmul.f32 1.442695, %v17458_v19  ;;  %8172 = vmatpush1.bf16.msra.mxu1 %v17459_v43  ;;  %v17460_v61 = vsub.f32 %v17414_v17, %v10896_v60  ;;  %v17461_v33 = vsub.f32 %v17415_v39, %v10896_v60  ;;  %v8897_v55 = vpop.eup %8896  ;;  %v1371_v58 = vadd.f32 %v11175_v47, %v1370_v1 }
 0x3b4   : > { %8174 = vmatprep.subr.bf16.mxu1 %v8173_v37  ;;  %8916 = vpow2.f32 %v1326_v59  ;;  %v1392_v49 = vadd.f32 %v8881_v42, %v1391_v50  ;;  %v8189_v34 = vpack.c.bf16 %v8895_v51, %v8893_v46  ;;  %v8899_v40 = vpop.eup %8898  ;;  %v17463_v37 = vsub.f32 %v17462_v57, %v10896_v60 }
 0x3b5   : > { %v1338_v6 = vmul.f32 1.442695, %v17460_v61  ;;  %v1342_v62 = vmul.f32 1.442695, %v17461_v33  ;;  %8918 = vpow2.f32 %v1330_v22  ;;  %v17464_v17 = vpack.c.bf16 %v11054_v56, %v11047_v21  ;;  %v8901_v31 = vpop.eup %8900 }
 0x3b6   : > { %v1346_v45 = vmul.f32 1.442695, %v17463_v37  ;;  %v1372_v39 = vadd.f32 %v11182_v32, %v1371_v58  ;;  %8920 = vpow2.f32 %v1334_v26  ;;  %v1393_v20 = vadd.f32 %v8883_v0, %v1392_v49  ;;  %v8903_v59 = vpop.eup %8902 }
 0x3b7   : > { %8176 = vmatpush1.bf16.msra.mxu1 %v17464_v17  ;;  %v8193_v11 = vpack.c.bf16 %v8899_v40, %v8897_v55  ;;  %8922 = vpow2.f32 %v1338_v6  ;;  %v8905_v42 = vpop.eup %8904  ;;  %v8197_v60 = vpack.c.bf16 %v8903_v59, %v8901_v31  ;;  %v17465_v56 = vpack.c.bf16 %v11069_v2, %v11062_v28 }
 0x3b8   : > { %8178 = vmatprep.subr.bf16.mxu1 %v8177_v35  ;;  %v1373_v23 = vadd.f32 %v11190_v41, %v1372_v39  ;;  %8924 = vpow2.f32 %v1342_v62  ;;  %v1394_v5 = vadd.f32 %v8885_v44, %v1393_v20  ;;  %v8907_v22 = vpop.eup %8906  ;;  %v17466_v61 = vpack.c.bf16 %v11083_v30, %v11077_v16 }
 0x3b9   : > { %8926 = vpow2.f32 %v1346_v45  ;;  %v8909_v21 = vpop.eup %8908  ;;  %v8201_v35 = vpack.c.bf16 %v8907_v22, %v8905_v42  ;;  %v17468_v39 = vpack.c.bf16 %v11108_v29, %v11102_v12  ;;  %v17472_v12 = vpack.c.bf16 %v11147_v18, %v11138_v27 }
 0x3ba   : > { %v1374_v3 = vadd.f32 %v11197_v9, %v1373_v23  ;;  %v1395_v0 = vadd.f32 %v8887_v48, %v1394_v5  ;;  %v8911_v19 = vpop.eup %8910  ;;  %v17475_v27 = vpack.c.bf16 %v11197_v9, %v11190_v41  ;;  %v17481_v9 = vld [vmem:[#allocation175_spill] sm:$0xff]  ;;  %v17482_v41 = vld [vmem:[#allocation14_spill] sm:$0xff] }
 0x3bb   : > { %8180 = vmatpush1.bf16.msra.mxu1 %v17465_v56  ;;  %v8913_v26 = vpop.eup %8912  ;;  %v8205_v50 = vpack.c.bf16 %v8911_v19, %v8909_v21  ;;  %v17483_v56 = vld [vmem:[#allocation12_spill] sm:$0xff] }
 0x3bc   : > { %8182 = vmatprep.subr.bf16.mxu1 %v8181_v25  ;;  %v1375_v43 = vadd.f32 %v11205_v7, %v1374_v3  ;;  %v1396_v1 = vadd.f32 %v8889_v24, %v1395_v0  ;;  %v8915_v44 = vpop.eup %8914  ;;  %v17467_v24 = vpack.c.bf16 %v11096_v14, %v11089_v4  ;;  %v17469_v4 = vld [vmem:[#allocation116_spill] sm:$0xff]  ;;  %v17485_v3 = vld [vmem:[#allocation178_spill] sm:$0xff] }
 0x3bd   : > { %v8209_v33 = vpack.c.bf16 %v8915_v44, %v8913_v26  ;;  %v17470_v14 = vpack.c.bf16 %v11119_v52, %v17469_v4  ;;  %v17473_v52 = vpack.c.bf16 %v11167_v38, %v11158_v8  ;;  %v17476_v8 = vpack.c.bf16 %v11213_v63, %v11205_v7  ;;  %v17488_v0 = vld [vmem:[#allocation40_spill] sm:$0xff]  ;;  %v17517_v4 = vld [vmem:[#allocation67_spill] sm:$0xff] }
 0x3be   : > { %v8917_v6 = vpop.eup %8916  ;;  %v1376_v2 = vadd.f32 %v11213_v63, %v1375_v43  ;;  %v1397_v28 = vadd.f32 %v8891_v54, %v1396_v1  ;;  %v17486_v63 = vld [vmem:[#allocation177_spill] sm:$0xff]  ;;  %v17487_v7 = vmov 0.0   ;;  %v17494_v43 = vld [vmem:[#allocation52_spill] sm:$0xff]  ;;  %v17495_v1 = vld [vmem:[#allocation54_spill] sm:$0xff] }
 0x3bf   : > { %8184 = vmatpush1.bf16.msra.mxu1 %v17466_v61  ;;  %v8919_v48 = vpop.eup %8918  ;;  %v17498_v61 = vld [vmem:[#allocation60_spill] sm:$0xff] }
 0x3c0   : > { %8186 = vmatprep.subr.bf16.mxu1 %v8185_v53  ;;  %v8921_v25 = vpop.eup %8920  ;;  %v1377_v62 = vadd.f32 %v11218_v10, %v1376_v2  ;;  %v1398_v58 = vadd.f32 %v8893_v46, %v1397_v28  ;;  %v8213_v49 = vpack.c.bf16 %v8919_v48, %v8917_v6  ;;  %v17500_v2 = vld [vmem:[#allocation64_spill] sm:$0xff]  ;;  %v17501_v28 = vld [vmem:[#allocation66_spill] sm:$0xff] }
 0x3c1   : > { %v8923_v57 = vpop.eup %8922 }
 0x3c2   : > { %v8925_v37 = vpop.eup %8924  ;;  %v11324_v30 = vadd.f32 %v11226_v36, %v1377_v62  ;;  %v1399_v16 = vadd.f32 %v8895_v51, %v1398_v58  ;;  %v8217_v54 = vpack.c.bf16 %v8923_v57, %v8921_v25  ;;  %v17471_v51 = vpack.c.bf16 %v11130_v13, %v11124_v15  ;;  %v17505_v62 = vld [vmem:[#allocation43_spill] sm:$0xff]  ;;  %v17506_v58 = vld [vmem:[#allocation45_spill] sm:$0xff] }
 0x3c3   : > { %8188 = vmatpush1.bf16.msra.mxu1 %v17467_v24  ;;  %v8927_v53 = vpop.eup %8926  ;;  %v17474_v15 = vpack.c.bf16 %v11182_v32, %v11175_v47  ;;  %v17477_v47 = vpack.c.bf16 %v11226_v36, %v11218_v10  ;;  %v17478_v32 = vld [vmem:[#allocation15_spill] sm:$0xff]  ;;  %v17489_v10 = vld [vmem:[#allocation42_spill] sm:$0xff]  ;;  %v17490_v36 = vld [vmem:[#allocation44_spill] sm:$0xff] }
 0x3c4   : > { %8190 = vmatprep.subr.bf16.mxu1 %v8189_v34  ;;  %v1400_v45 = vadd.f32 %v8897_v55, %v1399_v16  ;;  %v8221_v17 = vpack.c.bf16 %v8927_v53, %v8925_v37  ;;  %v17509_v24 = vld [vmem:[#allocation51_spill] sm:$0xff] }
 0x3c5   : > { %v17511_v16 = vld [vmem:[#allocation55_spill] sm:$0xff] }
 0x3c6   : > { %v1401_v46 = vadd.f32 %v8899_v40, %v1400_v45  ;;  %v298_v45 = vld [vmem:[#allocation6 + $0x118] sm:$0xff] }
 0x3c7   : > { %8192 = vmatpush1.bf16.msra.mxu1 %v17468_v39  ;;  %v17514_v39 = vld [vmem:[#allocation61_spill] sm:$0xff] }
 0x3c8   : > { %8194 = vmatprep.subr.bf16.mxu1 %v8193_v11  ;;  %v1402_v20 = vadd.f32 %v8901_v31, %v1401_v46  ;;  %v17515_v46 = vld [vmem:[#allocation63_spill] sm:$0xff] }
 0x3ca   : > { %v1403_v23 = vadd.f32 %v8903_v59, %v1402_v20  ;;  %v17516_v20 = vld [vmem:[#allocation65_spill] sm:$0xff] }
 0x3cb   : > { %8196 = vmatpush1.bf16.msra.mxu1 %v17470_v14  ;;  %v17518_v14 = vld [vmem:[#allocation69_spill] sm:$0xff] }
 0x3cc   : > { %8198 = vmatprep.subr.bf16.mxu1 %v8197_v60  ;;  %v1404_v5 = vadd.f32 %v8905_v42, %v1403_v23  ;;  %v17479_v60 = vld [vmem:[#allocation13_spill] sm:$0xff]  ;;  %v17519_v23 = vld [vmem:[#allocation71_spill] sm:$0xff] }
 0x3ce   : > { %v1405_v55 = vadd.f32 %v8907_v22, %v1404_v5  ;;  %v17480_v22 = vpack.c.bf16 %v17478_v32, %v17479_v60  ;;  %v1379_v5 = vrot.slane %v11324_v30, 4 }
 0x3cf   : > { %8200 = vmatpush1.bf16.msra.mxu1 %v17471_v51 }
 0x3d0   : > { %8202 = vmatprep.subr.bf16.mxu1 %v8201_v35  ;;  %v1406_v34 = vadd.f32 %v8909_v21, %v1405_v55  ;;  %v17484_v21 = vpack.c.bf16 %v17482_v41, %v17483_v56  ;;  %v17491_v35 = vld [vmem:[#allocation46_spill] sm:$0xff]  ;;  %v1380_v55 = vadd.f32 %v1379_v5, %v11324_v30 }
 0x3d2   : > { %v1407_v29 = vadd.f32 %v8911_v19, %v1406_v34  ;;  %v17492_v19 = vld [vmem:[#allocation48_spill] sm:$0xff] }
 0x3d3   : > { %8204 = vmatpush1.bf16.msra.mxu1 %v17472_v12  ;;  %v1381_v12 = vrot.slane %v1380_v55, 2 }
 0x3d4   : > { %8206 = vmatprep.subr.bf16.mxu1 %v8205_v50  ;;  %v1408_v40 = vadd.f32 %v8913_v26, %v1407_v29  ;;  %v17493_v26 = vld [vmem:[#allocation50_spill] sm:$0xff]  ;;  %v17496_v50 = vld [vmem:[#allocation56_spill] sm:$0xff] }
 0x3d6   : > { %v1409_v31 = vadd.f32 %v8915_v44, %v1408_v40  ;;  %v17497_v44 = vld [vmem:[#allocation58_spill] sm:$0xff]  ;;  %v1382_v40 = vadd.f32 %v1381_v12, %v1380_v55 }
 0x3d7   : > { %8208 = vmatpush1.bf16.msra.mxu1 %v17473_v52 }
 0x3d8   : > { %8210 = vmatprep.subr.bf16.mxu1 %v8209_v33  ;;  %v1410_v11 = vadd.f32 %v8917_v6, %v1409_v31  ;;  %v17499_v6 = vld [vmem:[#allocation62_spill] sm:$0xff]  ;;  %v17502_v33 = vld [vmem:[#allocation68_spill] sm:$0xff]  ;;  %v1383_v31 = vrot.slane %v1382_v40, 1 }
 0x3da   : > { %v1411_v13 = vadd.f32 %v8919_v48, %v1410_v11  ;;  %v17503_v48 = vld [vmem:[#allocation70_spill] sm:$0xff] }
 0x3db   : > { %8212 = vmatpush1.bf16.msra.mxu1 %v17474_v15  ;;  %v1384_v15 = vadd.f32 %v1383_v31, %v1382_v40 }
 0x3dc   : > { %8214 = vmatprep.subr.bf16.mxu1 %v8213_v49  ;;  %v1412_v59 = vadd.f32 %v8921_v25, %v1411_v13  ;;  %v17504_v25 = vld [vmem:[#allocation41_spill] sm:$0xff]  ;;  %v17507_v49 = vld [vmem:[#allocation47_spill] sm:$0xff] }
 0x3dd   : > { %8928 = vrcp.f32 %v1384_v15 }
 0x3de   : > { %v1413_v18 = vadd.f32 %v8923_v57, %v1412_v59  ;;  %v17508_v57 = vld [vmem:[#allocation49_spill] sm:$0xff] }
 0x3df   : > { %8216 = vmatpush1.bf16.msra.mxu1 %v17475_v27 }
 0x3e0   : > { %8218 = vmatprep.subr.bf16.mxu1 %v8217_v54  ;;  %v1414_v42 = vadd.f32 %v8925_v37, %v1413_v18  ;;  %v17510_v37 = vld [vmem:[#allocation53_spill] sm:$0xff]  ;;  %v297_v54 = vld [vmem:[#allocation6 + $0x110] sm:$0xff] }
 0x3e1   : > { %580 = vmatmul.mubr.f32.gmra.mrb[68].mxu0 %v297_v54 }
 0x3e2   : > { %v11350_v38 = vadd.f32 %v8927_v53, %v1414_v42  ;;  %585 = vmatprep.mubr.f32.mxu0 %v17487_v7  ;;  %v17512_v53 = vld [vmem:[#allocation57_spill] sm:$0xff] }
 0x3e3   : > { %8220 = vmatpush1.bf16.msra.mxu1 %v17476_v8 }
 0x3e4   : > { %8222 = vmatprep.subr.bf16.mxu1 %v8221_v17  ;;  %v17513_v17 = vld [vmem:[#allocation59_spill] sm:$0xff]  ;;  %v1416_v51 = vrot.slane %v11350_v38, 4 }
 0x3e5   : > { %586 = vmatmul.mubr.f32.gmra.mrb[70].mxu0 %v298_v45 }
 0x3e6   : > { %591 = vmatprep.mubr.f32.mxu0 %v17487_v7  ;;  %v1417_v34 = vadd.f32 %v1416_v51, %v11350_v38 }
 0x3e7   : > { %8224 = vmatpush1.bf16.msra.mxu1 %v17477_v47  ;;  %v8929_v59 = vpop.eup %8928 }
 0x3e8   : > { %8226 = vmatprep.subr.bf16.mxu1 %v17480_v22  ;;  %v1418_v29 = vrot.slane %v1417_v34, 2 }
 0x3ea   : > { %1487 = vmatmul.mubr.f32.vlgmr.msra.gmra.mrb[64].mxu1 %v17481_v9  ;;  %v1419_v52 = vadd.f32 %v1418_v29, %v1417_v34 }
 0x3eb   : > { %8228 = vmatpush1.bf16.msra.mxu1 %v17484_v21  ;;  %1492 = vmatprep.mubr.f32.mxu1 %v17485_v3 }
 0x3ec   : > { %v1420_v11 = vrot.slane %v1419_v52, 1 }
 0x3ee   : > { %1493 = vmatmul.mubr.f32.gmra.mrb[66].mxu1 %v17486_v63  ;;  %v1421_v13 = vadd.f32 %v1420_v11, %v1419_v52 }
 0x3ef   : > { %1733 = vmatprep.mubr.f32.mxu1 %v17487_v7 }
 0x3f0   : > { %8930 = vrcp.f32 %v1421_v13 }
 0x3f2   : > { %7894 = vmatmul.mubr.msk.f32.vlgmr.msra.gmra.mrb[68].mxu1 %vm728_vm0, %v17488_v0 }
 0x3f3   : > { %1739 = vmatprep.mubr.f32.mxu1 %v17487_v7 }
 0x3f6   : > { %7895 = vmatmul.mubr.msk.f32.gmra.mrb[70].mxu1 %vm728_vm0, %v17489_v10 }
 0x3f7   : > { %1745 = vmatprep.mubr.f32.mxu1 %v17487_v7 }
 0x3fa   : > { %7896 = vmatmul.mubr.msk.f32.gmra.mrb[72].mxu1 %vm728_vm0, %v17490_v36  ;;  %v8931_v18 = vpop.eup %8930 }
 0x3fb   : > { %1751 = vmatprep.mubr.f32.mxu1 %v17487_v7 }
 0x3fe   : > { %7897 = vmatmul.mubr.msk.f32.gmra.mrb[74].mxu1 %vm728_vm0, %v17491_v35 }
 0x3ff   : > { %1757 = vmatprep.mubr.f32.mxu1 %v17487_v7 }
 0x402   : > { %7898 = vmatmul.mubr.msk.f32.gmra.mrb[76].mxu1 %vm728_vm0, %v17492_v19 }
 0x403   : > { %1763 = vmatprep.mubr.f32.mxu1 %v17487_v7 }
 0x406   : > { %7899 = vmatmul.mubr.msk.f32.gmra.mrb[78].mxu1 %vm728_vm0, %v17493_v26 }
 0x407   : > { %1769 = vmatprep.mubr.f32.mxu1 %v17487_v7 }
 0x40a   : > { %7900 = vmatmul.mubr.msk.f32.gmra.mrb[80].mxu1 %vm728_vm0, %v17494_v43 }
 0x40b   : > { %1775 = vmatprep.mubr.f32.mxu1 %v17487_v7 }
 0x40e   : > { %7901 = vmatmul.mubr.msk.f32.gmra.mrb[82].mxu1 %vm728_vm0, %v17495_v1 }
 0x40f   : > { %1781 = vmatprep.mubr.f32.mxu1 %v17487_v7 }
 0x412   : > { %7902 = vmatmul.mubr.msk.f32.gmra.mrb[84].mxu1 %vm728_vm0, %v17496_v50 }
 0x413   : > { %1787 = vmatprep.mubr.f32.mxu1 %v17487_v7 }
 0x416   : > { %7903 = vmatmul.mubr.msk.f32.gmra.mrb[86].mxu1 %vm728_vm0, %v17497_v44 }
 0x417   : > { %1793 = vmatprep.mubr.f32.mxu1 %v17487_v7 }
 0x41a   : > { %7904 = vmatmul.mubr.msk.f32.gmra.mrb[88].mxu1 %vm728_vm0, %v17498_v61 }
 0x41b   : > { %1799 = vmatprep.mubr.f32.mxu1 %v17487_v7 }
 0x41e   : > { %7905 = vmatmul.mubr.msk.f32.gmra.mrb[90].mxu1 %vm728_vm0, %v17499_v6 }
 0x41f   : > { %1805 = vmatprep.mubr.f32.mxu1 %v17487_v7 }
 0x422   : > { %7906 = vmatmul.mubr.msk.f32.gmra.mrb[92].mxu1 %vm728_vm0, %v17500_v2 }
 0x423   : > { %1811 = vmatprep.mubr.f32.mxu1 %v17487_v7 }
 0x426   : > { %7907 = vmatmul.mubr.msk.f32.gmra.mrb[94].mxu1 %vm728_vm0, %v17501_v28 }
 0x427   : > { %1817 = vmatprep.mubr.f32.mxu1 %v17487_v7 }
 0x42a   : > { %7908 = vmatmul.mubr.msk.f32.gmra.mrb[96].mxu1 %vm728_vm0, %v17502_v33 }
 0x42b   : > { %1823 = vmatprep.mubr.f32.mxu1 %v17487_v7 }
 0x42e   : > { %7909 = vmatmul.mubr.msk.f32.gmra.mrb[98].mxu1 %vm728_vm0, %v17503_v48 }
 0x42f   : > { %1829 = vmatprep.mubr.f32.mxu1 %v17487_v7 }
 0x432   : > { %7910 = vmatmul.mubr.msk.f32.gmra.mrb[100].mxu1 %vm728_vm0, %v17504_v25 }
 0x433   : > { %1835 = vmatprep.mubr.f32.mxu1 %v17487_v7 }
 0x436   : > { %7911 = vmatmul.mubr.msk.f32.gmra.mrb[102].mxu1 %vm728_vm0, %v17505_v62 }
 0x437   : > { %1841 = vmatprep.mubr.f32.mxu1 %v17487_v7 }
 0x43a   : > { %7912 = vmatmul.mubr.msk.f32.gmra.mrb[104].mxu1 %vm728_vm0, %v17506_v58 }
 0x43b   : > { %1847 = vmatprep.mubr.f32.mxu1 %v17487_v7 }
 0x43e   : > { %7913 = vmatmul.mubr.msk.f32.gmra.mrb[106].mxu1 %vm728_vm0, %v17507_v49 }
 0x43f   : > { %1853 = vmatprep.mubr.f32.mxu1 %v17487_v7 }
 0x442   : > { %7914 = vmatmul.mubr.msk.f32.gmra.mrb[108].mxu1 %vm728_vm0, %v17508_v57 }
 0x443   : > { %1859 = vmatprep.mubr.f32.mxu1 %v17487_v7 }
 0x446   : > { %7915 = vmatmul.mubr.msk.f32.gmra.mrb[110].mxu1 %vm728_vm0, %v17509_v24 }
 0x447   : > { %1865 = vmatprep.mubr.f32.mxu1 %v17487_v7 }
 0x44a   : > { %7916 = vmatmul.mubr.msk.f32.gmra.mrb[112].mxu1 %vm728_vm0, %v17510_v37 }
 0x44b   : > { %1871 = vmatprep.mubr.f32.mxu1 %v17487_v7 }
 0x44e   : > { %7917 = vmatmul.mubr.msk.f32.gmra.mrb[114].mxu1 %vm728_vm0, %v17511_v16 }
 0x44f   : > { %1877 = vmatprep.mubr.f32.mxu1 %v17487_v7 }
 0x452   : > { %7918 = vmatmul.mubr.msk.f32.gmra.mrb[116].mxu1 %vm728_vm0, %v17512_v53 }
 0x453   : > { %1883 = vmatprep.mubr.f32.mxu1 %v17487_v7 }
 0x456   : > { %7919 = vmatmul.mubr.msk.f32.gmra.mrb[118].mxu1 %vm728_vm0, %v17513_v17 }
 0x457   : > { %1889 = vmatprep.mubr.f32.mxu1 %v17487_v7 }
 0x45a   : > { %7920 = vmatmul.mubr.msk.f32.gmra.mrb[120].mxu1 %vm728_vm0, %v17514_v39 }
 0x45b   : > { %1895 = vmatprep.mubr.f32.mxu1 %v17487_v7 }
 0x45e   : > { %7921 = vmatmul.mubr.msk.f32.gmra.mrb[122].mxu1 %vm728_vm0, %v17515_v46 }
 0x45f   : > { %1901 = vmatprep.mubr.f32.mxu1 %v17487_v7 }
 0x462   : > { %7922 = vmatmul.mubr.msk.f32.gmra.mrb[124].mxu1 %vm728_vm0, %v17516_v20 }
 0x463   : > { %1907 = vmatprep.mubr.f32.mxu1 %v17487_v7 }
 0x466   : > { %7923 = vmatmul.mubr.msk.f32.gmra.mrb[126].mxu1 %vm728_vm0, %v17517_v4 }
 0x467   : > { %1913 = vmatprep.mubr.f32.mxu1 %v17487_v7 }
 0x46a   : > { %7924 = vmatmul.mubr.msk.f32.gmra.mrb[128].mxu1 %vm728_vm0, %v17518_v14 }
 0x46b   : > { %1919 = vmatprep.mubr.f32.mxu1 %v17487_v7 }
 0x46e   : > { %7925 = vmatmul.mubr.msk.f32.gmra.mrb[130].mxu1 %vm728_vm0, %v17519_v23 }
 0x4bd   : > { %v1488_v27 = vpop.f32.mrb[64].mxu1 }
 0x4be   : > { %v11466_v42 = vmul.f32 %v8929_v59, %v1488_v27  ;;  %v1490_v8 = vpop.f32.mrb[65].mxu1 }
 0x4bf   : > { %v11468_v47 = vmul.f32 %v8931_v18, %v1490_v8 }
 0x4c0   : > { %17520 = vst [vmem:[#allocation117_spill] sm:$0xff] %v11466_v42 }
 0x4c1   : > { %17521 = vst [vmem:[#allocation120_spill] sm:$0xff] %v11468_v47  ;;  %v1494_v30 = vpop.f32.mrb[66].mxu1 }
 0x4c2   : > { %v11470_v38 = vmul.f32 %v8929_v59, %v1494_v30  ;;  %v1496_v32 = vpop.f32.mrb[67].mxu1 }
 0x4c3   : > { %v11472_v60 = vmul.f32 %v8931_v18, %v1496_v32 }
 0x4c4   : > { %17522 = vst [vmem:[#allocation123_spill] sm:$0xff] %v11470_v38 }
 0x4c5   : > { %17523 = vst [vmem:[#allocation124_spill] sm:$0xff] %v11472_v60  ;;  %v11476_v9 = vpop.f32.mrb[68].mxu1 }
 0x4c6   : > { %v11478_v41 = vpop.f32.mrb[69].mxu1 }
 0x4c9   : > { %v11480_v56 = vpop.f32.mrb[70].mxu1 }
 0x4ca   : > { %v11482_v21 = vpop.f32.mrb[71].mxu1 }
 0x4cd   : > { %v11484_v3 = vpop.f32.mrb[72].mxu1 }
 0x4ce   : > { %v1926_v63 = vmax.f32 %v11476_v9, %v11484_v3  ;;  %v11488_v0 = vpop.f32.mrb[73].mxu1 }
 0x4cf   : > { %v1963_v10 = vmax.f32 %v11478_v41, %v11488_v0 }
 0x4d1   : > { %v11492_v36 = vpop.f32.mrb[74].mxu1 }
 0x4d2   : > { %v1927_v35 = vmax.f32 %v11480_v56, %v11492_v36  ;;  %v11496_v19 = vpop.f32.mrb[75].mxu1 }
 0x4d3   : > { %v1964_v26 = vmax.f32 %v11482_v21, %v11496_v19 }
 0x4d5   : > { %v11500_v43 = vpop.f32.mrb[76].mxu1 }
 0x4d6   : > { %v11502_v1 = vpop.f32.mrb[77].mxu1  ;;  %v1928_v50 = vmax.f32 %v1926_v63, %v11500_v43 }
 0x4d7   : > { %v1965_v44 = vmax.f32 %v1963_v10, %v11502_v1 }
 0x4d9   : > { %v11506_v61 = vpop.f32.mrb[78].mxu1 }
 0x4da   : > { %v11508_v6 = vpop.f32.mrb[79].mxu1  ;;  %v1929_v2 = vmax.f32 %v1927_v35, %v11506_v61 }
 0x4db   : > { %v1966_v28 = vmax.f32 %v1964_v26, %v11508_v6 }
 0x4dd   : > { %v11512_v33 = vpop.f32.mrb[80].mxu1 }
 0x4de   : > { %v11514_v48 = vpop.f32.mrb[81].mxu1  ;;  %v1930_v25 = vmax.f32 %v1928_v50, %v11512_v33 }
 0x4df   : > { %v1967_v62 = vmax.f32 %v1965_v44, %v11514_v48 }
 0x4e1   : > { %v11518_v58 = vpop.f32.mrb[82].mxu1 }
 0x4e2   : > { %v11520_v49 = vpop.f32.mrb[83].mxu1  ;;  %v1931_v57 = vmax.f32 %v1929_v2, %v11518_v58 }
 0x4e3   : > { %v1968_v24 = vmax.f32 %v1966_v28, %v11520_v49 }
 0x4e5   : > { %v11524_v37 = vpop.f32.mrb[84].mxu1 }
 0x4e6   : > { %v1932_v16 = vmax.f32 %v1930_v25, %v11524_v37  ;;  %v11527_v54 = vpop.f32.mrb[85].mxu1 }
 0x4e7   : > { %v1969_v53 = vmax.f32 %v1967_v62, %v11527_v54 }
 0x4e9   : > { %v11530_v45 = vpop.f32.mrb[86].mxu1 }
 0x4ea   : > { %v1933_v17 = vmax.f32 %v1931_v57, %v11530_v45  ;;  %v11533_v39 = vpop.f32.mrb[87].mxu1 }
 0x4eb   : > { %v1970_v46 = vmax.f32 %v1968_v24, %v11533_v39 }
 0x4ed   : > { %v11536_v20 = vpop.f32.mrb[88].mxu1 }
 0x4ee   : > { %v1934_v4 = vmax.f32 %v1932_v16, %v11536_v20  ;;  %v11539_v14 = vpop.f32.mrb[89].mxu1 }
 0x4ef   : > { %v1971_v23 = vmax.f32 %v1969_v53, %v11539_v14 }
 0x4f1   : > { %v11542_v5 = vpop.f32.mrb[90].mxu1 }
 0x4f2   : > { %v1935_v51 = vmax.f32 %v1933_v17, %v11542_v5  ;;  %v11545_v55 = vpop.f32.mrb[91].mxu1 }
 0x4f3   : > { %v1972_v34 = vmax.f32 %v1970_v46, %v11545_v55 }
 0x4f5   : > { %v11548_v12 = vpop.f32.mrb[92].mxu1 }
 0x4f6   : > { %v1936_v29 = vmax.f32 %v1934_v4, %v11548_v12  ;;  %v11551_v40 = vpop.f32.mrb[93].mxu1 }
 0x4f7   : > { %v1973_v52 = vmax.f32 %v1971_v23, %v11551_v40 }
 0x4f9   : > { %v11554_v31 = vpop.f32.mrb[94].mxu1 }
 0x4fa   : > { %v1937_v11 = vmax.f32 %v1935_v51, %v11554_v31  ;;  %v11557_v15 = vpop.f32.mrb[95].mxu1 }
 0x4fb   : > { %17524 = vst [vmem:[#allocation127_spill] sm:$0xff] %v11557_v15  ;;  %v1974_v13 = vmax.f32 %v1972_v34, %v11557_v15 }
 0x4fd   : > { %v11560_v59 = vpop.f32.mrb[96].mxu1 }
 0x4fe   : > { %v1938_v27 = vmax.f32 %v1936_v29, %v11560_v59  ;;  %v11563_v18 = vpop.f32.mrb[97].mxu1 }
 0x4ff   : > { %17525 = vst [vmem:[#allocation130_spill] sm:$0xff] %v11563_v18  ;;  %v1975_v8 = vmax.f32 %v1973_v52, %v11563_v18 }
 0x501   : > { %v11566_v30 = vpop.f32.mrb[98].mxu1 }
 0x502   : > { %v1939_v32 = vmax.f32 %v1937_v11, %v11566_v30  ;;  %v11569_v63 = vpop.f32.mrb[99].mxu1 }
 0x503   : > { %17526 = vst [vmem:[#allocation133_spill] sm:$0xff] %v11569_v63  ;;  %v1976_v10 = vmax.f32 %v1974_v13, %v11569_v63  ;;  %v11675_v63 = vpop.f32.mrb[68].mxu0 }
 0x504   : > { %17543 = vst [vmem:[#allocation14_spill] sm:$0xff] %v11675_v63  ;;  %v11677_v18 = vpop.f32.mrb[69].mxu0 }
 0x505   : > { %v11572_v35 = vpop.f32.mrb[100].mxu1 }
 0x506   : > { %v1940_v26 = vmax.f32 %v1938_v27, %v11572_v35  ;;  %v11575_v50 = vpop.f32.mrb[101].mxu1 }
 0x507   : > { %17527 = vst [vmem:[#allocation136_spill] sm:$0xff] %v11575_v50  ;;  %v1977_v44 = vmax.f32 %v1975_v8, %v11575_v50  ;;  %v303_v50 = vld [vmem:[#allocation6 + $0x140] sm:$0xff] }
 0x509   : > { %v11578_v2 = vpop.f32.mrb[102].mxu1 }
 0x50a   : > { %v1941_v28 = vmax.f32 %v1939_v32, %v11578_v2  ;;  %v11581_v25 = vpop.f32.mrb[103].mxu1 }
 0x50b   : > { %17528 = vst [vmem:[#allocation139_spill] sm:$0xff] %v11581_v25  ;;  %v1978_v62 = vmax.f32 %v1976_v10, %v11581_v25 }
 0x50d   : > { %v11584_v57 = vpop.f32.mrb[104].mxu1 }
 0x50e   : > { %v1942_v24 = vmax.f32 %v1940_v26, %v11584_v57  ;;  %v11587_v16 = vpop.f32.mrb[105].mxu1 }
 0x50f   : > { %17529 = vst [vmem:[#allocation142_spill] sm:$0xff] %v11587_v16  ;;  %v1979_v53 = vmax.f32 %v1977_v44, %v11587_v16 }
 0x511   : > { %v11590_v17 = vpop.f32.mrb[106].mxu1 }
 0x512   : > { %v1943_v46 = vmax.f32 %v1941_v28, %v11590_v17  ;;  %v11593_v4 = vpop.f32.mrb[107].mxu1 }
 0x513   : > { %17530 = vst [vmem:[#allocation145_spill] sm:$0xff] %v11593_v4  ;;  %v1980_v23 = vmax.f32 %v1978_v62, %v11593_v4 }
 0x515   : > { %v11596_v51 = vpop.f32.mrb[108].mxu1 }
 0x516   : > { %v1944_v34 = vmax.f32 %v1942_v24, %v11596_v51  ;;  %v11599_v29 = vpop.f32.mrb[109].mxu1 }
 0x517   : > { %17531 = vst [vmem:[#allocation148_spill] sm:$0xff] %v11599_v29  ;;  %v1981_v52 = vmax.f32 %v1979_v53, %v11599_v29  ;;  %v300_v29 = vld [vmem:[#allocation6 + $0x128] sm:$0xff] }
 0x519   : > { %v11602_v11 = vpop.f32.mrb[110].mxu1 }
 0x51a   : > { %v1945_v13 = vmax.f32 %v1943_v46, %v11602_v11  ;;  %v11605_v27 = vpop.f32.mrb[111].mxu1 }
 0x51b   : > { %17532 = vst [vmem:[#allocation151_spill] sm:$0xff] %v11605_v27  ;;  %v1982_v8 = vmax.f32 %v1980_v23, %v11605_v27  ;;  %v299_v27 = vld [vmem:[#allocation6 + $0x120] sm:$0xff] }
 0x51c   : > { %592 = vmatmul.mubr.f32.gmra.mrb[72].mxu0 %v299_v27  ;;  %v301_v27 = vld [vmem:[#allocation6 + $0x130] sm:$0xff] }
 0x51d   : > { %v11608_v32 = vpop.f32.mrb[112].mxu1  ;;  %597 = vmatprep.mubr.f32.mxu0 %v17487_v7 }
 0x51e   : > { %v1946_v10 = vmax.f32 %v1944_v34, %v11608_v32  ;;  %v11611_v26 = vpop.f32.mrb[113].mxu1 }
 0x51f   : > { %17533 = vst [vmem:[#allocation157_spill] sm:$0xff] %v11611_v26  ;;  %v1983_v44 = vmax.f32 %v1981_v52, %v11611_v26 }
 0x520   : > { %598 = vmatmul.mubr.f32.gmra.mrb[74].mxu0 %v300_v29  ;;  %v302_v29 = vld [vmem:[#allocation6 + $0x138] sm:$0xff] }
 0x521   : > { %v11614_v28 = vpop.f32.mrb[114].mxu1  ;;  %603 = vmatprep.mubr.f32.mxu0 %v17487_v7 }
 0x522   : > { %v1947_v24 = vmax.f32 %v1945_v13, %v11614_v28  ;;  %v11619_v53 = vpop.f32.mrb[115].mxu1 }
 0x523   : > { %17534 = vst [vmem:[#allocation163_spill] sm:$0xff] %v11619_v53  ;;  %v1984_v46 = vmax.f32 %v1982_v8, %v11619_v53 }
 0x524   : > { %604 = vmatmul.mubr.f32.gmra.mrb[76].mxu0 %v301_v27 }
 0x525   : > { %v11622_v23 = vpop.f32.mrb[116].mxu1  ;;  %609 = vmatprep.mubr.f32.mxu0 %v17487_v7 }
 0x526   : > { %v1948_v22 = vmax.f32 %v1946_v10, %v11622_v23  ;;  %v11625_v34 = vpop.f32.mrb[117].mxu1 }
 0x527   : > { %17535 = vst [vmem:[#allocation166_spill] sm:$0xff] %v11625_v34  ;;  %v1985_v42 = vmax.f32 %v1983_v44, %v11625_v34 }
 0x528   : > { %610 = vmatmul.mubr.f32.gmra.mrb[78].mxu0 %v302_v29 }
 0x529   : > { %v11628_v52 = vpop.f32.mrb[118].mxu1  ;;  %615 = vmatprep.mubr.f32.mxu0 %v17487_v7 }
 0x52a   : > { %v1949_v38 = vmax.f32 %v1947_v24, %v11628_v52  ;;  %v11631_v26 = vpop.f32.mrb[119].mxu1 }
 0x52b   : > { %17536 = vst [vmem:[#allocation154_spill] sm:$0xff] %v11631_v26  ;;  %v1986_v13 = vmax.f32 %v1984_v46, %v11631_v26 }
 0x52c   : > { %616 = vmatmul.mubr.f32.gmra.mrb[80].mxu0 %v303_v50  ;;  %v305_v50 = vld [vmem:[#allocation6 + $0x150] sm:$0xff] }
 0x52d   : > { %v11634_v62 = vpop.f32.mrb[120].mxu1  ;;  %621 = vmatprep.mubr.f32.mxu0 %v17487_v7 }
 0x52e   : > { %v1950_v8 = vmax.f32 %v1948_v22, %v11634_v62  ;;  %v11637_v47 = vpop.f32.mrb[121].mxu1 }
 0x52f   : > { %17537 = vst [vmem:[#allocation160_spill] sm:$0xff] %v11637_v47  ;;  %v1987_v10 = vmax.f32 %v1985_v42, %v11637_v47 }
 0x531   : > { %v11640_v60 = vpop.f32.mrb[122].mxu1 }
 0x532   : > { %v1951_v44 = vmax.f32 %v1949_v38, %v11640_v60  ;;  %v11643_v34 = vpop.f32.mrb[123].mxu1 }
 0x533   : > { %17538 = vst [vmem:[#allocation169_spill] sm:$0xff] %v11643_v34  ;;  %v1988_v24 = vmax.f32 %v1986_v13, %v11643_v34 }
 0x535   : > { %v11646_v53 = vpop.f32.mrb[124].mxu1 }
 0x536   : > { %v1952_v46 = vmax.f32 %v1950_v8, %v11646_v53  ;;  %v11649_v26 = vpop.f32.mrb[125].mxu1 }
 0x537   : > { %17539 = vst [vmem:[#allocation116_spill] sm:$0xff] %v11649_v26  ;;  %v1989_v22 = vmax.f32 %v1987_v10, %v11649_v26 }
 0x539   : > { %v11653_v42 = vpop.f32.mrb[126].mxu1 }
 0x53a   : > { %v1953_v38 = vmax.f32 %v1951_v44, %v11653_v42  ;;  %v11656_v47 = vpop.f32.mrb[127].mxu1 }
 0x53b   : > { %17540 = vst [vmem:[#allocation15_spill] sm:$0xff] %v11656_v47  ;;  %v1990_v13 = vmax.f32 %v1988_v24, %v11656_v47 }
 0x53d   : > { %v11660_v8 = vpop.f32.mrb[128].mxu1 }
 0x53e   : > { %v1954_v34 = vmax.f32 %v1952_v46, %v11660_v8  ;;  %v11663_v10 = vpop.f32.mrb[129].mxu1 }
 0x53f   : > { %17541 = vst [vmem:[#allocation13_spill] sm:$0xff] %v11663_v10  ;;  %v1991_v26 = vmax.f32 %v1989_v22, %v11663_v10  ;;  %v304_v10 = vld [vmem:[#allocation6 + $0x148] sm:$0xff] }
 0x540   : > { %622 = vmatmul.mubr.f32.gmra.mrb[82].mxu0 %v304_v10 }
 0x541   : > { %v11667_v44 = vpop.f32.mrb[130].mxu1  ;;  %627 = vmatprep.mubr.f32.mxu0 %v17487_v7 }
 0x542   : > { %v1955_v4 = vmax.f32 %v1953_v38, %v11667_v44  ;;  %v11670_v24 = vpop.f32.mrb[131].mxu1 }
 0x543   : > { %17542 = vst [vmem:[#allocation175_spill] sm:$0xff] %v11670_v24  ;;  %v1992_v47 = vmax.f32 %v1990_v13, %v11670_v24  ;;  %v11679_v13 = vpop.f32.mrb[70].mxu0 }
 0x544   : > { %v1956_v16 = vmax.f32 %v1954_v34, %v1955_v4  ;;  %17544 = vst [vmem:[#allocation12_spill] sm:$0xff] %v11679_v13  ;;  %v11681_v34 = vpop.f32.mrb[71].mxu0  ;;  %628 = vmatmul.mubr.f32.gmra.mrb[84].mxu0 %v305_v50 }
 0x545   : > { %v1993_v46 = vmax.f32 %v1991_v26, %v1992_v47  ;;  %17545 = vst [vmem:[#allocation178_spill] sm:$0xff] %v11681_v34  ;;  %633 = vmatprep.mubr.f32.mxu0 %v17487_v7 }
 0x546   : > { %v1957_v25 = vrot.slane %v1956_v16, 4  ;;  %v17563_v63 = vld [vmem:[#allocation13_spill] sm:$0xff] }
 0x547   : > { %v1994_v22 = vrot.slane %v1993_v46, 4 }
 0x548   : > { %v1958_v27 = vmax.f32 %v1956_v16, %v1957_v25 }
 0x549   : > { %v1995_v38 = vmax.f32 %v1993_v46, %v1994_v22  ;;  %v306_v46 = vld [vmem:[#allocation6 + $0x158] sm:$0xff] }
 0x54a   : > { %v1959_v15 = vrot.slane %v1958_v27, 2  ;;  %634 = vmatmul.mubr.f32.gmra.mrb[86].mxu0 %v306_v46 }
 0x54b   : > { %v1996_v4 = vrot.slane %v1995_v38, 2  ;;  %639 = vmatprep.mubr.f32.mxu0 %v17487_v7 }
 0x54c   : > { %v1960_v47 = vmax.f32 %v1958_v27, %v1959_v15 }
 0x54d   : > { %v1997_v25 = vmax.f32 %v1995_v38, %v1996_v4 }
 0x54e   : > { %v1961_v16 = vrot.slane %v1960_v47, 1 }
 0x54f   : > { %v1998_v26 = vrot.slane %v1997_v25, 1 }
 0x550   : > { %v11684_v29 = vmax.f32 %v1960_v47, %v1961_v16 }
 0x551   : > { %v11687_v22 = vmax.f32 %v1997_v25, %v1998_v26 }
 0x552   : > { %v2000_v10 = vsub.f32 %v11476_v9, %v11684_v29  ;;  %v2002_v15 = vsub.f32 %v11480_v56, %v11684_v29  ;;  %v2004_v27 = vsub.f32 %v11484_v3, %v11684_v29  ;;  %v2006_v38 = vsub.f32 %v11492_v36, %v11684_v29 }
 0x553   : > { %v2008_v4 = vsub.f32 %v11500_v43, %v11684_v29  ;;  %v2010_v47 = vsub.f32 %v11506_v61, %v11684_v29  ;;  %v2012_v50 = vsub.f32 %v11512_v33, %v11684_v29  ;;  %v2014_v9 = vsub.f32 %v11518_v58, %v11684_v29  ;;  %v307_v61 = vld [vmem:[#allocation6 + $0x160] sm:$0xff] }
 0x554   : > { %v2016_v56 = vsub.f32 %v11524_v37, %v11684_v29  ;;  %v2018_v3 = vsub.f32 %v11530_v45, %v11684_v29  ;;  %v2020_v36 = vsub.f32 %v11536_v20, %v11684_v29  ;;  %v2022_v43 = vsub.f32 %v11542_v5, %v11684_v29  ;;  %640 = vmatmul.mubr.f32.gmra.mrb[88].mxu0 %v307_v61 }
 0x555   : > { %v2024_v33 = vsub.f32 %v11548_v12, %v11684_v29  ;;  %v2026_v58 = vsub.f32 %v11554_v31, %v11684_v29  ;;  %v2028_v37 = vsub.f32 %v11560_v59, %v11684_v29  ;;  %v2030_v45 = vsub.f32 %v11566_v30, %v11684_v29  ;;  %645 = vmatprep.mubr.f32.mxu0 %v17487_v7 }
 0x556   : > { %v2032_v20 = vsub.f32 %v11572_v35, %v11684_v29  ;;  %v2034_v5 = vsub.f32 %v11578_v2, %v11684_v29  ;;  %v2036_v25 = vsub.f32 %v11584_v57, %v11684_v29  ;;  %v2038_v12 = vsub.f32 %v11590_v17, %v11684_v29 }
 0x557   : > { %v2040_v31 = vsub.f32 %v11596_v51, %v11684_v29  ;;  %v2042_v59 = vsub.f32 %v11602_v11, %v11684_v29  ;;  %v2044_v30 = vsub.f32 %v11608_v32, %v11684_v29  ;;  %v2046_v35 = vsub.f32 %v11614_v28, %v11684_v29  ;;  %v308_v11 = vld [vmem:[#allocation6 + $0x168] sm:$0xff]  ;;  %v309_v28 = vld [vmem:[#allocation6 + $0x170] sm:$0xff] }
 0x558   : > { %v2064_v46 = vmul.f32 1.442695, %v2000_v10  ;;  %v2068_v61 = vmul.f32 1.442695, %v2002_v15  ;;  %v2072_v17 = vmul.f32 1.442695, %v2004_v27  ;;  %646 = vmatmul.mubr.f32.gmra.mrb[90].mxu0 %v308_v11 }
 0x559   : > { %v2076_v57 = vmul.f32 1.442695, %v2006_v38  ;;  %v2080_v32 = vmul.f32 1.442695, %v2008_v4  ;;  %651 = vmatprep.mubr.f32.mxu0 %v17487_v7  ;;  %v2084_v16 = vmul.f32 1.442695, %v2010_v47 }
 0x55a   : > { %8932 = vpow2.f32 %v2064_v46  ;;  %v2088_v26 = vmul.f32 1.442695, %v2012_v50  ;;  %v310_v10 = vld [vmem:[#allocation6 + $0x178] sm:$0xff]  ;;  %v2092_v15 = vmul.f32 1.442695, %v2014_v9 }
 0x55b   : > { %8934 = vpow2.f32 %v2068_v61  ;;  %v2096_v27 = vmul.f32 1.442695, %v2016_v56  ;;  %v2100_v13 = vmul.f32 1.442695, %v2018_v3  ;;  %v2104_v38 = vmul.f32 1.442695, %v2020_v36 }
 0x55c   : > { %8936 = vpow2.f32 %v2072_v17  ;;  %652 = vmatmul.mubr.f32.gmra.mrb[92].mxu0 %v309_v28  ;;  %v2108_v51 = vmul.f32 1.442695, %v2022_v43  ;;  %v2112_v2 = vmul.f32 1.442695, %v2024_v33  ;;  %v2116_v4 = vmul.f32 1.442695, %v2026_v58 }
 0x55d   : > { %8938 = vpow2.f32 %v2076_v57  ;;  %657 = vmatprep.mubr.f32.mxu0 %v17487_v7  ;;  %v2120_v11 = vmul.f32 1.442695, %v2028_v37  ;;  %v2124_v46 = vmul.f32 1.442695, %v2030_v45  ;;  %v2128_v47 = vmul.f32 1.442695, %v2032_v20 }
 0x55e   : > { %8940 = vpow2.f32 %v2080_v32  ;;  %v2132_v17 = vmul.f32 1.442695, %v2034_v5  ;;  %v2136_v50 = vmul.f32 1.442695, %v2036_v25  ;;  %v2140_v57 = vmul.f32 1.442695, %v2038_v12 }
 0x55f   : > { %8942 = vpow2.f32 %v2084_v16  ;;  %v2144_v9 = vmul.f32 1.442695, %v2040_v31  ;;  %v11761_v56 = vmul.f32 1.442695, %v2042_v59  ;;  %v11763_v3 = vmul.f32 1.442695, %v2044_v30 }
 0x560   : > { %8944 = vpow2.f32 %v2088_v26  ;;  %658 = vmatmul.mubr.f32.gmra.mrb[94].mxu0 %v310_v10  ;;  %v11765_v36 = vmul.f32 1.442695, %v2046_v35  ;;  %v17547_v16 = vld [vmem:[#allocation130_spill] sm:$0xff]  ;;  %v17548_v61 = vld [vmem:[#allocation133_spill] sm:$0xff]  ;;  %v17550_v35 = vld [vmem:[#allocation139_spill] sm:$0xff] }
 0x561   : > { %8946 = vpow2.f32 %v2092_v15  ;;  %2330 = vmatprep.mubr.f32.mxu0 %v11677_v18  ;;  %v17551_v31 = vld [vmem:[#allocation142_spill] sm:$0xff]  ;;  %v17552_v26 = vld [vmem:[#allocation145_spill] sm:$0xff]  ;;  %v17553_v25 = vld [vmem:[#allocation148_spill] sm:$0xff] }
 0x562   : > { %8948 = vpow2.f32 %v2096_v27  ;;  %v17554_v18 = vld [vmem:[#allocation151_spill] sm:$0xff]  ;;  %v17555_v32 = vld [vmem:[#allocation157_spill] sm:$0xff]  ;;  %v17557_v10 = vld [vmem:[#allocation166_spill] sm:$0xff] }
 0x563   : > { %8950 = vpow2.f32 %v2100_v13  ;;  %v17556_v20 = vld [vmem:[#allocation163_spill] sm:$0xff]  ;;  %v17558_v58 = vld [vmem:[#allocation154_spill] sm:$0xff] }
 0x564   : > { %v11776_v45 = vpop.eup %8932  ;;  %8952 = vpow2.f32 %v2104_v38  ;;  %v17562_v15 = vld [vmem:[#allocation15_spill] sm:$0xff] }
 0x565   : > { %v11784_v13 = vpop.eup %8934  ;;  %8954 = vpow2.f32 %v2108_v51  ;;  %v17546_v51 = vld [vmem:[#allocation127_spill] sm:$0xff] }
 0x566   : > { %v11792_v59 = vpop.eup %8936  ;;  %8956 = vpow2.f32 %v2112_v2  ;;  %v2192_v30 = vadd.f32 %v11784_v13, %v11776_v45  ;;  %v17549_v2 = vld [vmem:[#allocation136_spill] sm:$0xff] }
 0x567   : > { %v11800_v28 = vpop.eup %8938  ;;  %8958 = vpow2.f32 %v2116_v4  ;;  %v17560_v4 = vld [vmem:[#allocation169_spill] sm:$0xff] }
 0x568   : > { %v11808_v27 = vpop.eup %8940  ;;  %8960 = vpow2.f32 %v2120_v11  ;;  %v2193_v38 = vadd.f32 %v11792_v59, %v2192_v30 }
 0x569   : > { %v11815_v12 = vpop.eup %8942  ;;  %8962 = vpow2.f32 %v2124_v46 }
 0x56a   : > { %v11823_v5 = vpop.eup %8944  ;;  %8964 = vpow2.f32 %v2128_v47  ;;  %v2194_v30 = vadd.f32 %v11800_v28, %v2193_v38 }
 0x56b   : > { %v11830_v37 = vpop.eup %8946  ;;  %8966 = vpow2.f32 %v2132_v17 }
 0x56c   : > { %v11838_v43 = vpop.eup %8948  ;;  %8968 = vpow2.f32 %v2136_v50  ;;  %v2195_v38 = vadd.f32 %v11808_v27, %v2194_v30  ;;  %v17564_v30 = vsub.f32 %v11622_v23, %v11684_v29 }
 0x56d   : > { %v11845_v34 = vpop.eup %8950  ;;  %8970 = vpow2.f32 %v2140_v57  ;;  %v17565_v57 = vsub.f32 %v11628_v52, %v11684_v29 }
 0x56e   : > { %v11853_v33 = vpop.eup %8952  ;;  %8972 = vpow2.f32 %v2144_v9  ;;  %v2160_v46 = vmul.f32 1.442695, %v17564_v30  ;;  %v2196_v17 = vadd.f32 %v11815_v12, %v2195_v38  ;;  %v17566_v9 = vsub.f32 %v11634_v62, %v11684_v29 }
 0x56f   : > { %v11859_v7 = vpop.eup %8954  ;;  %8974 = vpow2.f32 %v11761_v56  ;;  %v2164_v47 = vmul.f32 1.442695, %v17565_v57  ;;  %v17567_v56 = vsub.f32 %v11640_v60, %v11684_v29  ;;  %v17571_v60 = vsub.f32 %v11660_v8, %v11684_v29 }
 0x570   : > { %v11865_v11 = vpop.eup %8956  ;;  %8976 = vpow2.f32 %v11763_v3  ;;  %v2168_v50 = vmul.f32 1.442695, %v17566_v9  ;;  %v2197_v23 = vadd.f32 %v11823_v5, %v2196_v17  ;;  %v17568_v3 = vsub.f32 %v11646_v53, %v11684_v29 }
 0x571   : > { %v11872_v30 = vpop.eup %8958  ;;  %8978 = vpow2.f32 %v11765_v36  ;;  %v2172_v38 = vmul.f32 1.442695, %v17567_v56  ;;  %v17569_v17 = vsub.f32 %v11653_v42, %v11684_v29 }
 0x572   : > { %v11878_v52 = vpop.eup %8960  ;;  %8980 = vpow2.f32 %v2160_v46  ;;  %v2176_v57 = vmul.f32 1.442695, %v17568_v3  ;;  %v2198_v62 = vadd.f32 %v11830_v37, %v2197_v23  ;;  %v2184_v46 = vmul.f32 1.442695, %v17571_v60 }
 0x573   : > { %v11884_v9 = vpop.eup %8962  ;;  %8982 = vpow2.f32 %v2164_v47  ;;  %v2180_v36 = vmul.f32 1.442695, %v17569_v17  ;;  %v17572_v23 = vsub.f32 %v11667_v44, %v11684_v29  ;;  %v17575_v44 = vsub.f32 %v11488_v0, %v11687_v22 }
 0x574   : > { %v11889_v24 = vpop.eup %8964  ;;  %8984 = vpow2.f32 %v2168_v50  ;;  %v2199_v56 = vadd.f32 %v11838_v43, %v2198_v62  ;;  %v17573_v50 = vsub.f32 %v11478_v41, %v11687_v22  ;;  %v17574_v62 = vsub.f32 %v11482_v21, %v11687_v22 }
 0x575   : > { %17570 = vst [vmem:[#allocation177_spill] sm:$0xff] %v11889_v24  ;;  %v11895_v53 = vpop.eup %8966  ;;  %8986 = vpow2.f32 %v2172_v38  ;;  %v2188_v47 = vmul.f32 1.442695, %v17572_v23  ;;  %v2074_v29 = vmul.f32 1.442695, %v17575_v44  ;;  %v17576_v41 = vsub.f32 %v11496_v19, %v11687_v22 }
 0x576   : > { %v11900_v3 = vpop.eup %8968  ;;  %8988 = vpow2.f32 %v2176_v57  ;;  %v2200_v42 = vadd.f32 %v11845_v34, %v2199_v56  ;;  %v2066_v17 = vmul.f32 1.442695, %v17573_v50  ;;  %v2070_v38 = vmul.f32 1.442695, %v17574_v62 }
 0x577   : > { %v11906_v8 = vpop.eup %8970  ;;  %8990 = vpow2.f32 %v2180_v36  ;;  %v2078_v56 = vmul.f32 1.442695, %v17576_v41  ;;  %v17577_v36 = vsub.f32 %v11502_v1, %v11687_v22  ;;  %v17578_v21 = vsub.f32 %v11508_v6, %v11687_v22 }
 0x578   : > { %v11914_v60 = vpop.eup %8972  ;;  %8992 = vpow2.f32 %v2184_v46  ;;  %v2201_v57 = vadd.f32 %v11853_v33, %v2200_v42  ;;  %v17579_v46 = vsub.f32 %v11514_v48, %v11687_v22  ;;  %v17580_v42 = vsub.f32 %v11520_v49, %v11687_v22 }
 0x579   : > { %v2082_v23 = vmul.f32 1.442695, %v17577_v36  ;;  %v11923_v50 = vpop.eup %8974  ;;  %8994 = vpow2.f32 %v2188_v47  ;;  %v2086_v0 = vmul.f32 1.442695, %v17578_v21  ;;  %v17581_v47 = vsub.f32 %v11527_v54, %v11687_v22 }
 0x57a   : > { %v2090_v62 = vmul.f32 1.442695, %v17579_v46  ;;  %v2094_v19 = vmul.f32 1.442695, %v17580_v42  ;;  %v11934_v44 = vpop.eup %8976  ;;  %v2202_v1 = vadd.f32 %v11859_v7, %v2201_v57  ;;  %8996 = vpow2.f32 %v2066_v17 }
 0x57b   : > { %v2098_v41 = vmul.f32 1.442695, %v17581_v47  ;;  %v17582_v6 = vsub.f32 %v11533_v39, %v11687_v22  ;;  %v11943_v21 = vpop.eup %8978  ;;  %8998 = vpow2.f32 %v2070_v38 }
 0x57c   : > { %v11951_v57 = vpop.eup %8980  ;;  %v2203_v54 = vadd.f32 %v11865_v11, %v2202_v1  ;;  %9000 = vpow2.f32 %v2074_v29 }
 0x57d   : > { %v2102_v36 = vmul.f32 1.442695, %v17582_v6  ;;  %v11958_v46 = vpop.eup %8982  ;;  %9002 = vpow2.f32 %v2078_v56  ;;  %v17583_v56 = vsub.f32 %v11539_v14, %v11687_v22  ;;  %v17584_v6 = vsub.f32 %v11545_v55, %v11687_v22 }
 0x57e   : > { %v11966_v1 = vpop.eup %8984  ;;  %v2204_v29 = vadd.f32 %v11872_v30, %v2203_v54  ;;  %9004 = vpow2.f32 %v2082_v23 }
 0x57f   : > { %v11973_v39 = vpop.eup %8986  ;;  %9006 = vpow2.f32 %v2086_v0  ;;  %v2106_v38 = vmul.f32 1.442695, %v17583_v56  ;;  %v2110_v47 = vmul.f32 1.442695, %v17584_v6 }
 0x580   : > { %v11981_v54 = vpop.eup %8988  ;;  %v2205_v23 = vadd.f32 %v11878_v52, %v2204_v29  ;;  %9008 = vpow2.f32 %v2090_v62  ;;  %v17585_v62 = vsub.f32 %v11551_v40, %v11687_v22  ;;  %v17590_v40 = vsub.f32 %v17550_v35, %v11687_v22 }
 0x581   : > { %v11989_v17 = vpop.eup %8990  ;;  %9010 = vpow2.f32 %v2094_v19  ;;  %v17586_v19 = vsub.f32 %v17546_v51, %v11687_v22  ;;  %v17589_v51 = vsub.f32 %v17549_v2, %v11687_v22  ;;  %v17593_v35 = vsub.f32 %v17553_v25, %v11687_v22 }
 0x582   : > { %v11994_v42 = vpop.eup %8992  ;;  %v2206_v49 = vadd.f32 %v11884_v9, %v2205_v23  ;;  %9012 = vpow2.f32 %v2098_v41  ;;  %v2114_v14 = vmul.f32 1.442695, %v17585_v62  ;;  %v17587_v41 = vsub.f32 %v17547_v16, %v11687_v22 }
 0x583   : > { %v12002_v56 = vpop.eup %8994  ;;  %9014 = vpow2.f32 %v2102_v36  ;;  %v2118_v55 = vmul.f32 1.442695, %v17586_v19  ;;  %v17588_v36 = vsub.f32 %v17548_v61, %v11687_v22  ;;  %v2130_v19 = vmul.f32 1.442695, %v17589_v51 }
 0x584   : > { %v8997_v6 = vpop.eup %8996  ;;  %v2207_v0 = vadd.f32 %v11889_v24, %v2206_v49  ;;  %9016 = vpow2.f32 %v2106_v38  ;;  %v2122_v23 = vmul.f32 1.442695, %v17587_v41  ;;  %v17591_v61 = vsub.f32 %v17551_v31, %v11687_v22 }
 0x585   : > { %v8999_v62 = vpop.eup %8998  ;;  %9018 = vpow2.f32 %v2110_v47  ;;  %v2126_v29 = vmul.f32 1.442695, %v17588_v36  ;;  %v2134_v47 = vmul.f32 1.442695, %v17590_v40  ;;  %v2146_v40 = vmul.f32 1.442695, %v17593_v35 }
 0x586   : > { %v9001_v48 = vpop.eup %9000  ;;  %v2208_v49 = vadd.f32 %v11895_v53, %v2207_v0  ;;  %9020 = vpow2.f32 %v2114_v14  ;;  %v2229_v38 = vadd.f32 %v8999_v62, %v8997_v6  ;;  %v8229_v16 = vpack.c.bf16 %v8999_v62, %v8997_v6 }
 0x587   : > { %v9003_v41 = vpop.eup %9002  ;;  %9022 = vpow2.f32 %v2118_v55  ;;  %v2138_v36 = vmul.f32 1.442695, %v17591_v61  ;;  %v17592_v55 = vsub.f32 %v17552_v26, %v11687_v22  ;;  %v17594_v31 = vpack.c.bf16 %v11784_v13, %v11776_v45 }
 0x588   : > { %v9005_v24 = vpop.eup %9004  ;;  %v2209_v2 = vadd.f32 %v11900_v3, %v2208_v49  ;;  %9024 = vpow2.f32 %v2122_v23  ;;  %v2230_v51 = vadd.f32 %v9001_v48, %v2229_v38  ;;  %8230 = vmatprep.subr.bf16.mxu0 %v8229_v16  ;;  %v8233_v0 = vpack.c.bf16 %v9003_v41, %v9001_v48 }
 0x589   : > { %v9007_v14 = vpop.eup %9006  ;;  %9026 = vpow2.f32 %v2126_v29  ;;  %v2142_v6 = vmul.f32 1.442695, %v17592_v55  ;;  %8232 = vmatpush1.bf16.msra.mxu0 %v17594_v31  ;;  %v17595_v26 = vsub.f32 %v17554_v18, %v11687_v22  ;;  %v17596_v25 = vsub.f32 %v17555_v32, %v11687_v22  ;;  %v17601_v31 = vld [vmem:[#allocation160_spill] sm:$0xff] }
 0x58a   : > { %v9009_v62 = vpop.eup %9008  ;;  %v2210_v23 = vadd.f32 %v11906_v8, %v2209_v2  ;;  %9028 = vpow2.f32 %v2130_v19  ;;  %v2231_v49 = vadd.f32 %v9003_v41, %v2230_v51  ;;  %8234 = vmatprep.subr.bf16.mxu0 %v8233_v0  ;;  %v8237_v48 = vpack.c.bf16 %v9007_v14, %v9005_v24 }
 0x58b   : > { %v9011_v29 = vpop.eup %9010  ;;  %9030 = vpow2.f32 %v2134_v47  ;;  %v2150_v38 = vmul.f32 1.442695, %v17595_v26  ;;  %v2154_v16 = vmul.f32 1.442695, %v17596_v25  ;;  %v17597_v41 = vsub.f32 %v17556_v20, %v11687_v22 }
 0x58c   : > { %v9013_v61 = vpop.eup %9012  ;;  %v2211_v45 = vadd.f32 %v11914_v60, %v2210_v23  ;;  %9032 = vpow2.f32 %v2138_v36  ;;  %v2232_v13 = vadd.f32 %v9005_v24, %v2231_v49  ;;  %v8241_v2 = vpack.c.bf16 %v9011_v29, %v9009_v62 }
 0x58d   : > { %v9015_v19 = vpop.eup %9014  ;;  %9034 = vpow2.f32 %v2142_v6  ;;  %v2158_v47 = vmul.f32 1.442695, %v17597_v41  ;;  %v17598_v18 = vsub.f32 %v17557_v10, %v11687_v22  ;;  %v17599_v32 = vpack.c.bf16 %v11800_v28, %v11792_v59 }
 0x58e   : > { %v9017_v0 = vpop.eup %9016  ;;  %v2212_v55 = vadd.f32 %v11923_v50, %v2211_v45  ;;  %9036 = vpow2.f32 %v2146_v40  ;;  %v2233_v24 = vadd.f32 %v9007_v14, %v2232_v13  ;;  %v8245_v36 = vpack.c.bf16 %v9015_v19, %v9013_v61 }
 0x58f   : > { %v2162_v51 = vmul.f32 1.442695, %v17598_v18  ;;  %8236 = vmatpush1.bf16.msra.mxu0 %v17599_v32  ;;  %v9019_v6 = vpop.eup %9018  ;;  %9038 = vpow2.f32 %v2150_v38  ;;  %v17600_v20 = vsub.f32 %v17558_v58, %v11687_v22  ;;  %v17602_v10 = vsub.f32 %v17601_v31, %v11687_v22  ;;  %v17604_v38 = vld [vmem:[#allocation116_spill] sm:$0xff] }
 0x590   : > { %8238 = vmatprep.subr.bf16.mxu0 %v8237_v48  ;;  %v9021_v49 = vpop.eup %9020  ;;  %v2213_v59 = vadd.f32 %v11934_v44, %v2212_v55  ;;  %9040 = vpow2.f32 %v2154_v16  ;;  %v2234_v28 = vadd.f32 %v9009_v62, %v2233_v24  ;;  %v8249_v26 = vpack.c.bf16 %v9019_v6, %v9017_v0 }
 0x591   : > { %v2166_v35 = vmul.f32 1.442695, %v17600_v20  ;;  %v2170_v23 = vmul.f32 1.442695, %v17602_v10  ;;  %v9023_v40 = vpop.eup %9022  ;;  %9042 = vpow2.f32 %v2158_v47  ;;  %v17603_v14 = vsub.f32 %v17560_v4, %v11687_v22 }
 0x592   : > { %v17605_v58 = vsub.f32 %v17604_v38, %v11687_v22  ;;  %v17606_v45 = vpack.c.bf16 %v11815_v12, %v11808_v27  ;;  %v9025_v13 = vpop.eup %9024  ;;  %v2214_v41 = vadd.f32 %v11943_v21, %v2213_v59  ;;  %9044 = vpow2.f32 %v2162_v51 }
 0x593   : > { %v2174_v48 = vmul.f32 1.442695, %v17603_v14  ;;  %v2235_v62 = vadd.f32 %v9011_v29, %v2234_v28  ;;  %v8253_v16 = vpack.c.bf16 %v9023_v40, %v9021_v49  ;;  %v9027_v47 = vpop.eup %9026  ;;  %9046 = vpow2.f32 %v2166_v35  ;;  %v17609_v29 = vld [vmem:[#allocation175_spill] sm:$0xff] }
 0x594   : > { %v2178_v25 = vmul.f32 1.442695, %v17605_v58  ;;  %8240 = vmatpush1.bf16.msra.mxu0 %v17606_v45  ;;  %v17607_v4 = vsub.f32 %v17562_v15, %v11687_v22  ;;  %v17608_v32 = vsub.f32 %v17563_v63, %v11687_v22  ;;  %v9029_v24 = vpop.eup %9028  ;;  %v2215_v12 = vadd.f32 %v11951_v57, %v2214_v41 }
 0x595   : > { %8242 = vmatprep.subr.bf16.mxu0 %v8241_v2  ;;  %9048 = vpow2.f32 %v2170_v23  ;;  %v2236_v27 = vadd.f32 %v9013_v61, %v2235_v62  ;;  %v8257_v20 = vpack.c.bf16 %v9027_v47, %v9025_v13  ;;  %v9031_v51 = vpop.eup %9030  ;;  %v17610_v2 = vsub.f32 %v17609_v29, %v11687_v22 }
 0x596   : > { %v2182_v18 = vmul.f32 1.442695, %v17607_v4  ;;  %v2186_v55 = vmul.f32 1.442695, %v17608_v32  ;;  %9050 = vpow2.f32 %v2174_v48  ;;  %v17611_v15 = vpack.c.bf16 %v11830_v37, %v11823_v5  ;;  %v9033_v31 = vpop.eup %9032 }
 0x597   : > { %v2190_v35 = vmul.f32 1.442695, %v17610_v2  ;;  %v2216_v63 = vadd.f32 %v11958_v46, %v2215_v12  ;;  %9052 = vpow2.f32 %v2178_v25  ;;  %v2237_v10 = vadd.f32 %v9015_v19, %v2236_v27  ;;  %v9035_v23 = vpop.eup %9034 }
 0x598   : > { %8244 = vmatpush1.bf16.msra.mxu0 %v17611_v15  ;;  %v8261_v59 = vpack.c.bf16 %v9031_v51, %v9029_v24  ;;  %9054 = vpow2.f32 %v2182_v18  ;;  %v9037_v61 = vpop.eup %9036  ;;  %v8265_v22 = vpack.c.bf16 %v9035_v23, %v9033_v31  ;;  %v17612_v37 = vpack.c.bf16 %v11845_v34, %v11838_v43 }
 0x599   : > { %8246 = vmatprep.subr.bf16.mxu0 %v8245_v36  ;;  %v2217_v28 = vadd.f32 %v11966_v1, %v2216_v63  ;;  %9056 = vpow2.f32 %v2186_v55  ;;  %v2238_v14 = vadd.f32 %v9017_v0, %v2237_v10  ;;  %v9039_v48 = vpop.eup %9038  ;;  %v17613_v4 = vpack.c.bf16 %v11859_v7, %v11853_v33 }
 0x59a   : > { %9058 = vpow2.f32 %v2190_v35  ;;  %v9041_v5 = vpop.eup %9040  ;;  %v8269_v36 = vpack.c.bf16 %v9039_v48, %v9037_v61  ;;  %v17615_v63 = vpack.c.bf16 %v11884_v9, %v11878_v52  ;;  %v17619_v52 = vpack.c.bf16 %v11923_v50, %v11914_v60 }
 0x59b   : > { %v2218_v38 = vadd.f32 %v11973_v39, %v2217_v28  ;;  %v2239_v19 = vadd.f32 %v9019_v6, %v2238_v14  ;;  %v9043_v58 = vpop.eup %9042  ;;  %v17622_v60 = vpack.c.bf16 %v11973_v39, %v11966_v1  ;;  %v17628_v39 = vld [vmem:[#allocation14_spill] sm:$0xff] }
 0x59c   : > { %8248 = vmatpush1.bf16.msra.mxu0 %v17612_v37  ;;  %v9045_v25 = vpop.eup %9044  ;;  %v8273_v62 = vpack.c.bf16 %v9043_v58, %v9041_v5  ;;  %v17629_v1 = vld [vmem:[#allocation18_spill] sm:$0xff]  ;;  %v17630_v37 = vld [vmem:[#allocation16_spill] sm:$0xff] }
 0x59d   : > { %8250 = vmatprep.subr.bf16.mxu0 %v8249_v26  ;;  %v2219_v45 = vadd.f32 %v11981_v54, %v2218_v38  ;;  %v2240_v41 = vadd.f32 %v9021_v49, %v2239_v19  ;;  %v9047_v0 = vpop.eup %9046  ;;  %v17614_v49 = vpack.c.bf16 %v11872_v30, %v11865_v11  ;;  %v17616_v11 = vld [vmem:[#allocation177_spill] sm:$0xff]  ;;  %v17632_v38 = vld [vmem:[#allocation178_spill] sm:$0xff]  ;;  %v17635_v19 = vld [vmem:[#allocation72_spill] sm:$0xff] }
 0x59e   : > { %v8277_v32 = vpack.c.bf16 %v9047_v0, %v9045_v25  ;;  %v17617_v30 = vpack.c.bf16 %v11895_v53, %v17616_v11  ;;  %v17620_v53 = vpack.c.bf16 %v11943_v21, %v11934_v44  ;;  %v17623_v44 = vpack.c.bf16 %v11989_v17, %v11981_v54 }
 0x59f   : > { %v9049_v18 = vpop.eup %9048  ;;  %v2220_v34 = vadd.f32 %v11989_v17, %v2219_v45  ;;  %v2241_v43 = vadd.f32 %v9023_v40, %v2240_v41  ;;  %v17633_v17 = vld [vmem:[#allocation12_spill] sm:$0xff]  ;;  %v17634_v54 = vmov 0.0   ;;  %v17642_v41 = vld [vmem:[#allocation86_spill] sm:$0xff] }
 0x5a0   : > { %8252 = vmatpush1.bf16.msra.mxu0 %v17613_v4  ;;  %v9051_v6 = vpop.eup %9050  ;;  %v17641_v45 = vld [vmem:[#allocation84_spill] sm:$0xff] }
 0x5a1   : > { %8254 = vmatprep.subr.bf16.mxu0 %v8253_v16  ;;  %v9053_v26 = vpop.eup %9052  ;;  %v2221_v55 = vadd.f32 %v11994_v42, %v2220_v34  ;;  %v2242_v12 = vadd.f32 %v9025_v13, %v2241_v43  ;;  %v8281_v27 = vpack.c.bf16 %v9051_v6, %v9049_v18  ;;  %v17645_v4 = vld [vmem:[#allocation92_spill] sm:$0xff]  ;;  %v17648_v43 = vld [vmem:[#allocation98_spill] sm:$0xff] }
 0x5a2   : > { %v9055_v29 = vpop.eup %9054  ;;  %v17647_v34 = vld [vmem:[#allocation96_spill] sm:$0xff] }
 0x5a3   : > { %v9057_v2 = vpop.eup %9056  ;;  %v12100_v7 = vadd.f32 %v12002_v56, %v2221_v55  ;;  %v2243_v33 = vadd.f32 %v9027_v47, %v2242_v12  ;;  %v8285_v40 = vpack.c.bf16 %v9055_v29, %v9053_v26  ;;  %v17618_v47 = vpack.c.bf16 %v11906_v8, %v11900_v3  ;;  %v17651_v55 = vld [vmem:[#allocation102_spill] sm:$0xff] }
 0x5a4   : > { %8256 = vmatpush1.bf16.msra.mxu0 %v17614_v49  ;;  %v9059_v16 = vpop.eup %9058  ;;  %v17621_v3 = vpack.c.bf16 %v11958_v46, %v11951_v57  ;;  %v17624_v57 = vpack.c.bf16 %v12002_v56, %v11994_v42  ;;  %v17625_v46 = vld [vmem:[#allocation19_spill] sm:$0xff]  ;;  %v17636_v42 = vld [vmem:[#allocation74_spill] sm:$0xff]  ;;  %v17637_v56 = vld [vmem:[#allocation76_spill] sm:$0xff] }
 0x5a5   : > { %8258 = vmatprep.subr.bf16.mxu0 %v8257_v20  ;;  %v2244_v35 = vadd.f32 %v9029_v24, %v2243_v33  ;;  %v8289_v15 = vpack.c.bf16 %v9059_v16, %v9057_v2  ;;  %v17656_v33 = vld [vmem:[#allocation75_spill] sm:$0xff] }
 0x5a7   : > { %v2245_v13 = vadd.f32 %v9031_v51, %v2244_v35  ;;  %v17659_v35 = vld [vmem:[#allocation77_spill] sm:$0xff] }
 0x5a8   : > { %8260 = vmatpush1.bf16.msra.mxu0 %v17615_v63 }
 0x5a9   : > { %8262 = vmatprep.subr.bf16.mxu0 %v8261_v59  ;;  %v2246_v10 = vadd.f32 %v9033_v31, %v2245_v13  ;;  %v17662_v13 = vld [vmem:[#allocation79_spill] sm:$0xff] }
 0x5ab   : > { %v2247_v28 = vadd.f32 %v9035_v23, %v2246_v10 }
 0x5ac   : > { %8264 = vmatpush1.bf16.msra.mxu0 %v17617_v30  ;;  %v17665_v30 = vld [vmem:[#allocation81_spill] sm:$0xff] }
 0x5ad   : > { %8266 = vmatprep.subr.bf16.mxu0 %v8265_v22  ;;  %v2248_v14 = vadd.f32 %v9037_v61, %v2247_v28  ;;  %v17626_v22 = vld [vmem:[#allocation17_spill] sm:$0xff] }
 0x5af   : > { %v2249_v24 = vadd.f32 %v9039_v48, %v2248_v14  ;;  %v17627_v48 = vpack.c.bf16 %v17625_v46, %v17626_v22  ;;  %v17685_v46 = vld [vmem:[#allocation97_spill] sm:$0xff]  ;;  %v17686_v22 = vld [vmem:[#allocation99_spill] sm:$0xff] }
 0x5b0   : > { %8268 = vmatpush1.bf16.msra.mxu0 %v17618_v47  ;;  %v17668_v47 = vld [vmem:[#allocation83_spill] sm:$0xff] }
 0x5b1   : > { %8270 = vmatprep.subr.bf16.mxu0 %v8269_v36  ;;  %v2250_v20 = vadd.f32 %v9041_v5, %v2249_v24  ;;  %v17631_v5 = vpack.c.bf16 %v17629_v1, %v17630_v37  ;;  %v17638_v36 = vld [vmem:[#allocation78_spill] sm:$0xff]  ;;  %v2223_v1 = vrot.slane %v12100_v7, 4 }
 0x5b3   : > { %v2251_v9 = vadd.f32 %v9043_v58, %v2250_v20  ;;  %v17639_v58 = vld [vmem:[#allocation80_spill] sm:$0xff] }
 0x5b4   : > { %8272 = vmatpush1.bf16.msra.mxu0 %v17619_v52  ;;  %v17671_v52 = vld [vmem:[#allocation85_spill] sm:$0xff] }
 0x5b5   : > { %8274 = vmatprep.subr.bf16.mxu0 %v8273_v62  ;;  %v2252_v51 = vadd.f32 %v9045_v25, %v2251_v9  ;;  %v17640_v25 = vld [vmem:[#allocation82_spill] sm:$0xff]  ;;  %v17643_v62 = vld [vmem:[#allocation88_spill] sm:$0xff] }
 0x5b7   : > { %v2253_v31 = vadd.f32 %v9047_v0, %v2252_v51  ;;  %v17644_v0 = vld [vmem:[#allocation90_spill] sm:$0xff] }
 0x5b8   : > { %8276 = vmatpush1.bf16.msra.mxu0 %v17620_v53  ;;  %v17674_v53 = vld [vmem:[#allocation87_spill] sm:$0xff] }
 0x5b9   : > { %8278 = vmatprep.subr.bf16.mxu0 %v8277_v32  ;;  %v2254_v59 = vadd.f32 %v9049_v18, %v2253_v31  ;;  %v17646_v18 = vld [vmem:[#allocation94_spill] sm:$0xff]  ;;  %v17649_v32 = vld [vmem:[#allocation100_spill] sm:$0xff] }
 0x5bb   : > { %v2255_v8 = vadd.f32 %v9051_v6, %v2254_v59 }
 0x5bc   : > { %8280 = vmatpush1.bf16.msra.mxu0 %v17621_v3  ;;  %v17677_v3 = vld [vmem:[#allocation89_spill] sm:$0xff] }
 0x5bd   : > { %8282 = vmatprep.subr.bf16.mxu0 %v8281_v27  ;;  %v2256_v23 = vadd.f32 %v9053_v26, %v2255_v8 }
 0x5bf   : > { %v2257_v50 = vadd.f32 %v9055_v29, %v2256_v23  ;;  %v17654_v29 = vld [vmem:[#allocation73_spill] sm:$0xff] }
 0x5c0   : > { %8284 = vmatpush1.bf16.msra.mxu0 %v17622_v60  ;;  %v17680_v60 = vld [vmem:[#allocation91_spill] sm:$0xff] }
 0x5c1   : > { %8286 = vmatprep.subr.bf16.mxu0 %v8285_v40  ;;  %v2258_v61 = vadd.f32 %v9057_v2, %v2257_v50 }
 0x5c3   : > { %v12126_v21 = vadd.f32 %v9059_v16, %v2258_v61 }
 0x5c4   : > { %8288 = vmatpush1.bf16.msra.mxu0 %v17623_v44  ;;  %v17683_v44 = vld [vmem:[#allocation93_spill] sm:$0xff] }
 0x5c5   : > { %8290 = vmatprep.subr.bf16.mxu0 %v8289_v15  ;;  %v2260_v37 = vrot.slane %v12126_v21, 4 }
 0x5c8   : > { %8292 = vmatpush1.bf16.msra.mxu0 %v17624_v57  ;;  %v17684_v57 = vld [vmem:[#allocation95_spill] sm:$0xff] }
 0x5c9   : > { %8294 = vmatprep.subr.bf16.mxu0 %v17627_v48  ;;  %v17687_v48 = vld [vmem:[#allocation101_spill] sm:$0xff] }
 0x5cb   : > { %2331 = vmatmul.mubr.f32.vlgmr.msra.gmra.mrb[96].mxu0 %v17628_v39  ;;  %v17688_v39 = vld [vmem:[#allocation103_spill] sm:$0xff] }
 0x5cc   : > { %8296 = vmatpush1.bf16.msra.mxu0 %v17631_v5  ;;  %2336 = vmatprep.mubr.f32.mxu0 %v17632_v38  ;;  %v2224_v5 = vadd.f32 %v2223_v1, %v12100_v7  ;;  %v2261_v38 = vadd.f32 %v2260_v37, %v12126_v21 }
 0x5cf   : > { %2337 = vmatmul.mubr.f32.gmra.mrb[98].mxu0 %v17633_v17  ;;  %v2225_v17 = vrot.slane %v2224_v5, 2 }
 0x5d0   : > { %2577 = vmatprep.mubr.f32.mxu0 %v17634_v54 }
 0x5d3   : > { %7926 = vmatmul.mubr.msk.f32.vlgmr.msra.gmra.mrb[100].mxu0 %vm728_vm0, %v17635_v19  ;;  %v2262_v19 = vrot.slane %v2261_v38, 2 }
 0x5d4   : > { %2583 = vmatprep.mubr.f32.mxu0 %v17634_v54 }
 0x5d7   : > { %7927 = vmatmul.mubr.msk.f32.gmra.mrb[102].mxu0 %vm728_vm0, %v17636_v42  ;;  %v2226_v42 = vadd.f32 %v2225_v17, %v2224_v5 }
 0x5d8   : > { %2589 = vmatprep.mubr.f32.mxu0 %v17634_v54 }
 0x5db   : > { %7928 = vmatmul.mubr.msk.f32.gmra.mrb[104].mxu0 %vm728_vm0, %v17637_v56  ;;  %v2263_v56 = vadd.f32 %v2262_v19, %v2261_v38 }
 0x5dc   : > { %2595 = vmatprep.mubr.f32.mxu0 %v17634_v54 }
 0x5df   : > { %7929 = vmatmul.mubr.msk.f32.gmra.mrb[106].mxu0 %vm728_vm0, %v17638_v36  ;;  %v2227_v36 = vrot.slane %v2226_v42, 1 }
 0x5e0   : > { %2601 = vmatprep.mubr.f32.mxu0 %v17634_v54 }
 0x5e3   : > { %7930 = vmatmul.mubr.msk.f32.gmra.mrb[108].mxu0 %vm728_vm0, %v17639_v58  ;;  %v2264_v58 = vrot.slane %v2263_v56, 1 }
 0x5e4   : > { %2607 = vmatprep.mubr.f32.mxu0 %v17634_v54 }
 0x5e7   : > { %7931 = vmatmul.mubr.msk.f32.gmra.mrb[110].mxu0 %vm728_vm0, %v17640_v25  ;;  %v2228_v25 = vadd.f32 %v2227_v36, %v2226_v42 }
 0x5e8   : > { %2613 = vmatprep.mubr.f32.mxu0 %v17634_v54 }
 0x5e9   : > { %9060 = vrcp.f32 %v2228_v25 }
 0x5eb   : > { %7932 = vmatmul.mubr.msk.f32.gmra.mrb[112].mxu0 %vm728_vm0, %v17641_v45  ;;  %v2265_v45 = vadd.f32 %v2264_v58, %v2263_v56 }
 0x5ec   : > { %2619 = vmatprep.mubr.f32.mxu0 %v17634_v54 }
 0x5ed   : > { %9062 = vrcp.f32 %v2265_v45 }
 0x5ef   : > { %7933 = vmatmul.mubr.msk.f32.gmra.mrb[114].mxu0 %vm728_vm0, %v17642_v41  ;;  %v12185_v6 = vpop.f32.mrb[72].mxu0 }
 0x5f0   : > { %2625 = vmatprep.mubr.f32.mxu0 %v17634_v54  ;;  %17650 = vst [vmem:[#allocation40_spill] sm:$0xff] %v12185_v6  ;;  %v595_v26 = vpop.f32.mrb[73].mxu0 }
 0x5f1   : > { %3174 = vmatprep.mubr.f32.mxu1 %v595_v26 }
 0x5f3   : > { %7934 = vmatmul.mubr.msk.f32.gmra.mrb[116].mxu0 %vm728_vm0, %v17643_v62  ;;  %v12190_v12 = vpop.f32.mrb[74].mxu0  ;;  %v9061_v41 = vpop.eup %9060 }
 0x5f4   : > { %2631 = vmatprep.mubr.f32.mxu0 %v17634_v54  ;;  %17652 = vst [vmem:[#allocation42_spill] sm:$0xff] %v12190_v12  ;;  %v12193_v27 = vpop.f32.mrb[75].mxu0 }
 0x5f5   : > { %17653 = vst [vmem:[#allocation44_spill] sm:$0xff] %v12193_v27 }
 0x5f7   : > { %7935 = vmatmul.mubr.msk.f32.gmra.mrb[118].mxu0 %vm728_vm0, %v17644_v0  ;;  %v12197_v49 = vpop.f32.mrb[76].mxu0  ;;  %v9063_v0 = vpop.eup %9062 }
 0x5f8   : > { %2637 = vmatprep.mubr.f32.mxu0 %v17634_v54  ;;  %17655 = vst [vmem:[#allocation46_spill] sm:$0xff] %v12197_v49  ;;  %v607_v2 = vpop.f32.mrb[77].mxu0 }
 0x5fb   : > { %7936 = vmatmul.mubr.msk.f32.gmra.mrb[120].mxu0 %vm728_vm0, %v17645_v4  ;;  %v12202_v40 = vpop.f32.mrb[78].mxu0 }
 0x5fc   : > { %2643 = vmatprep.mubr.f32.mxu0 %v17634_v54  ;;  %17657 = vst [vmem:[#allocation48_spill] sm:$0xff] %v12202_v40  ;;  %v12205_v16 = vpop.f32.mrb[79].mxu0 }
 0x5fd   : > { %17658 = vst [vmem:[#allocation50_spill] sm:$0xff] %v12205_v16 }
 0x5ff   : > { %7937 = vmatmul.mubr.msk.f32.gmra.mrb[122].mxu0 %vm728_vm0, %v17646_v18  ;;  %v12209_v15 = vpop.f32.mrb[80].mxu0 }
 0x600   : > { %2649 = vmatprep.mubr.f32.mxu0 %v17634_v54  ;;  %17660 = vst [vmem:[#allocation52_spill] sm:$0xff] %v12209_v15  ;;  %v12212_v63 = vpop.f32.mrb[81].mxu0 }
 0x601   : > { %17661 = vst [vmem:[#allocation54_spill] sm:$0xff] %v12212_v63 }
 0x603   : > { %7938 = vmatmul.mubr.msk.f32.gmra.mrb[124].mxu0 %vm728_vm0, %v17647_v34 }
 0x604   : > { %2655 = vmatprep.mubr.f32.mxu0 %v17634_v54 }
 0x607   : > { %7939 = vmatmul.mubr.msk.f32.gmra.mrb[126].mxu0 %vm728_vm0, %v17648_v43 }
 0x608   : > { %2661 = vmatprep.mubr.f32.mxu0 %v17634_v54 }
 0x60b   : > { %7940 = vmatmul.mubr.msk.f32.gmra.mrb[128].mxu0 %vm728_vm0, %v17649_v32 }
 0x60c   : > { %2667 = vmatprep.mubr.f32.mxu0 %v17634_v54 }
 0x60f   : > { %7941 = vmatmul.mubr.msk.f32.gmra.mrb[130].mxu0 %vm728_vm0, %v17651_v55 }
 0x610   : > { %2673 = vmatprep.mubr.f32.mxu0 %v17634_v54 }
 0x613   : > { %7942 = vmatmul.mubr.msk.f32.gmra.mrb[132].mxu0 %vm728_vm0, %v17654_v29  ;;  %v12216_v10 = vpop.f32.mrb[82].mxu0 }
 0x614   : > { %2679 = vmatprep.mubr.f32.mxu0 %v17634_v54  ;;  %17663 = vst [vmem:[#allocation56_spill] sm:$0xff] %v12216_v10  ;;  %v12219_v11 = vpop.f32.mrb[83].mxu0 }
 0x615   : > { %17664 = vst [vmem:[#allocation58_spill] sm:$0xff] %v12219_v11 }
 0x617   : > { %7943 = vmatmul.mubr.msk.f32.gmra.mrb[134].mxu0 %vm728_vm0, %v17656_v33  ;;  %v12223_v28 = vpop.f32.mrb[84].mxu0 }
 0x618   : > { %2685 = vmatprep.mubr.f32.mxu0 %v17634_v54  ;;  %17666 = vst [vmem:[#allocation60_spill] sm:$0xff] %v12223_v28  ;;  %v12226_v14 = vpop.f32.mrb[85].mxu0 }
 0x619   : > { %17667 = vst [vmem:[#allocation62_spill] sm:$0xff] %v12226_v14 }
 0x61b   : > { %7944 = vmatmul.mubr.msk.f32.gmra.mrb[136].mxu0 %vm728_vm0, %v17659_v35 }
 0x61c   : > { %2691 = vmatprep.mubr.f32.mxu0 %v17634_v54 }
 0x61d   : > { %v12230_v24 = vpop.f32.mrb[86].mxu0 }
 0x61e   : > { %17669 = vst [vmem:[#allocation64_spill] sm:$0xff] %v12230_v24  ;;  %v12233_v20 = vpop.f32.mrb[87].mxu0 }
 0x61f   : > { %7945 = vmatmul.mubr.msk.f32.gmra.mrb[138].mxu0 %vm728_vm0, %v17662_v13  ;;  %17670 = vst [vmem:[#allocation66_spill] sm:$0xff] %v12233_v20 }
 0x620   : > { %2697 = vmatprep.mubr.f32.mxu0 %v17634_v54 }
 0x623   : > { %7946 = vmatmul.mubr.msk.f32.gmra.mrb[140].mxu0 %vm728_vm0, %v17665_v30 }
 0x624   : > { %2703 = vmatprep.mubr.f32.mxu0 %v17634_v54 }
 0x627   : > { %7947 = vmatmul.mubr.msk.f32.gmra.mrb[142].mxu0 %vm728_vm0, %v17668_v47  ;;  %v12237_v9 = vpop.f32.mrb[88].mxu0 }
 0x628   : > { %2709 = vmatprep.mubr.f32.mxu0 %v17634_v54  ;;  %17672 = vst [vmem:[#allocation68_spill] sm:$0xff] %v12237_v9  ;;  %v12240_v51 = vpop.f32.mrb[89].mxu0 }
 0x629   : > { %17673 = vst [vmem:[#allocation70_spill] sm:$0xff] %v12240_v51 }
 0x62b   : > { %7948 = vmatmul.mubr.msk.f32.gmra.mrb[144].mxu0 %vm728_vm0, %v17671_v52  ;;  %v12244_v31 = vpop.f32.mrb[90].mxu0 }
 0x62c   : > { %2715 = vmatprep.mubr.f32.mxu0 %v17634_v54  ;;  %17675 = vst [vmem:[#allocation41_spill] sm:$0xff] %v12244_v31  ;;  %v12247_v59 = vpop.f32.mrb[91].mxu0 }
 0x62d   : > { %17676 = vst [vmem:[#allocation43_spill] sm:$0xff] %v12247_v59 }
 0x62f   : > { %7949 = vmatmul.mubr.msk.f32.gmra.mrb[146].mxu0 %vm728_vm0, %v17674_v53  ;;  %v12251_v8 = vpop.f32.mrb[92].mxu0 }
 0x630   : > { %2721 = vmatprep.mubr.f32.mxu0 %v17634_v54  ;;  %17678 = vst [vmem:[#allocation45_spill] sm:$0xff] %v12251_v8  ;;  %v12254_v23 = vpop.f32.mrb[93].mxu0 }
 0x631   : > { %17679 = vst [vmem:[#allocation47_spill] sm:$0xff] %v12254_v23 }
 0x633   : > { %7950 = vmatmul.mubr.msk.f32.gmra.mrb[148].mxu0 %vm728_vm0, %v17677_v3  ;;  %v12258_v50 = vpop.f32.mrb[94].mxu0 }
 0x634   : > { %2727 = vmatprep.mubr.f32.mxu0 %v17634_v54  ;;  %17681 = vst [vmem:[#allocation49_spill] sm:$0xff] %v12258_v50  ;;  %v12261_v61 = vpop.f32.mrb[95].mxu0 }
 0x635   : > { %17682 = vst [vmem:[#allocation51_spill] sm:$0xff] %v12261_v61 }
 0x637   : > { %7951 = vmatmul.mubr.msk.f32.gmra.mrb[150].mxu0 %vm728_vm0, %v17680_v60 }
 0x638   : > { %2733 = vmatprep.mubr.f32.mxu0 %v17634_v54 }
 0x63b   : > { %7952 = vmatmul.mubr.msk.f32.gmra.mrb[152].mxu0 %vm728_vm0, %v17683_v44 }
 0x63c   : > { %2739 = vmatprep.mubr.f32.mxu0 %v17634_v54 }
 0x63f   : > { %7953 = vmatmul.mubr.msk.f32.gmra.mrb[154].mxu0 %vm728_vm0, %v17684_v57 }
 0x640   : > { %2745 = vmatprep.mubr.f32.mxu0 %v17634_v54 }
 0x643   : > { %7954 = vmatmul.mubr.msk.f32.gmra.mrb[156].mxu0 %vm728_vm0, %v17685_v46 }
 0x644   : > { %2751 = vmatprep.mubr.f32.mxu0 %v17634_v54 }
 0x647   : > { %7955 = vmatmul.mubr.msk.f32.gmra.mrb[158].mxu0 %vm728_vm0, %v17686_v22 }
 0x648   : > { %2757 = vmatprep.mubr.f32.mxu0 %v17634_v54 }
 0x64b   : > { %7956 = vmatmul.mubr.msk.f32.gmra.mrb[160].mxu0 %vm728_vm0, %v17687_v48 }
 0x64c   : > { %2763 = vmatprep.mubr.f32.mxu0 %v17634_v54 }
 0x64f   : > { %7957 = vmatmul.mubr.msk.f32.gmra.mrb[162].mxu0 %vm728_vm0, %v17688_v39 }
 0x650   : > { %4018 = vmatprep.mubr.f32.mxu0 %v607_v2 }
 0x69e   : > { %v2332_v62 = vpop.f32.mrb[96].mxu0 }
 0x69f   : > { %v12284_v4 = vmul.f32 %v9061_v41, %v2332_v62  ;;  %v2334_v18 = vpop.f32.mrb[97].mxu0 }
 0x6a0   : > { %v12286_v34 = vmul.f32 %v9063_v0, %v2334_v18 }
 0x6a1   : > { %17689 = vst [vmem:[#allocation53_spill] sm:$0xff] %v12284_v4 }
 0x6a2   : > { %17690 = vst [vmem:[#allocation55_spill] sm:$0xff] %v12286_v34  ;;  %v2338_v7 = vpop.f32.mrb[98].mxu0 }
 0x6a3   : > { %v12288_v21 = vmul.f32 %v9061_v41, %v2338_v7  ;;  %v2340_v43 = vpop.f32.mrb[99].mxu0 }
 0x6a4   : > { %v12290_v32 = vmul.f32 %v9063_v0, %v2340_v43 }
 0x6a5   : > { %17691 = vst [vmem:[#allocation57_spill] sm:$0xff] %v12288_v21 }
 0x6a6   : > { %17692 = vst [vmem:[#allocation59_spill] sm:$0xff] %v12290_v32  ;;  %v12296_v29 = vpop.f32.mrb[100].mxu0 }
 0x6a7   : > { %v12298_v2 = vpop.f32.mrb[101].mxu0 }
 0x6aa   : > { %v12300_v33 = vpop.f32.mrb[102].mxu0 }
 0x6ab   : > { %v12302_v35 = vpop.f32.mrb[103].mxu0 }
 0x6ae   : > { %v12304_v13 = vpop.f32.mrb[104].mxu0 }
 0x6af   : > { %v2770_v30 = vmax.f32 %v12296_v29, %v12304_v13  ;;  %v12308_v47 = vpop.f32.mrb[105].mxu0 }
 0x6b0   : > { %v2807_v52 = vmax.f32 %v12298_v2, %v12308_v47 }
 0x6b2   : > { %v12312_v53 = vpop.f32.mrb[106].mxu0 }
 0x6b3   : > { %v2771_v3 = vmax.f32 %v12300_v33, %v12312_v53  ;;  %v12316_v60 = vpop.f32.mrb[107].mxu0 }
 0x6b4   : > { %v2808_v44 = vmax.f32 %v12302_v35, %v12316_v60 }
 0x6b6   : > { %v12320_v57 = vpop.f32.mrb[108].mxu0 }
 0x6b7   : > { %v2772_v46 = vmax.f32 %v2770_v30, %v12320_v57  ;;  %v12323_v22 = vpop.f32.mrb[109].mxu0 }
 0x6b8   : > { %v2809_v48 = vmax.f32 %v2807_v52, %v12323_v22 }
 0x6ba   : > { %v12326_v39 = vpop.f32.mrb[110].mxu0 }
 0x6bb   : > { %v2773_v1 = vmax.f32 %v2771_v3, %v12326_v39  ;;  %v12329_v37 = vpop.f32.mrb[111].mxu0 }
 0x6bc   : > { %v2810_v5 = vmax.f32 %v2808_v44, %v12329_v37 }
 0x6be   : > { %v12332_v38 = vpop.f32.mrb[112].mxu0 }
 0x6bf   : > { %v2774_v17 = vmax.f32 %v2772_v46, %v12332_v38  ;;  %v12335_v19 = vpop.f32.mrb[113].mxu0 }
 0x6c0   : > { %v2811_v42 = vmax.f32 %v2809_v48, %v12335_v19 }
 0x6c2   : > { %v12338_v56 = vpop.f32.mrb[114].mxu0 }
 0x6c3   : > { %v2775_v36 = vmax.f32 %v2773_v1, %v12338_v56  ;;  %v12341_v58 = vpop.f32.mrb[115].mxu0 }
 0x6c4   : > { %v2812_v25 = vmax.f32 %v2810_v5, %v12341_v58 }
 0x6c6   : > { %v12344_v45 = vpop.f32.mrb[116].mxu0 }
 0x6c7   : > { %v2776_v41 = vmax.f32 %v2774_v17, %v12344_v45  ;;  %v12347_v62 = vpop.f32.mrb[117].mxu0 }
 0x6c8   : > { %v2813_v0 = vmax.f32 %v2811_v42, %v12347_v62 }
 0x6ca   : > { %v12350_v18 = vpop.f32.mrb[118].mxu0 }
 0x6cb   : > { %v2777_v7 = vmax.f32 %v2775_v36, %v12350_v18  ;;  %v12353_v43 = vpop.f32.mrb[119].mxu0 }
 0x6cc   : > { %v2814_v30 = vmax.f32 %v2812_v25, %v12353_v43 }
 0x6ce   : > { %v12356_v52 = vpop.f32.mrb[120].mxu0 }
 0x6cf   : > { %v2778_v3 = vmax.f32 %v2776_v41, %v12356_v52  ;;  %v12359_v44 = vpop.f32.mrb[121].mxu0 }
 0x6d0   : > { %v2815_v46 = vmax.f32 %v2813_v0, %v12359_v44 }
 0x6d2   : > { %v12362_v48 = vpop.f32.mrb[122].mxu0 }
 0x6d3   : > { %v2779_v1 = vmax.f32 %v2777_v7, %v12362_v48  ;;  %v12365_v5 = vpop.f32.mrb[123].mxu0 }
 0x6d4   : > { %17693 = vst [vmem:[#allocation61_spill] sm:$0xff] %v12365_v5  ;;  %v2816_v17 = vmax.f32 %v2814_v30, %v12365_v5 }
 0x6d6   : > { %v12368_v42 = vpop.f32.mrb[124].mxu0 }
 0x6d7   : > { %v2780_v36 = vmax.f32 %v2778_v3, %v12368_v42  ;;  %v12371_v25 = vpop.f32.mrb[125].mxu0 }
 0x6d8   : > { %17694 = vst [vmem:[#allocation63_spill] sm:$0xff] %v12371_v25  ;;  %v2817_v41 = vmax.f32 %v2815_v46, %v12371_v25 }
 0x6da   : > { %v12374_v26 = vpop.f32.mrb[126].mxu0 }
 0x6db   : > { %v2781_v0 = vmax.f32 %v2779_v1, %v12374_v26  ;;  %v12377_v55 = vpop.f32.mrb[127].mxu0 }
 0x6dc   : > { %17695 = vst [vmem:[#allocation65_spill] sm:$0xff] %v12377_v55  ;;  %v2818_v7 = vmax.f32 %v2816_v17, %v12377_v55 }
 0x6de   : > { %v12380_v50 = vpop.f32.mrb[128].mxu0 }
 0x6df   : > { %v2782_v30 = vmax.f32 %v2780_v36, %v12380_v50  ;;  %v12383_v61 = vpop.f32.mrb[129].mxu0 }
 0x6e0   : > { %17696 = vst [vmem:[#allocation67_spill] sm:$0xff] %v12383_v61  ;;  %v2819_v3 = vmax.f32 %v2817_v41, %v12383_v61 }
 0x6e2   : > { %v12386_v8 = vpop.f32.mrb[130].mxu0 }
 0x6e3   : > { %v2783_v46 = vmax.f32 %v2781_v0, %v12386_v8  ;;  %v12389_v23 = vpop.f32.mrb[131].mxu0 }
 0x6e4   : > { %17697 = vst [vmem:[#allocation69_spill] sm:$0xff] %v12389_v23  ;;  %v2820_v1 = vmax.f32 %v2818_v7, %v12389_v23 }
 0x6e6   : > { %v12392_v31 = vpop.f32.mrb[132].mxu0 }
 0x6e7   : > { %v2784_v17 = vmax.f32 %v2782_v30, %v12392_v31  ;;  %v12395_v59 = vpop.f32.mrb[133].mxu0 }
 0x6e8   : > { %17698 = vst [vmem:[#allocation71_spill] sm:$0xff] %v12395_v59  ;;  %v2821_v36 = vmax.f32 %v2819_v3, %v12395_v59 }
 0x6ea   : > { %v12398_v9 = vpop.f32.mrb[134].mxu0 }
 0x6eb   : > { %v2785_v41 = vmax.f32 %v2783_v46, %v12398_v9  ;;  %v12401_v4 = vpop.f32.mrb[135].mxu0 }
 0x6ec   : > { %17699 = vst [vmem:[#allocation127_spill] sm:$0xff] %v12401_v4  ;;  %v2822_v0 = vmax.f32 %v2820_v1, %v12401_v4 }
 0x6ee   : > { %v12404_v21 = vpop.f32.mrb[136].mxu0 }
 0x6ef   : > { %v2786_v7 = vmax.f32 %v2784_v17, %v12404_v21  ;;  %v12407_v34 = vpop.f32.mrb[137].mxu0 }
 0x6f0   : > { %17700 = vst [vmem:[#allocation130_spill] sm:$0xff] %v12407_v34  ;;  %v2823_v30 = vmax.f32 %v2821_v36, %v12407_v34 }
 0x6f2   : > { %v12410_v32 = vpop.f32.mrb[138].mxu0 }
 0x6f3   : > { %v2787_v3 = vmax.f32 %v2785_v41, %v12410_v32  ;;  %v12413_v24 = vpop.f32.mrb[139].mxu0 }
 0x6f4   : > { %17701 = vst [vmem:[#allocation133_spill] sm:$0xff] %v12413_v24  ;;  %v2824_v46 = vmax.f32 %v2822_v0, %v12413_v24 }
 0x6f6   : > { %v12416_v20 = vpop.f32.mrb[140].mxu0 }
 0x6f7   : > { %v2788_v1 = vmax.f32 %v2786_v7, %v12416_v20  ;;  %v12419_v28 = vpop.f32.mrb[141].mxu0 }
 0x6f8   : > { %17702 = vst [vmem:[#allocation136_spill] sm:$0xff] %v12419_v28  ;;  %v2825_v17 = vmax.f32 %v2823_v30, %v12419_v28 }
 0x6fa   : > { %v12422_v51 = vpop.f32.mrb[142].mxu0 }
 0x6fb   : > { %v2789_v36 = vmax.f32 %v2787_v3, %v12422_v51  ;;  %v12425_v10 = vpop.f32.mrb[143].mxu0 }
 0x6fc   : > { %17703 = vst [vmem:[#allocation139_spill] sm:$0xff] %v12425_v10  ;;  %v2826_v41 = vmax.f32 %v2824_v46, %v12425_v10 }
 0x6fe   : > { %v12428_v11 = vpop.f32.mrb[144].mxu0 }
 0x6ff   : > { %v2790_v0 = vmax.f32 %v2788_v1, %v12428_v11  ;;  %v12431_v15 = vpop.f32.mrb[145].mxu0 }
 0x700   : > { %17704 = vst [vmem:[#allocation142_spill] sm:$0xff] %v12431_v15  ;;  %v2827_v7 = vmax.f32 %v2825_v17, %v12431_v15 }
 0x702   : > { %v12434_v14 = vpop.f32.mrb[146].mxu0 }
 0x703   : > { %v2791_v30 = vmax.f32 %v2789_v36, %v12434_v14  ;;  %v12437_v40 = vpop.f32.mrb[147].mxu0 }
 0x704   : > { %17705 = vst [vmem:[#allocation145_spill] sm:$0xff] %v12437_v40  ;;  %v2828_v3 = vmax.f32 %v2826_v41, %v12437_v40 }
 0x706   : > { %v12440_v16 = vpop.f32.mrb[148].mxu0 }
 0x707   : > { %v2792_v46 = vmax.f32 %v2790_v0, %v12440_v16  ;;  %v12443_v49 = vpop.f32.mrb[149].mxu0 }
 0x708   : > { %17706 = vst [vmem:[#allocation148_spill] sm:$0xff] %v12443_v49  ;;  %v2829_v1 = vmax.f32 %v2827_v7, %v12443_v49 }
 0x70a   : > { %v12446_v63 = vpop.f32.mrb[150].mxu0 }
 0x70b   : > { %v2793_v17 = vmax.f32 %v2791_v30, %v12446_v63  ;;  %v12449_v54 = vpop.f32.mrb[151].mxu0 }
 0x70c   : > { %17707 = vst [vmem:[#allocation151_spill] sm:$0xff] %v12449_v54  ;;  %v2830_v36 = vmax.f32 %v2828_v3, %v12449_v54 }
 0x70e   : > { %v12452_v12 = vpop.f32.mrb[152].mxu0 }
 0x70f   : > { %v2794_v41 = vmax.f32 %v2792_v46, %v12452_v12  ;;  %v12455_v27 = vpop.f32.mrb[153].mxu0 }
 0x710   : > { %17708 = vst [vmem:[#allocation157_spill] sm:$0xff] %v12455_v27  ;;  %v2831_v0 = vmax.f32 %v2829_v1, %v12455_v27 }
 0x712   : > { %v12458_v6 = vpop.f32.mrb[154].mxu0 }
 0x713   : > { %v2795_v7 = vmax.f32 %v2793_v17, %v12458_v6  ;;  %v12461_v49 = vpop.f32.mrb[155].mxu0 }
 0x714   : > { %17709 = vst [vmem:[#allocation163_spill] sm:$0xff] %v12461_v49  ;;  %v2832_v30 = vmax.f32 %v2830_v36, %v12461_v49 }
 0x716   : > { %v12464_v40 = vpop.f32.mrb[156].mxu0 }
 0x717   : > { %v2796_v3 = vmax.f32 %v2794_v41, %v12464_v40  ;;  %v12467_v54 = vpop.f32.mrb[157].mxu0 }
 0x718   : > { %17710 = vst [vmem:[#allocation166_spill] sm:$0xff] %v12467_v54  ;;  %v2833_v46 = vmax.f32 %v2831_v0, %v12467_v54 }
 0x71a   : > { %v12470_v15 = vpop.f32.mrb[158].mxu0 }
 0x71b   : > { %v2797_v1 = vmax.f32 %v2795_v7, %v12470_v15  ;;  %v12473_v27 = vpop.f32.mrb[159].mxu0 }
 0x71c   : > { %17711 = vst [vmem:[#allocation154_spill] sm:$0xff] %v12473_v27  ;;  %v2834_v17 = vmax.f32 %v2832_v30, %v12473_v27 }
 0x71e   : > { %v12476_v10 = vpop.f32.mrb[160].mxu0 }
 0x71f   : > { %v2798_v36 = vmax.f32 %v2796_v3, %v12476_v10  ;;  %v12479_v49 = vpop.f32.mrb[161].mxu0 }
 0x720   : > { %17712 = vst [vmem:[#allocation169_spill] sm:$0xff] %v12479_v49  ;;  %v2835_v41 = vmax.f32 %v2833_v46, %v12479_v49 }
 0x722   : > { %v12482_v28 = vpop.f32.mrb[162].mxu0 }
 0x723   : > { %v2799_v0 = vmax.f32 %v2797_v1, %v12482_v28  ;;  %v12485_v54 = vpop.f32.mrb[163].mxu0 }
 0x724   : > { %17713 = vst [vmem:[#allocation15_spill] sm:$0xff] %v12485_v54  ;;  %v2836_v7 = vmax.f32 %v2834_v17, %v12485_v54 }
 0x725   : > { %v2800_v24 = vmax.f32 %v2798_v36, %v2799_v0 }
 0x726   : > { %v2837_v34 = vmax.f32 %v2835_v41, %v2836_v7 }
 0x727   : > { %v2801_v4 = vrot.slane %v2800_v24, 4 }
 0x728   : > { %v2838_v30 = vrot.slane %v2837_v34, 4 }
 0x729   : > { %v2802_v27 = vmax.f32 %v2800_v24, %v2801_v4 }
 0x72a   : > { %v2839_v59 = vmax.f32 %v2837_v34, %v2838_v30 }
 0x72b   : > { %v2803_v23 = vrot.slane %v2802_v27, 2 }
 0x72c   : > { %v2840_v3 = vrot.slane %v2839_v59, 2 }
 0x72d   : > { %v2804_v61 = vmax.f32 %v2802_v27, %v2803_v23 }
 0x72e   : > { %v2841_v55 = vmax.f32 %v2839_v59, %v2840_v3 }
 0x72f   : > { %v2805_v25 = vrot.slane %v2804_v61, 1 }
 0x730   : > { %v2842_v46 = vrot.slane %v2841_v55, 1 }
 0x731   : > { %v12488_v49 = vmax.f32 %v2804_v61, %v2805_v25 }
 0x732   : > { %v12490_v5 = vmax.f32 %v2841_v55, %v2842_v46 }
 0x733   : > { %v2844_v1 = vsub.f32 %v12296_v29, %v12488_v49  ;;  %v2846_v17 = vsub.f32 %v12300_v33, %v12488_v49  ;;  %v2848_v24 = vsub.f32 %v12304_v13, %v12488_v49  ;;  %v2850_v4 = vsub.f32 %v12312_v53, %v12488_v49 }
 0x734   : > { %v2852_v27 = vsub.f32 %v12320_v57, %v12488_v49  ;;  %v2854_v59 = vsub.f32 %v12326_v39, %v12488_v49  ;;  %v2856_v23 = vsub.f32 %v12332_v38, %v12488_v49  ;;  %v2858_v61 = vsub.f32 %v12338_v56, %v12488_v49 }
 0x735   : > { %v2860_v34 = vsub.f32 %v12344_v45, %v12488_v49  ;;  %v2862_v55 = vsub.f32 %v12350_v18, %v12488_v49  ;;  %v2864_v29 = vsub.f32 %v12356_v52, %v12488_v49  ;;  %v2866_v33 = vsub.f32 %v12362_v48, %v12488_v49 }
 0x736   : > { %v2868_v13 = vsub.f32 %v12368_v42, %v12488_v49  ;;  %v2870_v53 = vsub.f32 %v12374_v26, %v12488_v49  ;;  %v2872_v57 = vsub.f32 %v12380_v50, %v12488_v49  ;;  %v2874_v39 = vsub.f32 %v12386_v8, %v12488_v49 }
 0x737   : > { %v2876_v38 = vsub.f32 %v12392_v31, %v12488_v49  ;;  %v2878_v56 = vsub.f32 %v12398_v9, %v12488_v49  ;;  %v2880_v45 = vsub.f32 %v12404_v21, %v12488_v49  ;;  %v2882_v18 = vsub.f32 %v12410_v32, %v12488_v49  ;;  %v17733_v9 = vld [vmem:[#allocation169_spill] sm:$0xff] }
 0x738   : > { %v2884_v26 = vsub.f32 %v12416_v20, %v12488_v49  ;;  %v2886_v50 = vsub.f32 %v12422_v51, %v12488_v49  ;;  %v2888_v8 = vsub.f32 %v12428_v11, %v12488_v49  ;;  %v2890_v31 = vsub.f32 %v12434_v14, %v12488_v49 }
 0x739   : > { %v2908_v48 = vmul.f32 1.442695, %v2844_v1  ;;  %v2912_v42 = vmul.f32 1.442695, %v2846_v17  ;;  %v2916_v25 = vmul.f32 1.442695, %v2848_v24 }
 0x73a   : > { %v2920_v41 = vmul.f32 1.442695, %v2850_v4  ;;  %v2924_v7 = vmul.f32 1.442695, %v2852_v27  ;;  %v2928_v30 = vmul.f32 1.442695, %v2854_v59 }
 0x73b   : > { %9064 = vpow2.f32 %v2908_v48  ;;  %v2932_v3 = vmul.f32 1.442695, %v2856_v23  ;;  %v2936_v46 = vmul.f32 1.442695, %v2858_v61  ;;  %v2940_v14 = vmul.f32 1.442695, %v2860_v34 }
 0x73c   : > { %9066 = vpow2.f32 %v2912_v42  ;;  %v2944_v52 = vmul.f32 1.442695, %v2862_v55  ;;  %v2948_v1 = vmul.f32 1.442695, %v2864_v29  ;;  %v2952_v17 = vmul.f32 1.442695, %v2866_v33 }
 0x73d   : > { %9068 = vpow2.f32 %v2916_v25  ;;  %v2956_v24 = vmul.f32 1.442695, %v2868_v13  ;;  %v2960_v36 = vmul.f32 1.442695, %v2870_v53  ;;  %v2964_v4 = vmul.f32 1.442695, %v2872_v57 }
 0x73e   : > { %9070 = vpow2.f32 %v2920_v41  ;;  %v2968_v11 = vmul.f32 1.442695, %v2874_v39  ;;  %v2972_v0 = vmul.f32 1.442695, %v2876_v38  ;;  %v2976_v48 = vmul.f32 1.442695, %v2878_v56 }
 0x73f   : > { %9072 = vpow2.f32 %v2924_v7  ;;  %v2980_v27 = vmul.f32 1.442695, %v2880_v45  ;;  %v2984_v59 = vmul.f32 1.442695, %v2882_v18  ;;  %v2988_v42 = vmul.f32 1.442695, %v2884_v26 }
 0x740   : > { %9074 = vpow2.f32 %v2928_v30  ;;  %v12560_v23 = vmul.f32 1.442695, %v2886_v50  ;;  %v12562_v61 = vmul.f32 1.442695, %v2888_v8  ;;  %v12564_v34 = vmul.f32 1.442695, %v2890_v31 }
 0x741   : > { %9076 = vpow2.f32 %v2932_v3  ;;  %v17714_v26 = vld [vmem:[#allocation61_spill] sm:$0xff]  ;;  %v17717_v30 = vld [vmem:[#allocation67_spill] sm:$0xff]  ;;  %v17721_v45 = vld [vmem:[#allocation130_spill] sm:$0xff] }
 0x742   : > { %9078 = vpow2.f32 %v2936_v46  ;;  %v17716_v25 = vld [vmem:[#allocation65_spill] sm:$0xff]  ;;  %v17720_v18 = vld [vmem:[#allocation127_spill] sm:$0xff]  ;;  %v17723_v39 = vld [vmem:[#allocation136_spill] sm:$0xff] }
 0x743   : > { %9080 = vpow2.f32 %v2940_v14  ;;  %v17715_v14 = vld [vmem:[#allocation63_spill] sm:$0xff]  ;;  %v17718_v46 = vld [vmem:[#allocation69_spill] sm:$0xff]  ;;  %v17725_v41 = vld [vmem:[#allocation142_spill] sm:$0xff] }
 0x744   : > { %9082 = vpow2.f32 %v2944_v52  ;;  %v17722_v3 = vld [vmem:[#allocation133_spill] sm:$0xff]  ;;  %v17724_v57 = vld [vmem:[#allocation139_spill] sm:$0xff] }
 0x745   : > { %v12574_v53 = vpop.eup %9064  ;;  %9084 = vpow2.f32 %v2948_v1  ;;  %v17726_v33 = vld [vmem:[#allocation145_spill] sm:$0xff]  ;;  %v17727_v1 = vld [vmem:[#allocation148_spill] sm:$0xff]  ;;  %v17728_v55 = vld [vmem:[#allocation151_spill] sm:$0xff] }
 0x746   : > { %v12582_v56 = vpop.eup %9066  ;;  %9086 = vpow2.f32 %v2952_v17  ;;  %v17719_v17 = vld [vmem:[#allocation71_spill] sm:$0xff] }
 0x747   : > { %v12590_v8 = vpop.eup %9068  ;;  %9088 = vpow2.f32 %v2956_v24  ;;  %v3036_v31 = vadd.f32 %v12582_v56, %v12574_v53  ;;  %v17732_v24 = vld [vmem:[#allocation154_spill] sm:$0xff] }
 0x748   : > { %v12598_v7 = vpop.eup %9070  ;;  %9090 = vpow2.f32 %v2960_v36  ;;  %v17730_v36 = vld [vmem:[#allocation163_spill] sm:$0xff] }
 0x749   : > { %v12606_v50 = vpop.eup %9072  ;;  %9092 = vpow2.f32 %v2964_v4  ;;  %v3037_v52 = vadd.f32 %v12590_v8, %v3036_v31 }
 0x74a   : > { %v12613_v38 = vpop.eup %9074  ;;  %9094 = vpow2.f32 %v2968_v11 }
 0x74b   : > { %v12621_v13 = vpop.eup %9076  ;;  %9096 = vpow2.f32 %v2972_v0  ;;  %v3038_v31 = vadd.f32 %v12598_v7, %v3037_v52 }
 0x74c   : > { %v12628_v29 = vpop.eup %9078  ;;  %9098 = vpow2.f32 %v2976_v48 }
 0x74d   : > { %v12636_v20 = vpop.eup %9080  ;;  %9100 = vpow2.f32 %v2980_v27  ;;  %v3039_v52 = vadd.f32 %v12606_v50, %v3038_v31  ;;  %v17734_v31 = vsub.f32 %v12440_v16, %v12488_v49 }
 0x74e   : > { %v12643_v21 = vpop.eup %9082  ;;  %9102 = vpow2.f32 %v2984_v59  ;;  %v17735_v59 = vsub.f32 %v12446_v63, %v12488_v49 }
 0x74f   : > { %v12651_v51 = vpop.eup %9084  ;;  %9104 = vpow2.f32 %v2988_v42  ;;  %v3004_v11 = vmul.f32 1.442695, %v17734_v31  ;;  %v3040_v48 = vadd.f32 %v12613_v38, %v3039_v52  ;;  %v17736_v42 = vsub.f32 %v12452_v12, %v12488_v49 }
 0x750   : > { %v12657_v32 = vpop.eup %9086  ;;  %9106 = vpow2.f32 %v12560_v23  ;;  %v3008_v0 = vmul.f32 1.442695, %v17735_v59  ;;  %v17737_v23 = vsub.f32 %v12458_v6, %v12488_v49  ;;  %v17741_v6 = vsub.f32 %v12476_v10, %v12488_v49 }
 0x751   : > { %v12663_v4 = vpop.eup %9088  ;;  %9108 = vpow2.f32 %v12562_v61  ;;  %v3012_v27 = vmul.f32 1.442695, %v17736_v42  ;;  %v3041_v16 = vadd.f32 %v12621_v13, %v3040_v48  ;;  %v17738_v61 = vsub.f32 %v12464_v40, %v12488_v49 }
 0x752   : > { %v12670_v31 = vpop.eup %9090  ;;  %9110 = vpow2.f32 %v12564_v34  ;;  %v3016_v52 = vmul.f32 1.442695, %v17737_v23  ;;  %v17739_v48 = vsub.f32 %v12470_v15, %v12488_v49 }
 0x753   : > { %v12676_v63 = vpop.eup %9092  ;;  %9112 = vpow2.f32 %v3004_v11  ;;  %v3020_v59 = vmul.f32 1.442695, %v17738_v61  ;;  %v3042_v12 = vadd.f32 %v12628_v29, %v3041_v16  ;;  %v3028_v11 = vmul.f32 1.442695, %v17741_v6 }
 0x754   : > { %v12682_v42 = vpop.eup %9094  ;;  %9114 = vpow2.f32 %v3008_v0  ;;  %v3024_v34 = vmul.f32 1.442695, %v17739_v48  ;;  %v17742_v16 = vsub.f32 %v12482_v28, %v12488_v49  ;;  %v17745_v49 = vsub.f32 %v12308_v47, %v12490_v5 }
 0x755   : > { %v12687_v54 = vpop.eup %9096  ;;  %9116 = vpow2.f32 %v3012_v27  ;;  %v3043_v23 = vadd.f32 %v12636_v20, %v3042_v12  ;;  %v17743_v27 = vsub.f32 %v12298_v2, %v12490_v5  ;;  %v17744_v12 = vsub.f32 %v12302_v35, %v12490_v5 }
 0x756   : > { %17740 = vst [vmem:[#allocation13_spill] sm:$0xff] %v12687_v54  ;;  %v12693_v40 = vpop.eup %9098  ;;  %9118 = vpow2.f32 %v3016_v52  ;;  %v3032_v0 = vmul.f32 1.442695, %v17742_v16  ;;  %v2918_v28 = vmul.f32 1.442695, %v17745_v49  ;;  %v17746_v2 = vsub.f32 %v12316_v60, %v12490_v5 }
 0x757   : > { %v12698_v61 = vpop.eup %9100  ;;  %9120 = vpow2.f32 %v3020_v59  ;;  %v3044_v15 = vadd.f32 %v12643_v21, %v3043_v23  ;;  %v2910_v48 = vmul.f32 1.442695, %v17743_v27  ;;  %v2914_v52 = vmul.f32 1.442695, %v17744_v12 }
 0x758   : > { %v12704_v10 = vpop.eup %9102  ;;  %9122 = vpow2.f32 %v3024_v34  ;;  %v2922_v23 = vmul.f32 1.442695, %v17746_v2  ;;  %v17747_v34 = vsub.f32 %v12323_v22, %v12490_v5  ;;  %v17748_v35 = vsub.f32 %v12329_v37, %v12490_v5 }
 0x759   : > { %v12712_v6 = vpop.eup %9104  ;;  %9124 = vpow2.f32 %v3028_v11  ;;  %v3045_v59 = vadd.f32 %v12651_v51, %v3044_v15  ;;  %v17749_v11 = vsub.f32 %v12335_v19, %v12490_v5  ;;  %v17750_v15 = vsub.f32 %v12341_v58, %v12490_v5 }
 0x75a   : > { %v2926_v16 = vmul.f32 1.442695, %v17747_v34  ;;  %v12721_v27 = vpop.eup %9106  ;;  %9126 = vpow2.f32 %v3032_v0  ;;  %v2930_v47 = vmul.f32 1.442695, %v17748_v35  ;;  %v17751_v0 = vsub.f32 %v12347_v62, %v12490_v5 }
 0x75b   : > { %v2934_v12 = vmul.f32 1.442695, %v17749_v11  ;;  %v2938_v60 = vmul.f32 1.442695, %v17750_v15  ;;  %v12732_v49 = vpop.eup %9108  ;;  %v3046_v22 = vadd.f32 %v12657_v32, %v3045_v59  ;;  %9128 = vpow2.f32 %v2910_v48 }
 0x75c   : > { %v2942_v2 = vmul.f32 1.442695, %v17751_v0  ;;  %v17752_v37 = vsub.f32 %v12353_v43, %v12490_v5  ;;  %v12741_v35 = vpop.eup %9110  ;;  %9130 = vpow2.f32 %v2914_v52 }
 0x75d   : > { %v12749_v59 = vpop.eup %9112  ;;  %v3047_v62 = vadd.f32 %v12663_v4, %v3046_v22  ;;  %9132 = vpow2.f32 %v2918_v28 }
 0x75e   : > { %v2946_v34 = vmul.f32 1.442695, %v17752_v37  ;;  %v12756_v11 = vpop.eup %9114  ;;  %9134 = vpow2.f32 %v2922_v23  ;;  %v17753_v23 = vsub.f32 %v12359_v44, %v12490_v5  ;;  %v17754_v37 = vsub.f32 %v17714_v26, %v12490_v5 }
 0x75f   : > { %v12764_v22 = vpop.eup %9116  ;;  %v3048_v28 = vadd.f32 %v12670_v31, %v3047_v62  ;;  %9136 = vpow2.f32 %v2926_v16 }
 0x760   : > { %v12771_v43 = vpop.eup %9118  ;;  %9138 = vpow2.f32 %v2930_v47  ;;  %v2950_v52 = vmul.f32 1.442695, %v17753_v23  ;;  %v2954_v0 = vmul.f32 1.442695, %v17754_v37 }
 0x761   : > { %v12779_v62 = vpop.eup %9120  ;;  %v3049_v16 = vadd.f32 %v12676_v63, %v3048_v28  ;;  %9140 = vpow2.f32 %v2934_v12  ;;  %v17755_v12 = vsub.f32 %v17715_v14, %v12490_v5  ;;  %v17760_v14 = vsub.f32 %v17720_v18, %v12490_v5 }
 0x762   : > { %v12787_v48 = vpop.eup %9122  ;;  %9142 = vpow2.f32 %v2938_v60  ;;  %v17756_v60 = vsub.f32 %v17716_v25, %v12490_v5  ;;  %v17759_v25 = vsub.f32 %v17719_v17, %v12490_v5  ;;  %v17763_v18 = vsub.f32 %v17723_v39, %v12490_v5 }
 0x763   : > { %v12792_v15 = vpop.eup %9124  ;;  %v3050_v58 = vadd.f32 %v12682_v42, %v3049_v16  ;;  %9144 = vpow2.f32 %v2942_v2  ;;  %v2958_v44 = vmul.f32 1.442695, %v17755_v12  ;;  %v17757_v2 = vsub.f32 %v17717_v30, %v12490_v5 }
 0x764   : > { %v12800_v23 = vpop.eup %9126  ;;  %9146 = vpow2.f32 %v2946_v34  ;;  %v2962_v26 = vmul.f32 1.442695, %v17756_v60  ;;  %v17758_v34 = vsub.f32 %v17718_v46, %v12490_v5  ;;  %v2974_v60 = vmul.f32 1.442695, %v17759_v25 }
 0x765   : > { %v9129_v37 = vpop.eup %9128  ;;  %v3051_v47 = vadd.f32 %v12687_v54, %v3050_v58  ;;  %9148 = vpow2.f32 %v2950_v52  ;;  %v2966_v16 = vmul.f32 1.442695, %v17757_v2  ;;  %v17761_v46 = vsub.f32 %v17721_v45, %v12490_v5 }
 0x766   : > { %v9131_v12 = vpop.eup %9130  ;;  %9150 = vpow2.f32 %v2954_v0  ;;  %v2970_v28 = vmul.f32 1.442695, %v17758_v34  ;;  %v2978_v0 = vmul.f32 1.442695, %v17760_v14  ;;  %v2990_v14 = vmul.f32 1.442695, %v17763_v18 }
 0x767   : > { %v9133_v19 = vpop.eup %9132  ;;  %v3052_v58 = vadd.f32 %v12693_v40, %v3051_v47  ;;  %9152 = vpow2.f32 %v2958_v44  ;;  %v3073_v52 = vadd.f32 %v9131_v12, %v9129_v37  ;;  %v8297_v30 = vpack.c.bf16 %v9131_v12, %v9129_v37 }
 0x768   : > { %v9135_v2 = vpop.eup %9134  ;;  %9154 = vpow2.f32 %v2962_v26  ;;  %v2982_v34 = vmul.f32 1.442695, %v17761_v46  ;;  %v17762_v26 = vsub.f32 %v17722_v3, %v12490_v5  ;;  %v17764_v45 = vpack.c.bf16 %v12582_v56, %v12574_v53 }
 0x769   : > { %v9137_v54 = vpop.eup %9136  ;;  %v3053_v17 = vadd.f32 %v12698_v61, %v3052_v58  ;;  %9156 = vpow2.f32 %v2966_v16  ;;  %v3074_v25 = vadd.f32 %v9133_v19, %v3073_v52  ;;  %8298 = vmatprep.subr.bf16.mxu1 %v8297_v30  ;;  %v8301_v47 = vpack.c.bf16 %v9135_v2, %v9133_v19 }
 0x76a   : > { %v9139_v44 = vpop.eup %9138  ;;  %9158 = vpow2.f32 %v2970_v28  ;;  %v2986_v37 = vmul.f32 1.442695, %v17762_v26  ;;  %8300 = vmatpush1.bf16.msra.mxu1 %v17764_v45  ;;  %v17765_v3 = vsub.f32 %v17724_v57, %v12490_v5  ;;  %v17766_v39 = vsub.f32 %v17725_v41, %v12490_v5  ;;  %v17771_v45 = vld [vmem:[#allocation157_spill] sm:$0xff] }
 0x76b   : > { %v9141_v12 = vpop.eup %9140  ;;  %v3054_v16 = vadd.f32 %v12704_v10, %v3053_v17  ;;  %9160 = vpow2.f32 %v2974_v60  ;;  %v3075_v58 = vadd.f32 %v9135_v2, %v3074_v25  ;;  %8302 = vmatprep.subr.bf16.mxu1 %v8301_v47  ;;  %v8305_v19 = vpack.c.bf16 %v9139_v44, %v9137_v54 }
 0x76c   : > { %v9143_v28 = vpop.eup %9142  ;;  %9162 = vpow2.f32 %v2978_v0  ;;  %v2994_v52 = vmul.f32 1.442695, %v17765_v3  ;;  %v2998_v30 = vmul.f32 1.442695, %v17766_v39  ;;  %v17767_v2 = vsub.f32 %v17726_v33, %v12490_v5 }
 0x76d   : > { %v9145_v46 = vpop.eup %9144  ;;  %v3055_v53 = vadd.f32 %v12712_v6, %v3054_v16  ;;  %9164 = vpow2.f32 %v2982_v34  ;;  %v3076_v56 = vadd.f32 %v9137_v54, %v3075_v58  ;;  %v8309_v17 = vpack.c.bf16 %v9143_v28, %v9141_v12 }
 0x76e   : > { %v9147_v60 = vpop.eup %9146  ;;  %9166 = vpow2.f32 %v2986_v37  ;;  %v3002_v0 = vmul.f32 1.442695, %v17767_v2  ;;  %v17768_v57 = vsub.f32 %v17727_v1, %v12490_v5  ;;  %v17769_v41 = vpack.c.bf16 %v12598_v7, %v12590_v8 }
 0x76f   : > { %v9149_v47 = vpop.eup %9148  ;;  %v3056_v26 = vadd.f32 %v12721_v27, %v3055_v53  ;;  %9168 = vpow2.f32 %v2990_v14  ;;  %v3077_v54 = vadd.f32 %v9139_v44, %v3076_v56  ;;  %v8313_v34 = vpack.c.bf16 %v9147_v60, %v9145_v46 }
 0x770   : > { %v3006_v25 = vmul.f32 1.442695, %v17768_v57  ;;  %8304 = vmatpush1.bf16.msra.mxu1 %v17769_v41  ;;  %v9151_v37 = vpop.eup %9150  ;;  %9170 = vpow2.f32 %v2994_v52  ;;  %v17770_v33 = vsub.f32 %v17728_v55, %v12490_v5  ;;  %v17772_v1 = vsub.f32 %v17771_v45, %v12490_v5  ;;  %v17774_v52 = vld [vmem:[#allocation166_spill] sm:$0xff] }
 0x771   : > { %8306 = vmatprep.subr.bf16.mxu1 %v8305_v19  ;;  %v9153_v58 = vpop.eup %9152  ;;  %v3057_v8 = vadd.f32 %v12732_v49, %v3056_v26  ;;  %9172 = vpow2.f32 %v2998_v30  ;;  %v3078_v7 = vadd.f32 %v9141_v12, %v3077_v54  ;;  %v8317_v3 = vpack.c.bf16 %v9151_v37, %v9149_v47 }
 0x772   : > { %v3010_v18 = vmul.f32 1.442695, %v17770_v33  ;;  %v3014_v16 = vmul.f32 1.442695, %v17772_v1  ;;  %v9155_v14 = vpop.eup %9154  ;;  %9174 = vpow2.f32 %v3002_v0  ;;  %v17773_v44 = vsub.f32 %v17730_v36, %v12490_v5 }
 0x773   : > { %v17775_v55 = vsub.f32 %v17774_v52, %v12490_v5  ;;  %v17776_v53 = vpack.c.bf16 %v12613_v38, %v12606_v50  ;;  %v9157_v56 = vpop.eup %9156  ;;  %v3058_v2 = vadd.f32 %v12741_v35, %v3057_v8  ;;  %9176 = vpow2.f32 %v3006_v25 }
 0x774   : > { %v3018_v19 = vmul.f32 1.442695, %v17773_v44  ;;  %v3079_v12 = vadd.f32 %v9143_v28, %v3078_v7  ;;  %v8321_v30 = vpack.c.bf16 %v9155_v14, %v9153_v58  ;;  %v9159_v0 = vpop.eup %9158  ;;  %9178 = vpow2.f32 %v3010_v18  ;;  %v17779_v28 = vld [vmem:[#allocation15_spill] sm:$0xff] }
 0x775   : > { %v3022_v39 = vmul.f32 1.442695, %v17775_v55  ;;  %8308 = vmatpush1.bf16.msra.mxu1 %v17776_v53  ;;  %v17777_v36 = vsub.f32 %v17732_v24, %v12490_v5  ;;  %v17778_v41 = vsub.f32 %v17733_v9, %v12490_v5  ;;  %v9161_v54 = vpop.eup %9160  ;;  %v3059_v38 = vadd.f32 %v12749_v59, %v3058_v2 }
 0x776   : > { %8310 = vmatprep.subr.bf16.mxu1 %v8309_v17  ;;  %9180 = vpow2.f32 %v3014_v16  ;;  %v3080_v50 = vadd.f32 %v9145_v46, %v3079_v12  ;;  %v8325_v33 = vpack.c.bf16 %v9159_v0, %v9157_v56  ;;  %v9163_v25 = vpop.eup %9162  ;;  %v17780_v17 = vsub.f32 %v17779_v28, %v12490_v5 }
 0x777   : > { %v3026_v57 = vmul.f32 1.442695, %v17777_v36  ;;  %v3030_v26 = vmul.f32 1.442695, %v17778_v41  ;;  %9182 = vpow2.f32 %v3018_v19  ;;  %v17781_v24 = vpack.c.bf16 %v12628_v29, %v12621_v13  ;;  %v9165_v45 = vpop.eup %9164 }
 0x778   : > { %v3034_v18 = vmul.f32 1.442695, %v17780_v17  ;;  %v3060_v9 = vadd.f32 %v12756_v11, %v3059_v38  ;;  %9184 = vpow2.f32 %v3022_v39  ;;  %v3081_v1 = vadd.f32 %v9147_v60, %v3080_v50  ;;  %v9167_v16 = vpop.eup %9166 }
 0x779   : > { %8312 = vmatpush1.bf16.msra.mxu1 %v17781_v24  ;;  %v8329_v8 = vpack.c.bf16 %v9163_v25, %v9161_v54  ;;  %9186 = vpow2.f32 %v3026_v57  ;;  %v9169_v46 = vpop.eup %9168  ;;  %v8333_v5 = vpack.c.bf16 %v9167_v16, %v9165_v45  ;;  %v17782_v29 = vpack.c.bf16 %v12643_v21, %v12636_v20 }
 0x77a   : > { %8314 = vmatprep.subr.bf16.mxu1 %v8313_v34  ;;  %v3061_v7 = vadd.f32 %v12764_v22, %v3060_v9  ;;  %9188 = vpow2.f32 %v3030_v26  ;;  %v3082_v44 = vadd.f32 %v9149_v47, %v3081_v1  ;;  %v9171_v19 = vpop.eup %9170  ;;  %v17783_v36 = vpack.c.bf16 %v12657_v32, %v12651_v51 }
 0x77b   : > { %9190 = vpow2.f32 %v3034_v18  ;;  %v9173_v13 = vpop.eup %9172  ;;  %v8337_v34 = vpack.c.bf16 %v9171_v19, %v9169_v46  ;;  %v17785_v9 = vpack.c.bf16 %v12682_v42, %v12676_v63  ;;  %v17789_v63 = vpack.c.bf16 %v12721_v27, %v12712_v6 }
 0x77c   : > { %v3062_v52 = vadd.f32 %v12771_v43, %v3061_v7  ;;  %v3083_v60 = vadd.f32 %v9151_v37, %v3082_v44  ;;  %v9175_v55 = vpop.eup %9174  ;;  %v17792_v6 = vpack.c.bf16 %v12771_v43, %v12764_v22  ;;  %v17798_v43 = vld [vmem:[#allocation40_spill] sm:$0xff] }
 0x77d   : > { %8316 = vmatpush1.bf16.msra.mxu1 %v17782_v29  ;;  %v9177_v39 = vpop.eup %9176  ;;  %v8341_v12 = vpack.c.bf16 %v9175_v55, %v9173_v13  ;;  %v17799_v22 = vld [vmem:[#allocation44_spill] sm:$0xff]  ;;  %v17800_v29 = vld [vmem:[#allocation22_spill] sm:$0xff] }
 0x77e   : > { %8318 = vmatprep.subr.bf16.mxu1 %v8317_v3  ;;  %v3063_v53 = vadd.f32 %v12779_v62, %v3062_v52  ;;  %v3084_v2 = vadd.f32 %v9153_v58, %v3083_v60  ;;  %v9179_v47 = vpop.eup %9178  ;;  %v17784_v58 = vpack.c.bf16 %v12670_v31, %v12663_v4  ;;  %v17786_v4 = vld [vmem:[#allocation13_spill] sm:$0xff]  ;;  %v17805_v60 = vld [vmem:[#allocation104_spill] sm:$0xff] }
 0x77f   : > { %v8345_v41 = vpack.c.bf16 %v9179_v47, %v9177_v39  ;;  %v17787_v31 = vpack.c.bf16 %v12693_v40, %v17786_v4  ;;  %v17790_v40 = vpack.c.bf16 %v12741_v35, %v12732_v49  ;;  %v17793_v49 = vpack.c.bf16 %v12787_v48, %v12779_v62  ;;  %v17836_v4 = vld [vmem:[#allocation147_spill] sm:$0xff] }
 0x780   : > { %v9181_v57 = vpop.eup %9180  ;;  %v3064_v21 = vadd.f32 %v12787_v48, %v3063_v53  ;;  %v3085_v20 = vadd.f32 %v9155_v14, %v3084_v2  ;;  %v17803_v48 = vld [vmem:[#allocation42_spill] sm:$0xff]  ;;  %v17804_v62 = vmov 0.0   ;;  %v17812_v2 = vld [vmem:[#allocation121_spill] sm:$0xff] }
 0x781   : > { %8320 = vmatpush1.bf16.msra.mxu1 %v17783_v36  ;;  %v9183_v37 = vpop.eup %9182  ;;  %v17811_v53 = vld [vmem:[#allocation118_spill] sm:$0xff]  ;;  %v17815_v36 = vld [vmem:[#allocation131_spill] sm:$0xff] }
 0x782   : > { %8322 = vmatprep.subr.bf16.mxu1 %v8321_v30  ;;  %v9185_v3 = vpop.eup %9184  ;;  %v3065_v26 = vadd.f32 %v12792_v15, %v3064_v21  ;;  %v3086_v38 = vadd.f32 %v9157_v56, %v3085_v20  ;;  %v8349_v50 = vpack.c.bf16 %v9183_v37, %v9181_v57  ;;  %v17817_v21 = vld [vmem:[#allocation137_spill] sm:$0xff]  ;;  %v17818_v20 = vld [vmem:[#allocation140_spill] sm:$0xff] }
 0x783   : > { %v9187_v28 = vpop.eup %9186 }
 0x784   : > { %v9189_v17 = vpop.eup %9188  ;;  %v12898_v32 = vadd.f32 %v12800_v23, %v3065_v26  ;;  %v3087_v51 = vadd.f32 %v9159_v0, %v3086_v38  ;;  %v8353_v14 = vpack.c.bf16 %v9187_v28, %v9185_v3  ;;  %v17788_v0 = vpack.c.bf16 %v12704_v10, %v12698_v61  ;;  %v17822_v26 = vld [vmem:[#allocation107_spill] sm:$0xff]  ;;  %v17823_v38 = vld [vmem:[#allocation109_spill] sm:$0xff] }
 0x785   : > { %8324 = vmatpush1.bf16.msra.mxu1 %v17784_v58  ;;  %v9191_v30 = vpop.eup %9190  ;;  %v17791_v61 = vpack.c.bf16 %v12756_v11, %v12749_v59  ;;  %v17794_v59 = vpack.c.bf16 %v12800_v23, %v12792_v15  ;;  %v17795_v11 = vld [vmem:[#allocation23_spill] sm:$0xff]  ;;  %v17806_v15 = vld [vmem:[#allocation106_spill] sm:$0xff]  ;;  %v17807_v23 = vld [vmem:[#allocation108_spill] sm:$0xff] }
 0x786   : > { %8326 = vmatprep.subr.bf16.mxu1 %v8325_v33  ;;  %v3088_v18 = vadd.f32 %v9161_v54, %v3087_v51  ;;  %v8357_v24 = vpack.c.bf16 %v9191_v30, %v9189_v17  ;;  %v17826_v58 = vld [vmem:[#allocation115_spill] sm:$0xff]  ;;  %v17828_v51 = vld [vmem:[#allocation122_spill] sm:$0xff] }
 0x788   : > { %v3089_v56 = vadd.f32 %v9163_v25, %v3088_v18  ;;  %v17831_v18 = vld [vmem:[#allocation132_spill] sm:$0xff] }
 0x789   : > { %8328 = vmatpush1.bf16.msra.mxu1 %v17785_v9  ;;  %v17833_v9 = vld [vmem:[#allocation138_spill] sm:$0xff] }
 0x78a   : > { %8330 = vmatprep.subr.bf16.mxu1 %v8329_v8  ;;  %v3090_v1 = vadd.f32 %v9165_v45, %v3089_v56  ;;  %v17834_v56 = vld [vmem:[#allocation141_spill] sm:$0xff] }
 0x78c   : > { %v3091_v7 = vadd.f32 %v9167_v16, %v3090_v1  ;;  %v17835_v1 = vld [vmem:[#allocation144_spill] sm:$0xff] }
 0x78d   : > { %8332 = vmatpush1.bf16.msra.mxu1 %v17787_v31  ;;  %v17837_v31 = vld [vmem:[#allocation54_spill] sm:$0xff] }
 0x78e   : > { %8334 = vmatprep.subr.bf16.mxu1 %v8333_v5  ;;  %v3092_v44 = vadd.f32 %v9169_v46, %v3091_v7  ;;  %v17796_v5 = vld [vmem:[#allocation21_spill] sm:$0xff]  ;;  %v3067_v7 = vrot.slane %v12898_v32, 4 }
 0x790   : > { %v3093_v54 = vadd.f32 %v9171_v19, %v3092_v44  ;;  %v17797_v19 = vpack.c.bf16 %v17795_v11, %v17796_v5 }
 0x791   : > { %8336 = vmatpush1.bf16.msra.mxu1 %v17788_v0  ;;  %v3068_v0 = vadd.f32 %v3067_v7, %v12898_v32 }
 0x792   : > { %8338 = vmatprep.subr.bf16.mxu1 %v8337_v34  ;;  %v3094_v33 = vadd.f32 %v9173_v13, %v3093_v54  ;;  %v17801_v13 = vld [vmem:[#allocation20_spill] sm:$0xff]  ;;  %v17808_v34 = vld [vmem:[#allocation110_spill] sm:$0xff] }
 0x793   : > { %v17802_v52 = vpack.c.bf16 %v17800_v29, %v17801_v13 }
 0x794   : > { %v3095_v42 = vadd.f32 %v9175_v55, %v3094_v33  ;;  %v17809_v55 = vld [vmem:[#allocation112_spill] sm:$0xff]  ;;  %v3069_v33 = vrot.slane %v3068_v0, 2 }
 0x795   : > { %8340 = vmatpush1.bf16.msra.mxu1 %v17789_v63 }
 0x796   : > { %8342 = vmatprep.subr.bf16.mxu1 %v8341_v12  ;;  %v3096_v25 = vadd.f32 %v9177_v39, %v3095_v42  ;;  %v17810_v39 = vld [vmem:[#allocation114_spill] sm:$0xff]  ;;  %v17813_v12 = vld [vmem:[#allocation125_spill] sm:$0xff]  ;;  %v3070_v42 = vadd.f32 %v3069_v33, %v3068_v0 }
 0x798   : > { %v3097_v45 = vadd.f32 %v9179_v47, %v3096_v25  ;;  %v17814_v47 = vld [vmem:[#allocation128_spill] sm:$0xff] }
 0x799   : > { %8344 = vmatpush1.bf16.msra.mxu1 %v17790_v40  ;;  %v3071_v40 = vrot.slane %v3070_v42, 1 }
 0x79a   : > { %8346 = vmatprep.subr.bf16.mxu1 %v8345_v41  ;;  %v3098_v8 = vadd.f32 %v9181_v57, %v3097_v45  ;;  %v17816_v57 = vld [vmem:[#allocation134_spill] sm:$0xff]  ;;  %v17819_v41 = vld [vmem:[#allocation143_spill] sm:$0xff] }
 0x79c   : > { %v3099_v10 = vadd.f32 %v9183_v37, %v3098_v8  ;;  %v17820_v37 = vld [vmem:[#allocation146_spill] sm:$0xff]  ;;  %v3072_v8 = vadd.f32 %v3071_v40, %v3070_v42 }
 0x79d   : > { %8348 = vmatpush1.bf16.msra.mxu1 %v17791_v61 }
 0x79e   : > { %8350 = vmatprep.subr.bf16.mxu1 %v8349_v50  ;;  %v3100_v16 = vadd.f32 %v9185_v3, %v3099_v10  ;;  %v17821_v3 = vld [vmem:[#allocation105_spill] sm:$0xff]  ;;  %v17824_v50 = vld [vmem:[#allocation111_spill] sm:$0xff]  ;;  %9192 = vrcp.f32 %v3072_v8 }
 0x7a0   : > { %v3101_v27 = vadd.f32 %v9187_v28, %v3100_v16  ;;  %v17825_v28 = vld [vmem:[#allocation113_spill] sm:$0xff] }
 0x7a1   : > { %8352 = vmatpush1.bf16.msra.mxu1 %v17792_v6 }
 0x7a2   : > { %8354 = vmatprep.subr.bf16.mxu1 %v8353_v14  ;;  %v3102_v46 = vadd.f32 %v9189_v17, %v3101_v27  ;;  %v17827_v17 = vld [vmem:[#allocation119_spill] sm:$0xff]  ;;  %v17829_v14 = vld [vmem:[#allocation126_spill] sm:$0xff] }
 0x7a4   : > { %v12924_v35 = vadd.f32 %v9191_v30, %v3102_v46  ;;  %v17830_v30 = vld [vmem:[#allocation129_spill] sm:$0xff] }
 0x7a5   : > { %8356 = vmatpush1.bf16.msra.mxu1 %v17793_v49 }
 0x7a6   : > { %8358 = vmatprep.subr.bf16.mxu1 %v8357_v24  ;;  %v17832_v24 = vld [vmem:[#allocation135_spill] sm:$0xff]  ;;  %v3104_v44 = vrot.slane %v12924_v35, 4 }
 0x7a8   : > { %v3105_v54 = vadd.f32 %v3104_v44, %v12924_v35  ;;  %v9193_v10 = vpop.eup %9192 }
 0x7a9   : > { %8360 = vmatpush1.bf16.msra.mxu1 %v17794_v59 }
 0x7aa   : > { %8362 = vmatprep.subr.bf16.mxu1 %v17797_v19  ;;  %v3106_v63 = vrot.slane %v3105_v54, 2 }
 0x7ac   : > { %3175 = vmatmul.mubr.f32.vlgmr.msra.gmra.mrb[132].mxu1 %v17798_v43  ;;  %v3107_v25 = vadd.f32 %v3106_v63, %v3105_v54 }
 0x7ad   : > { %3180 = vmatprep.mubr.f32.mxu1 %v17799_v22  ;;  %8364 = vmatpush1.bf16.msra.mxu1 %v17802_v52 }
 0x7ae   : > { %v3108_v45 = vrot.slane %v3107_v25, 1 }
 0x7b0   : > { %3181 = vmatmul.mubr.f32.gmra.mrb[134].mxu1 %v17803_v48  ;;  %v3109_v61 = vadd.f32 %v3108_v45, %v3107_v25 }
 0x7b1   : > { %3421 = vmatprep.mubr.f32.mxu1 %v17804_v62 }
 0x7b2   : > { %9194 = vrcp.f32 %v3109_v61 }
 0x7b4   : > { %7958 = vmatmul.mubr.msk.f32.vlgmr.msra.gmra.mrb[136].mxu1 %vm728_vm0, %v17805_v60 }
 0x7b5   : > { %3427 = vmatprep.mubr.f32.mxu1 %v17804_v62 }
 0x7b8   : > { %7959 = vmatmul.mubr.msk.f32.gmra.mrb[138].mxu1 %vm728_vm0, %v17806_v15 }
 0x7b9   : > { %3433 = vmatprep.mubr.f32.mxu1 %v17804_v62 }
 0x7bc   : > { %7960 = vmatmul.mubr.msk.f32.gmra.mrb[140].mxu1 %vm728_vm0, %v17807_v23  ;;  %v9195_v6 = vpop.eup %9194 }
 0x7bd   : > { %3439 = vmatprep.mubr.f32.mxu1 %v17804_v62 }
 0x7c0   : > { %7961 = vmatmul.mubr.msk.f32.gmra.mrb[142].mxu1 %vm728_vm0, %v17808_v34 }
 0x7c1   : > { %3445 = vmatprep.mubr.f32.mxu1 %v17804_v62 }
 0x7c4   : > { %7962 = vmatmul.mubr.msk.f32.gmra.mrb[144].mxu1 %vm728_vm0, %v17809_v55 }
 0x7c5   : > { %3451 = vmatprep.mubr.f32.mxu1 %v17804_v62 }
 0x7c8   : > { %7963 = vmatmul.mubr.msk.f32.gmra.mrb[146].mxu1 %vm728_vm0, %v17810_v39 }
 0x7c9   : > { %3457 = vmatprep.mubr.f32.mxu1 %v17804_v62 }
 0x7cc   : > { %7964 = vmatmul.mubr.msk.f32.gmra.mrb[148].mxu1 %vm728_vm0, %v17811_v53 }
 0x7cd   : > { %3463 = vmatprep.mubr.f32.mxu1 %v17804_v62 }
 0x7d0   : > { %7965 = vmatmul.mubr.msk.f32.gmra.mrb[150].mxu1 %vm728_vm0, %v17812_v2 }
 0x7d1   : > { %3469 = vmatprep.mubr.f32.mxu1 %v17804_v62 }
 0x7d4   : > { %7966 = vmatmul.mubr.msk.f32.gmra.mrb[152].mxu1 %vm728_vm0, %v17813_v12 }
 0x7d5   : > { %3475 = vmatprep.mubr.f32.mxu1 %v17804_v62 }
 0x7d8   : > { %7967 = vmatmul.mubr.msk.f32.gmra.mrb[154].mxu1 %vm728_vm0, %v17814_v47 }
 0x7d9   : > { %3481 = vmatprep.mubr.f32.mxu1 %v17804_v62 }
 0x7dc   : > { %7968 = vmatmul.mubr.msk.f32.gmra.mrb[156].mxu1 %vm728_vm0, %v17815_v36 }
 0x7dd   : > { %3487 = vmatprep.mubr.f32.mxu1 %v17804_v62 }
 0x7e0   : > { %7969 = vmatmul.mubr.msk.f32.gmra.mrb[158].mxu1 %vm728_vm0, %v17816_v57 }
 0x7e1   : > { %3493 = vmatprep.mubr.f32.mxu1 %v17804_v62 }
 0x7e4   : > { %7970 = vmatmul.mubr.msk.f32.gmra.mrb[160].mxu1 %vm728_vm0, %v17817_v21 }
 0x7e5   : > { %3499 = vmatprep.mubr.f32.mxu1 %v17804_v62 }
 0x7e8   : > { %7971 = vmatmul.mubr.msk.f32.gmra.mrb[162].mxu1 %vm728_vm0, %v17818_v20 }
 0x7e9   : > { %3505 = vmatprep.mubr.f32.mxu1 %v17804_v62 }
 0x7ec   : > { %7972 = vmatmul.mubr.msk.f32.gmra.mrb[164].mxu1 %vm728_vm0, %v17819_v41 }
 0x7ed   : > { %3511 = vmatprep.mubr.f32.mxu1 %v17804_v62 }
 0x7f0   : > { %7973 = vmatmul.mubr.msk.f32.gmra.mrb[166].mxu1 %vm728_vm0, %v17820_v37 }
 0x7f1   : > { %3517 = vmatprep.mubr.f32.mxu1 %v17804_v62 }
 0x7f4   : > { %7974 = vmatmul.mubr.msk.f32.gmra.mrb[168].mxu1 %vm728_vm0, %v17821_v3 }
 0x7f5   : > { %3523 = vmatprep.mubr.f32.mxu1 %v17804_v62 }
 0x7f8   : > { %7975 = vmatmul.mubr.msk.f32.gmra.mrb[170].mxu1 %vm728_vm0, %v17822_v26 }
 0x7f9   : > { %3529 = vmatprep.mubr.f32.mxu1 %v17804_v62 }
 0x7fc   : > { %7976 = vmatmul.mubr.msk.f32.gmra.mrb[172].mxu1 %vm728_vm0, %v17823_v38 }
 0x7fd   : > { %3535 = vmatprep.mubr.f32.mxu1 %v17804_v62 }
 0x800   : > { %7977 = vmatmul.mubr.msk.f32.gmra.mrb[174].mxu1 %vm728_vm0, %v17824_v50 }
 0x801   : > { %3541 = vmatprep.mubr.f32.mxu1 %v17804_v62 }
 0x804   : > { %7978 = vmatmul.mubr.msk.f32.gmra.mrb[176].mxu1 %vm728_vm0, %v17825_v28 }
 0x805   : > { %3547 = vmatprep.mubr.f32.mxu1 %v17804_v62 }
 0x808   : > { %7979 = vmatmul.mubr.msk.f32.gmra.mrb[178].mxu1 %vm728_vm0, %v17826_v58 }
 0x809   : > { %3553 = vmatprep.mubr.f32.mxu1 %v17804_v62 }
 0x80c   : > { %7980 = vmatmul.mubr.msk.f32.gmra.mrb[180].mxu1 %vm728_vm0, %v17827_v17 }
 0x80d   : > { %3559 = vmatprep.mubr.f32.mxu1 %v17804_v62 }
 0x810   : > { %7981 = vmatmul.mubr.msk.f32.gmra.mrb[182].mxu1 %vm728_vm0, %v17828_v51 }
 0x811   : > { %3565 = vmatprep.mubr.f32.mxu1 %v17804_v62 }
 0x814   : > { %7982 = vmatmul.mubr.msk.f32.gmra.mrb[184].mxu1 %vm728_vm0, %v17829_v14 }
 0x815   : > { %3571 = vmatprep.mubr.f32.mxu1 %v17804_v62 }
 0x818   : > { %7983 = vmatmul.mubr.msk.f32.gmra.mrb[186].mxu1 %vm728_vm0, %v17830_v30 }
 0x819   : > { %3577 = vmatprep.mubr.f32.mxu1 %v17804_v62 }
 0x81c   : > { %7984 = vmatmul.mubr.msk.f32.gmra.mrb[188].mxu1 %vm728_vm0, %v17831_v18 }
 0x81d   : > { %3583 = vmatprep.mubr.f32.mxu1 %v17804_v62 }
 0x820   : > { %7985 = vmatmul.mubr.msk.f32.gmra.mrb[190].mxu1 %vm728_vm0, %v17832_v24 }
 0x821   : > { %3589 = vmatprep.mubr.f32.mxu1 %v17804_v62 }
 0x824   : > { %7986 = vmatmul.mubr.msk.f32.gmra.mrb[192].mxu1 %vm728_vm0, %v17833_v9 }
 0x825   : > { %3595 = vmatprep.mubr.f32.mxu1 %v17804_v62 }
 0x828   : > { %7987 = vmatmul.mubr.msk.f32.gmra.mrb[194].mxu1 %vm728_vm0, %v17834_v56 }
 0x829   : > { %3601 = vmatprep.mubr.f32.mxu1 %v17804_v62 }
 0x82c   : > { %7988 = vmatmul.mubr.msk.f32.gmra.mrb[196].mxu1 %vm728_vm0, %v17835_v1 }
 0x82d   : > { %3607 = vmatprep.mubr.f32.mxu1 %v17804_v62 }
 0x830   : > { %7989 = vmatmul.mubr.msk.f32.gmra.mrb[198].mxu1 %vm728_vm0, %v17836_v4 }
 0x831   : > { %4862 = vmatprep.mubr.f32.mxu1 %v17837_v31 }
 0x87f   : > { %v3176_v16 = vpop.f32.mrb[132].mxu1 }
 0x880   : > { %v13039_v27 = vmul.f32 %v9193_v10, %v3176_v16  ;;  %v3178_v46 = vpop.f32.mrb[133].mxu1 }
 0x881   : > { %v13041_v49 = vmul.f32 %v9195_v6, %v3178_v46 }
 0x882   : > { %17838 = vst [vmem:[#allocation160_spill] sm:$0xff] %v13039_v27 }
 0x883   : > { %17839 = vst [vmem:[#allocation116_spill] sm:$0xff] %v13041_v49  ;;  %v3182_v32 = vpop.f32.mrb[134].mxu1 }
 0x884   : > { %v13043_v35 = vmul.f32 %v9193_v10, %v3182_v32  ;;  %v3184_v59 = vpop.f32.mrb[135].mxu1 }
 0x885   : > { %v13045_v11 = vmul.f32 %v9195_v6, %v3184_v59 }
 0x886   : > { %17840 = vst [vmem:[#allocation175_spill] sm:$0xff] %v13043_v35 }
 0x887   : > { %17841 = vst [vmem:[#allocation177_spill] sm:$0xff] %v13045_v11  ;;  %v13051_v43 = vpop.f32.mrb[136].mxu1 }
 0x888   : > { %v13053_v22 = vpop.f32.mrb[137].mxu1 }
 0x88b   : > { %v13055_v29 = vpop.f32.mrb[138].mxu1 }
 0x88c   : > { %v13057_v13 = vpop.f32.mrb[139].mxu1 }
 0x88f   : > { %v13059_v52 = vpop.f32.mrb[140].mxu1 }
 0x890   : > { %v3614_v48 = vmax.f32 %v13051_v43, %v13059_v52  ;;  %v13063_v60 = vpop.f32.mrb[141].mxu1 }
 0x891   : > { %v3651_v15 = vmax.f32 %v13053_v22, %v13063_v60 }
 0x893   : > { %v13067_v23 = vpop.f32.mrb[142].mxu1 }
 0x894   : > { %v3615_v34 = vmax.f32 %v13055_v29, %v13067_v23  ;;  %v13071_v55 = vpop.f32.mrb[143].mxu1 }
 0x895   : > { %v3652_v39 = vmax.f32 %v13057_v13, %v13071_v55 }
 0x897   : > { %v13075_v53 = vpop.f32.mrb[144].mxu1 }
 0x898   : > { %v3616_v2 = vmax.f32 %v3614_v48, %v13075_v53  ;;  %v13078_v12 = vpop.f32.mrb[145].mxu1 }
 0x899   : > { %v3653_v47 = vmax.f32 %v3651_v15, %v13078_v12 }
 0x89b   : > { %v13081_v36 = vpop.f32.mrb[146].mxu1 }
 0x89c   : > { %v3617_v57 = vmax.f32 %v3615_v34, %v13081_v36  ;;  %v13084_v21 = vpop.f32.mrb[147].mxu1 }
 0x89d   : > { %v3654_v20 = vmax.f32 %v3652_v39, %v13084_v21 }
 0x89f   : > { %v13087_v41 = vpop.f32.mrb[148].mxu1 }
 0x8a0   : > { %v3618_v37 = vmax.f32 %v3616_v2, %v13087_v41  ;;  %v13090_v3 = vpop.f32.mrb[149].mxu1 }
 0x8a1   : > { %v3655_v26 = vmax.f32 %v3653_v47, %v13090_v3 }
 0x8a3   : > { %v13093_v38 = vpop.f32.mrb[150].mxu1 }
 0x8a4   : > { %v3619_v50 = vmax.f32 %v3617_v57, %v13093_v38  ;;  %v13096_v28 = vpop.f32.mrb[151].mxu1 }
 0x8a5   : > { %v3656_v58 = vmax.f32 %v3654_v20, %v13096_v28 }
 0x8a7   : > { %v13099_v17 = vpop.f32.mrb[152].mxu1 }
 0x8a8   : > { %v3620_v51 = vmax.f32 %v3618_v37, %v13099_v17  ;;  %v13102_v14 = vpop.f32.mrb[153].mxu1 }
 0x8a9   : > { %v3657_v30 = vmax.f32 %v3655_v26, %v13102_v14 }
 0x8ab   : > { %v13105_v18 = vpop.f32.mrb[154].mxu1 }
 0x8ac   : > { %v3621_v24 = vmax.f32 %v3619_v50, %v13105_v18  ;;  %v13108_v9 = vpop.f32.mrb[155].mxu1 }
 0x8ad   : > { %v3658_v56 = vmax.f32 %v3656_v58, %v13108_v9 }
 0x8af   : > { %v13111_v1 = vpop.f32.mrb[156].mxu1 }
 0x8b0   : > { %v3622_v4 = vmax.f32 %v3620_v51, %v13111_v1  ;;  %v13114_v31 = vpop.f32.mrb[157].mxu1 }
 0x8b1   : > { %v3659_v7 = vmax.f32 %v3657_v30, %v13114_v31 }
 0x8b3   : > { %v13117_v44 = vpop.f32.mrb[158].mxu1 }
 0x8b4   : > { %v3623_v0 = vmax.f32 %v3621_v24, %v13117_v44  ;;  %v13120_v54 = vpop.f32.mrb[159].mxu1 }
 0x8b5   : > { %17842 = vst [vmem:[#allocation19_spill] sm:$0xff] %v13120_v54  ;;  %v3660_v33 = vmax.f32 %v3658_v56, %v13120_v54 }
 0x8b7   : > { %v13123_v63 = vpop.f32.mrb[160].mxu1 }
 0x8b8   : > { %v3624_v42 = vmax.f32 %v3622_v4, %v13123_v63  ;;  %v13126_v25 = vpop.f32.mrb[161].mxu1 }
 0x8b9   : > { %17843 = vst [vmem:[#allocation17_spill] sm:$0xff] %v13126_v25  ;;  %v3661_v40 = vmax.f32 %v3659_v7, %v13126_v25 }
 0x8bb   : > { %v13129_v45 = vpop.f32.mrb[162].mxu1 }
 0x8bc   : > { %v3625_v8 = vmax.f32 %v3623_v0, %v13129_v45  ;;  %v13132_v61 = vpop.f32.mrb[163].mxu1 }
 0x8bd   : > { %17844 = vst [vmem:[#allocation14_spill] sm:$0xff] %v13132_v61  ;;  %v3662_v10 = vmax.f32 %v3660_v33, %v13132_v61 }
 0x8bf   : > { %v13135_v16 = vpop.f32.mrb[164].mxu1 }
 0x8c0   : > { %v3626_v6 = vmax.f32 %v3624_v42, %v13135_v16  ;;  %v13138_v46 = vpop.f32.mrb[165].mxu1 }
 0x8c1   : > { %17845 = vst [vmem:[#allocation18_spill] sm:$0xff] %v13138_v46  ;;  %v3663_v32 = vmax.f32 %v3661_v40, %v13138_v46 }
 0x8c3   : > { %v13141_v59 = vpop.f32.mrb[166].mxu1 }
 0x8c4   : > { %v3627_v48 = vmax.f32 %v3625_v8, %v13141_v59  ;;  %v13144_v15 = vpop.f32.mrb[167].mxu1 }
 0x8c5   : > { %17846 = vst [vmem:[#allocation16_spill] sm:$0xff] %v13144_v15  ;;  %v3664_v34 = vmax.f32 %v3662_v10, %v13144_v15 }
 0x8c7   : > { %v13147_v39 = vpop.f32.mrb[168].mxu1 }
 0x8c8   : > { %v3628_v2 = vmax.f32 %v3626_v6, %v13147_v39  ;;  %v13150_v47 = vpop.f32.mrb[169].mxu1 }
 0x8c9   : > { %17847 = vst [vmem:[#allocation178_spill] sm:$0xff] %v13150_v47  ;;  %v3665_v57 = vmax.f32 %v3663_v32, %v13150_v47 }
 0x8cb   : > { %v13153_v20 = vpop.f32.mrb[170].mxu1 }
 0x8cc   : > { %v3629_v37 = vmax.f32 %v3627_v48, %v13153_v20  ;;  %v13156_v26 = vpop.f32.mrb[171].mxu1 }
 0x8cd   : > { %17848 = vst [vmem:[#allocation12_spill] sm:$0xff] %v13156_v26  ;;  %v3666_v50 = vmax.f32 %v3664_v34, %v13156_v26 }
 0x8cf   : > { %v13159_v58 = vpop.f32.mrb[172].mxu1 }
 0x8d0   : > { %v3630_v51 = vmax.f32 %v3628_v2, %v13159_v58  ;;  %v13162_v30 = vpop.f32.mrb[173].mxu1 }
 0x8d1   : > { %17849 = vst [vmem:[#allocation72_spill] sm:$0xff] %v13162_v30  ;;  %v3667_v24 = vmax.f32 %v3665_v57, %v13162_v30 }
 0x8d3   : > { %v13165_v56 = vpop.f32.mrb[174].mxu1 }
 0x8d4   : > { %v3631_v4 = vmax.f32 %v3629_v37, %v13165_v56  ;;  %v13168_v7 = vpop.f32.mrb[175].mxu1 }
 0x8d5   : > { %17850 = vst [vmem:[#allocation74_spill] sm:$0xff] %v13168_v7  ;;  %v3668_v0 = vmax.f32 %v3666_v50, %v13168_v7 }
 0x8d7   : > { %v13171_v33 = vpop.f32.mrb[176].mxu1 }
 0x8d8   : > { %v3632_v42 = vmax.f32 %v3630_v51, %v13171_v33  ;;  %v13174_v40 = vpop.f32.mrb[177].mxu1 }
 0x8d9   : > { %17851 = vst [vmem:[#allocation76_spill] sm:$0xff] %v13174_v40  ;;  %v3669_v8 = vmax.f32 %v3667_v24, %v13174_v40 }
 0x8db   : > { %v13177_v10 = vpop.f32.mrb[178].mxu1 }
 0x8dc   : > { %v3633_v6 = vmax.f32 %v3631_v4, %v13177_v10  ;;  %v13180_v32 = vpop.f32.mrb[179].mxu1 }
 0x8dd   : > { %17852 = vst [vmem:[#allocation78_spill] sm:$0xff] %v13180_v32  ;;  %v3670_v48 = vmax.f32 %v3668_v0, %v13180_v32 }
 0x8df   : > { %v13183_v34 = vpop.f32.mrb[180].mxu1 }
 0x8e0   : > { %v3634_v2 = vmax.f32 %v3632_v42, %v13183_v34  ;;  %v13186_v57 = vpop.f32.mrb[181].mxu1 }
 0x8e1   : > { %17853 = vst [vmem:[#allocation80_spill] sm:$0xff] %v13186_v57  ;;  %v3671_v37 = vmax.f32 %v3669_v8, %v13186_v57 }
 0x8e3   : > { %v13189_v50 = vpop.f32.mrb[182].mxu1 }
 0x8e4   : > { %v3635_v51 = vmax.f32 %v3633_v6, %v13189_v50  ;;  %v13192_v24 = vpop.f32.mrb[183].mxu1 }
 0x8e5   : > { %17854 = vst [vmem:[#allocation82_spill] sm:$0xff] %v13192_v24  ;;  %v3672_v4 = vmax.f32 %v3670_v48, %v13192_v24 }
 0x8e7   : > { %v13195_v5 = vpop.f32.mrb[184].mxu1 }
 0x8e8   : > { %v3636_v0 = vmax.f32 %v3634_v2, %v13195_v5  ;;  %v13198_v19 = vpop.f32.mrb[185].mxu1 }
 0x8e9   : > { %17855 = vst [vmem:[#allocation84_spill] sm:$0xff] %v13198_v19  ;;  %v3673_v42 = vmax.f32 %v3671_v37, %v13198_v19 }
 0x8eb   : > { %v13201_v27 = vpop.f32.mrb[186].mxu1 }
 0x8ec   : > { %v3637_v8 = vmax.f32 %v3635_v51, %v13201_v27  ;;  %v13204_v35 = vpop.f32.mrb[187].mxu1 }
 0x8ed   : > { %17856 = vst [vmem:[#allocation86_spill] sm:$0xff] %v13204_v35  ;;  %v3674_v6 = vmax.f32 %v3672_v4, %v13204_v35 }
 0x8ef   : > { %v13207_v49 = vpop.f32.mrb[188].mxu1 }
 0x8f0   : > { %v3638_v48 = vmax.f32 %v3636_v0, %v13207_v49  ;;  %v13210_v11 = vpop.f32.mrb[189].mxu1 }
 0x8f1   : > { %17857 = vst [vmem:[#allocation88_spill] sm:$0xff] %v13210_v11  ;;  %v3675_v2 = vmax.f32 %v3673_v42, %v13210_v11 }
 0x8f3   : > { %v13213_v62 = vpop.f32.mrb[190].mxu1 }
 0x8f4   : > { %v3639_v37 = vmax.f32 %v3637_v8, %v13213_v62  ;;  %v13216_v19 = vpop.f32.mrb[191].mxu1 }
 0x8f5   : > { %17858 = vst [vmem:[#allocation90_spill] sm:$0xff] %v13216_v19  ;;  %v3676_v51 = vmax.f32 %v3674_v6, %v13216_v19 }
 0x8f7   : > { %v13219_v24 = vpop.f32.mrb[192].mxu1 }
 0x8f8   : > { %v3640_v4 = vmax.f32 %v3638_v48, %v13219_v24  ;;  %v13222_v35 = vpop.f32.mrb[193].mxu1 }
 0x8f9   : > { %17859 = vst [vmem:[#allocation92_spill] sm:$0xff] %v13222_v35  ;;  %v3677_v0 = vmax.f32 %v3675_v2, %v13222_v35 }
 0x8fb   : > { %v13225_v57 = vpop.f32.mrb[194].mxu1 }
 0x8fc   : > { %v3641_v42 = vmax.f32 %v3639_v37, %v13225_v57  ;;  %v13228_v11 = vpop.f32.mrb[195].mxu1 }
 0x8fd   : > { %17860 = vst [vmem:[#allocation94_spill] sm:$0xff] %v13228_v11  ;;  %v3678_v8 = vmax.f32 %v3676_v51, %v13228_v11 }
 0x8ff   : > { %v13231_v32 = vpop.f32.mrb[196].mxu1 }
 0x900   : > { %v3642_v6 = vmax.f32 %v3640_v4, %v13231_v32  ;;  %v13234_v19 = vpop.f32.mrb[197].mxu1 }
 0x901   : > { %17861 = vst [vmem:[#allocation96_spill] sm:$0xff] %v13234_v19  ;;  %v3679_v48 = vmax.f32 %v3677_v0, %v13234_v19 }
 0x903   : > { %v13237_v40 = vpop.f32.mrb[198].mxu1 }
 0x904   : > { %v3643_v2 = vmax.f32 %v3641_v42, %v13237_v40  ;;  %v13240_v35 = vpop.f32.mrb[199].mxu1 }
 0x905   : > { %17862 = vst [vmem:[#allocation98_spill] sm:$0xff] %v13240_v35  ;;  %v3680_v37 = vmax.f32 %v3678_v8, %v13240_v35 }
 0x906   : > { %v3644_v7 = vmax.f32 %v3642_v6, %v3643_v2 }
 0x907   : > { %v3681_v30 = vmax.f32 %v3679_v48, %v3680_v37 }
 0x908   : > { %v3645_v26 = vrot.slane %v3644_v7, 4 }
 0x909   : > { %v3682_v51 = vrot.slane %v3681_v30, 4 }
 0x90a   : > { %v3646_v11 = vmax.f32 %v3644_v7, %v3645_v26 }
 0x90b   : > { %v3683_v47 = vmax.f32 %v3681_v30, %v3682_v51 }
 0x90c   : > { %v3647_v15 = vrot.slane %v3646_v11, 2 }
 0x90d   : > { %v3684_v4 = vrot.slane %v3683_v47, 2 }
 0x90e   : > { %v3648_v46 = vmax.f32 %v3646_v11, %v3647_v15  ;;  %v17882_v15 = vld [vmem:[#allocation96_spill] sm:$0xff] }
 0x90f   : > { %v3685_v61 = vmax.f32 %v3683_v47, %v3684_v4 }
 0x910   : > { %v3649_v25 = vrot.slane %v3648_v46, 1 }
 0x911   : > { %v3686_v0 = vrot.slane %v3685_v61, 1 }
 0x912   : > { %v13243_v19 = vmax.f32 %v3648_v46, %v3649_v25 }
 0x913   : > { %v13245_v54 = vmax.f32 %v3685_v61, %v3686_v0 }
 0x914   : > { %v3688_v42 = vsub.f32 %v13051_v43, %v13243_v19  ;;  %v3690_v8 = vsub.f32 %v13055_v29, %v13243_v19  ;;  %v3692_v26 = vsub.f32 %v13059_v52, %v13243_v19  ;;  %v3694_v30 = vsub.f32 %v13067_v23, %v13243_v19 }
 0x915   : > { %v3696_v11 = vsub.f32 %v13075_v53, %v13243_v19  ;;  %v3698_v25 = vsub.f32 %v13081_v36, %v13243_v19  ;;  %v3700_v61 = vsub.f32 %v13087_v41, %v13243_v19  ;;  %v3702_v43 = vsub.f32 %v13093_v38, %v13243_v19 }
 0x916   : > { %v3704_v29 = vsub.f32 %v13099_v17, %v13243_v19  ;;  %v3706_v52 = vsub.f32 %v13105_v18, %v13243_v19  ;;  %v3708_v23 = vsub.f32 %v13111_v1, %v13243_v19  ;;  %v3710_v53 = vsub.f32 %v13117_v44, %v13243_v19 }
 0x917   : > { %v3712_v36 = vsub.f32 %v13123_v63, %v13243_v19  ;;  %v3714_v41 = vsub.f32 %v13129_v45, %v13243_v19  ;;  %v3716_v38 = vsub.f32 %v13135_v16, %v13243_v19  ;;  %v3718_v17 = vsub.f32 %v13141_v59, %v13243_v19 }
 0x918   : > { %v3720_v18 = vsub.f32 %v13147_v39, %v13243_v19  ;;  %v3722_v1 = vsub.f32 %v13153_v20, %v13243_v19  ;;  %v3724_v44 = vsub.f32 %v13159_v58, %v13243_v19  ;;  %v3726_v63 = vsub.f32 %v13165_v56, %v13243_v19 }
 0x919   : > { %v3728_v45 = vsub.f32 %v13171_v33, %v13243_v19  ;;  %v3730_v16 = vsub.f32 %v13177_v10, %v13243_v19  ;;  %v3732_v46 = vsub.f32 %v13183_v34, %v13243_v19  ;;  %v3734_v59 = vsub.f32 %v13189_v50, %v13243_v19 }
 0x91a   : > { %v3752_v10 = vmul.f32 1.442695, %v3688_v42  ;;  %v3756_v34 = vmul.f32 1.442695, %v3690_v8  ;;  %v3760_v50 = vmul.f32 1.442695, %v3692_v26 }
 0x91b   : > { %v3764_v48 = vmul.f32 1.442695, %v3694_v30  ;;  %v3768_v37 = vmul.f32 1.442695, %v3696_v11  ;;  %v3772_v51 = vmul.f32 1.442695, %v3698_v25 }
 0x91c   : > { %9196 = vpow2.f32 %v3752_v10  ;;  %v3776_v4 = vmul.f32 1.442695, %v3700_v61  ;;  %v3780_v0 = vmul.f32 1.442695, %v3702_v43  ;;  %v3784_v7 = vmul.f32 1.442695, %v3704_v29 }
 0x91d   : > { %9198 = vpow2.f32 %v3756_v34  ;;  %v3788_v33 = vmul.f32 1.442695, %v3706_v52  ;;  %v3792_v42 = vmul.f32 1.442695, %v3708_v23  ;;  %v3796_v8 = vmul.f32 1.442695, %v3710_v53 }
 0x91e   : > { %9200 = vpow2.f32 %v3760_v50  ;;  %v3800_v26 = vmul.f32 1.442695, %v3712_v36  ;;  %v3804_v6 = vmul.f32 1.442695, %v3714_v41  ;;  %v3808_v30 = vmul.f32 1.442695, %v3716_v38 }
 0x91f   : > { %9202 = vpow2.f32 %v3764_v48  ;;  %v3812_v56 = vmul.f32 1.442695, %v3718_v17  ;;  %v3816_v2 = vmul.f32 1.442695, %v3720_v18  ;;  %v3820_v10 = vmul.f32 1.442695, %v3722_v1 }
 0x920   : > { %9204 = vpow2.f32 %v3768_v37  ;;  %v3824_v11 = vmul.f32 1.442695, %v3724_v44  ;;  %v3828_v25 = vmul.f32 1.442695, %v3726_v63  ;;  %v3832_v34 = vmul.f32 1.442695, %v3728_v45 }
 0x921   : > { %9206 = vpow2.f32 %v3772_v51  ;;  %v13315_v61 = vmul.f32 1.442695, %v3730_v16  ;;  %v13317_v43 = vmul.f32 1.442695, %v3732_v46  ;;  %v13319_v29 = vmul.f32 1.442695, %v3734_v59 }
 0x922   : > { %9208 = vpow2.f32 %v3776_v4  ;;  %v17863_v45 = vld [vmem:[#allocation19_spill] sm:$0xff]  ;;  %v17865_v50 = vld [vmem:[#allocation14_spill] sm:$0xff]  ;;  %v17869_v63 = vld [vmem:[#allocation12_spill] sm:$0xff] }
 0x923   : > { %9210 = vpow2.f32 %v3780_v0  ;;  %v17866_v51 = vld [vmem:[#allocation18_spill] sm:$0xff]  ;;  %v17867_v0 = vld [vmem:[#allocation16_spill] sm:$0xff] }
 0x924   : > { %9212 = vpow2.f32 %v3784_v7  ;;  %v17864_v7 = vld [vmem:[#allocation17_spill] sm:$0xff]  ;;  %v17870_v44 = vld [vmem:[#allocation72_spill] sm:$0xff]  ;;  %v17871_v4 = vld [vmem:[#allocation74_spill] sm:$0xff] }
 0x925   : > { %9214 = vpow2.f32 %v3788_v33  ;;  %v17872_v17 = vld [vmem:[#allocation76_spill] sm:$0xff]  ;;  %v17873_v38 = vld [vmem:[#allocation78_spill] sm:$0xff] }
 0x926   : > { %v13329_v41 = vpop.eup %9196  ;;  %9216 = vpow2.f32 %v3792_v42  ;;  %v17874_v48 = vld [vmem:[#allocation80_spill] sm:$0xff]  ;;  %v17875_v53 = vld [vmem:[#allocation82_spill] sm:$0xff] }
 0x927   : > { %v13337_v1 = vpop.eup %9198  ;;  %9218 = vpow2.f32 %v3796_v8  ;;  %v17868_v8 = vld [vmem:[#allocation178_spill] sm:$0xff]  ;;  %v17876_v42 = vld [vmem:[#allocation84_spill] sm:$0xff] }
 0x928   : > { %v13345_v46 = vpop.eup %9200  ;;  %9220 = vpow2.f32 %v3800_v26  ;;  %v3880_v59 = vadd.f32 %v13337_v1, %v13329_v41  ;;  %v17877_v52 = vld [vmem:[#allocation86_spill] sm:$0xff] }
 0x929   : > { %v13353_v37 = vpop.eup %9202  ;;  %9222 = vpow2.f32 %v3804_v6  ;;  %v17879_v6 = vld [vmem:[#allocation90_spill] sm:$0xff] }
 0x92a   : > { %v13361_v16 = vpop.eup %9204  ;;  %9224 = vpow2.f32 %v3808_v30  ;;  %v3881_v33 = vadd.f32 %v13345_v46, %v3880_v59  ;;  %v17881_v26 = vld [vmem:[#allocation94_spill] sm:$0xff] }
 0x92b   : > { %v13368_v18 = vpop.eup %9206  ;;  %9226 = vpow2.f32 %v3812_v56 }
 0x92c   : > { %v13376_v36 = vpop.eup %9208  ;;  %9228 = vpow2.f32 %v3816_v2  ;;  %v3882_v59 = vadd.f32 %v13353_v37, %v3881_v33 }
 0x92d   : > { %v13383_v23 = vpop.eup %9210  ;;  %9230 = vpow2.f32 %v3820_v10 }
 0x92e   : > { %v13391_v20 = vpop.eup %9212  ;;  %9232 = vpow2.f32 %v3824_v11  ;;  %v3883_v33 = vadd.f32 %v13361_v16, %v3882_v59  ;;  %v17883_v59 = vsub.f32 %v13195_v5, %v13243_v19 }
 0x92f   : > { %v13398_v39 = vpop.eup %9214  ;;  %9234 = vpow2.f32 %v3828_v25  ;;  %v17884_v25 = vsub.f32 %v13201_v27, %v13243_v19 }
 0x930   : > { %v13406_v58 = vpop.eup %9216  ;;  %9236 = vpow2.f32 %v3832_v34  ;;  %v3848_v56 = vmul.f32 1.442695, %v17883_v59  ;;  %v3884_v10 = vadd.f32 %v13368_v18, %v3883_v33  ;;  %v17885_v34 = vsub.f32 %v13207_v49, %v13243_v19 }
 0x931   : > { %v13412_v47 = vpop.eup %9218  ;;  %9238 = vpow2.f32 %v13315_v61  ;;  %v3852_v2 = vmul.f32 1.442695, %v17884_v25  ;;  %v17886_v61 = vsub.f32 %v13213_v62, %v13243_v19  ;;  %v17890_v62 = vsub.f32 %v13231_v32, %v13243_v19 }
 0x932   : > { %v13418_v30 = vpop.eup %9220  ;;  %9240 = vpow2.f32 %v13317_v43  ;;  %v3856_v11 = vmul.f32 1.442695, %v17885_v34  ;;  %v3885_v5 = vadd.f32 %v13376_v36, %v3884_v10  ;;  %v17887_v43 = vsub.f32 %v13219_v24, %v13243_v19 }
 0x933   : > { %v13425_v59 = vpop.eup %9222  ;;  %9242 = vpow2.f32 %v13319_v29  ;;  %v3860_v33 = vmul.f32 1.442695, %v17886_v61  ;;  %v17888_v10 = vsub.f32 %v13225_v57, %v13243_v19 }
 0x934   : > { %v13431_v27 = vpop.eup %9224  ;;  %9244 = vpow2.f32 %v3848_v56  ;;  %v3864_v25 = vmul.f32 1.442695, %v17887_v43  ;;  %v3886_v49 = vadd.f32 %v13383_v23, %v3885_v5  ;;  %v3872_v56 = vmul.f32 1.442695, %v17890_v62 }
 0x935   : > { %v13437_v34 = vpop.eup %9226  ;;  %9246 = vpow2.f32 %v3852_v2  ;;  %v3868_v29 = vmul.f32 1.442695, %v17888_v10  ;;  %v17891_v5 = vsub.f32 %v13237_v40, %v13243_v19  ;;  %v17894_v19 = vsub.f32 %v13063_v60, %v13245_v54 }
 0x936   : > { %v13442_v35 = vpop.eup %9228  ;;  %9248 = vpow2.f32 %v3856_v11  ;;  %v3887_v61 = vadd.f32 %v13391_v20, %v3886_v49  ;;  %v17892_v11 = vsub.f32 %v13053_v22, %v13245_v54  ;;  %v17893_v49 = vsub.f32 %v13057_v13, %v13245_v54 }
 0x937   : > { %17889 = vst [vmem:[#allocation100_spill] sm:$0xff] %v13442_v35  ;;  %v13448_v24 = vpop.eup %9230  ;;  %9250 = vpow2.f32 %v3860_v33  ;;  %v3876_v2 = vmul.f32 1.442695, %v17891_v5  ;;  %v3762_v40 = vmul.f32 1.442695, %v17894_v19  ;;  %v17895_v22 = vsub.f32 %v13071_v55, %v13245_v54 }
 0x938   : > { %v13453_v43 = vpop.eup %9232  ;;  %9252 = vpow2.f32 %v3864_v25  ;;  %v3888_v57 = vadd.f32 %v13398_v39, %v3887_v61  ;;  %v3754_v10 = vmul.f32 1.442695, %v17892_v11  ;;  %v3758_v33 = vmul.f32 1.442695, %v17893_v49 }
 0x939   : > { %v13459_v32 = vpop.eup %9234  ;;  %9254 = vpow2.f32 %v3868_v29  ;;  %v3766_v61 = vmul.f32 1.442695, %v17895_v22  ;;  %v17896_v29 = vsub.f32 %v13078_v12, %v13245_v54  ;;  %v17897_v13 = vsub.f32 %v13084_v21, %v13245_v54 }
 0x93a   : > { %v13467_v62 = vpop.eup %9236  ;;  %9256 = vpow2.f32 %v3872_v56  ;;  %v3889_v25 = vadd.f32 %v13406_v58, %v3888_v57  ;;  %v17898_v56 = vsub.f32 %v13090_v3, %v13245_v54  ;;  %v17899_v57 = vsub.f32 %v13096_v28, %v13245_v54 }
 0x93b   : > { %v3770_v5 = vmul.f32 1.442695, %v17896_v29  ;;  %v13476_v11 = vpop.eup %9238  ;;  %9258 = vpow2.f32 %v3876_v2  ;;  %v3774_v60 = vmul.f32 1.442695, %v17897_v13  ;;  %v17900_v2 = vsub.f32 %v13102_v14, %v13245_v54 }
 0x93c   : > { %v3778_v49 = vmul.f32 1.442695, %v17898_v56  ;;  %v3782_v55 = vmul.f32 1.442695, %v17899_v57  ;;  %v13487_v19 = vpop.eup %9240  ;;  %v3890_v12 = vadd.f32 %v13412_v47, %v3889_v25  ;;  %9260 = vpow2.f32 %v3754_v10 }
 0x93d   : > { %v3786_v22 = vmul.f32 1.442695, %v17900_v2  ;;  %v17901_v21 = vsub.f32 %v13108_v9, %v13245_v54  ;;  %v13496_v13 = vpop.eup %9242  ;;  %9262 = vpow2.f32 %v3758_v33 }
 0x93e   : > { %v13504_v25 = vpop.eup %9244  ;;  %v3891_v14 = vadd.f32 %v13418_v30, %v3890_v12  ;;  %9264 = vpow2.f32 %v3762_v40 }
 0x93f   : > { %v3790_v29 = vmul.f32 1.442695, %v17901_v21  ;;  %v13511_v56 = vpop.eup %9246  ;;  %9266 = vpow2.f32 %v3766_v61  ;;  %v17902_v61 = vsub.f32 %v13114_v31, %v13245_v54  ;;  %v17903_v21 = vsub.f32 %v17863_v45, %v13245_v54 }
 0x940   : > { %v13519_v12 = vpop.eup %9248  ;;  %v3892_v40 = vadd.f32 %v13425_v59, %v3891_v14  ;;  %9268 = vpow2.f32 %v3770_v5 }
 0x941   : > { %v13526_v9 = vpop.eup %9250  ;;  %9270 = vpow2.f32 %v3774_v60  ;;  %v3794_v33 = vmul.f32 1.442695, %v17902_v61  ;;  %v3798_v2 = vmul.f32 1.442695, %v17903_v21 }
 0x942   : > { %v13534_v14 = vpop.eup %9252  ;;  %v3893_v5 = vadd.f32 %v13431_v27, %v3892_v40  ;;  %9272 = vpow2.f32 %v3778_v49  ;;  %v17904_v49 = vsub.f32 %v17864_v7, %v13245_v54  ;;  %v17909_v7 = vsub.f32 %v17869_v63, %v13245_v54 }
 0x943   : > { %v13542_v10 = vpop.eup %9254  ;;  %9274 = vpow2.f32 %v3782_v55  ;;  %v17905_v55 = vsub.f32 %v17865_v50, %v13245_v54  ;;  %v17908_v50 = vsub.f32 %v17868_v8, %v13245_v54  ;;  %v17912_v63 = vsub.f32 %v17872_v17, %v13245_v54 }
 0x944   : > { %v13547_v57 = vpop.eup %9256  ;;  %v3894_v28 = vadd.f32 %v13437_v34, %v3893_v5  ;;  %9276 = vpow2.f32 %v3786_v22  ;;  %v3802_v31 = vmul.f32 1.442695, %v17904_v49  ;;  %v17906_v22 = vsub.f32 %v17866_v51, %v13245_v54 }
 0x945   : > { %v13555_v61 = vpop.eup %9258  ;;  %9278 = vpow2.f32 %v3790_v29  ;;  %v3806_v45 = vmul.f32 1.442695, %v17905_v55  ;;  %v17907_v29 = vsub.f32 %v17867_v0, %v13245_v54  ;;  %v3818_v55 = vmul.f32 1.442695, %v17908_v50 }
 0x946   : > { %v9261_v21 = vpop.eup %9260  ;;  %v3895_v60 = vadd.f32 %v13442_v35, %v3894_v28  ;;  %9280 = vpow2.f32 %v3794_v33  ;;  %v3810_v5 = vmul.f32 1.442695, %v17906_v22  ;;  %v17910_v0 = vsub.f32 %v17870_v44, %v13245_v54 }
 0x947   : > { %v9263_v49 = vpop.eup %9262  ;;  %9282 = vpow2.f32 %v3798_v2  ;;  %v3814_v40 = vmul.f32 1.442695, %v17907_v29  ;;  %v3822_v2 = vmul.f32 1.442695, %v17909_v7  ;;  %v3834_v7 = vmul.f32 1.442695, %v17912_v63 }
 0x948   : > { %v9265_v3 = vpop.eup %9264  ;;  %v3896_v28 = vadd.f32 %v13448_v24, %v3895_v60  ;;  %9284 = vpow2.f32 %v3802_v31  ;;  %v3917_v33 = vadd.f32 %v9263_v49, %v9261_v21  ;;  %v8365_v51 = vpack.c.bf16 %v9263_v49, %v9261_v21 }
 0x949   : > { %v9267_v22 = vpop.eup %9266  ;;  %9286 = vpow2.f32 %v3806_v45  ;;  %v3826_v29 = vmul.f32 1.442695, %v17910_v0  ;;  %v17911_v45 = vsub.f32 %v17871_v4, %v13245_v54  ;;  %v17913_v44 = vpack.c.bf16 %v13337_v1, %v13329_v41 }
 0x94a   : > { %v9269_v35 = vpop.eup %9268  ;;  %v3897_v8 = vadd.f32 %v13453_v43, %v3896_v28  ;;  %9288 = vpow2.f32 %v3810_v5  ;;  %v3918_v50 = vadd.f32 %v9265_v3, %v3917_v33  ;;  %8366 = vmatprep.subr.bf16.mxu0 %v8365_v51  ;;  %v8369_v60 = vpack.c.bf16 %v9267_v22, %v9265_v3 }
 0x94b   : > { %v9271_v31 = vpop.eup %9270  ;;  %9290 = vpow2.f32 %v3814_v40  ;;  %v3830_v21 = vmul.f32 1.442695, %v17911_v45  ;;  %8368 = vmatpush1.bf16.msra.mxu0 %v17913_v44  ;;  %v17914_v4 = vsub.f32 %v17873_v38, %v13245_v54  ;;  %v17915_v17 = vsub.f32 %v17874_v48, %v13245_v54  ;;  %v17920_v44 = vld [vmem:[#allocation88_spill] sm:$0xff] }
 0x94c   : > { %v9273_v49 = vpop.eup %9272  ;;  %v3898_v5 = vadd.f32 %v13459_v32, %v3897_v8  ;;  %9292 = vpow2.f32 %v3818_v55  ;;  %v3919_v28 = vadd.f32 %v9267_v22, %v3918_v50  ;;  %8370 = vmatprep.subr.bf16.mxu0 %v8369_v60  ;;  %v8373_v3 = vpack.c.bf16 %v9271_v31, %v9269_v35 }
 0x94d   : > { %v9275_v40 = vpop.eup %9274  ;;  %9294 = vpow2.f32 %v3822_v2  ;;  %v3838_v33 = vmul.f32 1.442695, %v17914_v4  ;;  %v3842_v51 = vmul.f32 1.442695, %v17915_v17  ;;  %v17916_v22 = vsub.f32 %v17875_v53, %v13245_v54 }
 0x94e   : > { %v9277_v0 = vpop.eup %9276  ;;  %v3899_v41 = vadd.f32 %v13467_v62, %v3898_v5  ;;  %9296 = vpow2.f32 %v3826_v29  ;;  %v3920_v1 = vadd.f32 %v9269_v35, %v3919_v28  ;;  %v8377_v8 = vpack.c.bf16 %v9275_v40, %v9273_v49 }
 0x94f   : > { %v9279_v55 = vpop.eup %9278  ;;  %9298 = vpow2.f32 %v3830_v21  ;;  %v3846_v2 = vmul.f32 1.442695, %v17916_v22  ;;  %v17917_v38 = vsub.f32 %v17876_v42, %v13245_v54  ;;  %v17918_v48 = vpack.c.bf16 %v13353_v37, %v13345_v46 }
 0x950   : > { %v9281_v60 = vpop.eup %9280  ;;  %v3900_v45 = vadd.f32 %v13476_v11, %v3899_v41  ;;  %9300 = vpow2.f32 %v3834_v7  ;;  %v3921_v35 = vadd.f32 %v9271_v31, %v3920_v1  ;;  %v8381_v29 = vpack.c.bf16 %v9279_v55, %v9277_v0 }
 0x951   : > { %v3850_v50 = vmul.f32 1.442695, %v17917_v38  ;;  %8372 = vmatpush1.bf16.msra.mxu0 %v17918_v48  ;;  %v9283_v21 = vpop.eup %9282  ;;  %9302 = vpow2.f32 %v3838_v33  ;;  %v17919_v53 = vsub.f32 %v17877_v52, %v13245_v54  ;;  %v17921_v42 = vsub.f32 %v17920_v44, %v13245_v54  ;;  %v17923_v33 = vld [vmem:[#allocation92_spill] sm:$0xff] }
 0x952   : > { %8374 = vmatprep.subr.bf16.mxu0 %v8373_v3  ;;  %v9285_v28 = vpop.eup %9284  ;;  %v3901_v46 = vadd.f32 %v13487_v19, %v3900_v45  ;;  %9304 = vpow2.f32 %v3842_v51  ;;  %v3922_v37 = vadd.f32 %v9273_v49, %v3921_v35  ;;  %v8385_v4 = vpack.c.bf16 %v9283_v21, %v9281_v60 }
 0x953   : > { %v3854_v63 = vmul.f32 1.442695, %v17919_v53  ;;  %v3858_v5 = vmul.f32 1.442695, %v17921_v42  ;;  %v9287_v7 = vpop.eup %9286  ;;  %9306 = vpow2.f32 %v3846_v2  ;;  %v17922_v31 = vsub.f32 %v17879_v6, %v13245_v54 }
 0x954   : > { %v17924_v52 = vsub.f32 %v17923_v33, %v13245_v54  ;;  %v17925_v41 = vpack.c.bf16 %v13368_v18, %v13361_v16  ;;  %v9289_v1 = vpop.eup %9288  ;;  %v3902_v22 = vadd.f32 %v13496_v13, %v3901_v46  ;;  %9308 = vpow2.f32 %v3850_v50 }
 0x955   : > { %v3862_v3 = vmul.f32 1.442695, %v17922_v31  ;;  %v3923_v49 = vadd.f32 %v9275_v40, %v3922_v37  ;;  %v8389_v51 = vpack.c.bf16 %v9287_v7, %v9285_v28  ;;  %v9291_v2 = vpop.eup %9290  ;;  %9310 = vpow2.f32 %v3854_v63  ;;  %v17928_v40 = vld [vmem:[#allocation98_spill] sm:$0xff] }
 0x956   : > { %v3866_v17 = vmul.f32 1.442695, %v17924_v52  ;;  %8376 = vmatpush1.bf16.msra.mxu0 %v17925_v41  ;;  %v17926_v6 = vsub.f32 %v17881_v26, %v13245_v54  ;;  %v17927_v48 = vsub.f32 %v17882_v15, %v13245_v54  ;;  %v9293_v35 = vpop.eup %9292  ;;  %v3903_v18 = vadd.f32 %v13504_v25, %v3902_v22 }
 0x957   : > { %8378 = vmatprep.subr.bf16.mxu0 %v8377_v8  ;;  %9312 = vpow2.f32 %v3858_v5  ;;  %v3924_v16 = vadd.f32 %v9277_v0, %v3923_v49  ;;  %v8393_v53 = vpack.c.bf16 %v9291_v2, %v9289_v1  ;;  %v9295_v50 = vpop.eup %9294  ;;  %v17929_v8 = vsub.f32 %v17928_v40, %v13245_v54 }
 0x958   : > { %v3870_v38 = vmul.f32 1.442695, %v17926_v6  ;;  %v3874_v45 = vmul.f32 1.442695, %v17927_v48  ;;  %9314 = vpow2.f32 %v3862_v3  ;;  %v17930_v26 = vpack.c.bf16 %v13383_v23, %v13376_v36  ;;  %v9297_v44 = vpop.eup %9296 }
 0x959   : > { %v3878_v63 = vmul.f32 1.442695, %v17929_v8  ;;  %v3904_v15 = vadd.f32 %v13511_v56, %v3903_v18  ;;  %9316 = vpow2.f32 %v3866_v17  ;;  %v3925_v42 = vadd.f32 %v9279_v55, %v3924_v16  ;;  %v9299_v5 = vpop.eup %9298 }
 0x95a   : > { %8380 = vmatpush1.bf16.msra.mxu0 %v17930_v26  ;;  %v8397_v46 = vpack.c.bf16 %v9295_v50, %v9293_v35  ;;  %9318 = vpow2.f32 %v3870_v38  ;;  %v9301_v0 = vpop.eup %9300  ;;  %v8401_v54 = vpack.c.bf16 %v9299_v5, %v9297_v44  ;;  %v17931_v23 = vpack.c.bf16 %v13398_v39, %v13391_v20 }
 0x95b   : > { %8382 = vmatprep.subr.bf16.mxu0 %v8381_v29  ;;  %v3905_v37 = vadd.f32 %v13519_v12, %v3904_v15  ;;  %9320 = vpow2.f32 %v3874_v45  ;;  %v3926_v31 = vadd.f32 %v9281_v60, %v3925_v42  ;;  %v9303_v3 = vpop.eup %9302  ;;  %v17932_v6 = vpack.c.bf16 %v13412_v47, %v13406_v58 }
 0x95c   : > { %9322 = vpow2.f32 %v3878_v63  ;;  %v9305_v36 = vpop.eup %9304  ;;  %v8405_v29 = vpack.c.bf16 %v9303_v3, %v9301_v0  ;;  %v17934_v15 = vpack.c.bf16 %v13437_v34, %v13431_v27  ;;  %v17938_v27 = vpack.c.bf16 %v13476_v11, %v13467_v62 }
 0x95d   : > { %v3906_v33 = vadd.f32 %v13526_v9, %v3905_v37  ;;  %v3927_v55 = vadd.f32 %v9283_v21, %v3926_v31  ;;  %v9307_v52 = vpop.eup %9306  ;;  %v17941_v62 = vpack.c.bf16 %v13526_v9, %v13519_v12  ;;  %v17947_v9 = vld [vmem:[#allocation46_spill] sm:$0xff] }
 0x95e   : > { %8384 = vmatpush1.bf16.msra.mxu0 %v17931_v23  ;;  %v9309_v17 = vpop.eup %9308  ;;  %v8409_v49 = vpack.c.bf16 %v9307_v52, %v9305_v36  ;;  %v17948_v12 = vld [vmem:[#allocation50_spill] sm:$0xff] }
 0x95f   : > { %8386 = vmatprep.subr.bf16.mxu0 %v8385_v4  ;;  %v3907_v41 = vadd.f32 %v13534_v14, %v3906_v33  ;;  %v3928_v22 = vadd.f32 %v9285_v28, %v3927_v55  ;;  %v9311_v60 = vpop.eup %9310  ;;  %v17933_v28 = vpack.c.bf16 %v13425_v59, %v13418_v30  ;;  %v17935_v30 = vld [vmem:[#allocation100_spill] sm:$0xff]  ;;  %v17949_v23 = vld [vmem:[#allocation26_spill] sm:$0xff]  ;;  %v17954_v55 = vld [vmem:[#allocation149_spill] sm:$0xff] }
 0x960   : > { %v8413_v48 = vpack.c.bf16 %v9311_v60, %v9309_v17  ;;  %v17936_v59 = vpack.c.bf16 %v13448_v24, %v17935_v30  ;;  %v17939_v24 = vpack.c.bf16 %v13496_v13, %v13487_v19  ;;  %v17942_v19 = vpack.c.bf16 %v13542_v10, %v13534_v14  ;;  %v4104_v30 = vpop.trf.xlu1 }
 0x961   : > { %v9313_v38 = vpop.eup %9312  ;;  %v3908_v39 = vadd.f32 %v13542_v10, %v3907_v41  ;;  %v3929_v20 = vadd.f32 %v9287_v7, %v3928_v22  ;;  %v17952_v10 = vld [vmem:[#allocation48_spill] sm:$0xff]  ;;  %v17953_v14 = vmov 0.0   ;;  %v17960_v41 = vld [vmem:[#allocation167_spill] sm:$0xff]  ;;  %v17961_v22 = vld [vmem:[#allocation170_spill] sm:$0xff] }
 0x962   : > { %8388 = vmatpush1.bf16.msra.mxu0 %v17932_v6  ;;  %v9315_v21 = vpop.eup %9314  ;;  %v17964_v6 = vld [vmem:[#allocation179_spill] sm:$0xff] }
 0x963   : > { %8390 = vmatprep.subr.bf16.mxu0 %v8389_v51  ;;  %v9317_v4 = vpop.eup %9316  ;;  %v3909_v45 = vadd.f32 %v13547_v57, %v3908_v39  ;;  %v3930_v18 = vadd.f32 %v9289_v1, %v3929_v20  ;;  %v8417_v16 = vpack.c.bf16 %v9315_v21, %v9313_v38  ;;  %v17966_v39 = vld [vmem:[#allocation183_spill] sm:$0xff]  ;;  %v17967_v20 = vld [vmem:[#allocation185_spill] sm:$0xff] }
 0x964   : > { %v9319_v40 = vpop.eup %9318 }
 0x965   : > { %v9321_v8 = vpop.eup %9320  ;;  %v13653_v47 = vadd.f32 %v13555_v61, %v3909_v45  ;;  %v3931_v58 = vadd.f32 %v9291_v2, %v3930_v18  ;;  %v8421_v7 = vpack.c.bf16 %v9319_v40, %v9317_v4  ;;  %v17937_v2 = vpack.c.bf16 %v13459_v32, %v13453_v43  ;;  %v17970_v45 = vld [vmem:[#allocation153_spill] sm:$0xff]  ;;  %v17971_v18 = vld [vmem:[#allocation156_spill] sm:$0xff] }
 0x966   : > { %8392 = vmatpush1.bf16.msra.mxu0 %v17933_v28  ;;  %v9323_v51 = vpop.eup %9322  ;;  %v17940_v43 = vpack.c.bf16 %v13511_v56, %v13504_v25  ;;  %v17943_v25 = vpack.c.bf16 %v13555_v61, %v13547_v57  ;;  %v17944_v56 = vld [vmem:[#allocation27_spill] sm:$0xff]  ;;  %v17955_v57 = vld [vmem:[#allocation152_spill] sm:$0xff]  ;;  %v17974_v28 = vld [vmem:[#allocation165_spill] sm:$0xff] }
 0x967   : > { %8394 = vmatprep.subr.bf16.mxu0 %v8393_v53  ;;  %v3932_v63 = vadd.f32 %v9293_v35, %v3931_v58  ;;  %v8425_v26 = vpack.c.bf16 %v9323_v51, %v9321_v8  ;;  %v17956_v61 = vld [vmem:[#allocation155_spill] sm:$0xff] }
 0x968   : > { %v17976_v58 = vld [vmem:[#allocation171_spill] sm:$0xff] }
 0x969   : > { %v3933_v1 = vadd.f32 %v9295_v50, %v3932_v63  ;;  %v17979_v63 = vld [vmem:[#allocation180_spill] sm:$0xff] }
 0x96a   : > { %8396 = vmatpush1.bf16.msra.mxu0 %v17934_v15  ;;  %v17981_v15 = vld [vmem:[#allocation184_spill] sm:$0xff] }
 0x96b   : > { %8398 = vmatprep.subr.bf16.mxu0 %v8397_v46  ;;  %v3934_v42 = vadd.f32 %v9297_v44, %v3933_v1  ;;  %v17982_v1 = vld [vmem:[#allocation186_spill] sm:$0xff] }
 0x96d   : > { %v3935_v37 = vadd.f32 %v9299_v5, %v3934_v42  ;;  %v17983_v42 = vld [vmem:[#allocation188_spill] sm:$0xff] }
 0x96e   : > { %8400 = vmatpush1.bf16.msra.mxu0 %v17936_v59  ;;  %v17984_v59 = vld [vmem:[#allocation62_spill] sm:$0xff] }
 0x96f   : > { %8402 = vmatprep.subr.bf16.mxu0 %v8401_v54  ;;  %v3936_v31 = vadd.f32 %v9301_v0, %v3935_v37  ;;  %v17945_v54 = vld [vmem:[#allocation25_spill] sm:$0xff]  ;;  %v3911_v37 = vrot.slane %v13653_v47, 4 }
 0x971   : > { %v3937_v35 = vadd.f32 %v9303_v3, %v3936_v31  ;;  %v17946_v3 = vpack.c.bf16 %v17944_v56, %v17945_v54 }
 0x972   : > { %8404 = vmatpush1.bf16.msra.mxu0 %v17937_v2  ;;  %v3912_v2 = vadd.f32 %v3911_v37, %v13653_v47 }
 0x973   : > { %8406 = vmatprep.subr.bf16.mxu0 %v8405_v29  ;;  %v3938_v53 = vadd.f32 %v9305_v36, %v3937_v35  ;;  %v17950_v36 = vld [vmem:[#allocation24_spill] sm:$0xff]  ;;  %v17957_v29 = vld [vmem:[#allocation158_spill] sm:$0xff] }
 0x974   : > { %v17951_v33 = vpack.c.bf16 %v17949_v23, %v17950_v36 }
 0x975   : > { %v3939_v34 = vadd.f32 %v9307_v52, %v3938_v53  ;;  %v17958_v52 = vld [vmem:[#allocation161_spill] sm:$0xff]  ;;  %v3913_v53 = vrot.slane %v3912_v2, 2 }
 0x976   : > { %8408 = vmatpush1.bf16.msra.mxu0 %v17938_v27 }
 0x977   : > { %8410 = vmatprep.subr.bf16.mxu0 %v8409_v49  ;;  %v3940_v50 = vadd.f32 %v9309_v17, %v3939_v34  ;;  %v17959_v17 = vld [vmem:[#allocation164_spill] sm:$0xff]  ;;  %v3914_v34 = vadd.f32 %v3913_v53, %v3912_v2 }
 0x978   : > { %v17962_v49 = vld [vmem:[#allocation172_spill] sm:$0xff] }
 0x979   : > { %v3941_v44 = vadd.f32 %v9311_v60, %v3940_v50  ;;  %v17963_v60 = vld [vmem:[#allocation174_spill] sm:$0xff] }
 0x97a   : > { %8412 = vmatpush1.bf16.msra.mxu0 %v17939_v24  ;;  %v3915_v24 = vrot.slane %v3914_v34, 1 }
 0x97b   : > { %8414 = vmatprep.subr.bf16.mxu0 %v8413_v48  ;;  %v3942_v46 = vadd.f32 %v9313_v38, %v3941_v44  ;;  %v17965_v38 = vld [vmem:[#allocation181_spill] sm:$0xff]  ;;  %v17968_v48 = vld [vmem:[#allocation187_spill] sm:$0xff] }
 0x97d   : > { %v3943_v32 = vadd.f32 %v9315_v21, %v3942_v46  ;;  %v4072_v21 = vpop.trf.xlu0  ;;  %v3916_v46 = vadd.f32 %v3915_v24, %v3914_v34 }
 0x97e   : > { %8416 = vmatpush1.bf16.msra.mxu0 %v17940_v43 }
 0x97f   : > { %8418 = vmatprep.subr.bf16.mxu0 %v8417_v16  ;;  %v3944_v5 = vadd.f32 %v9317_v4, %v3943_v32  ;;  %v17969_v4 = vld [vmem:[#allocation150_spill] sm:$0xff]  ;;  %v17972_v16 = vld [vmem:[#allocation159_spill] sm:$0xff]  ;;  %9324 = vrcp.f32 %v3916_v46 }
 0x981   : > { %v3945_v11 = vadd.f32 %v9319_v40, %v3944_v5  ;;  %v17973_v40 = vld [vmem:[#allocation162_spill] sm:$0xff] }
 0x982   : > { %8420 = vmatpush1.bf16.msra.mxu0 %v17941_v62 }
 0x983   : > { %8422 = vmatprep.subr.bf16.mxu0 %v8421_v7  ;;  %v3946_v0 = vadd.f32 %v9321_v8, %v3945_v11  ;;  %v17975_v8 = vld [vmem:[#allocation168_spill] sm:$0xff]  ;;  %v17977_v7 = vld [vmem:[#allocation173_spill] sm:$0xff] }
 0x985   : > { %v13679_v13 = vadd.f32 %v9323_v51, %v3946_v0  ;;  %v17978_v51 = vld [vmem:[#allocation176_spill] sm:$0xff] }
 0x986   : > { %8424 = vmatpush1.bf16.msra.mxu0 %v17942_v19 }
 0x987   : > { %8426 = vmatprep.subr.bf16.mxu0 %v8425_v26  ;;  %v17980_v26 = vld [vmem:[#allocation182_spill] sm:$0xff]  ;;  %v3948_v31 = vrot.slane %v13679_v13, 4 }
 0x989   : > { %v3949_v35 = vadd.f32 %v3948_v31, %v13679_v13  ;;  %v9325_v32 = vpop.eup %9324 }
 0x98a   : > { %8428 = vmatpush1.bf16.msra.mxu0 %v17943_v25 }
 0x98b   : > { %8430 = vmatprep.subr.bf16.mxu0 %v17946_v3  ;;  %v3950_v27 = vrot.slane %v3949_v35, 2 }
 0x98d   : > { %4019 = vmatmul.mubr.f32.vlgmr.msra.gmra.mrb[164].mxu0 %v17947_v9  ;;  %v3951_v50 = vadd.f32 %v3950_v27, %v3949_v35 }
 0x98e   : > { %4024 = vmatprep.mubr.f32.mxu0 %v17948_v12  ;;  %8432 = vmatpush1.bf16.msra.mxu0 %v17951_v33 }
 0x98f   : > { %v3952_v44 = vrot.slane %v3951_v50, 1 }
 0x991   : > { %4025 = vmatmul.mubr.f32.gmra.mrb[166].mxu0 %v17952_v10  ;;  %v3953_v43 = vadd.f32 %v3952_v44, %v3951_v50 }
 0x992   : > { %4265 = vmatprep.mubr.f32.mxu0 %v17953_v14 }
 0x993   : > { %9326 = vrcp.f32 %v3953_v43 }
 0x995   : > { %7990 = vmatmul.mubr.msk.f32.vlgmr.msra.gmra.mrb[168].mxu0 %vm728_vm0, %v17954_v55 }
 0x996   : > { %4271 = vmatprep.mubr.f32.mxu0 %v17953_v14 }
 0x999   : > { %7991 = vmatmul.mubr.msk.f32.gmra.mrb[170].mxu0 %vm728_vm0, %v17955_v57 }
 0x99a   : > { %4277 = vmatprep.mubr.f32.mxu0 %v17953_v14 }
 0x99d   : > { %7992 = vmatmul.mubr.msk.f32.gmra.mrb[172].mxu0 %vm728_vm0, %v17956_v61  ;;  %v9327_v62 = vpop.eup %9326 }
 0x99e   : > { %4283 = vmatprep.mubr.f32.mxu0 %v17953_v14 }
 0x9a1   : > { %7993 = vmatmul.mubr.msk.f32.gmra.mrb[174].mxu0 %vm728_vm0, %v17957_v29 }
 0x9a2   : > { %4289 = vmatprep.mubr.f32.mxu0 %v17953_v14 }
 0x9a5   : > { %7994 = vmatmul.mubr.msk.f32.gmra.mrb[176].mxu0 %vm728_vm0, %v17958_v52 }
 0x9a6   : > { %4295 = vmatprep.mubr.f32.mxu0 %v17953_v14 }
 0x9a9   : > { %7995 = vmatmul.mubr.msk.f32.gmra.mrb[178].mxu0 %vm728_vm0, %v17959_v17 }
 0x9aa   : > { %4301 = vmatprep.mubr.f32.mxu0 %v17953_v14 }
 0x9ad   : > { %7996 = vmatmul.mubr.msk.f32.gmra.mrb[180].mxu0 %vm728_vm0, %v17960_v41 }
 0x9ae   : > { %4307 = vmatprep.mubr.f32.mxu0 %v17953_v14 }
 0x9b1   : > { %7997 = vmatmul.mubr.msk.f32.gmra.mrb[182].mxu0 %vm728_vm0, %v17961_v22 }
 0x9b2   : > { %4313 = vmatprep.mubr.f32.mxu0 %v17953_v14 }
 0x9b5   : > { %7998 = vmatmul.mubr.msk.f32.gmra.mrb[184].mxu0 %vm728_vm0, %v17962_v49 }
 0x9b6   : > { %4319 = vmatprep.mubr.f32.mxu0 %v17953_v14 }
 0x9b9   : > { %7999 = vmatmul.mubr.msk.f32.gmra.mrb[186].mxu0 %vm728_vm0, %v17963_v60 }
 0x9ba   : > { %4325 = vmatprep.mubr.f32.mxu0 %v17953_v14 }
 0x9bd   : > { %8000 = vmatmul.mubr.msk.f32.gmra.mrb[188].mxu0 %vm728_vm0, %v17964_v6 }
 0x9be   : > { %4331 = vmatprep.mubr.f32.mxu0 %v17953_v14 }
 0x9c1   : > { %8001 = vmatmul.mubr.msk.f32.gmra.mrb[190].mxu0 %vm728_vm0, %v17965_v38 }
 0x9c2   : > { %4337 = vmatprep.mubr.f32.mxu0 %v17953_v14 }
 0x9c5   : > { %8002 = vmatmul.mubr.msk.f32.gmra.mrb[192].mxu0 %vm728_vm0, %v17966_v39 }
 0x9c6   : > { %4343 = vmatprep.mubr.f32.mxu0 %v17953_v14 }
 0x9c9   : > { %8003 = vmatmul.mubr.msk.f32.gmra.mrb[194].mxu0 %vm728_vm0, %v17967_v20 }
 0x9ca   : > { %4349 = vmatprep.mubr.f32.mxu0 %v17953_v14 }
 0x9cd   : > { %8004 = vmatmul.mubr.msk.f32.gmra.mrb[196].mxu0 %vm728_vm0, %v17968_v48 }
 0x9ce   : > { %4355 = vmatprep.mubr.f32.mxu0 %v17953_v14 }
 0x9d1   : > { %8005 = vmatmul.mubr.msk.f32.gmra.mrb[198].mxu0 %vm728_vm0, %v4072_v21 }
 0x9d2   : > { %4361 = vmatprep.mubr.f32.mxu0 %v17953_v14 }
 0x9d5   : > { %8006 = vmatmul.mubr.msk.f32.gmra.mrb[200].mxu0 %vm728_vm0, %v17969_v4 }
 0x9d6   : > { %4367 = vmatprep.mubr.f32.mxu0 %v17953_v14 }
 0x9d9   : > { %8007 = vmatmul.mubr.msk.f32.gmra.mrb[202].mxu0 %vm728_vm0, %v17970_v45 }
 0x9da   : > { %4373 = vmatprep.mubr.f32.mxu0 %v17953_v14 }
 0x9dd   : > { %8008 = vmatmul.mubr.msk.f32.gmra.mrb[204].mxu0 %vm728_vm0, %v17971_v18 }
 0x9de   : > { %4379 = vmatprep.mubr.f32.mxu0 %v17953_v14 }
 0x9e1   : > { %8009 = vmatmul.mubr.msk.f32.gmra.mrb[206].mxu0 %vm728_vm0, %v17972_v16 }
 0x9e2   : > { %4385 = vmatprep.mubr.f32.mxu0 %v17953_v14 }
 0x9e5   : > { %8010 = vmatmul.mubr.msk.f32.gmra.mrb[208].mxu0 %vm728_vm0, %v17973_v40 }
 0x9e6   : > { %4391 = vmatprep.mubr.f32.mxu0 %v17953_v14 }
 0x9e9   : > { %8011 = vmatmul.mubr.msk.f32.gmra.mrb[210].mxu0 %vm728_vm0, %v17974_v28 }
 0x9ea   : > { %4397 = vmatprep.mubr.f32.mxu0 %v17953_v14 }
 0x9ed   : > { %8012 = vmatmul.mubr.msk.f32.gmra.mrb[212].mxu0 %vm728_vm0, %v17975_v8 }
 0x9ee   : > { %4403 = vmatprep.mubr.f32.mxu0 %v17953_v14 }
 0x9f1   : > { %8013 = vmatmul.mubr.msk.f32.gmra.mrb[214].mxu0 %vm728_vm0, %v17976_v58 }
 0x9f2   : > { %4409 = vmatprep.mubr.f32.mxu0 %v17953_v14 }
 0x9f5   : > { %8014 = vmatmul.mubr.msk.f32.gmra.mrb[216].mxu0 %vm728_vm0, %v17977_v7 }
 0x9f6   : > { %4415 = vmatprep.mubr.f32.mxu0 %v17953_v14 }
 0x9f9   : > { %8015 = vmatmul.mubr.msk.f32.gmra.mrb[218].mxu0 %vm728_vm0, %v17978_v51 }
 0x9fa   : > { %4421 = vmatprep.mubr.f32.mxu0 %v17953_v14 }
 0x9fd   : > { %8016 = vmatmul.mubr.msk.f32.gmra.mrb[220].mxu0 %vm728_vm0, %v17979_v63 }
 0x9fe   : > { %4427 = vmatprep.mubr.f32.mxu0 %v17953_v14 }
 0xa01   : > { %8017 = vmatmul.mubr.msk.f32.gmra.mrb[222].mxu0 %vm728_vm0, %v17980_v26 }
 0xa02   : > { %4433 = vmatprep.mubr.f32.mxu0 %v17953_v14 }
 0xa05   : > { %8018 = vmatmul.mubr.msk.f32.gmra.mrb[224].mxu0 %vm728_vm0, %v17981_v15 }
 0xa06   : > { %4439 = vmatprep.mubr.f32.mxu0 %v17953_v14 }
 0xa09   : > { %8019 = vmatmul.mubr.msk.f32.gmra.mrb[226].mxu0 %vm728_vm0, %v17982_v1 }
 0xa0a   : > { %4445 = vmatprep.mubr.f32.mxu0 %v17953_v14 }
 0xa0d   : > { %8020 = vmatmul.mubr.msk.f32.gmra.mrb[228].mxu0 %vm728_vm0, %v17983_v42 }
 0xa0e   : > { %4451 = vmatprep.mubr.f32.mxu0 %v17953_v14 }
 0xa11   : > { %8021 = vmatmul.mubr.msk.f32.gmra.mrb[230].mxu0 %vm728_vm0, %v4104_v30 }
 0xa12   : > { %5706 = vmatprep.mubr.f32.mxu0 %v17984_v59 }
 0xa60   : > { %v4020_v5 = vpop.f32.mrb[164].mxu0 }
 0xa61   : > { %v13792_v11 = vmul.f32 %v9325_v32, %v4020_v5  ;;  %v4022_v0 = vpop.f32.mrb[165].mxu0 }
 0xa62   : > { %v13794_v19 = vmul.f32 %v9327_v62, %v4022_v0 }
 0xa63   : > { %17985 = vst [vmem:[#allocation102_spill] sm:$0xff] %v13792_v11 }
 0xa64   : > { %17986 = vst [vmem:[#allocation73_spill] sm:$0xff] %v13794_v19  ;;  %v4026_v47 = vpop.f32.mrb[166].mxu0 }
 0xa65   : > { %v13796_v13 = vmul.f32 %v9325_v32, %v4026_v47  ;;  %v4028_v25 = vpop.f32.mrb[167].mxu0 }
 0xa66   : > { %v13798_v56 = vmul.f32 %v9327_v62, %v4028_v25 }
 0xa67   : > { %17987 = vst [vmem:[#allocation75_spill] sm:$0xff] %v13796_v13 }
 0xa68   : > { %17988 = vst [vmem:[#allocation77_spill] sm:$0xff] %v13798_v56  ;;  %v13804_v9 = vpop.f32.mrb[168].mxu0 }
 0xa69   : > { %v13806_v12 = vpop.f32.mrb[169].mxu0 }
 0xa6c   : > { %v13808_v23 = vpop.f32.mrb[170].mxu0 }
 0xa6d   : > { %v13810_v36 = vpop.f32.mrb[171].mxu0 }
 0xa70   : > { %v13812_v33 = vpop.f32.mrb[172].mxu0 }
 0xa71   : > { %v4458_v10 = vmax.f32 %v13804_v9, %v13812_v33  ;;  %v13816_v55 = vpop.f32.mrb[173].mxu0 }
 0xa72   : > { %v4495_v57 = vmax.f32 %v13806_v12, %v13816_v55 }
 0xa74   : > { %v13820_v61 = vpop.f32.mrb[174].mxu0 }
 0xa75   : > { %v4459_v29 = vmax.f32 %v13808_v23, %v13820_v61  ;;  %v13824_v52 = vpop.f32.mrb[175].mxu0 }
 0xa76   : > { %v4496_v17 = vmax.f32 %v13810_v36, %v13824_v52 }
 0xa78   : > { %v13828_v41 = vpop.f32.mrb[176].mxu0 }
 0xa79   : > { %v4460_v22 = vmax.f32 %v4458_v10, %v13828_v41  ;;  %v13831_v49 = vpop.f32.mrb[177].mxu0 }
 0xa7a   : > { %v4497_v60 = vmax.f32 %v4495_v57, %v13831_v49 }
 0xa7c   : > { %v13834_v6 = vpop.f32.mrb[178].mxu0 }
 0xa7d   : > { %v4461_v38 = vmax.f32 %v4459_v29, %v13834_v6  ;;  %v13837_v39 = vpop.f32.mrb[179].mxu0 }
 0xa7e   : > { %v4498_v20 = vmax.f32 %v4496_v17, %v13837_v39 }
 0xa80   : > { %v13840_v48 = vpop.f32.mrb[180].mxu0 }
 0xa81   : > { %v4462_v21 = vmax.f32 %v4460_v22, %v13840_v48  ;;  %v13843_v4 = vpop.f32.mrb[181].mxu0 }
 0xa82   : > { %v4499_v45 = vmax.f32 %v4497_v60, %v13843_v4 }
 0xa84   : > { %v13846_v18 = vpop.f32.mrb[182].mxu0 }
 0xa85   : > { %v4463_v16 = vmax.f32 %v4461_v38, %v13846_v18  ;;  %v13849_v40 = vpop.f32.mrb[183].mxu0 }
 0xa86   : > { %v4500_v28 = vmax.f32 %v4498_v20, %v13849_v40 }
 0xa88   : > { %v13852_v8 = vpop.f32.mrb[184].mxu0 }
 0xa89   : > { %v4464_v58 = vmax.f32 %v4462_v21, %v13852_v8  ;;  %v13855_v7 = vpop.f32.mrb[185].mxu0 }
 0xa8a   : > { %v4501_v51 = vmax.f32 %v4499_v45, %v13855_v7 }
 0xa8c   : > { %v13858_v63 = vpop.f32.mrb[186].mxu0 }
 0xa8d   : > { %v4465_v26 = vmax.f32 %v4463_v16, %v13858_v63  ;;  %v13861_v15 = vpop.f32.mrb[187].mxu0 }
 0xa8e   : > { %v4502_v1 = vmax.f32 %v4500_v28, %v13861_v15 }
 0xa90   : > { %v13864_v42 = vpop.f32.mrb[188].mxu0 }
 0xa91   : > { %v4466_v30 = vmax.f32 %v4464_v58, %v13864_v42  ;;  %v13867_v59 = vpop.f32.mrb[189].mxu0 }
 0xa92   : > { %v4503_v37 = vmax.f32 %v4501_v51, %v13867_v59 }
 0xa94   : > { %v13870_v31 = vpop.f32.mrb[190].mxu0 }
 0xa95   : > { %v4467_v2 = vmax.f32 %v4465_v26, %v13870_v31  ;;  %v13873_v35 = vpop.f32.mrb[191].mxu0 }
 0xa96   : > { %17989 = vst [vmem:[#allocation79_spill] sm:$0xff] %v13873_v35  ;;  %v4504_v53 = vmax.f32 %v4502_v1, %v13873_v35 }
 0xa98   : > { %v13876_v27 = vpop.f32.mrb[192].mxu0 }
 0xa99   : > { %v4468_v34 = vmax.f32 %v4466_v30, %v13876_v27  ;;  %v13879_v50 = vpop.f32.mrb[193].mxu0 }
 0xa9a   : > { %17990 = vst [vmem:[#allocation81_spill] sm:$0xff] %v13879_v50  ;;  %v4505_v24 = vmax.f32 %v4503_v37, %v13879_v50 }
 0xa9c   : > { %v13882_v44 = vpop.f32.mrb[194].mxu0 }
 0xa9d   : > { %v4469_v46 = vmax.f32 %v4467_v2, %v13882_v44  ;;  %v13885_v43 = vpop.f32.mrb[195].mxu0 }
 0xa9e   : > { %17991 = vst [vmem:[#allocation83_spill] sm:$0xff] %v13885_v43  ;;  %v4506_v32 = vmax.f32 %v4504_v53, %v13885_v43 }
 0xaa0   : > { %v13888_v5 = vpop.f32.mrb[196].mxu0 }
 0xaa1   : > { %v4470_v62 = vmax.f32 %v4468_v34, %v13888_v5  ;;  %v13891_v0 = vpop.f32.mrb[197].mxu0 }
 0xaa2   : > { %17992 = vst [vmem:[#allocation85_spill] sm:$0xff] %v13891_v0  ;;  %v4507_v47 = vmax.f32 %v4505_v24, %v13891_v0 }
 0xaa4   : > { %v13894_v25 = vpop.f32.mrb[198].mxu0 }
 0xaa5   : > { %v4471_v10 = vmax.f32 %v4469_v46, %v13894_v25  ;;  %v13897_v57 = vpop.f32.mrb[199].mxu0 }
 0xaa6   : > { %17993 = vst [vmem:[#allocation87_spill] sm:$0xff] %v13897_v57  ;;  %v4508_v29 = vmax.f32 %v4506_v32, %v13897_v57 }
 0xaa8   : > { %v13900_v17 = vpop.f32.mrb[200].mxu0 }
 0xaa9   : > { %v4472_v22 = vmax.f32 %v4470_v62, %v13900_v17  ;;  %v13903_v60 = vpop.f32.mrb[201].mxu0 }
 0xaaa   : > { %17994 = vst [vmem:[#allocation89_spill] sm:$0xff] %v13903_v60  ;;  %v4509_v38 = vmax.f32 %v4507_v47, %v13903_v60 }
 0xaac   : > { %v13906_v20 = vpop.f32.mrb[202].mxu0 }
 0xaad   : > { %v4473_v21 = vmax.f32 %v4471_v10, %v13906_v20  ;;  %v13909_v45 = vpop.f32.mrb[203].mxu0 }
 0xaae   : > { %17995 = vst [vmem:[#allocation91_spill] sm:$0xff] %v13909_v45  ;;  %v4510_v16 = vmax.f32 %v4508_v29, %v13909_v45 }
 0xab0   : > { %v13912_v28 = vpop.f32.mrb[204].mxu0 }
 0xab1   : > { %v4474_v58 = vmax.f32 %v4472_v22, %v13912_v28  ;;  %v13915_v51 = vpop.f32.mrb[205].mxu0 }
 0xab2   : > { %17996 = vst [vmem:[#allocation93_spill] sm:$0xff] %v13915_v51  ;;  %v4511_v26 = vmax.f32 %v4509_v38, %v13915_v51 }
 0xab4   : > { %v13918_v1 = vpop.f32.mrb[206].mxu0 }
 0xab5   : > { %v4475_v30 = vmax.f32 %v4473_v21, %v13918_v1  ;;  %v13921_v37 = vpop.f32.mrb[207].mxu0 }
 0xab6   : > { %17997 = vst [vmem:[#allocation95_spill] sm:$0xff] %v13921_v37  ;;  %v4512_v2 = vmax.f32 %v4510_v16, %v13921_v37 }
 0xab8   : > { %v13924_v53 = vpop.f32.mrb[208].mxu0 }
 0xab9   : > { %v4476_v34 = vmax.f32 %v4474_v58, %v13924_v53  ;;  %v13927_v24 = vpop.f32.mrb[209].mxu0 }
 0xaba   : > { %17998 = vst [vmem:[#allocation97_spill] sm:$0xff] %v13927_v24  ;;  %v4513_v46 = vmax.f32 %v4511_v26, %v13927_v24 }
 0xabc   : > { %v13930_v32 = vpop.f32.mrb[210].mxu0 }
 0xabd   : > { %v4477_v62 = vmax.f32 %v4475_v30, %v13930_v32  ;;  %v13933_v47 = vpop.f32.mrb[211].mxu0 }
 0xabe   : > { %17999 = vst [vmem:[#allocation99_spill] sm:$0xff] %v13933_v47  ;;  %v4514_v10 = vmax.f32 %v4512_v2, %v13933_v47 }
 0xac0   : > { %v13936_v29 = vpop.f32.mrb[212].mxu0 }
 0xac1   : > { %v4478_v22 = vmax.f32 %v4476_v34, %v13936_v29  ;;  %v13939_v38 = vpop.f32.mrb[213].mxu0 }
 0xac2   : > { %18000 = vst [vmem:[#allocation101_spill] sm:$0xff] %v13939_v38  ;;  %v4515_v21 = vmax.f32 %v4513_v46, %v13939_v38 }
 0xac4   : > { %v13942_v16 = vpop.f32.mrb[214].mxu0 }
 0xac5   : > { %v4479_v58 = vmax.f32 %v4477_v62, %v13942_v16  ;;  %v13945_v26 = vpop.f32.mrb[215].mxu0 }
 0xac6   : > { %18001 = vst [vmem:[#allocation103_spill] sm:$0xff] %v13945_v26  ;;  %v4516_v30 = vmax.f32 %v4514_v10, %v13945_v26 }
 0xac8   : > { %v13948_v54 = vpop.f32.mrb[216].mxu0 }
 0xac9   : > { %v4480_v2 = vmax.f32 %v4478_v22, %v13948_v54  ;;  %v13951_v3 = vpop.f32.mrb[217].mxu0 }
 0xaca   : > { %18002 = vst [vmem:[#allocation61_spill] sm:$0xff] %v13951_v3  ;;  %v4517_v34 = vmax.f32 %v4515_v21, %v13951_v3 }
 0xacc   : > { %v13954_v11 = vpop.f32.mrb[218].mxu0 }
 0xacd   : > { %v4481_v46 = vmax.f32 %v4479_v58, %v13954_v11  ;;  %v13957_v13 = vpop.f32.mrb[219].mxu0 }
 0xace   : > { %18003 = vst [vmem:[#allocation63_spill] sm:$0xff] %v13957_v13  ;;  %v4518_v62 = vmax.f32 %v4516_v30, %v13957_v13 }
 0xad0   : > { %v13960_v19 = vpop.f32.mrb[220].mxu0 }
 0xad1   : > { %v4482_v10 = vmax.f32 %v4480_v2, %v13960_v19  ;;  %v13963_v56 = vpop.f32.mrb[221].mxu0 }
 0xad2   : > { %18004 = vst [vmem:[#allocation65_spill] sm:$0xff] %v13963_v56  ;;  %v4519_v22 = vmax.f32 %v4517_v34, %v13963_v56 }
 0xad4   : > { %v13966_v14 = vpop.f32.mrb[222].mxu0 }
 0xad5   : > { %v4483_v21 = vmax.f32 %v4481_v46, %v13966_v14  ;;  %v13969_v3 = vpop.f32.mrb[223].mxu0 }
 0xad6   : > { %18005 = vst [vmem:[#allocation67_spill] sm:$0xff] %v13969_v3  ;;  %v4520_v58 = vmax.f32 %v4518_v62, %v13969_v3 }
 0xad8   : > { %v13972_v26 = vpop.f32.mrb[224].mxu0 }
 0xad9   : > { %v4484_v30 = vmax.f32 %v4482_v10, %v13972_v26  ;;  %v13975_v13 = vpop.f32.mrb[225].mxu0 }
 0xada   : > { %18006 = vst [vmem:[#allocation69_spill] sm:$0xff] %v13975_v13  ;;  %v4521_v2 = vmax.f32 %v4519_v22, %v13975_v13 }
 0xadc   : > { %v13978_v38 = vpop.f32.mrb[226].mxu0 }
 0xadd   : > { %v4485_v34 = vmax.f32 %v4483_v21, %v13978_v38  ;;  %v13981_v56 = vpop.f32.mrb[227].mxu0 }
 0xade   : > { %18007 = vst [vmem:[#allocation71_spill] sm:$0xff] %v13981_v56  ;;  %v4522_v46 = vmax.f32 %v4520_v58, %v13981_v56 }
 0xae0   : > { %v13984_v47 = vpop.f32.mrb[228].mxu0 }
 0xae1   : > { %v4486_v62 = vmax.f32 %v4484_v30, %v13984_v47  ;;  %v13987_v3 = vpop.f32.mrb[229].mxu0 }
 0xae2   : > { %18008 = vst [vmem:[#allocation127_spill] sm:$0xff] %v13987_v3  ;;  %v4523_v10 = vmax.f32 %v4521_v2, %v13987_v3 }
 0xae4   : > { %v13990_v24 = vpop.f32.mrb[230].mxu0 }
 0xae5   : > { %v4487_v22 = vmax.f32 %v4485_v34, %v13990_v24  ;;  %v13993_v13 = vpop.f32.mrb[231].mxu0 }
 0xae6   : > { %18009 = vst [vmem:[#allocation130_spill] sm:$0xff] %v13993_v13  ;;  %v4524_v21 = vmax.f32 %v4522_v46, %v13993_v13 }
 0xae7   : > { %v4488_v37 = vmax.f32 %v4486_v62, %v4487_v22 }
 0xae8   : > { %v4525_v51 = vmax.f32 %v4523_v10, %v4524_v21 }
 0xae9   : > { %v4489_v45 = vrot.slane %v4488_v37, 4 }
 0xaea   : > { %v4526_v58 = vrot.slane %v4525_v51, 4 }
 0xaeb   : > { %v4490_v56 = vmax.f32 %v4488_v37, %v4489_v45 }
 0xaec   : > { %v4527_v60 = vmax.f32 %v4525_v51, %v4526_v58 }
 0xaed   : > { %v4491_v57 = vrot.slane %v4490_v56, 2 }
 0xaee   : > { %v4528_v30 = vrot.slane %v4527_v60, 2 }
 0xaef   : > { %v4492_v0 = vmax.f32 %v4490_v56, %v4491_v57  ;;  %v18029_v57 = vld [vmem:[#allocation127_spill] sm:$0xff] }
 0xaf0   : > { %v4529_v43 = vmax.f32 %v4527_v60, %v4528_v30 }
 0xaf1   : > { %v4493_v50 = vrot.slane %v4492_v0, 1 }
 0xaf2   : > { %v4530_v2 = vrot.slane %v4529_v43, 1 }
 0xaf3   : > { %v13996_v3 = vmax.f32 %v4492_v0, %v4493_v50 }
 0xaf4   : > { %v13998_v35 = vmax.f32 %v4529_v43, %v4530_v2 }
 0xaf5   : > { %v4532_v34 = vsub.f32 %v13804_v9, %v13996_v3  ;;  %v4534_v46 = vsub.f32 %v13808_v23, %v13996_v3  ;;  %v4536_v45 = vsub.f32 %v13812_v33, %v13996_v3  ;;  %v4538_v51 = vsub.f32 %v13820_v61, %v13996_v3 }
 0xaf6   : > { %v4540_v56 = vsub.f32 %v13828_v41, %v13996_v3  ;;  %v4542_v50 = vsub.f32 %v13834_v6, %v13996_v3  ;;  %v4544_v43 = vsub.f32 %v13840_v48, %v13996_v3  ;;  %v4546_v9 = vsub.f32 %v13846_v18, %v13996_v3 }
 0xaf7   : > { %v4548_v23 = vsub.f32 %v13852_v8, %v13996_v3  ;;  %v4550_v33 = vsub.f32 %v13858_v63, %v13996_v3  ;;  %v4552_v61 = vsub.f32 %v13864_v42, %v13996_v3  ;;  %v4554_v41 = vsub.f32 %v13870_v31, %v13996_v3 }
 0xaf8   : > { %v4556_v6 = vsub.f32 %v13876_v27, %v13996_v3  ;;  %v4558_v48 = vsub.f32 %v13882_v44, %v13996_v3  ;;  %v4560_v18 = vsub.f32 %v13888_v5, %v13996_v3  ;;  %v4562_v8 = vsub.f32 %v13894_v25, %v13996_v3 }
 0xaf9   : > { %v4564_v63 = vsub.f32 %v13900_v17, %v13996_v3  ;;  %v4566_v42 = vsub.f32 %v13906_v20, %v13996_v3  ;;  %v4568_v31 = vsub.f32 %v13912_v28, %v13996_v3  ;;  %v4570_v27 = vsub.f32 %v13918_v1, %v13996_v3 }
 0xafa   : > { %v4572_v44 = vsub.f32 %v13924_v53, %v13996_v3  ;;  %v4574_v5 = vsub.f32 %v13930_v32, %v13996_v3  ;;  %v4576_v0 = vsub.f32 %v13936_v29, %v13996_v3  ;;  %v4578_v25 = vsub.f32 %v13942_v16, %v13996_v3 }
 0xafb   : > { %v4596_v32 = vmul.f32 1.442695, %v4532_v34  ;;  %v4600_v29 = vmul.f32 1.442695, %v4534_v46  ;;  %v4604_v16 = vmul.f32 1.442695, %v4536_v45 }
 0xafc   : > { %v4608_v10 = vmul.f32 1.442695, %v4538_v51  ;;  %v4612_v21 = vmul.f32 1.442695, %v4540_v56  ;;  %v4616_v58 = vmul.f32 1.442695, %v4542_v50 }
 0xafd   : > { %9328 = vpow2.f32 %v4596_v32  ;;  %v4620_v30 = vmul.f32 1.442695, %v4544_v43  ;;  %v4624_v2 = vmul.f32 1.442695, %v4546_v9  ;;  %v4628_v37 = vmul.f32 1.442695, %v4548_v23 }
 0xafe   : > { %9330 = vpow2.f32 %v4600_v29  ;;  %v4632_v53 = vmul.f32 1.442695, %v4550_v33  ;;  %v4636_v34 = vmul.f32 1.442695, %v4552_v61  ;;  %v4640_v46 = vmul.f32 1.442695, %v4554_v41 }
 0xaff   : > { %9332 = vpow2.f32 %v4604_v16  ;;  %v4644_v45 = vmul.f32 1.442695, %v4556_v6  ;;  %v4648_v62 = vmul.f32 1.442695, %v4558_v48  ;;  %v4652_v51 = vmul.f32 1.442695, %v4560_v18 }
 0xb00   : > { %9334 = vpow2.f32 %v4608_v10  ;;  %v4656_v1 = vmul.f32 1.442695, %v4562_v8  ;;  %v4660_v22 = vmul.f32 1.442695, %v4564_v63  ;;  %v4664_v32 = vmul.f32 1.442695, %v4566_v42 }
 0xb01   : > { %9336 = vpow2.f32 %v4612_v21  ;;  %v4668_v56 = vmul.f32 1.442695, %v4568_v31  ;;  %v4672_v50 = vmul.f32 1.442695, %v4570_v27  ;;  %v4676_v29 = vmul.f32 1.442695, %v4572_v44 }
 0xb02   : > { %9338 = vpow2.f32 %v4616_v58  ;;  %v14068_v43 = vmul.f32 1.442695, %v4574_v5  ;;  %v14070_v9 = vmul.f32 1.442695, %v4576_v0  ;;  %v14072_v23 = vmul.f32 1.442695, %v4578_v25 }
 0xb03   : > { %9340 = vpow2.f32 %v4620_v30  ;;  %v18010_v44 = vld [vmem:[#allocation79_spill] sm:$0xff]  ;;  %v18013_v58 = vld [vmem:[#allocation85_spill] sm:$0xff] }
 0xb04   : > { %9342 = vpow2.f32 %v4624_v2  ;;  %v18012_v16 = vld [vmem:[#allocation83_spill] sm:$0xff]  ;;  %v18017_v31 = vld [vmem:[#allocation93_spill] sm:$0xff] }
 0xb05   : > { %9344 = vpow2.f32 %v4628_v37  ;;  %v18011_v37 = vld [vmem:[#allocation81_spill] sm:$0xff]  ;;  %v18014_v2 = vld [vmem:[#allocation87_spill] sm:$0xff] }
 0xb06   : > { %9346 = vpow2.f32 %v4632_v53  ;;  %v18016_v27 = vld [vmem:[#allocation91_spill] sm:$0xff]  ;;  %v18019_v8 = vld [vmem:[#allocation97_spill] sm:$0xff] }
 0xb07   : > { %v14082_v48 = vpop.eup %9328  ;;  %9348 = vpow2.f32 %v4636_v34  ;;  %v18018_v30 = vld [vmem:[#allocation95_spill] sm:$0xff]  ;;  %v18021_v10 = vld [vmem:[#allocation101_spill] sm:$0xff] }
 0xb08   : > { %v14090_v42 = vpop.eup %9330  ;;  %9350 = vpow2.f32 %v4640_v46  ;;  %v18015_v46 = vld [vmem:[#allocation89_spill] sm:$0xff]  ;;  %v18020_v18 = vld [vmem:[#allocation99_spill] sm:$0xff] }
 0xb09   : > { %v14098_v0 = vpop.eup %9332  ;;  %9352 = vpow2.f32 %v4644_v45  ;;  %v4724_v25 = vadd.f32 %v14090_v42, %v14082_v48  ;;  %v18022_v41 = vld [vmem:[#allocation103_spill] sm:$0xff]  ;;  %v18023_v34 = vld [vmem:[#allocation61_spill] sm:$0xff] }
 0xb0a   : > { %v14106_v21 = vpop.eup %9334  ;;  %9354 = vpow2.f32 %v4648_v62  ;;  %v18024_v33 = vld [vmem:[#allocation63_spill] sm:$0xff] }
 0xb0b   : > { %v14114_v5 = vpop.eup %9336  ;;  %9356 = vpow2.f32 %v4652_v51  ;;  %v4725_v53 = vadd.f32 %v14098_v0, %v4724_v25  ;;  %v18026_v62 = vld [vmem:[#allocation67_spill] sm:$0xff] }
 0xb0c   : > { %v14121_v63 = vpop.eup %9338  ;;  %9358 = vpow2.f32 %v4656_v1  ;;  %v18028_v45 = vld [vmem:[#allocation71_spill] sm:$0xff] }
 0xb0d   : > { %v14129_v6 = vpop.eup %9340  ;;  %9360 = vpow2.f32 %v4660_v22  ;;  %v4726_v25 = vadd.f32 %v14106_v21, %v4725_v53 }
 0xb0e   : > { %v14136_v61 = vpop.eup %9342  ;;  %9362 = vpow2.f32 %v4664_v32 }
 0xb0f   : > { %v14144_v20 = vpop.eup %9344  ;;  %9364 = vpow2.f32 %v4668_v56  ;;  %v4727_v53 = vadd.f32 %v14114_v5, %v4726_v25  ;;  %v18030_v25 = vsub.f32 %v13948_v54, %v13996_v3 }
 0xb10   : > { %v14151_v17 = vpop.eup %9346  ;;  %9366 = vpow2.f32 %v4672_v50  ;;  %v18031_v50 = vsub.f32 %v13954_v11, %v13996_v3 }
 0xb11   : > { %v14159_v28 = vpop.eup %9348  ;;  %9368 = vpow2.f32 %v4676_v29  ;;  %v4692_v1 = vmul.f32 1.442695, %v18030_v25  ;;  %v4728_v32 = vadd.f32 %v14121_v63, %v4727_v53  ;;  %v18032_v29 = vsub.f32 %v13960_v19, %v13996_v3 }
 0xb12   : > { %v14165_v60 = vpop.eup %9350  ;;  %9370 = vpow2.f32 %v14068_v43  ;;  %v4696_v22 = vmul.f32 1.442695, %v18031_v50  ;;  %v18033_v43 = vsub.f32 %v13966_v14, %v13996_v3  ;;  %v18037_v14 = vsub.f32 %v13984_v47, %v13996_v3 }
 0xb13   : > { %v14171_v51 = vpop.eup %9352  ;;  %9372 = vpow2.f32 %v14070_v9  ;;  %v4700_v56 = vmul.f32 1.442695, %v18032_v29  ;;  %v4729_v54 = vadd.f32 %v14129_v6, %v4728_v32  ;;  %v18034_v9 = vsub.f32 %v13972_v26, %v13996_v3 }
 0xb14   : > { %v14178_v25 = vpop.eup %9354  ;;  %9374 = vpow2.f32 %v14072_v23  ;;  %v4704_v53 = vmul.f32 1.442695, %v18033_v43  ;;  %v18035_v32 = vsub.f32 %v13978_v38, %v13996_v3 }
 0xb15   : > { %v14184_v11 = vpop.eup %9356  ;;  %9376 = vpow2.f32 %v4692_v1  ;;  %v4708_v50 = vmul.f32 1.442695, %v18034_v9  ;;  %v4730_v19 = vadd.f32 %v14136_v61, %v4729_v54  ;;  %v4716_v1 = vmul.f32 1.442695, %v18037_v14 }
 0xb16   : > { %v14190_v29 = vpop.eup %9358  ;;  %9378 = vpow2.f32 %v4696_v22  ;;  %v4712_v23 = vmul.f32 1.442695, %v18035_v32  ;;  %v18038_v54 = vsub.f32 %v13990_v24, %v13996_v3  ;;  %v18041_v3 = vsub.f32 %v13816_v55, %v13998_v35 }
 0xb17   : > { %v14195_v13 = vpop.eup %9360  ;;  %9380 = vpow2.f32 %v4700_v56  ;;  %v4731_v43 = vadd.f32 %v14144_v20, %v4730_v19  ;;  %v18039_v56 = vsub.f32 %v13806_v12, %v13998_v35  ;;  %v18040_v19 = vsub.f32 %v13810_v36, %v13998_v35 }
 0xb18   : > { %18036 = vst [vmem:[#allocation133_spill] sm:$0xff] %v14195_v13  ;;  %v14201_v26 = vpop.eup %9362  ;;  %9382 = vpow2.f32 %v4704_v53  ;;  %v4720_v22 = vmul.f32 1.442695, %v18038_v54  ;;  %v4606_v24 = vmul.f32 1.442695, %v18041_v3  ;;  %v18042_v12 = vsub.f32 %v13824_v52, %v13998_v35 }
 0xb19   : > { %v14206_v9 = vpop.eup %9364  ;;  %9384 = vpow2.f32 %v4708_v50  ;;  %v4732_v38 = vadd.f32 %v14151_v17, %v4731_v43  ;;  %v4598_v32 = vmul.f32 1.442695, %v18039_v56  ;;  %v4602_v53 = vmul.f32 1.442695, %v18040_v19 }
 0xb1a   : > { %v14212_v47 = vpop.eup %9366  ;;  %9386 = vpow2.f32 %v4712_v23  ;;  %v4610_v43 = vmul.f32 1.442695, %v18042_v12  ;;  %v18043_v23 = vsub.f32 %v13831_v49, %v13998_v35  ;;  %v18044_v36 = vsub.f32 %v13837_v39, %v13998_v35 }
 0xb1b   : > { %v14220_v14 = vpop.eup %9368  ;;  %9388 = vpow2.f32 %v4716_v1  ;;  %v4733_v50 = vadd.f32 %v14159_v28, %v4732_v38  ;;  %v18045_v1 = vsub.f32 %v13843_v4, %v13998_v35  ;;  %v18046_v38 = vsub.f32 %v13849_v40, %v13998_v35 }
 0xb1c   : > { %v4614_v54 = vmul.f32 1.442695, %v18043_v23  ;;  %v14229_v56 = vpop.eup %9370  ;;  %9390 = vpow2.f32 %v4720_v22  ;;  %v4618_v55 = vmul.f32 1.442695, %v18044_v36  ;;  %v18047_v22 = vsub.f32 %v13855_v7, %v13998_v35 }
 0xb1d   : > { %v4622_v19 = vmul.f32 1.442695, %v18045_v1  ;;  %v4626_v52 = vmul.f32 1.442695, %v18046_v38  ;;  %v14240_v3 = vpop.eup %9372  ;;  %v4734_v49 = vadd.f32 %v14165_v60, %v4733_v50  ;;  %9392 = vpow2.f32 %v4598_v32 }
 0xb1e   : > { %v4630_v12 = vmul.f32 1.442695, %v18047_v22  ;;  %v18048_v39 = vsub.f32 %v13861_v15, %v13998_v35  ;;  %v14249_v36 = vpop.eup %9374  ;;  %9394 = vpow2.f32 %v4602_v53 }
 0xb1f   : > { %v14257_v50 = vpop.eup %9376  ;;  %v4735_v7 = vadd.f32 %v14171_v51, %v4734_v49  ;;  %9396 = vpow2.f32 %v4606_v24 }
 0xb20   : > { %v4634_v23 = vmul.f32 1.442695, %v18048_v39  ;;  %v14264_v1 = vpop.eup %9378  ;;  %9398 = vpow2.f32 %v4610_v43  ;;  %v18049_v43 = vsub.f32 %v13867_v59, %v13998_v35  ;;  %v18050_v39 = vsub.f32 %v18010_v44, %v13998_v35 }
 0xb21   : > { %v14272_v49 = vpop.eup %9380  ;;  %v4736_v24 = vadd.f32 %v14178_v25, %v4735_v7  ;;  %9400 = vpow2.f32 %v4614_v54 }
 0xb22   : > { %v14279_v15 = vpop.eup %9382  ;;  %9402 = vpow2.f32 %v4618_v55  ;;  %v4638_v53 = vmul.f32 1.442695, %v18049_v43  ;;  %v4642_v22 = vmul.f32 1.442695, %v18050_v39 }
 0xb23   : > { %v14287_v7 = vpop.eup %9384  ;;  %v4737_v54 = vadd.f32 %v14184_v11, %v4736_v24  ;;  %9404 = vpow2.f32 %v4622_v19  ;;  %v18051_v19 = vsub.f32 %v18011_v37, %v13998_v35  ;;  %v18056_v37 = vsub.f32 %v18016_v27, %v13998_v35 }
 0xb24   : > { %v14295_v32 = vpop.eup %9386  ;;  %9406 = vpow2.f32 %v4626_v52  ;;  %v18052_v52 = vsub.f32 %v18012_v16, %v13998_v35  ;;  %v18055_v16 = vsub.f32 %v18015_v46, %v13998_v35  ;;  %v18059_v27 = vsub.f32 %v18019_v8, %v13998_v35 }
 0xb25   : > { %v14300_v38 = vpop.eup %9388  ;;  %v4738_v40 = vadd.f32 %v14190_v29, %v4737_v54  ;;  %9408 = vpow2.f32 %v4630_v12  ;;  %v4646_v59 = vmul.f32 1.442695, %v18051_v19  ;;  %v18053_v12 = vsub.f32 %v18013_v58, %v13998_v35 }
 0xb26   : > { %v14308_v43 = vpop.eup %9390  ;;  %9410 = vpow2.f32 %v4634_v23  ;;  %v4650_v44 = vmul.f32 1.442695, %v18052_v52  ;;  %v18054_v23 = vsub.f32 %v18014_v2, %v13998_v35  ;;  %v4662_v52 = vmul.f32 1.442695, %v18055_v16 }
 0xb27   : > { %v9393_v39 = vpop.eup %9392  ;;  %v4739_v55 = vadd.f32 %v14195_v13, %v4738_v40  ;;  %9412 = vpow2.f32 %v4638_v53  ;;  %v4654_v54 = vmul.f32 1.442695, %v18053_v12  ;;  %v18057_v2 = vsub.f32 %v18017_v31, %v13998_v35 }
 0xb28   : > { %v9395_v19 = vpop.eup %9394  ;;  %9414 = vpow2.f32 %v4642_v22  ;;  %v4658_v24 = vmul.f32 1.442695, %v18054_v23  ;;  %v4666_v22 = vmul.f32 1.442695, %v18056_v37  ;;  %v4678_v37 = vmul.f32 1.442695, %v18059_v27 }
 0xb29   : > { %v9397_v4 = vpop.eup %9396  ;;  %v4740_v40 = vadd.f32 %v14201_v26, %v4739_v55  ;;  %9416 = vpow2.f32 %v4646_v59  ;;  %v4761_v53 = vadd.f32 %v9395_v19, %v9393_v39  ;;  %v8433_v58 = vpack.c.bf16 %v9395_v19, %v9393_v39 }
 0xb2a   : > { %v9399_v12 = vpop.eup %9398  ;;  %9418 = vpow2.f32 %v4650_v44  ;;  %v4670_v23 = vmul.f32 1.442695, %v18057_v2  ;;  %v18058_v44 = vsub.f32 %v18018_v30, %v13998_v35  ;;  %v18060_v31 = vpack.c.bf16 %v14090_v42, %v14082_v48 }
 0xb2b   : > { %v9401_v13 = vpop.eup %9400  ;;  %v4741_v46 = vadd.f32 %v14206_v9, %v4740_v40  ;;  %9420 = vpow2.f32 %v4654_v54  ;;  %v4762_v16 = vadd.f32 %v9397_v4, %v4761_v53  ;;  %8434 = vmatprep.subr.bf16.mxu1 %v8433_v58  ;;  %v8437_v55 = vpack.c.bf16 %v9399_v12, %v9397_v4 }
 0xb2c   : > { %v9403_v59 = vpop.eup %9402  ;;  %9422 = vpow2.f32 %v4658_v24  ;;  %v4674_v39 = vmul.f32 1.442695, %v18058_v44  ;;  %8436 = vmatpush1.bf16.msra.mxu1 %v18060_v31  ;;  %v18061_v30 = vsub.f32 %v18020_v18, %v13998_v35  ;;  %v18062_v8 = vsub.f32 %v18021_v10, %v13998_v35  ;;  %v18067_v31 = vld [vmem:[#allocation65_spill] sm:$0xff] }
 0xb2d   : > { %v9405_v19 = vpop.eup %9404  ;;  %v4742_v54 = vadd.f32 %v14212_v47, %v4741_v46  ;;  %9424 = vpow2.f32 %v4662_v52  ;;  %v4763_v40 = vadd.f32 %v9399_v12, %v4762_v16  ;;  %8438 = vmatprep.subr.bf16.mxu1 %v8437_v55  ;;  %v8441_v4 = vpack.c.bf16 %v9403_v59, %v9401_v13 }
 0xb2e   : > { %v9407_v24 = vpop.eup %9406  ;;  %9426 = vpow2.f32 %v4666_v22  ;;  %v4682_v53 = vmul.f32 1.442695, %v18061_v30  ;;  %v4686_v58 = vmul.f32 1.442695, %v18062_v8  ;;  %v18063_v12 = vsub.f32 %v18022_v41, %v13998_v35 }
 0xb2f   : > { %v9409_v2 = vpop.eup %9408  ;;  %v4743_v48 = vadd.f32 %v14220_v14, %v4742_v54  ;;  %9428 = vpow2.f32 %v4670_v23  ;;  %v4764_v42 = vadd.f32 %v9401_v13, %v4763_v40  ;;  %v8445_v46 = vpack.c.bf16 %v9407_v24, %v9405_v19 }
 0xb30   : > { %v9411_v52 = vpop.eup %9410  ;;  %9430 = vpow2.f32 %v4674_v39  ;;  %v4690_v22 = vmul.f32 1.442695, %v18063_v12  ;;  %v18064_v18 = vsub.f32 %v18023_v34, %v13998_v35  ;;  %v18065_v10 = vpack.c.bf16 %v14106_v21, %v14098_v0 }
 0xb31   : > { %v9413_v55 = vpop.eup %9412  ;;  %v4744_v44 = vadd.f32 %v14229_v56, %v4743_v48  ;;  %9432 = vpow2.f32 %v4678_v37  ;;  %v4765_v13 = vadd.f32 %v9403_v59, %v4764_v42  ;;  %v8449_v23 = vpack.c.bf16 %v9411_v52, %v9409_v2 }
 0xb32   : > { %v4694_v16 = vmul.f32 1.442695, %v18064_v18  ;;  %8440 = vmatpush1.bf16.msra.mxu1 %v18065_v10  ;;  %v9415_v39 = vpop.eup %9414  ;;  %9434 = vpow2.f32 %v4682_v53  ;;  %v18066_v41 = vsub.f32 %v18024_v33, %v13998_v35  ;;  %v18068_v34 = vsub.f32 %v18067_v31, %v13998_v35  ;;  %v18070_v53 = vld [vmem:[#allocation69_spill] sm:$0xff] }
 0xb33   : > { %8442 = vmatprep.subr.bf16.mxu1 %v8441_v4  ;;  %v9417_v40 = vpop.eup %9416  ;;  %v4745_v0 = vadd.f32 %v14240_v3, %v4744_v44  ;;  %9436 = vpow2.f32 %v4686_v58  ;;  %v4766_v21 = vadd.f32 %v9405_v19, %v4765_v13  ;;  %v8453_v30 = vpack.c.bf16 %v9415_v39, %v9413_v55 }
 0xb34   : > { %v4698_v27 = vmul.f32 1.442695, %v18066_v41  ;;  %v4702_v54 = vmul.f32 1.442695, %v18068_v34  ;;  %v9419_v37 = vpop.eup %9418  ;;  %9438 = vpow2.f32 %v4690_v22  ;;  %v18069_v59 = vsub.f32 %v18026_v62, %v13998_v35 }
 0xb35   : > { %v18071_v33 = vsub.f32 %v18070_v53, %v13998_v35  ;;  %v18072_v48 = vpack.c.bf16 %v14121_v63, %v14114_v5  ;;  %v9421_v42 = vpop.eup %9420  ;;  %v4746_v12 = vadd.f32 %v14249_v36, %v4745_v0  ;;  %9440 = vpow2.f32 %v4694_v16 }
 0xb36   : > { %v4706_v4 = vmul.f32 1.442695, %v18069_v59  ;;  %v4767_v19 = vadd.f32 %v9407_v24, %v4766_v21  ;;  %v8457_v58 = vpack.c.bf16 %v9419_v37, %v9417_v40  ;;  %v9423_v22 = vpop.eup %9422  ;;  %9442 = vpow2.f32 %v4698_v27  ;;  %v18075_v24 = vld [vmem:[#allocation130_spill] sm:$0xff] }
 0xb37   : > { %v4710_v8 = vmul.f32 1.442695, %v18071_v33  ;;  %8444 = vmatpush1.bf16.msra.mxu1 %v18072_v48  ;;  %v18073_v62 = vsub.f32 %v18028_v45, %v13998_v35  ;;  %v18074_v10 = vsub.f32 %v18029_v57, %v13998_v35  ;;  %v9425_v13 = vpop.eup %9424  ;;  %v4747_v63 = vadd.f32 %v14257_v50, %v4746_v12 }
 0xb38   : > { %8446 = vmatprep.subr.bf16.mxu1 %v8445_v46  ;;  %9444 = vpow2.f32 %v4702_v54  ;;  %v4768_v5 = vadd.f32 %v9409_v2, %v4767_v19  ;;  %v8461_v41 = vpack.c.bf16 %v9423_v22, %v9421_v42  ;;  %v9427_v16 = vpop.eup %9426  ;;  %v18076_v46 = vsub.f32 %v18075_v24, %v13998_v35 }
 0xb39   : > { %v4714_v18 = vmul.f32 1.442695, %v18073_v62  ;;  %v4718_v44 = vmul.f32 1.442695, %v18074_v10  ;;  %9446 = vpow2.f32 %v4706_v4  ;;  %v18077_v45 = vpack.c.bf16 %v14136_v61, %v14129_v6  ;;  %v9429_v31 = vpop.eup %9428 }
 0xb3a   : > { %v4722_v27 = vmul.f32 1.442695, %v18076_v46  ;;  %v4748_v57 = vadd.f32 %v14264_v1, %v4747_v63  ;;  %9448 = vpow2.f32 %v4710_v8  ;;  %v4769_v34 = vadd.f32 %v9411_v52, %v4768_v5  ;;  %v9431_v54 = vpop.eup %9430 }
 0xb3b   : > { %8448 = vmatpush1.bf16.msra.mxu1 %v18077_v45  ;;  %v8465_v0 = vpack.c.bf16 %v9427_v16, %v9425_v13  ;;  %9450 = vpow2.f32 %v4714_v18  ;;  %v9433_v2 = vpop.eup %9432  ;;  %v8469_v35 = vpack.c.bf16 %v9431_v54, %v9429_v31  ;;  %v18078_v61 = vpack.c.bf16 %v14151_v17, %v14144_v20 }
 0xb3c   : > { %8450 = vmatprep.subr.bf16.mxu1 %v8449_v23  ;;  %v4749_v21 = vadd.f32 %v14272_v49, %v4748_v57  ;;  %9452 = vpow2.f32 %v4718_v44  ;;  %v4770_v59 = vadd.f32 %v9413_v55, %v4769_v34  ;;  %v9435_v4 = vpop.eup %9434  ;;  %v18079_v62 = vpack.c.bf16 %v14165_v60, %v14159_v28 }
 0xb3d   : > { %9454 = vpow2.f32 %v4722_v27  ;;  %v9437_v6 = vpop.eup %9436  ;;  %v8473_v23 = vpack.c.bf16 %v9435_v4, %v9433_v2  ;;  %v18081_v57 = vpack.c.bf16 %v14190_v29, %v14184_v11  ;;  %v18085_v11 = vpack.c.bf16 %v14229_v56, %v14220_v14 }
 0xb3e   : > { %v4750_v53 = vadd.f32 %v14279_v15, %v4749_v21  ;;  %v4771_v52 = vadd.f32 %v9415_v39, %v4770_v59  ;;  %v9439_v33 = vpop.eup %9438  ;;  %v18088_v56 = vpack.c.bf16 %v14279_v15, %v14272_v49  ;;  %v18094_v49 = vld [vmem:[#allocation52_spill] sm:$0xff] }
 0xb3f   : > { %8452 = vmatpush1.bf16.msra.mxu1 %v18078_v61  ;;  %v9441_v8 = vpop.eup %9440  ;;  %v8477_v19 = vpack.c.bf16 %v9439_v33, %v9437_v6 }
 0xb40   : > { %8454 = vmatprep.subr.bf16.mxu1 %v8453_v30  ;;  %v4751_v48 = vadd.f32 %v14287_v7, %v4750_v53  ;;  %v4772_v12 = vadd.f32 %v9417_v40, %v4771_v52  ;;  %v9443_v55 = vpop.eup %9442  ;;  %v18080_v40 = vpack.c.bf16 %v14178_v25, %v14171_v51  ;;  %v18082_v51 = vld [vmem:[#allocation133_spill] sm:$0xff] }
 0xb41   : > { %v8481_v10 = vpack.c.bf16 %v9443_v55, %v9441_v8  ;;  %v18083_v25 = vpack.c.bf16 %v14201_v26, %v18082_v51  ;;  %v18086_v26 = vpack.c.bf16 %v14249_v36, %v14240_v3  ;;  %v18089_v36 = vpack.c.bf16 %v14295_v32, %v14287_v7  ;;  %v18092_v53 = vld [vmem:[#allocation29_spill] sm:$0xff] }
 0xb42   : > { %v9445_v18 = vpop.eup %9444  ;;  %v4752_v17 = vadd.f32 %v14295_v32, %v4751_v48  ;;  %v4773_v20 = vadd.f32 %v9419_v37, %v4772_v12  ;;  %v18097_v32 = vld [vmem:[#allocation28_spill] sm:$0xff]  ;;  %v18100_v48 = vmov 0.0  }
 0xb43   : > { %8456 = vmatpush1.bf16.msra.mxu1 %v18079_v62  ;;  %v9447_v39 = vpop.eup %9446 }
 0xb44   : > { %8458 = vmatprep.subr.bf16.mxu1 %v8457_v58  ;;  %v9449_v30 = vpop.eup %9448  ;;  %v4753_v44 = vadd.f32 %v14300_v38, %v4752_v17  ;;  %v4774_v63 = vadd.f32 %v9421_v42, %v4773_v20  ;;  %v8485_v5 = vpack.c.bf16 %v9447_v39, %v9445_v18 }
 0xb45   : > { %v9451_v24 = vpop.eup %9450 }
 0xb46   : > { %v9453_v46 = vpop.eup %9452  ;;  %v14406_v60 = vadd.f32 %v14308_v43, %v4753_v44  ;;  %v4775_v28 = vadd.f32 %v9423_v22, %v4774_v63  ;;  %v8489_v37 = vpack.c.bf16 %v9451_v24, %v9449_v30  ;;  %v18084_v22 = vpack.c.bf16 %v14212_v47, %v14206_v9 }
 0xb47   : > { %8460 = vmatpush1.bf16.msra.mxu1 %v18080_v40  ;;  %v9455_v58 = vpop.eup %9454  ;;  %v18087_v47 = vpack.c.bf16 %v14264_v1, %v14257_v50  ;;  %v18090_v50 = vpack.c.bf16 %v14308_v43, %v14300_v38  ;;  %v18091_v1 = vld [vmem:[#allocation31_spill] sm:$0xff] }
 0xb48   : > { %8462 = vmatprep.subr.bf16.mxu1 %v8461_v41  ;;  %v4776_v27 = vadd.f32 %v9425_v13, %v4775_v28  ;;  %v8493_v45 = vpack.c.bf16 %v9455_v58, %v9453_v46  ;;  %v4901_v41 = vpop.trf.xlu0  ;;  %v18093_v52 = vpack.c.bf16 %v18091_v1, %v18092_v53 }
 0xb4a   : > { %v4777_v42 = vadd.f32 %v9427_v16, %v4776_v27 }
 0xb4b   : > { %8464 = vmatpush1.bf16.msra.mxu1 %v18081_v57 }
 0xb4c   : > { %8466 = vmatprep.subr.bf16.mxu1 %v8465_v0  ;;  %v4778_v34 = vadd.f32 %v9429_v31, %v4777_v42  ;;  %v4902_v31 = vpop.trf.xlu0 }
 0xb4e   : > { %v4779_v21 = vadd.f32 %v9431_v54, %v4778_v34 }
 0xb4f   : > { %8468 = vmatpush1.bf16.msra.mxu1 %v18083_v25  ;;  %v18101_v25 = vld [vmem:[#allocation70_spill] sm:$0xff] }
 0xb50   : > { %8470 = vmatprep.subr.bf16.mxu1 %v8469_v35  ;;  %v4780_v59 = vadd.f32 %v9433_v2, %v4779_v21  ;;  %v4903_v2 = vpop.trf.xlu0  ;;  %v4755_v21 = vrot.slane %v14406_v60, 4 }
 0xb52   : > { %v4781_v13 = vadd.f32 %v9435_v4, %v4780_v59 }
 0xb53   : > { %8472 = vmatpush1.bf16.msra.mxu1 %v18084_v22  ;;  %v4756_v22 = vadd.f32 %v4755_v21, %v14406_v60 }
 0xb54   : > { %8474 = vmatprep.subr.bf16.mxu1 %v8473_v23  ;;  %v4782_v61 = vadd.f32 %v9437_v6, %v4781_v13  ;;  %v4904_v4 = vpop.trf.xlu0  ;;  %v18095_v23 = vld [vmem:[#allocation58_spill] sm:$0xff] }
 0xb56   : > { %v4783_v29 = vadd.f32 %v9439_v33, %v4782_v61  ;;  %v18096_v33 = vld [vmem:[#allocation30_spill] sm:$0xff] }
 0xb57   : > { %8476 = vmatpush1.bf16.msra.mxu1 %v18085_v11  ;;  %v18098_v7 = vpack.c.bf16 %v18096_v33, %v18097_v32 }
 0xb58   : > { %8478 = vmatprep.subr.bf16.mxu1 %v8477_v19  ;;  %v4784_v16 = vadd.f32 %v9441_v8, %v4783_v29  ;;  %v4905_v15 = vpop.trf.xlu0  ;;  %v18099_v8 = vld [vmem:[#allocation56_spill] sm:$0xff] }
 0xb5a   : > { %v4785_v0 = vadd.f32 %v9443_v55, %v4784_v16 }
 0xb5b   : > { %8480 = vmatpush1.bf16.msra.mxu1 %v18086_v26 }
 0xb5c   : > { %8482 = vmatprep.subr.bf16.mxu1 %v8481_v10  ;;  %v4786_v9 = vadd.f32 %v9445_v18, %v4785_v0  ;;  %v4906_v12 = vpop.trf.xlu0  ;;  %v4933_v18 = vpop.trf.xlu1 }
 0xb5e   : > { %v4787_v54 = vadd.f32 %v9447_v39, %v4786_v9 }
 0xb5f   : > { %8484 = vmatpush1.bf16.msra.mxu1 %v18087_v47 }
 0xb60   : > { %8486 = vmatprep.subr.bf16.mxu1 %v8485_v5  ;;  %v4788_v14 = vadd.f32 %v9449_v30, %v4787_v54  ;;  %v4907_v38 = vpop.trf.xlu0  ;;  %v4934_v20 = vpop.trf.xlu1 }
 0xb62   : > { %v4789_v35 = vadd.f32 %v9451_v24, %v4788_v14 }
 0xb63   : > { %8488 = vmatpush1.bf16.msra.mxu1 %v18088_v56 }
 0xb64   : > { %8490 = vmatprep.subr.bf16.mxu1 %v8489_v37  ;;  %v4790_v3 = vadd.f32 %v9453_v46, %v4789_v35  ;;  %v4908_v43 = vpop.trf.xlu0  ;;  %v4935_v39 = vpop.trf.xlu1 }
 0xb66   : > { %v14432_v6 = vadd.f32 %v9455_v58, %v4790_v3 }
 0xb67   : > { %8492 = vmatpush1.bf16.msra.mxu1 %v18089_v36 }
 0xb68   : > { %8494 = vmatprep.subr.bf16.mxu1 %v8493_v45  ;;  %v4909_v19 = vpop.trf.xlu0  ;;  %v4936_v44 = vpop.trf.xlu1  ;;  %v4792_v59 = vrot.slane %v14432_v6, 4 }
 0xb6a   : > { %v4793_v13 = vadd.f32 %v4792_v59, %v14432_v6 }
 0xb6b   : > { %8496 = vmatpush1.bf16.msra.mxu1 %v18090_v50 }
 0xb6c   : > { %8498 = vmatprep.subr.bf16.mxu1 %v18093_v52  ;;  %v4910_v55 = vpop.trf.xlu0  ;;  %v4937_v5 = vpop.trf.xlu1  ;;  %v4794_v61 = vrot.slane %v4793_v13, 2 }
 0xb6e   : > { %4863 = vmatmul.mubr.f32.vlgmr.msra.gmra.mrb[200].mxu1 %v18094_v49  ;;  %v4795_v29 = vadd.f32 %v4794_v61, %v4793_v13 }
 0xb6f   : > { %4868 = vmatprep.mubr.f32.mxu1 %v18095_v23  ;;  %8500 = vmatpush1.bf16.msra.mxu1 %v18098_v7 }
 0xb70   : > { %v4911_v62 = vpop.trf.xlu0  ;;  %v4938_v40 = vpop.trf.xlu1  ;;  %v4796_v26 = vrot.slane %v4795_v29, 1 }
 0xb72   : > { %4869 = vmatmul.mubr.f32.gmra.mrb[202].mxu1 %v18099_v8  ;;  %v4797_v0 = vadd.f32 %v4796_v26, %v4795_v29 }
 0xb73   : > { %5109 = vmatprep.mubr.f32.mxu1 %v18100_v48 }
 0xb74   : > { %v4912_v17 = vpop.trf.xlu0  ;;  %v4939_v46 = vpop.trf.xlu1 }
 0xb76   : > { %8022 = vmatmul.mubr.msk.f32.vlgmr.msra.gmra.mrb[204].mxu1 %vm728_vm0, %v4901_v41  ;;  %v4757_v41 = vrot.slane %v4756_v22, 2 }
 0xb77   : > { %5115 = vmatprep.mubr.f32.mxu1 %v18100_v48 }
 0xb78   : > { %v4913_v10 = vpop.trf.xlu0  ;;  %v4940_v28 = vpop.trf.xlu1  ;;  %v4758_v11 = vadd.f32 %v4757_v41, %v4756_v22 }
 0xb7a   : > { %8023 = vmatmul.mubr.msk.f32.gmra.mrb[206].mxu1 %vm728_vm0, %v4902_v31  ;;  %v4759_v16 = vrot.slane %v4758_v11, 1 }
 0xb7b   : > { %5121 = vmatprep.mubr.f32.mxu1 %v18100_v48 }
 0xb7c   : > { %v4914_v30 = vpop.trf.xlu0  ;;  %v4941_v37 = vpop.trf.xlu1  ;;  %v4760_v31 = vadd.f32 %v4759_v16, %v4758_v11 }
 0xb7e   : > { %8024 = vmatmul.mubr.msk.f32.gmra.mrb[208].mxu1 %vm728_vm0, %v4903_v2  ;;  %9456 = vrcp.f32 %v4760_v31 }
 0xb7f   : > { %5127 = vmatprep.mubr.f32.mxu1 %v18100_v48  ;;  %9458 = vrcp.f32 %v4797_v0 }
 0xb80   : > { %v4915_v63 = vpop.trf.xlu0  ;;  %v4942_v58 = vpop.trf.xlu1 }
 0xb82   : > { %8025 = vmatmul.mubr.msk.f32.gmra.mrb[210].mxu1 %vm728_vm0, %v4904_v4 }
 0xb83   : > { %5133 = vmatprep.mubr.f32.mxu1 %v18100_v48 }
 0xb84   : > { %v4916_v24 = vpop.trf.xlu0  ;;  %v4943_v27 = vpop.trf.xlu1 }
 0xb86   : > { %8026 = vmatmul.mubr.msk.f32.gmra.mrb[212].mxu1 %vm728_vm0, %v4905_v15 }
 0xb87   : > { %5139 = vmatprep.mubr.f32.mxu1 %v18100_v48 }
 0xb88   : > { %v4944_v45 = vpop.trf.xlu1  ;;  %v9457_v9 = vpop.eup %9456 }
 0xb89   : > { %v9459_v54 = vpop.eup %9458 }
 0xb8a   : > { %8027 = vmatmul.mubr.msk.f32.gmra.mrb[214].mxu1 %vm728_vm0, %v4906_v12 }
 0xb8b   : > { %5145 = vmatprep.mubr.f32.mxu1 %v18100_v48 }
 0xb8c   : > { %v4945_v57 = vpop.trf.xlu1 }
 0xb8e   : > { %8028 = vmatmul.mubr.msk.f32.gmra.mrb[216].mxu1 %vm728_vm0, %v4907_v38 }
 0xb8f   : > { %5151 = vmatprep.mubr.f32.mxu1 %v18100_v48 }
 0xb90   : > { %v4946_v42 = vpop.trf.xlu1 }
 0xb92   : > { %8029 = vmatmul.mubr.msk.f32.gmra.mrb[218].mxu1 %vm728_vm0, %v4908_v43 }
 0xb93   : > { %5157 = vmatprep.mubr.f32.mxu1 %v18100_v48 }
 0xb94   : > { %v4947_v34 = vpop.trf.xlu1 }
 0xb96   : > { %8030 = vmatmul.mubr.msk.f32.gmra.mrb[220].mxu1 %vm728_vm0, %v4909_v19 }
 0xb97   : > { %5163 = vmatprep.mubr.f32.mxu1 %v18100_v48 }
 0xb98   : > { %v4948_v51 = vpop.trf.xlu1 }
 0xb9a   : > { %8031 = vmatmul.mubr.msk.f32.gmra.mrb[222].mxu1 %vm728_vm0, %v4910_v55 }
 0xb9b   : > { %5169 = vmatprep.mubr.f32.mxu1 %v18100_v48 }
 0xb9e   : > { %8032 = vmatmul.mubr.msk.f32.gmra.mrb[224].mxu1 %vm728_vm0, %v4911_v62 }
 0xb9f   : > { %5175 = vmatprep.mubr.f32.mxu1 %v18100_v48 }
 0xba2   : > { %8033 = vmatmul.mubr.msk.f32.gmra.mrb[226].mxu1 %vm728_vm0, %v4912_v17 }
 0xba3   : > { %5181 = vmatprep.mubr.f32.mxu1 %v18100_v48 }
 0xba6   : > { %8034 = vmatmul.mubr.msk.f32.gmra.mrb[228].mxu1 %vm728_vm0, %v4913_v10 }
 0xba7   : > { %5187 = vmatprep.mubr.f32.mxu1 %v18100_v48 }
 0xbaa   : > { %8035 = vmatmul.mubr.msk.f32.gmra.mrb[230].mxu1 %vm728_vm0, %v4914_v30 }
 0xbab   : > { %5193 = vmatprep.mubr.f32.mxu1 %v18100_v48 }
 0xbae   : > { %8036 = vmatmul.mubr.msk.f32.gmra.mrb[232].mxu1 %vm728_vm0, %v4915_v63 }
 0xbaf   : > { %5199 = vmatprep.mubr.f32.mxu1 %v18100_v48 }
 0xbb2   : > { %8037 = vmatmul.mubr.msk.f32.gmra.mrb[234].mxu1 %vm728_vm0, %v4916_v24 }
 0xbb3   : > { %5205 = vmatprep.mubr.f32.mxu1 %v18100_v48 }
 0xbb6   : > { %8038 = vmatmul.mubr.msk.f32.gmra.mrb[236].mxu1 %vm728_vm0, %v4933_v18 }
 0xbb7   : > { %5211 = vmatprep.mubr.f32.mxu1 %v18100_v48 }
 0xbba   : > { %8039 = vmatmul.mubr.msk.f32.gmra.mrb[238].mxu1 %vm728_vm0, %v4934_v20 }
 0xbbb   : > { %5217 = vmatprep.mubr.f32.mxu1 %v18100_v48 }
 0xbbe   : > { %8040 = vmatmul.mubr.msk.f32.gmra.mrb[240].mxu1 %vm728_vm0, %v4935_v39 }
 0xbbf   : > { %5223 = vmatprep.mubr.f32.mxu1 %v18100_v48 }
 0xbc2   : > { %8041 = vmatmul.mubr.msk.f32.gmra.mrb[242].mxu1 %vm728_vm0, %v4936_v44 }
 0xbc3   : > { %5229 = vmatprep.mubr.f32.mxu1 %v18100_v48 }
 0xbc6   : > { %8042 = vmatmul.mubr.msk.f32.gmra.mrb[244].mxu1 %vm728_vm0, %v4937_v5 }
 0xbc7   : > { %5235 = vmatprep.mubr.f32.mxu1 %v18100_v48 }
 0xbca   : > { %8043 = vmatmul.mubr.msk.f32.gmra.mrb[246].mxu1 %vm728_vm0, %v4938_v40 }
 0xbcb   : > { %5241 = vmatprep.mubr.f32.mxu1 %v18100_v48 }
 0xbce   : > { %8044 = vmatmul.mubr.msk.f32.gmra.mrb[248].mxu1 %vm728_vm0, %v4939_v46 }
 0xbcf   : > { %5247 = vmatprep.mubr.f32.mxu1 %v18100_v48 }
 0xbd2   : > { %8045 = vmatmul.mubr.msk.f32.gmra.mrb[250].mxu1 %vm728_vm0, %v4940_v28 }
 0xbd3   : > { %5253 = vmatprep.mubr.f32.mxu1 %v18100_v48 }
 0xbd6   : > { %8046 = vmatmul.mubr.msk.f32.gmra.mrb[252].mxu1 %vm728_vm0, %v4941_v37 }
 0xbd7   : > { %5259 = vmatprep.mubr.f32.mxu1 %v18100_v48 }
 0xbda   : > { %8047 = vmatmul.mubr.msk.f32.gmra.mrb[254].mxu1 %vm728_vm0, %v4942_v58 }
 0xbdb   : > { %5265 = vmatprep.mubr.f32.mxu1 %v18100_v48 }
 0xbde   : > { %8048 = vmatmul.mubr.msk.f32.gmra.mrb[0].mxu1 %vm728_vm0, %v4943_v27 }
 0xbdf   : > { %5271 = vmatprep.mubr.f32.mxu1 %v18100_v48 }
 0xbe2   : > { %8049 = vmatmul.mubr.msk.f32.gmra.mrb[2].mxu1 %vm728_vm0, %v4944_v45 }
 0xbe3   : > { %5277 = vmatprep.mubr.f32.mxu1 %v18100_v48 }
 0xbe6   : > { %8050 = vmatmul.mubr.msk.f32.gmra.mrb[4].mxu1 %vm728_vm0, %v4945_v57 }
 0xbe7   : > { %5283 = vmatprep.mubr.f32.mxu1 %v18100_v48 }
 0xbea   : > { %8051 = vmatmul.mubr.msk.f32.gmra.mrb[6].mxu1 %vm728_vm0, %v4946_v42 }
 0xbeb   : > { %5289 = vmatprep.mubr.f32.mxu1 %v18100_v48 }
 0xbee   : > { %8052 = vmatmul.mubr.msk.f32.gmra.mrb[8].mxu1 %vm728_vm0, %v4947_v34 }
 0xbef   : > { %5295 = vmatprep.mubr.f32.mxu1 %v18100_v48 }
 0xbf2   : > { %8053 = vmatmul.mubr.msk.f32.gmra.mrb[10].mxu1 %vm728_vm0, %v4948_v51 }
 0xbf3   : > { %6550 = vmatprep.mubr.f32.mxu1 %v18101_v25 }
 0xc41   : > { %v4864_v47 = vpop.f32.mrb[200].mxu1 }
 0xc42   : > { %v14515_v2 = vmul.f32 %v9457_v9, %v4864_v47  ;;  %v4866_v14 = vpop.f32.mrb[201].mxu1 }
 0xc43   : > { %v14517_v56 = vmul.f32 %v9459_v54, %v4866_v14 }
 0xc44   : > { %18102 = vst [vmem:[#allocation136_spill] sm:$0xff] %v14515_v2 }
 0xc45   : > { %18103 = vst [vmem:[#allocation139_spill] sm:$0xff] %v14517_v56  ;;  %v4870_v60 = vpop.f32.mrb[202].mxu1 }
 0xc46   : > { %v14519_v35 = vmul.f32 %v9457_v9, %v4870_v60  ;;  %v4872_v3 = vpop.f32.mrb[203].mxu1 }
 0xc47   : > { %v14521_v36 = vmul.f32 %v9459_v54, %v4872_v3 }
 0xc48   : > { %18104 = vst [vmem:[#allocation142_spill] sm:$0xff] %v14519_v35 }
 0xc49   : > { %18105 = vst [vmem:[#allocation145_spill] sm:$0xff] %v14521_v36  ;;  %v14527_v50 = vpop.f32.mrb[204].mxu1 }
 0xc4a   : > { %v14529_v1 = vpop.f32.mrb[205].mxu1 }
 0xc4d   : > { %v14531_v53 = vpop.f32.mrb[206].mxu1 }
 0xc4e   : > { %v14533_v52 = vpop.f32.mrb[207].mxu1 }
 0xc51   : > { %v14535_v15 = vpop.f32.mrb[208].mxu1 }
 0xc52   : > { %v5302_v49 = vmax.f32 %v14527_v50, %v14535_v15  ;;  %v14539_v23 = vpop.f32.mrb[209].mxu1 }
 0xc53   : > { %v5339_v33 = vmax.f32 %v14529_v1, %v14539_v23 }
 0xc55   : > { %v14543_v32 = vpop.f32.mrb[210].mxu1 }
 0xc56   : > { %v5303_v7 = vmax.f32 %v14531_v53, %v14543_v32  ;;  %v14547_v8 = vpop.f32.mrb[211].mxu1 }
 0xc57   : > { %v5340_v12 = vmax.f32 %v14533_v52, %v14547_v8 }
 0xc59   : > { %v14551_v38 = vpop.f32.mrb[212].mxu1 }
 0xc5a   : > { %v5304_v43 = vmax.f32 %v5302_v49, %v14551_v38  ;;  %v14554_v19 = vpop.f32.mrb[213].mxu1 }
 0xc5b   : > { %v5341_v55 = vmax.f32 %v5339_v33, %v14554_v19 }
 0xc5d   : > { %v14557_v62 = vpop.f32.mrb[214].mxu1 }
 0xc5e   : > { %v5305_v18 = vmax.f32 %v5303_v7, %v14557_v62  ;;  %v14560_v17 = vpop.f32.mrb[215].mxu1 }
 0xc5f   : > { %v5342_v20 = vmax.f32 %v5340_v12, %v14560_v17 }
 0xc61   : > { %v14563_v10 = vpop.f32.mrb[216].mxu1 }
 0xc62   : > { %v5306_v39 = vmax.f32 %v5304_v43, %v14563_v10  ;;  %v14566_v30 = vpop.f32.mrb[217].mxu1 }
 0xc63   : > { %v5343_v44 = vmax.f32 %v5341_v55, %v14566_v30 }
 0xc65   : > { %v14569_v63 = vpop.f32.mrb[218].mxu1 }
 0xc66   : > { %v5307_v5 = vmax.f32 %v5305_v18, %v14569_v63  ;;  %v14572_v24 = vpop.f32.mrb[219].mxu1 }
 0xc67   : > { %v5344_v40 = vmax.f32 %v5342_v20, %v14572_v24 }
 0xc69   : > { %v14575_v46 = vpop.f32.mrb[220].mxu1 }
 0xc6a   : > { %v5308_v28 = vmax.f32 %v5306_v39, %v14575_v46  ;;  %v14578_v37 = vpop.f32.mrb[221].mxu1 }
 0xc6b   : > { %v5345_v58 = vmax.f32 %v5343_v44, %v14578_v37 }
 0xc6d   : > { %v14581_v27 = vpop.f32.mrb[222].mxu1 }
 0xc6e   : > { %v5309_v45 = vmax.f32 %v5307_v5, %v14581_v27  ;;  %v14584_v57 = vpop.f32.mrb[223].mxu1 }
 0xc6f   : > { %v5346_v42 = vmax.f32 %v5344_v40, %v14584_v57 }
 0xc71   : > { %v14587_v34 = vpop.f32.mrb[224].mxu1 }
 0xc72   : > { %v5310_v51 = vmax.f32 %v5308_v28, %v14587_v34  ;;  %v14590_v25 = vpop.f32.mrb[225].mxu1 }
 0xc73   : > { %v5347_v21 = vmax.f32 %v5345_v58, %v14590_v25 }
 0xc75   : > { %v14593_v59 = vpop.f32.mrb[226].mxu1 }
 0xc76   : > { %v5311_v22 = vmax.f32 %v5309_v45, %v14593_v59  ;;  %v14596_v13 = vpop.f32.mrb[227].mxu1 }
 0xc77   : > { %18106 = vst [vmem:[#allocation148_spill] sm:$0xff] %v14596_v13  ;;  %v5348_v41 = vmax.f32 %v5346_v42, %v14596_v13 }
 0xc79   : > { %v14599_v61 = vpop.f32.mrb[228].mxu1 }
 0xc7a   : > { %v5312_v11 = vmax.f32 %v5310_v51, %v14599_v61  ;;  %v14602_v29 = vpop.f32.mrb[229].mxu1 }
 0xc7b   : > { %18107 = vst [vmem:[#allocation151_spill] sm:$0xff] %v14602_v29  ;;  %v5349_v16 = vmax.f32 %v5347_v21, %v14602_v29 }
 0xc7d   : > { %v14605_v26 = vpop.f32.mrb[230].mxu1 }
 0xc7e   : > { %v5313_v31 = vmax.f32 %v5311_v22, %v14605_v26  ;;  %v14608_v0 = vpop.f32.mrb[231].mxu1 }
 0xc7f   : > { %18108 = vst [vmem:[#allocation163_spill] sm:$0xff] %v14608_v0  ;;  %v5350_v9 = vmax.f32 %v5348_v41, %v14608_v0 }
 0xc81   : > { %v14611_v47 = vpop.f32.mrb[232].mxu1 }
 0xc82   : > { %v5314_v54 = vmax.f32 %v5312_v11, %v14611_v47  ;;  %v14614_v14 = vpop.f32.mrb[233].mxu1 }
 0xc83   : > { %18109 = vst [vmem:[#allocation154_spill] sm:$0xff] %v14614_v14  ;;  %v5351_v60 = vmax.f32 %v5349_v16, %v14614_v14 }
 0xc85   : > { %v14617_v3 = vpop.f32.mrb[234].mxu1 }
 0xc86   : > { %v5315_v49 = vmax.f32 %v5313_v31, %v14617_v3  ;;  %v14620_v33 = vpop.f32.mrb[235].mxu1 }
 0xc87   : > { %18110 = vst [vmem:[#allocation169_spill] sm:$0xff] %v14620_v33  ;;  %v5352_v7 = vmax.f32 %v5350_v9, %v14620_v33 }
 0xc89   : > { %v14623_v12 = vpop.f32.mrb[236].mxu1 }
 0xc8a   : > { %v5316_v43 = vmax.f32 %v5314_v54, %v14623_v12  ;;  %v14626_v55 = vpop.f32.mrb[237].mxu1 }
 0xc8b   : > { %18111 = vst [vmem:[#allocation157_spill] sm:$0xff] %v14626_v55  ;;  %v5353_v18 = vmax.f32 %v5351_v60, %v14626_v55 }
 0xc8d   : > { %v14629_v20 = vpop.f32.mrb[238].mxu1 }
 0xc8e   : > { %v5317_v39 = vmax.f32 %v5315_v49, %v14629_v20  ;;  %v14632_v44 = vpop.f32.mrb[239].mxu1 }
 0xc8f   : > { %18112 = vst [vmem:[#allocation166_spill] sm:$0xff] %v14632_v44  ;;  %v5354_v5 = vmax.f32 %v5352_v7, %v14632_v44 }
 0xc91   : > { %v14635_v40 = vpop.f32.mrb[240].mxu1 }
 0xc92   : > { %v5318_v28 = vmax.f32 %v5316_v43, %v14635_v40  ;;  %v14638_v58 = vpop.f32.mrb[241].mxu1 }
 0xc93   : > { %18113 = vst [vmem:[#allocation15_spill] sm:$0xff] %v14638_v58  ;;  %v5355_v45 = vmax.f32 %v5353_v18, %v14638_v58 }
 0xc95   : > { %v14641_v42 = vpop.f32.mrb[242].mxu1 }
 0xc96   : > { %v5319_v51 = vmax.f32 %v5317_v39, %v14641_v42  ;;  %v14644_v21 = vpop.f32.mrb[243].mxu1 }
 0xc97   : > { %18114 = vst [vmem:[#allocation13_spill] sm:$0xff] %v14644_v21  ;;  %v5356_v22 = vmax.f32 %v5354_v5, %v14644_v21 }
 0xc99   : > { %v14647_v41 = vpop.f32.mrb[244].mxu1 }
 0xc9a   : > { %v5320_v11 = vmax.f32 %v5318_v28, %v14647_v41  ;;  %v14650_v16 = vpop.f32.mrb[245].mxu1 }
 0xc9b   : > { %18115 = vst [vmem:[#allocation23_spill] sm:$0xff] %v14650_v16  ;;  %v5357_v31 = vmax.f32 %v5355_v45, %v14650_v16 }
 0xc9d   : > { %v14653_v9 = vpop.f32.mrb[246].mxu1 }
 0xc9e   : > { %v5321_v54 = vmax.f32 %v5319_v51, %v14653_v9  ;;  %v14656_v60 = vpop.f32.mrb[247].mxu1 }
 0xc9f   : > { %18116 = vst [vmem:[#allocation21_spill] sm:$0xff] %v14656_v60  ;;  %v5358_v49 = vmax.f32 %v5356_v22, %v14656_v60 }
 0xca1   : > { %v14659_v7 = vpop.f32.mrb[248].mxu1 }
 0xca2   : > { %v5322_v43 = vmax.f32 %v5320_v11, %v14659_v7  ;;  %v14662_v18 = vpop.f32.mrb[249].mxu1 }
 0xca3   : > { %18117 = vst [vmem:[#allocation40_spill] sm:$0xff] %v14662_v18  ;;  %v5359_v39 = vmax.f32 %v5357_v31, %v14662_v18 }
 0xca5   : > { %v14665_v5 = vpop.f32.mrb[250].mxu1 }
 0xca6   : > { %v5323_v28 = vmax.f32 %v5321_v54, %v14665_v5  ;;  %v14668_v45 = vpop.f32.mrb[251].mxu1 }
 0xca7   : > { %18118 = vst [vmem:[#allocation44_spill] sm:$0xff] %v14668_v45  ;;  %v5360_v51 = vmax.f32 %v5358_v49, %v14668_v45 }
 0xca9   : > { %v14671_v4 = vpop.f32.mrb[252].mxu1 }
 0xcaa   : > { %v5324_v22 = vmax.f32 %v5322_v43, %v14671_v4  ;;  %v14674_v6 = vpop.f32.mrb[253].mxu1 }
 0xcab   : > { %18119 = vst [vmem:[#allocation22_spill] sm:$0xff] %v14674_v6  ;;  %v5361_v11 = vmax.f32 %v5359_v39, %v14674_v6 }
 0xcad   : > { %v14677_v2 = vpop.f32.mrb[254].mxu1 }
 0xcae   : > { %v5325_v31 = vmax.f32 %v5323_v28, %v14677_v2  ;;  %v14680_v35 = vpop.f32.mrb[255].mxu1 }
 0xcaf   : > { %18120 = vst [vmem:[#allocation20_spill] sm:$0xff] %v14680_v35  ;;  %v5362_v54 = vmax.f32 %v5360_v51, %v14680_v35 }
 0xcb1   : > { %v14683_v56 = vpop.f32.mrb[0].mxu1 }
 0xcb2   : > { %v5326_v49 = vmax.f32 %v5324_v22, %v14683_v56  ;;  %v14686_v36 = vpop.f32.mrb[1].mxu1 }
 0xcb3   : > { %18121 = vst [vmem:[#allocation42_spill] sm:$0xff] %v14686_v36  ;;  %v5363_v43 = vmax.f32 %v5361_v11, %v14686_v36 }
 0xcb5   : > { %v14689_v48 = vpop.f32.mrb[2].mxu1 }
 0xcb6   : > { %v5327_v39 = vmax.f32 %v5325_v31, %v14689_v48  ;;  %v14692_v6 = vpop.f32.mrb[3].mxu1 }
 0xcb7   : > { %18122 = vst [vmem:[#allocation104_spill] sm:$0xff] %v14692_v6  ;;  %v5364_v28 = vmax.f32 %v5362_v54, %v14692_v6 }
 0xcb9   : > { %v14695_v45 = vpop.f32.mrb[4].mxu1 }
 0xcba   : > { %v5328_v51 = vmax.f32 %v5326_v49, %v14695_v45  ;;  %v14698_v35 = vpop.f32.mrb[5].mxu1 }
 0xcbb   : > { %18123 = vst [vmem:[#allocation106_spill] sm:$0xff] %v14698_v35  ;;  %v5365_v22 = vmax.f32 %v5363_v43, %v14698_v35 }
 0xcbd   : > { %v14701_v18 = vpop.f32.mrb[6].mxu1 }
 0xcbe   : > { %v5329_v11 = vmax.f32 %v5327_v39, %v14701_v18  ;;  %v14704_v36 = vpop.f32.mrb[7].mxu1 }
 0xcbf   : > { %18124 = vst [vmem:[#allocation108_spill] sm:$0xff] %v14704_v36  ;;  %v5366_v31 = vmax.f32 %v5364_v28, %v14704_v36 }
 0xcc1   : > { %v14707_v60 = vpop.f32.mrb[8].mxu1 }
 0xcc2   : > { %v5330_v54 = vmax.f32 %v5328_v51, %v14707_v60  ;;  %v14710_v6 = vpop.f32.mrb[9].mxu1 }
 0xcc3   : > { %18125 = vst [vmem:[#allocation110_spill] sm:$0xff] %v14710_v6  ;;  %v5367_v49 = vmax.f32 %v5365_v22, %v14710_v6 }
 0xcc5   : > { %v14713_v16 = vpop.f32.mrb[10].mxu1 }
 0xcc6   : > { %v5331_v43 = vmax.f32 %v5329_v11, %v14713_v16  ;;  %v14716_v35 = vpop.f32.mrb[11].mxu1 }
 0xcc7   : > { %18126 = vst [vmem:[#allocation112_spill] sm:$0xff] %v14716_v35  ;;  %v5368_v39 = vmax.f32 %v5366_v31, %v14716_v35 }
 0xcc8   : > { %v5332_v21 = vmax.f32 %v5330_v54, %v5331_v43 }
 0xcc9   : > { %v5369_v58 = vmax.f32 %v5367_v49, %v5368_v39 }
 0xcca   : > { %v5333_v44 = vrot.slane %v5332_v21, 4 }
 0xccb   : > { %v5370_v28 = vrot.slane %v5369_v58, 4 }
 0xccc   : > { %v5334_v36 = vmax.f32 %v5332_v21, %v5333_v44 }
 0xccd   : > { %v5371_v55 = vmax.f32 %v5369_v58, %v5370_v28 }
 0xcce   : > { %v5335_v33 = vrot.slane %v5334_v36, 2 }
 0xccf   : > { %v5372_v51 = vrot.slane %v5371_v55, 2 }
 0xcd0   : > { %v5336_v14 = vmax.f32 %v5334_v36, %v5335_v33  ;;  %v18146_v33 = vld [vmem:[#allocation110_spill] sm:$0xff] }
 0xcd1   : > { %v5373_v0 = vmax.f32 %v5371_v55, %v5372_v51 }
 0xcd2   : > { %v5337_v29 = vrot.slane %v5336_v14, 1 }
 0xcd3   : > { %v5374_v22 = vrot.slane %v5373_v0, 1 }
 0xcd4   : > { %v14719_v6 = vmax.f32 %v5336_v14, %v5337_v29 }
 0xcd5   : > { %v14721_v13 = vmax.f32 %v5373_v0, %v5374_v22 }
 0xcd6   : > { %v5376_v11 = vsub.f32 %v14527_v50, %v14719_v6  ;;  %v5378_v31 = vsub.f32 %v14531_v53, %v14719_v6  ;;  %v5380_v44 = vsub.f32 %v14535_v15, %v14719_v6  ;;  %v5382_v58 = vsub.f32 %v14543_v32, %v14719_v6 }
 0xcd7   : > { %v5384_v36 = vsub.f32 %v14551_v38, %v14719_v6  ;;  %v5386_v29 = vsub.f32 %v14557_v62, %v14719_v6  ;;  %v5388_v0 = vsub.f32 %v14563_v10, %v14719_v6  ;;  %v5390_v50 = vsub.f32 %v14569_v63, %v14719_v6 }
 0xcd8   : > { %v5392_v53 = vsub.f32 %v14575_v46, %v14719_v6  ;;  %v5394_v15 = vsub.f32 %v14581_v27, %v14719_v6  ;;  %v5396_v32 = vsub.f32 %v14587_v34, %v14719_v6  ;;  %v5398_v38 = vsub.f32 %v14593_v59, %v14719_v6 }
 0xcd9   : > { %v5400_v62 = vsub.f32 %v14599_v61, %v14719_v6  ;;  %v5402_v10 = vsub.f32 %v14605_v26, %v14719_v6  ;;  %v5404_v63 = vsub.f32 %v14611_v47, %v14719_v6  ;;  %v5406_v46 = vsub.f32 %v14617_v3, %v14719_v6 }
 0xcda   : > { %v5408_v27 = vsub.f32 %v14623_v12, %v14719_v6  ;;  %v5410_v34 = vsub.f32 %v14629_v20, %v14719_v6  ;;  %v5412_v59 = vsub.f32 %v14635_v40, %v14719_v6  ;;  %v5414_v61 = vsub.f32 %v14641_v42, %v14719_v6 }
 0xcdb   : > { %v5416_v26 = vsub.f32 %v14647_v41, %v14719_v6  ;;  %v5418_v47 = vsub.f32 %v14653_v9, %v14719_v6  ;;  %v5420_v14 = vsub.f32 %v14659_v7, %v14719_v6  ;;  %v5422_v3 = vsub.f32 %v14665_v5, %v14719_v6 }
 0xcdc   : > { %v5440_v9 = vmul.f32 1.442695, %v5376_v11  ;;  %v5444_v7 = vmul.f32 1.442695, %v5378_v31  ;;  %v5448_v5 = vmul.f32 1.442695, %v5380_v44 }
 0xcdd   : > { %v5452_v49 = vmul.f32 1.442695, %v5382_v58  ;;  %v5456_v39 = vmul.f32 1.442695, %v5384_v36  ;;  %v5460_v28 = vmul.f32 1.442695, %v5386_v29 }
 0xcde   : > { %9460 = vpow2.f32 %v5440_v9  ;;  %v5464_v51 = vmul.f32 1.442695, %v5388_v0  ;;  %v5468_v22 = vmul.f32 1.442695, %v5390_v50  ;;  %v5472_v21 = vmul.f32 1.442695, %v5392_v53 }
 0xcdf   : > { %9462 = vpow2.f32 %v5444_v7  ;;  %v5476_v41 = vmul.f32 1.442695, %v5394_v15  ;;  %v5480_v11 = vmul.f32 1.442695, %v5396_v32  ;;  %v5484_v31 = vmul.f32 1.442695, %v5398_v38 }
 0xce0   : > { %9464 = vpow2.f32 %v5448_v5  ;;  %v5488_v44 = vmul.f32 1.442695, %v5400_v62  ;;  %v5492_v54 = vmul.f32 1.442695, %v5402_v10  ;;  %v5496_v58 = vmul.f32 1.442695, %v5404_v63 }
 0xce1   : > { %9466 = vpow2.f32 %v5452_v49  ;;  %v5500_v42 = vmul.f32 1.442695, %v5406_v46  ;;  %v5504_v43 = vmul.f32 1.442695, %v5408_v27  ;;  %v5508_v9 = vmul.f32 1.442695, %v5410_v34 }
 0xce2   : > { %9468 = vpow2.f32 %v5456_v39  ;;  %v5512_v36 = vmul.f32 1.442695, %v5412_v59  ;;  %v5516_v29 = vmul.f32 1.442695, %v5414_v61  ;;  %v5520_v7 = vmul.f32 1.442695, %v5416_v26 }
 0xce3   : > { %9470 = vpow2.f32 %v5460_v28  ;;  %v14791_v0 = vmul.f32 1.442695, %v5418_v47  ;;  %v14793_v50 = vmul.f32 1.442695, %v5420_v14  ;;  %v14795_v53 = vmul.f32 1.442695, %v5422_v3 }
 0xce4   : > { %9472 = vpow2.f32 %v5464_v51  ;;  %v18127_v26 = vld [vmem:[#allocation148_spill] sm:$0xff]  ;;  %v18129_v5 = vld [vmem:[#allocation163_spill] sm:$0xff]  ;;  %v18130_v28 = vld [vmem:[#allocation154_spill] sm:$0xff] }
 0xce5   : > { %9474 = vpow2.f32 %v5468_v22  ;;  %v18131_v22 = vld [vmem:[#allocation169_spill] sm:$0xff]  ;;  %v18133_v61 = vld [vmem:[#allocation166_spill] sm:$0xff]  ;;  %v18134_v59 = vld [vmem:[#allocation15_spill] sm:$0xff] }
 0xce6   : > { %9476 = vpow2.f32 %v5472_v21  ;;  %v18128_v21 = vld [vmem:[#allocation151_spill] sm:$0xff]  ;;  %v18135_v51 = vld [vmem:[#allocation13_spill] sm:$0xff]  ;;  %v18138_v49 = vld [vmem:[#allocation40_spill] sm:$0xff] }
 0xce7   : > { %9478 = vpow2.f32 %v5476_v41  ;;  %v18136_v46 = vld [vmem:[#allocation23_spill] sm:$0xff]  ;;  %v18137_v63 = vld [vmem:[#allocation21_spill] sm:$0xff]  ;;  %v18139_v38 = vld [vmem:[#allocation44_spill] sm:$0xff] }
 0xce8   : > { %v14805_v10 = vpop.eup %9460  ;;  %9480 = vpow2.f32 %v5480_v11  ;;  %v18140_v11 = vld [vmem:[#allocation22_spill] sm:$0xff]  ;;  %v18141_v15 = vld [vmem:[#allocation20_spill] sm:$0xff] }
 0xce9   : > { %v14813_v34 = vpop.eup %9462  ;;  %9482 = vpow2.f32 %v5484_v31  ;;  %v18132_v31 = vld [vmem:[#allocation157_spill] sm:$0xff] }
 0xcea   : > { %v14821_v14 = vpop.eup %9464  ;;  %9484 = vpow2.f32 %v5488_v44  ;;  %v5568_v3 = vadd.f32 %v14813_v34, %v14805_v10  ;;  %v18145_v44 = vld [vmem:[#allocation108_spill] sm:$0xff] }
 0xceb   : > { %v14829_v39 = vpop.eup %9466  ;;  %9486 = vpow2.f32 %v5492_v54  ;;  %v18143_v54 = vld [vmem:[#allocation104_spill] sm:$0xff] }
 0xcec   : > { %v14837_v47 = vpop.eup %9468  ;;  %9488 = vpow2.f32 %v5496_v58  ;;  %v5569_v41 = vadd.f32 %v14821_v14, %v5568_v3 }
 0xced   : > { %v14844_v27 = vpop.eup %9470  ;;  %9490 = vpow2.f32 %v5500_v42 }
 0xcee   : > { %v14852_v62 = vpop.eup %9472  ;;  %9492 = vpow2.f32 %v5504_v43  ;;  %v5570_v3 = vadd.f32 %v14829_v39, %v5569_v41 }
 0xcef   : > { %v14859_v32 = vpop.eup %9474  ;;  %9494 = vpow2.f32 %v5508_v9 }
 0xcf0   : > { %v14867_v20 = vpop.eup %9476  ;;  %9496 = vpow2.f32 %v5512_v36  ;;  %v5571_v41 = vadd.f32 %v14837_v47, %v5570_v3  ;;  %v18147_v3 = vsub.f32 %v14671_v4, %v14719_v6 }
 0xcf1   : > { %v14874_v12 = vpop.eup %9478  ;;  %9498 = vpow2.f32 %v5516_v29  ;;  %v18148_v29 = vsub.f32 %v14677_v2, %v14719_v6 }
 0xcf2   : > { %v14882_v40 = vpop.eup %9480  ;;  %9500 = vpow2.f32 %v5520_v7  ;;  %v5536_v42 = vmul.f32 1.442695, %v18147_v3  ;;  %v5572_v9 = vadd.f32 %v14844_v27, %v5571_v41  ;;  %v18149_v7 = vsub.f32 %v14683_v56, %v14719_v6 }
 0xcf3   : > { %v14888_v55 = vpop.eup %9482  ;;  %9502 = vpow2.f32 %v14791_v0  ;;  %v5540_v43 = vmul.f32 1.442695, %v18148_v29  ;;  %v18150_v0 = vsub.f32 %v14689_v48, %v14719_v6  ;;  %v18154_v48 = vsub.f32 %v14707_v60, %v14719_v6 }
 0xcf4   : > { %v14894_v58 = vpop.eup %9484  ;;  %9504 = vpow2.f32 %v14793_v50  ;;  %v5544_v36 = vmul.f32 1.442695, %v18149_v7  ;;  %v5573_v4 = vadd.f32 %v14852_v62, %v5572_v9  ;;  %v18151_v50 = vsub.f32 %v14695_v45, %v14719_v6 }
 0xcf5   : > { %v14901_v3 = vpop.eup %9486  ;;  %9506 = vpow2.f32 %v14795_v53  ;;  %v5548_v41 = vmul.f32 1.442695, %v18150_v0  ;;  %v18152_v9 = vsub.f32 %v14701_v18, %v14719_v6 }
 0xcf6   : > { %v14907_v2 = vpop.eup %9488  ;;  %9508 = vpow2.f32 %v5536_v42  ;;  %v5552_v29 = vmul.f32 1.442695, %v18151_v50  ;;  %v5574_v56 = vadd.f32 %v14859_v32, %v5573_v4  ;;  %v5560_v42 = vmul.f32 1.442695, %v18154_v48 }
 0xcf7   : > { %v14913_v7 = vpop.eup %9490  ;;  %9510 = vpow2.f32 %v5540_v43  ;;  %v5556_v53 = vmul.f32 1.442695, %v18152_v9  ;;  %v18155_v4 = vsub.f32 %v14713_v16, %v14719_v6  ;;  %v18158_v6 = vsub.f32 %v14539_v23, %v14721_v13 }
 0xcf8   : > { %v14918_v35 = vpop.eup %9492  ;;  %9512 = vpow2.f32 %v5544_v36  ;;  %v5575_v0 = vadd.f32 %v14867_v20, %v5574_v56  ;;  %v18156_v36 = vsub.f32 %v14529_v1, %v14721_v13  ;;  %v18157_v56 = vsub.f32 %v14533_v52, %v14721_v13 }
 0xcf9   : > { %18153 = vst [vmem:[#allocation114_spill] sm:$0xff] %v14918_v35  ;;  %v14924_v45 = vpop.eup %9494  ;;  %9514 = vpow2.f32 %v5548_v41  ;;  %v5564_v43 = vmul.f32 1.442695, %v18155_v4  ;;  %v5450_v16 = vmul.f32 1.442695, %v18158_v6  ;;  %v18159_v1 = vsub.f32 %v14547_v8, %v14721_v13 }
 0xcfa   : > { %v14929_v50 = vpop.eup %9496  ;;  %9516 = vpow2.f32 %v5552_v29  ;;  %v5576_v18 = vadd.f32 %v14874_v12, %v5575_v0  ;;  %v5442_v9 = vmul.f32 1.442695, %v18156_v36  ;;  %v5446_v41 = vmul.f32 1.442695, %v18157_v56 }
 0xcfb   : > { %v14935_v60 = vpop.eup %9498  ;;  %9518 = vpow2.f32 %v5556_v53  ;;  %v5454_v0 = vmul.f32 1.442695, %v18159_v1  ;;  %v18160_v53 = vsub.f32 %v14554_v19, %v14721_v13  ;;  %v18161_v52 = vsub.f32 %v14560_v17, %v14721_v13 }
 0xcfc   : > { %v14943_v48 = vpop.eup %9500  ;;  %9520 = vpow2.f32 %v5560_v42  ;;  %v5577_v29 = vadd.f32 %v14882_v40, %v5576_v18  ;;  %v18162_v42 = vsub.f32 %v14566_v30, %v14721_v13  ;;  %v18163_v18 = vsub.f32 %v14572_v24, %v14721_v13 }
 0xcfd   : > { %v5458_v4 = vmul.f32 1.442695, %v18160_v53  ;;  %v14952_v36 = vpop.eup %9502  ;;  %9522 = vpow2.f32 %v5564_v43  ;;  %v5462_v23 = vmul.f32 1.442695, %v18161_v52  ;;  %v18164_v43 = vsub.f32 %v14578_v37, %v14721_v13 }
 0xcfe   : > { %v5466_v56 = vmul.f32 1.442695, %v18162_v42  ;;  %v5470_v8 = vmul.f32 1.442695, %v18163_v18  ;;  %v14963_v6 = vpop.eup %9504  ;;  %v5578_v19 = vadd.f32 %v14888_v55, %v5577_v29  ;;  %9524 = vpow2.f32 %v5442_v9 }
 0xcff   : > { %v5474_v1 = vmul.f32 1.442695, %v18164_v43  ;;  %v18165_v17 = vsub.f32 %v14584_v57, %v14721_v13  ;;  %v14972_v52 = vpop.eup %9506  ;;  %9526 = vpow2.f32 %v5446_v41 }
 0xd00   : > { %v14980_v29 = vpop.eup %9508  ;;  %v5579_v37 = vadd.f32 %v14894_v58, %v5578_v19  ;;  %9528 = vpow2.f32 %v5450_v16 }
 0xd01   : > { %v5478_v53 = vmul.f32 1.442695, %v18165_v17  ;;  %v14987_v42 = vpop.eup %9510  ;;  %9530 = vpow2.f32 %v5454_v0  ;;  %v18166_v0 = vsub.f32 %v14590_v25, %v14721_v13  ;;  %v18167_v17 = vsub.f32 %v18127_v26, %v14721_v13 }
 0xd02   : > { %v14995_v19 = vpop.eup %9512  ;;  %v5580_v16 = vadd.f32 %v14901_v3, %v5579_v37  ;;  %9532 = vpow2.f32 %v5458_v4 }
 0xd03   : > { %v15002_v57 = vpop.eup %9514  ;;  %9534 = vpow2.f32 %v5462_v23  ;;  %v5482_v41 = vmul.f32 1.442695, %v18166_v0  ;;  %v5486_v43 = vmul.f32 1.442695, %v18167_v17 }
 0xd04   : > { %v15010_v37 = vpop.eup %9516  ;;  %v5581_v4 = vadd.f32 %v14907_v2, %v5580_v16  ;;  %9536 = vpow2.f32 %v5466_v56  ;;  %v18168_v56 = vsub.f32 %v18128_v21, %v14721_v13  ;;  %v18173_v21 = vsub.f32 %v18133_v61, %v14721_v13 }
 0xd05   : > { %v15018_v9 = vpop.eup %9518  ;;  %9538 = vpow2.f32 %v5470_v8  ;;  %v18169_v8 = vsub.f32 %v18129_v5, %v14721_v13  ;;  %v18172_v5 = vsub.f32 %v18132_v31, %v14721_v13  ;;  %v18176_v61 = vsub.f32 %v18136_v46, %v14721_v13 }
 0xd06   : > { %v15023_v18 = vpop.eup %9520  ;;  %v5582_v24 = vadd.f32 %v14913_v7, %v5581_v4  ;;  %9540 = vpow2.f32 %v5474_v1  ;;  %v5490_v25 = vmul.f32 1.442695, %v18168_v56  ;;  %v18170_v1 = vsub.f32 %v18130_v28, %v14721_v13 }
 0xd07   : > { %v15031_v0 = vpop.eup %9522  ;;  %9542 = vpow2.f32 %v5478_v53  ;;  %v5494_v26 = vmul.f32 1.442695, %v18169_v8  ;;  %v18171_v53 = vsub.f32 %v18131_v22, %v14721_v13  ;;  %v5506_v8 = vmul.f32 1.442695, %v18172_v5 }
 0xd08   : > { %v9525_v17 = vpop.eup %9524  ;;  %v5583_v23 = vadd.f32 %v14918_v35, %v5582_v24  ;;  %9544 = vpow2.f32 %v5482_v41  ;;  %v5498_v4 = vmul.f32 1.442695, %v18170_v1  ;;  %v18174_v22 = vsub.f32 %v18134_v59, %v14721_v13 }
 0xd09   : > { %v9527_v56 = vpop.eup %9526  ;;  %9546 = vpow2.f32 %v5486_v43  ;;  %v5502_v16 = vmul.f32 1.442695, %v18171_v53  ;;  %v5510_v43 = vmul.f32 1.442695, %v18173_v21  ;;  %v5522_v21 = vmul.f32 1.442695, %v18176_v61 }
 0xd0a   : > { %v9529_v30 = vpop.eup %9528  ;;  %v5584_v24 = vadd.f32 %v14924_v45, %v5583_v23  ;;  %9548 = vpow2.f32 %v5490_v25  ;;  %v5605_v41 = vadd.f32 %v9527_v56, %v9525_v17  ;;  %v8501_v28 = vpack.c.bf16 %v9527_v56, %v9525_v17 }
 0xd0b   : > { %v9531_v1 = vpop.eup %9530  ;;  %9550 = vpow2.f32 %v5494_v26  ;;  %v5514_v53 = vmul.f32 1.442695, %v18174_v22  ;;  %v18175_v26 = vsub.f32 %v18135_v51, %v14721_v13  ;;  %v18177_v59 = vpack.c.bf16 %v14813_v34, %v14805_v10 }
 0xd0c   : > { %v9533_v35 = vpop.eup %9532  ;;  %v5585_v31 = vadd.f32 %v14929_v50, %v5584_v24  ;;  %9552 = vpow2.f32 %v5498_v4  ;;  %v5606_v5 = vadd.f32 %v9529_v30, %v5605_v41  ;;  %8502 = vmatprep.subr.bf16.mxu0 %v8501_v28  ;;  %v8505_v23 = vpack.c.bf16 %v9531_v1, %v9529_v30 }
 0xd0d   : > { %v9535_v25 = vpop.eup %9534  ;;  %9554 = vpow2.f32 %v5502_v16  ;;  %v5518_v17 = vmul.f32 1.442695, %v18175_v26  ;;  %8504 = vmatpush1.bf16.msra.mxu0 %v18177_v59  ;;  %v18178_v51 = vsub.f32 %v18137_v63, %v14721_v13  ;;  %v18179_v46 = vsub.f32 %v18138_v49, %v14721_v13  ;;  %v18184_v59 = vld [vmem:[#allocation42_spill] sm:$0xff] }
 0xd0e   : > { %v9537_v56 = vpop.eup %9536  ;;  %v5586_v4 = vadd.f32 %v14935_v60, %v5585_v31  ;;  %9556 = vpow2.f32 %v5506_v8  ;;  %v5607_v24 = vadd.f32 %v9531_v1, %v5606_v5  ;;  %8506 = vmatprep.subr.bf16.mxu0 %v8505_v23  ;;  %v8509_v30 = vpack.c.bf16 %v9535_v25, %v9533_v35 }
 0xd0f   : > { %v9539_v16 = vpop.eup %9538  ;;  %9558 = vpow2.f32 %v5510_v43  ;;  %v5526_v41 = vmul.f32 1.442695, %v18178_v51  ;;  %v5530_v28 = vmul.f32 1.442695, %v18179_v46  ;;  %v18180_v1 = vsub.f32 %v18139_v38, %v14721_v13 }
 0xd10   : > { %v9541_v22 = vpop.eup %9540  ;;  %v5587_v10 = vadd.f32 %v14943_v48, %v5586_v4  ;;  %9560 = vpow2.f32 %v5514_v53  ;;  %v5608_v34 = vadd.f32 %v9533_v35, %v5607_v24  ;;  %v8513_v31 = vpack.c.bf16 %v9539_v16, %v9537_v56 }
 0xd11   : > { %v9543_v8 = vpop.eup %9542  ;;  %9562 = vpow2.f32 %v5518_v17  ;;  %v5534_v43 = vmul.f32 1.442695, %v18180_v1  ;;  %v18181_v63 = vsub.f32 %v18140_v11, %v14721_v13  ;;  %v18182_v49 = vpack.c.bf16 %v14829_v39, %v14821_v14 }
 0xd12   : > { %v9545_v23 = vpop.eup %9544  ;;  %v5588_v26 = vadd.f32 %v14952_v36, %v5587_v10  ;;  %9564 = vpow2.f32 %v5522_v21  ;;  %v5609_v35 = vadd.f32 %v9535_v25, %v5608_v34  ;;  %v8517_v53 = vpack.c.bf16 %v9543_v8, %v9541_v22 }
 0xd13   : > { %v5538_v5 = vmul.f32 1.442695, %v18181_v63  ;;  %8508 = vmatpush1.bf16.msra.mxu0 %v18182_v49  ;;  %v9547_v17 = vpop.eup %9546  ;;  %9566 = vpow2.f32 %v5526_v41  ;;  %v18183_v38 = vsub.f32 %v18141_v15, %v14721_v13  ;;  %v18185_v11 = vsub.f32 %v18184_v59, %v14721_v13  ;;  %v18187_v41 = vld [vmem:[#allocation106_spill] sm:$0xff] }
 0xd14   : > { %8510 = vmatprep.subr.bf16.mxu0 %v8509_v30  ;;  %v9549_v24 = vpop.eup %9548  ;;  %v5589_v14 = vadd.f32 %v14963_v6, %v5588_v26  ;;  %9568 = vpow2.f32 %v5530_v28  ;;  %v5610_v39 = vadd.f32 %v9537_v56, %v5609_v35  ;;  %v8521_v51 = vpack.c.bf16 %v9547_v17, %v9545_v23 }
 0xd15   : > { %v5542_v61 = vmul.f32 1.442695, %v18183_v38  ;;  %v5546_v4 = vmul.f32 1.442695, %v18185_v11  ;;  %v9551_v21 = vpop.eup %9550  ;;  %9570 = vpow2.f32 %v5534_v43  ;;  %v18186_v25 = vsub.f32 %v18143_v54, %v14721_v13 }
 0xd16   : > { %v18188_v15 = vsub.f32 %v18187_v41, %v14721_v13  ;;  %v18189_v10 = vpack.c.bf16 %v14844_v27, %v14837_v47  ;;  %v9553_v34 = vpop.eup %9552  ;;  %v5590_v1 = vadd.f32 %v14972_v52, %v5589_v14  ;;  %9572 = vpow2.f32 %v5538_v5 }
 0xd17   : > { %v5550_v30 = vmul.f32 1.442695, %v18186_v25  ;;  %v5611_v56 = vadd.f32 %v9539_v16, %v5610_v39  ;;  %v8525_v28 = vpack.c.bf16 %v9551_v21, %v9549_v24  ;;  %v9555_v43 = vpop.eup %9554  ;;  %9574 = vpow2.f32 %v5542_v61  ;;  %v18192_v16 = vld [vmem:[#allocation112_spill] sm:$0xff] }
 0xd18   : > { %v5554_v46 = vmul.f32 1.442695, %v18188_v15  ;;  %8512 = vmatpush1.bf16.msra.mxu0 %v18189_v10  ;;  %v18190_v54 = vsub.f32 %v18145_v44, %v14721_v13  ;;  %v18191_v49 = vsub.f32 %v18146_v33, %v14721_v13  ;;  %v9557_v35 = vpop.eup %9556  ;;  %v5591_v27 = vadd.f32 %v14980_v29, %v5590_v1 }
 0xd19   : > { %8514 = vmatprep.subr.bf16.mxu0 %v8513_v31  ;;  %9576 = vpow2.f32 %v5546_v4  ;;  %v5612_v47 = vadd.f32 %v9541_v22, %v5611_v56  ;;  %v8529_v38 = vpack.c.bf16 %v9555_v43, %v9553_v34  ;;  %v9559_v5 = vpop.eup %9558  ;;  %v18193_v31 = vsub.f32 %v18192_v16, %v14721_v13 }
 0xd1a   : > { %v5558_v63 = vmul.f32 1.442695, %v18190_v54  ;;  %v5562_v26 = vmul.f32 1.442695, %v18191_v49  ;;  %9578 = vpow2.f32 %v5550_v30  ;;  %v18194_v44 = vpack.c.bf16 %v14859_v32, %v14852_v62  ;;  %v9561_v59 = vpop.eup %9560 }
 0xd1b   : > { %v5566_v61 = vmul.f32 1.442695, %v18193_v31  ;;  %v5592_v33 = vadd.f32 %v14987_v42, %v5591_v27  ;;  %9580 = vpow2.f32 %v5554_v46  ;;  %v5613_v11 = vadd.f32 %v9543_v8, %v5612_v47  ;;  %v9563_v4 = vpop.eup %9562 }
 0xd1c   : > { %8516 = vmatpush1.bf16.msra.mxu0 %v18194_v44  ;;  %v8533_v14 = vpack.c.bf16 %v9559_v5, %v9557_v35  ;;  %9582 = vpow2.f32 %v5558_v63  ;;  %v9565_v22 = vpop.eup %9564  ;;  %v8537_v13 = vpack.c.bf16 %v9563_v4, %v9561_v59  ;;  %v18195_v32 = vpack.c.bf16 %v14874_v12, %v14867_v20 }
 0xd1d   : > { %8518 = vmatprep.subr.bf16.mxu0 %v8517_v53  ;;  %v5593_v39 = vadd.f32 %v14995_v19, %v5592_v33  ;;  %9584 = vpow2.f32 %v5562_v26  ;;  %v5614_v25 = vadd.f32 %v9545_v23, %v5613_v11  ;;  %v9567_v30 = vpop.eup %9566  ;;  %v18196_v54 = vpack.c.bf16 %v14888_v55, %v14882_v40 }
 0xd1e   : > { %9586 = vpow2.f32 %v5566_v61  ;;  %v9569_v62 = vpop.eup %9568  ;;  %v8541_v53 = vpack.c.bf16 %v9567_v30, %v9565_v22  ;;  %v18198_v33 = vpack.c.bf16 %v14913_v7, %v14907_v2  ;;  %v18202_v2 = vpack.c.bf16 %v14952_v36, %v14943_v48 }
 0xd1f   : > { %v5594_v41 = vadd.f32 %v15002_v57, %v5593_v39  ;;  %v5615_v8 = vadd.f32 %v9547_v17, %v5614_v25  ;;  %v9571_v15 = vpop.eup %9570  ;;  %v18205_v36 = vpack.c.bf16 %v15002_v57, %v14995_v19  ;;  %v18211_v19 = vld [vmem:[#allocation60_spill] sm:$0xff] }
 0xd20   : > { %8520 = vmatpush1.bf16.msra.mxu0 %v18195_v32  ;;  %v9573_v46 = vpop.eup %9572  ;;  %v8545_v56 = vpack.c.bf16 %v9571_v15, %v9569_v62 }
 0xd21   : > { %8522 = vmatprep.subr.bf16.mxu0 %v8521_v51  ;;  %v5595_v10 = vadd.f32 %v15010_v37, %v5594_v41  ;;  %v5616_v1 = vadd.f32 %v9549_v24, %v5615_v8  ;;  %v9575_v23 = vpop.eup %9574  ;;  %v18197_v24 = vpack.c.bf16 %v14901_v3, %v14894_v58  ;;  %v18199_v58 = vld [vmem:[#allocation114_spill] sm:$0xff]  ;;  %v18209_v41 = vld [vmem:[#allocation33_spill] sm:$0xff] }
 0xd22   : > { %v8549_v49 = vpack.c.bf16 %v9575_v23, %v9573_v46  ;;  %v18200_v3 = vpack.c.bf16 %v14924_v45, %v18199_v58  ;;  %v18203_v45 = vpack.c.bf16 %v14972_v52, %v14963_v6  ;;  %v18206_v52 = vpack.c.bf16 %v15018_v9, %v15010_v37 }
 0xd23   : > { %v9577_v63 = vpop.eup %9576  ;;  %v5596_v12 = vadd.f32 %v15018_v9, %v5595_v10  ;;  %v5617_v20 = vadd.f32 %v9551_v21, %v5616_v1  ;;  %v18214_v9 = vld [vmem:[#allocation32_spill] sm:$0xff] }
 0xd24   : > { %8524 = vmatpush1.bf16.msra.mxu0 %v18196_v54  ;;  %v9579_v17 = vpop.eup %9578  ;;  %v18217_v10 = vld [vmem:[#allocation120_spill] sm:$0xff]  ;;  %v18222_v54 = vld [vmem:[#allocation117_spill] sm:$0xff] }
 0xd25   : > { %8526 = vmatprep.subr.bf16.mxu0 %v8525_v28  ;;  %v9581_v51 = vpop.eup %9580  ;;  %v5597_v26 = vadd.f32 %v15023_v18, %v5596_v12  ;;  %v5618_v27 = vadd.f32 %v9553_v34, %v5617_v20  ;;  %v8553_v47 = vpack.c.bf16 %v9579_v17, %v9577_v63  ;;  %v18224_v12 = vld [vmem:[#allocation59_spill] sm:$0xff] }
 0xd26   : > { %v9583_v16 = vpop.eup %9582  ;;  %v18225_v20 = vld [vmem:[#allocation55_spill] sm:$0xff] }
 0xd27   : > { %v9585_v31 = vpop.eup %9584  ;;  %v15129_v55 = vadd.f32 %v15031_v0, %v5597_v26  ;;  %v5619_v40 = vadd.f32 %v9555_v43, %v5618_v27  ;;  %v8557_v21 = vpack.c.bf16 %v9583_v16, %v9581_v51  ;;  %v18201_v43 = vpack.c.bf16 %v14935_v60, %v14929_v50  ;;  %v18228_v26 = vld [vmem:[#allocation53_spill] sm:$0xff] }
 0xd28   : > { %8528 = vmatpush1.bf16.msra.mxu0 %v18197_v24  ;;  %v9587_v28 = vpop.eup %9586  ;;  %v18204_v60 = vpack.c.bf16 %v14987_v42, %v14980_v29  ;;  %v18207_v29 = vpack.c.bf16 %v15031_v0, %v15023_v18  ;;  %v18208_v42 = vld [vmem:[#allocation35_spill] sm:$0xff]  ;;  %v18220_v18 = vmov 0.0  }
 0xd29   : > { %8530 = vmatprep.subr.bf16.mxu0 %v8529_v38  ;;  %v5620_v61 = vadd.f32 %v9557_v35, %v5619_v40  ;;  %v8561_v44 = vpack.c.bf16 %v9587_v28, %v9585_v31  ;;  %v5745_v38 = vpop.trf.xlu0  ;;  %v18210_v8 = vpack.c.bf16 %v18208_v42, %v18209_v41  ;;  %v18234_v40 = vld [vmem:[#allocation160_spill] sm:$0xff] }
 0xd2b   : > { %v5621_v34 = vadd.f32 %v9559_v5, %v5620_v61  ;;  %v18236_v61 = vld [vmem:[#allocation77_spill] sm:$0xff] }
 0xd2c   : > { %8532 = vmatpush1.bf16.msra.mxu0 %v18198_v33 }
 0xd2d   : > { %8534 = vmatprep.subr.bf16.mxu0 %v8533_v14  ;;  %v5622_v11 = vadd.f32 %v9561_v59, %v5621_v34  ;;  %v5746_v59 = vpop.trf.xlu0  ;;  %v18239_v34 = vld [vmem:[#allocation75_spill] sm:$0xff] }
 0xd2f   : > { %v5623_v39 = vadd.f32 %v9563_v4, %v5622_v11  ;;  %v18240_v11 = vld [vmem:[#allocation102_spill] sm:$0xff] }
 0xd30   : > { %8536 = vmatpush1.bf16.msra.mxu0 %v18200_v3  ;;  %v18241_v58 = vpack.c.bf16 %v18239_v34, %v18240_v11  ;;  %v18242_v3 = vld [vmem:[#allocation145_spill] sm:$0xff] }
 0xd31   : > { %8538 = vmatprep.subr.bf16.mxu0 %v8537_v13  ;;  %v5624_v25 = vadd.f32 %v9565_v22, %v5623_v39  ;;  %v5747_v22 = vpop.trf.xlu0  ;;  %v18243_v39 = vld [vmem:[#allocation139_spill] sm:$0xff] }
 0xd33   : > { %v5625_v35 = vadd.f32 %v9567_v30, %v5624_v25  ;;  %v18244_v25 = vpack.c.bf16 %v18242_v3, %v18243_v39 }
 0xd34   : > { %8540 = vmatpush1.bf16.msra.mxu0 %v18201_v43 }
 0xd35   : > { %8542 = vmatprep.subr.bf16.mxu0 %v8541_v53  ;;  %v5626_v32 = vadd.f32 %v9569_v62, %v5625_v35  ;;  %v5748_v30 = vpop.trf.xlu0  ;;  %v18212_v53 = vld [vmem:[#allocation66_spill] sm:$0xff] }
 0xd36   : > { %v18245_v35 = vld [vmem:[#allocation142_spill] sm:$0xff] }
 0xd37   : > { %v5627_v7 = vadd.f32 %v9571_v15, %v5626_v32  ;;  %v18213_v15 = vld [vmem:[#allocation34_spill] sm:$0xff] }
 0xd38   : > { %8544 = vmatpush1.bf16.msra.mxu0 %v18202_v2  ;;  %v18215_v37 = vpack.c.bf16 %v18213_v15, %v18214_v9  ;;  %v5599_v15 = vrot.slane %v15129_v55, 4 }
 0xd39   : > { %8546 = vmatprep.subr.bf16.mxu0 %v8545_v56  ;;  %v5628_v5 = vadd.f32 %v9573_v46, %v5627_v7  ;;  %v5749_v57 = vpop.trf.xlu0  ;;  %v18216_v46 = vld [vmem:[#allocation124_spill] sm:$0xff] }
 0xd3a   : > { %v18218_v1 = vpack.c.bf16 %v18216_v46, %v18217_v10  ;;  %v18219_v56 = vld [vmem:[#allocation64_spill] sm:$0xff] }
 0xd3b   : > { %v5629_v14 = vadd.f32 %v9575_v23, %v5628_v5  ;;  %v18221_v23 = vld [vmem:[#allocation123_spill] sm:$0xff]  ;;  %v5777_v5 = vpop.trf.xlu1 }
 0xd3c   : > { %8548 = vmatpush1.bf16.msra.mxu0 %v18203_v45 }
 0xd3d   : > { %8550 = vmatprep.subr.bf16.mxu0 %v8549_v49  ;;  %v5630_v50 = vadd.f32 %v9577_v63, %v5629_v14  ;;  %v5750_v0 = vpop.trf.xlu0  ;;  %v18223_v63 = vpack.c.bf16 %v18221_v23, %v18222_v54  ;;  %v18226_v49 = vpack.c.bf16 %v18224_v12, %v18225_v20 }
 0xd3f   : > { %v5631_v4 = vadd.f32 %v9579_v17, %v5630_v50 }
 0xd40   : > { %8552 = vmatpush1.bf16.msra.mxu0 %v18204_v60 }
 0xd41   : > { %8554 = vmatprep.subr.bf16.mxu0 %v8553_v47  ;;  %v5632_v48 = vadd.f32 %v9581_v51, %v5631_v4  ;;  %v5751_v17 = vpop.trf.xlu0  ;;  %v18227_v51 = vld [vmem:[#allocation57_spill] sm:$0xff] }
 0xd42   : > { %v18229_v27 = vpack.c.bf16 %v18227_v51, %v18228_v26  ;;  %v18230_v47 = vld [vmem:[#allocation177_spill] sm:$0xff] }
 0xd43   : > { %v5633_v13 = vadd.f32 %v9583_v16, %v5632_v48  ;;  %v18231_v16 = vld [vmem:[#allocation116_spill] sm:$0xff] }
 0xd44   : > { %8556 = vmatpush1.bf16.msra.mxu0 %v18205_v36  ;;  %v18232_v24 = vpack.c.bf16 %v18230_v47, %v18231_v16 }
 0xd45   : > { %8558 = vmatprep.subr.bf16.mxu0 %v8557_v21  ;;  %v5634_v6 = vadd.f32 %v9585_v31, %v5633_v13  ;;  %v18233_v31 = vld [vmem:[#allocation175_spill] sm:$0xff] }
 0xd46   : > { %v18235_v21 = vpack.c.bf16 %v18233_v31, %v18234_v40 }
 0xd47   : > { %v15155_v62 = vadd.f32 %v9587_v28, %v5634_v6  ;;  %v5752_v28 = vpop.trf.xlu0 }
 0xd48   : > { %8560 = vmatpush1.bf16.msra.mxu0 %v18206_v52 }
 0xd49   : > { %8562 = vmatprep.subr.bf16.mxu0 %v8561_v44  ;;  %v18237_v44 = vld [vmem:[#allocation73_spill] sm:$0xff]  ;;  %v5636_v9 = vrot.slane %v15155_v62, 4 }
 0xd4a   : > { %v18238_v33 = vpack.c.bf16 %v18236_v61, %v18237_v44 }
 0xd4b   : > { %v5753_v43 = vpop.trf.xlu0  ;;  %v5637_v46 = vadd.f32 %v5636_v9, %v15155_v62 }
 0xd4c   : > { %8564 = vmatpush1.bf16.msra.mxu0 %v18207_v29 }
 0xd4d   : > { %8566 = vmatprep.subr.bf16.mxu0 %v18210_v8 }
 0xd4f   : > { %5707 = vmatmul.mubr.f32.vlgmr.msra.gmra.mrb[232].mxu0 %v18211_v19  ;;  %v5754_v2 = vpop.trf.xlu0 }
 0xd50   : > { %5712 = vmatprep.mubr.f32.mxu0 %v18212_v53  ;;  %8568 = vmatpush1.bf16.msra.mxu0 %v18215_v37  ;;  %v5600_v37 = vadd.f32 %v5599_v15, %v15129_v55 }
 0xd51   : > { %8702 = vmatprep.subr.bf16.mxu0 %v18218_v1  ;;  %v5638_v1 = vrot.slane %v5637_v46, 2 }
 0xd52   : > { %v5601_v10 = vrot.slane %v5600_v37, 2 }
 0xd53   : > { %5713 = vmatmul.mubr.f32.gmra.mrb[234].mxu0 %v18219_v56  ;;  %v5755_v7 = vpop.trf.xlu0 }
 0xd54   : > { %5953 = vmatprep.mubr.f32.mxu0 %v18220_v18  ;;  %v5602_v56 = vadd.f32 %v5601_v10, %v5600_v37 }
 0xd56   : > { %v5603_v23 = vrot.slane %v5602_v56, 1 }
 0xd57   : > { %8054 = vmatmul.mubr.msk.f32.vlgmr.msra.gmra.mrb[236].mxu0 %vm728_vm0, %v5745_v38  ;;  %v18246_v38 = vld [vmem:[#allocation136_spill] sm:$0xff]  ;;  %v5756_v45 = vpop.trf.xlu0 }
 0xd58   : > { %8704 = vmatpush1.bf16.msra.mxu0 %v18223_v63  ;;  %5959 = vmatprep.mubr.f32.mxu0 %v18220_v18  ;;  %v18247_v32 = vpack.c.bf16 %v18245_v35, %v18246_v38  ;;  %v5604_v63 = vadd.f32 %v5603_v23, %v5602_v56 }
 0xd59   : > { %8706 = vmatprep.subr.bf16.mxu0 %v18226_v49 }
 0xd5a   : > { %9588 = vrcp.f32 %v5604_v63 }
 0xd5b   : > { %8055 = vmatmul.mubr.msk.f32.gmra.mrb[238].mxu0 %vm728_vm0, %v5746_v59  ;;  %v5778_v59 = vpop.trf.xlu1  ;;  %v5757_v14 = vpop.trf.xlu0 }
 0xd5c   : > { %8708 = vmatpush1.bf16.msra.mxu0 %v18229_v27  ;;  %5965 = vmatprep.mubr.f32.mxu0 %v18220_v18 }
 0xd5d   : > { %8710 = vmatprep.subr.bf16.mxu0 %v18232_v24 }
 0xd5f   : > { %8056 = vmatmul.mubr.msk.f32.gmra.mrb[240].mxu0 %vm728_vm0, %v5747_v22  ;;  %v5779_v50 = vpop.trf.xlu1  ;;  %v5758_v60 = vpop.trf.xlu0 }
 0xd60   : > { %8712 = vmatpush1.bf16.msra.mxu0 %v18235_v21  ;;  %5971 = vmatprep.mubr.f32.mxu0 %v18220_v18 }
 0xd61   : > { %8714 = vmatprep.subr.bf16.mxu0 %v18238_v33 }
 0xd63   : > { %8057 = vmatmul.mubr.msk.f32.gmra.mrb[242].mxu0 %vm728_vm0, %v5748_v30  ;;  %v5780_v4 = vpop.trf.xlu1  ;;  %v5759_v22 = vpop.trf.xlu0 }
 0xd64   : > { %8716 = vmatpush1.bf16.msra.mxu0 %v18241_v58  ;;  %5977 = vmatprep.mubr.f32.mxu0 %v18220_v18  ;;  %v9589_v20 = vpop.eup %9588 }
 0xd65   : > { %8718 = vmatprep.subr.bf16.mxu0 %v18244_v25 }
 0xd67   : > { %8058 = vmatmul.mubr.msk.f32.gmra.mrb[244].mxu0 %vm728_vm0, %v5749_v57  ;;  %v5781_v48 = vpop.trf.xlu1  ;;  %v5760_v36 = vpop.trf.xlu0 }
 0xd68   : > { %8720 = vmatpush1.bf16.msra.mxu0 %v18247_v32  ;;  %5983 = vmatprep.mubr.f32.mxu0 %v18220_v18 }
 0xd6b   : > { %8059 = vmatmul.mubr.msk.f32.gmra.mrb[246].mxu0 %vm728_vm0, %v5750_v0  ;;  %v5782_v13 = vpop.trf.xlu1  ;;  %v5639_v0 = vadd.f32 %v5638_v1, %v5637_v46 }
 0xd6c   : > { %5989 = vmatprep.mubr.f32.mxu0 %v18220_v18 }
 0xd6d   : > { %v5640_v54 = vrot.slane %v5639_v0, 1 }
 0xd6f   : > { %8060 = vmatmul.mubr.msk.f32.gmra.mrb[248].mxu0 %vm728_vm0, %v5751_v17  ;;  %v5783_v6 = vpop.trf.xlu1  ;;  %v5641_v12 = vadd.f32 %v5640_v54, %v5639_v0 }
 0xd70   : > { %5995 = vmatprep.mubr.f32.mxu0 %v18220_v18 }
 0xd71   : > { %9590 = vrcp.f32 %v5641_v12 }
 0xd73   : > { %8061 = vmatmul.mubr.msk.f32.gmra.mrb[250].mxu0 %vm728_vm0, %v5752_v28  ;;  %v5784_v52 = vpop.trf.xlu1 }
 0xd74   : > { %6001 = vmatprep.mubr.f32.mxu0 %v18220_v18 }
 0xd77   : > { %8062 = vmatmul.mubr.msk.f32.gmra.mrb[252].mxu0 %vm728_vm0, %v5753_v43  ;;  %v5785_v30 = vpop.trf.xlu1 }
 0xd78   : > { %6007 = vmatprep.mubr.f32.mxu0 %v18220_v18 }
 0xd7b   : > { %8063 = vmatmul.mubr.msk.f32.gmra.mrb[254].mxu0 %vm728_vm0, %v5754_v2  ;;  %v5786_v29 = vpop.trf.xlu1  ;;  %v9591_v17 = vpop.eup %9590 }
 0xd7c   : > { %6013 = vmatprep.mubr.f32.mxu0 %v18220_v18 }
 0xd7f   : > { %8064 = vmatmul.mubr.msk.f32.gmra.mrb[0].mxu0 %vm728_vm0, %v5755_v7  ;;  %v5787_v42 = vpop.trf.xlu1 }
 0xd80   : > { %6019 = vmatprep.mubr.f32.mxu0 %v18220_v18 }
 0xd83   : > { %8065 = vmatmul.mubr.msk.f32.gmra.mrb[2].mxu0 %vm728_vm0, %v5756_v45  ;;  %v5788_v41 = vpop.trf.xlu1 }
 0xd84   : > { %6025 = vmatprep.mubr.f32.mxu0 %v18220_v18 }
 0xd87   : > { %8066 = vmatmul.mubr.msk.f32.gmra.mrb[4].mxu0 %vm728_vm0, %v5757_v14  ;;  %v5789_v8 = vpop.trf.xlu1 }
 0xd88   : > { %6031 = vmatprep.mubr.f32.mxu0 %v18220_v18 }
 0xd8b   : > { %8067 = vmatmul.mubr.msk.f32.gmra.mrb[6].mxu0 %vm728_vm0, %v5758_v60  ;;  %v5790_v57 = vpop.trf.xlu1 }
 0xd8c   : > { %6037 = vmatprep.mubr.f32.mxu0 %v18220_v18 }
 0xd8f   : > { %8068 = vmatmul.mubr.msk.f32.gmra.mrb[8].mxu0 %vm728_vm0, %v5759_v22  ;;  %v5791_v19 = vpop.trf.xlu1 }
 0xd90   : > { %6043 = vmatprep.mubr.f32.mxu0 %v18220_v18 }
 0xd93   : > { %8069 = vmatmul.mubr.msk.f32.gmra.mrb[10].mxu0 %vm728_vm0, %v5760_v36  ;;  %v5792_v53 = vpop.trf.xlu1 }
 0xd94   : > { %6049 = vmatprep.mubr.f32.mxu0 %v18220_v18 }
 0xd97   : > { %8070 = vmatmul.mubr.msk.f32.gmra.mrb[12].mxu0 %vm728_vm0, %v5777_v5 }
 0xd98   : > { %6055 = vmatprep.mubr.f32.mxu0 %v18220_v18 }
 0xd9b   : > { %8071 = vmatmul.mubr.msk.f32.gmra.mrb[14].mxu0 %vm728_vm0, %v5778_v59 }
 0xd9c   : > { %6061 = vmatprep.mubr.f32.mxu0 %v18220_v18 }
 0xd9f   : > { %8072 = vmatmul.mubr.msk.f32.gmra.mrb[16].mxu0 %vm728_vm0, %v5779_v50 }
 0xda0   : > { %6067 = vmatprep.mubr.f32.mxu0 %v18220_v18 }
 0xda3   : > { %8073 = vmatmul.mubr.msk.f32.gmra.mrb[18].mxu0 %vm728_vm0, %v5780_v4 }
 0xda4   : > { %6073 = vmatprep.mubr.f32.mxu0 %v18220_v18 }
 0xda7   : > { %8074 = vmatmul.mubr.msk.f32.gmra.mrb[20].mxu0 %vm728_vm0, %v5781_v48 }
 0xda8   : > { %6079 = vmatprep.mubr.f32.mxu0 %v18220_v18 }
 0xdab   : > { %8075 = vmatmul.mubr.msk.f32.gmra.mrb[22].mxu0 %vm728_vm0, %v5782_v13 }
 0xdac   : > { %6085 = vmatprep.mubr.f32.mxu0 %v18220_v18 }
 0xdaf   : > { %8076 = vmatmul.mubr.msk.f32.gmra.mrb[24].mxu0 %vm728_vm0, %v5783_v6 }
 0xdb0   : > { %6091 = vmatprep.mubr.f32.mxu0 %v18220_v18 }
 0xdb3   : > { %8077 = vmatmul.mubr.msk.f32.gmra.mrb[26].mxu0 %vm728_vm0, %v5784_v52 }
 0xdb4   : > { %6097 = vmatprep.mubr.f32.mxu0 %v18220_v18 }
 0xdb7   : > { %8078 = vmatmul.mubr.msk.f32.gmra.mrb[28].mxu0 %vm728_vm0, %v5785_v30 }
 0xdb8   : > { %6103 = vmatprep.mubr.f32.mxu0 %v18220_v18 }
 0xdbb   : > { %8079 = vmatmul.mubr.msk.f32.gmra.mrb[30].mxu0 %vm728_vm0, %v5786_v29 }
 0xdbc   : > { %6109 = vmatprep.mubr.f32.mxu0 %v18220_v18 }
 0xdbf   : > { %8080 = vmatmul.mubr.msk.f32.gmra.mrb[32].mxu0 %vm728_vm0, %v5787_v42 }
 0xdc0   : > { %6115 = vmatprep.mubr.f32.mxu0 %v18220_v18 }
 0xdc3   : > { %8081 = vmatmul.mubr.msk.f32.gmra.mrb[34].mxu0 %vm728_vm0, %v5788_v41 }
 0xdc4   : > { %6121 = vmatprep.mubr.f32.mxu0 %v18220_v18 }
 0xdc7   : > { %8082 = vmatmul.mubr.msk.f32.gmra.mrb[36].mxu0 %vm728_vm0, %v5789_v8 }
 0xdc8   : > { %6127 = vmatprep.mubr.f32.mxu0 %v18220_v18 }
 0xdcb   : > { %8083 = vmatmul.mubr.msk.f32.gmra.mrb[38].mxu0 %vm728_vm0, %v5790_v57 }
 0xdcc   : > { %6133 = vmatprep.mubr.f32.mxu0 %v18220_v18 }
 0xdcf   : > { %8084 = vmatmul.mubr.msk.f32.gmra.mrb[40].mxu0 %vm728_vm0, %v5791_v19 }
 0xdd0   : > { %6139 = vmatprep.mubr.f32.mxu0 %v18220_v18 }
 0xdd3   : > { %8085 = vmatmul.mubr.msk.f32.gmra.mrb[42].mxu0 %vm728_vm0, %v5792_v53 }
 0xdd4   : > { %7625 = vmatprep.mubr.f32.mxu0 %v18220_v18 }
 0xe22   : > { %v5708_v49 = vpop.f32.mrb[232].mxu0 }
 0xe23   : > { %v5721_v51 = vmul.f32 %v9589_v20, %v5708_v49  ;;  %v5710_v26 = vpop.f32.mrb[233].mxu0 }
 0xe24   : > { %v5722_v27 = vmul.f32 %v9591_v17, %v5710_v26 }
 0xe26   : > { %v5714_v47 = vpop.f32.mrb[234].mxu0 }
 0xe27   : > { %v5723_v55 = vmul.f32 %v9589_v20, %v5714_v47  ;;  %v5716_v16 = vpop.f32.mrb[235].mxu0 }
 0xe28   : > { %v5724_v62 = vmul.f32 %v9591_v17, %v5716_v16 }
 0xe29   : > { %v8723_v24 = vpack.c.bf16 %v5723_v55, %v5721_v51 }
 0xe2a   : > { %v8721_v31 = vpack.c.bf16 %v5724_v62, %v5722_v27  ;;  %v15268_v40 = vpop.f32.mrb[236].mxu0 }
 0xe2b   : > { %v15270_v21 = vpop.f32.mrb[237].mxu0 }
 0xe2c   : > { %8722 = vmatprep.subr.bf16.mxu0 %v8721_v31 }
 0xe2d   : > { %8724 = vmatpush1.bf16.msra.mxu0 %v8723_v24 }
 0xe2e   : > { %v15272_v28 = vpop.f32.mrb[238].mxu0 }
 0xe2f   : > { %v15274_v61 = vpop.f32.mrb[239].mxu0 }
 0xe32   : > { %v15276_v44 = vpop.f32.mrb[240].mxu0 }
 0xe33   : > { %v6146_v33 = vmax.f32 %v15268_v40, %v15276_v44  ;;  %v15280_v34 = vpop.f32.mrb[241].mxu0 }
 0xe34   : > { %v6183_v11 = vmax.f32 %v15270_v21, %v15280_v34 }
 0xe36   : > { %v15284_v58 = vpop.f32.mrb[242].mxu0 }
 0xe37   : > { %v6147_v3 = vmax.f32 %v15272_v28, %v15284_v58  ;;  %v15288_v39 = vpop.f32.mrb[243].mxu0 }
 0xe38   : > { %v6184_v25 = vmax.f32 %v15274_v61, %v15288_v39 }
 0xe3a   : > { %v15292_v43 = vpop.f32.mrb[244].mxu0 }
 0xe3b   : > { %v6148_v35 = vmax.f32 %v6146_v33, %v15292_v43  ;;  %v15295_v38 = vpop.f32.mrb[245].mxu0 }
 0xe3c   : > { %v6185_v32 = vmax.f32 %v6183_v11, %v15295_v38 }
 0xe3e   : > { %v15298_v2 = vpop.f32.mrb[246].mxu0 }
 0xe3f   : > { %v6149_v7 = vmax.f32 %v6147_v3, %v15298_v2  ;;  %v15301_v5 = vpop.f32.mrb[247].mxu0 }
 0xe40   : > { %v6186_v45 = vmax.f32 %v6184_v25, %v15301_v5 }
 0xe42   : > { %v15304_v59 = vpop.f32.mrb[248].mxu0 }
 0xe43   : > { %v6150_v14 = vmax.f32 %v6148_v35, %v15304_v59  ;;  %v15307_v50 = vpop.f32.mrb[249].mxu0 }
 0xe44   : > { %v6187_v60 = vmax.f32 %v6185_v32, %v15307_v50 }
 0xe46   : > { %v15310_v4 = vpop.f32.mrb[250].mxu0 }
 0xe47   : > { %v6151_v22 = vmax.f32 %v6149_v7, %v15310_v4  ;;  %v15313_v48 = vpop.f32.mrb[251].mxu0 }
 0xe48   : > { %v6188_v36 = vmax.f32 %v6186_v45, %v15313_v48 }
 0xe4a   : > { %v15316_v13 = vpop.f32.mrb[252].mxu0 }
 0xe4b   : > { %v6152_v6 = vmax.f32 %v6150_v14, %v15316_v13  ;;  %v15319_v52 = vpop.f32.mrb[253].mxu0 }
 0xe4c   : > { %v6189_v30 = vmax.f32 %v6187_v60, %v15319_v52 }
 0xe4e   : > { %v15322_v29 = vpop.f32.mrb[254].mxu0 }
 0xe4f   : > { %v6153_v42 = vmax.f32 %v6151_v22, %v15322_v29  ;;  %v15325_v41 = vpop.f32.mrb[255].mxu0 }
 0xe50   : > { %v6190_v8 = vmax.f32 %v6188_v36, %v15325_v41 }
 0xe52   : > { %v15328_v57 = vpop.f32.mrb[0].mxu0 }
 0xe53   : > { %v6154_v19 = vmax.f32 %v6152_v6, %v15328_v57  ;;  %v15331_v53 = vpop.f32.mrb[1].mxu0 }
 0xe54   : > { %v6191_v15 = vmax.f32 %v6189_v30, %v15331_v53 }
 0xe56   : > { %v15334_v9 = vpop.f32.mrb[2].mxu0 }
 0xe57   : > { %v6155_v37 = vmax.f32 %v6153_v42, %v15334_v9  ;;  %v15337_v46 = vpop.f32.mrb[3].mxu0 }
 0xe58   : > { %18248 = vst [vmem:[#allocation118_spill] sm:$0xff] %v15337_v46  ;;  %v6192_v10 = vmax.f32 %v6190_v8, %v15337_v46 }
 0xe5a   : > { %v15340_v1 = vpop.f32.mrb[4].mxu0 }
 0xe5b   : > { %v6156_v56 = vmax.f32 %v6154_v19, %v15340_v1  ;;  %v15343_v0 = vpop.f32.mrb[5].mxu0 }
 0xe5c   : > { %18249 = vst [vmem:[#allocation121_spill] sm:$0xff] %v15343_v0  ;;  %v6193_v23 = vmax.f32 %v6191_v15, %v15343_v0 }
 0xe5e   : > { %v15346_v54 = vpop.f32.mrb[6].mxu0 }
 0xe5f   : > { %v6157_v63 = vmax.f32 %v6155_v37, %v15346_v54  ;;  %v15349_v12 = vpop.f32.mrb[7].mxu0 }
 0xe60   : > { %18250 = vst [vmem:[#allocation125_spill] sm:$0xff] %v15349_v12  ;;  %v6194_v20 = vmax.f32 %v6192_v10, %v15349_v12 }
 0xe62   : > { %v15352_v49 = vpop.f32.mrb[8].mxu0 }
 0xe63   : > { %v6158_v17 = vmax.f32 %v6156_v56, %v15352_v49  ;;  %v15355_v51 = vpop.f32.mrb[9].mxu0 }
 0xe64   : > { %18251 = vst [vmem:[#allocation128_spill] sm:$0xff] %v15355_v51  ;;  %v6195_v26 = vmax.f32 %v6193_v23, %v15355_v51 }
 0xe66   : > { %v15358_v27 = vpop.f32.mrb[10].mxu0 }
 0xe67   : > { %v6159_v47 = vmax.f32 %v6157_v63, %v15358_v27  ;;  %v15361_v55 = vpop.f32.mrb[11].mxu0 }
 0xe68   : > { %18252 = vst [vmem:[#allocation131_spill] sm:$0xff] %v15361_v55  ;;  %v6196_v16 = vmax.f32 %v6194_v20, %v15361_v55 }
 0xe6a   : > { %v15364_v62 = vpop.f32.mrb[12].mxu0 }
 0xe6b   : > { %v6160_v24 = vmax.f32 %v6158_v17, %v15364_v62  ;;  %v15367_v31 = vpop.f32.mrb[13].mxu0 }
 0xe6c   : > { %18253 = vst [vmem:[#allocation134_spill] sm:$0xff] %v15367_v31  ;;  %v6197_v33 = vmax.f32 %v6195_v26, %v15367_v31 }
 0xe6e   : > { %v15370_v11 = vpop.f32.mrb[14].mxu0 }
 0xe6f   : > { %v6161_v3 = vmax.f32 %v6159_v47, %v15370_v11  ;;  %v15373_v25 = vpop.f32.mrb[15].mxu0 }
 0xe70   : > { %18254 = vst [vmem:[#allocation137_spill] sm:$0xff] %v15373_v25  ;;  %v6198_v35 = vmax.f32 %v6196_v16, %v15373_v25 }
 0xe72   : > { %v15376_v32 = vpop.f32.mrb[16].mxu0 }
 0xe73   : > { %v6162_v7 = vmax.f32 %v6160_v24, %v15376_v32  ;;  %v15379_v45 = vpop.f32.mrb[17].mxu0 }
 0xe74   : > { %18255 = vst [vmem:[#allocation140_spill] sm:$0xff] %v15379_v45  ;;  %v6199_v14 = vmax.f32 %v6197_v33, %v15379_v45 }
 0xe76   : > { %v15382_v60 = vpop.f32.mrb[18].mxu0 }
 0xe77   : > { %v6163_v22 = vmax.f32 %v6161_v3, %v15382_v60  ;;  %v15385_v36 = vpop.f32.mrb[19].mxu0 }
 0xe78   : > { %18256 = vst [vmem:[#allocation143_spill] sm:$0xff] %v15385_v36  ;;  %v6200_v6 = vmax.f32 %v6198_v35, %v15385_v36 }
 0xe7a   : > { %v15388_v30 = vpop.f32.mrb[20].mxu0 }
 0xe7b   : > { %v6164_v42 = vmax.f32 %v6162_v7, %v15388_v30  ;;  %v15391_v8 = vpop.f32.mrb[21].mxu0 }
 0xe7c   : > { %18257 = vst [vmem:[#allocation146_spill] sm:$0xff] %v15391_v8  ;;  %v6201_v19 = vmax.f32 %v6199_v14, %v15391_v8 }
 0xe7e   : > { %v15394_v15 = vpop.f32.mrb[22].mxu0 }
 0xe7f   : > { %v6165_v37 = vmax.f32 %v6163_v22, %v15394_v15  ;;  %v15397_v10 = vpop.f32.mrb[23].mxu0 }
 0xe80   : > { %18258 = vst [vmem:[#allocation105_spill] sm:$0xff] %v15397_v10  ;;  %v6202_v56 = vmax.f32 %v6200_v6, %v15397_v10 }
 0xe82   : > { %v15400_v23 = vpop.f32.mrb[24].mxu0 }
 0xe83   : > { %v6166_v63 = vmax.f32 %v6164_v42, %v15400_v23  ;;  %v15403_v20 = vpop.f32.mrb[25].mxu0 }
 0xe84   : > { %18259 = vst [vmem:[#allocation107_spill] sm:$0xff] %v15403_v20  ;;  %v6203_v17 = vmax.f32 %v6201_v19, %v15403_v20 }
 0xe86   : > { %v15406_v26 = vpop.f32.mrb[26].mxu0 }
 0xe87   : > { %v6167_v47 = vmax.f32 %v6165_v37, %v15406_v26  ;;  %v15409_v16 = vpop.f32.mrb[27].mxu0 }
 0xe88   : > { %18260 = vst [vmem:[#allocation109_spill] sm:$0xff] %v15409_v16  ;;  %v6204_v24 = vmax.f32 %v6202_v56, %v15409_v16 }
 0xe8a   : > { %v15412_v33 = vpop.f32.mrb[28].mxu0 }
 0xe8b   : > { %v6168_v3 = vmax.f32 %v6166_v63, %v15412_v33  ;;  %v15415_v35 = vpop.f32.mrb[29].mxu0 }
 0xe8c   : > { %18261 = vst [vmem:[#allocation111_spill] sm:$0xff] %v15415_v35  ;;  %v6205_v7 = vmax.f32 %v6203_v17, %v15415_v35 }
 0xe8e   : > { %v15418_v14 = vpop.f32.mrb[30].mxu0 }
 0xe8f   : > { %v6169_v22 = vmax.f32 %v6167_v47, %v15418_v14  ;;  %v15421_v6 = vpop.f32.mrb[31].mxu0 }
 0xe90   : > { %18262 = vst [vmem:[#allocation113_spill] sm:$0xff] %v15421_v6  ;;  %v6206_v42 = vmax.f32 %v6204_v24, %v15421_v6 }
 0xe92   : > { %v15424_v19 = vpop.f32.mrb[32].mxu0 }
 0xe93   : > { %v6170_v37 = vmax.f32 %v6168_v3, %v15424_v19  ;;  %v15427_v56 = vpop.f32.mrb[33].mxu0 }
 0xe94   : > { %18263 = vst [vmem:[#allocation115_spill] sm:$0xff] %v15427_v56  ;;  %v6207_v63 = vmax.f32 %v6205_v7, %v15427_v56 }
 0xe96   : > { %v15430_v18 = vpop.f32.mrb[34].mxu0 }
 0xe97   : > { %v6171_v17 = vmax.f32 %v6169_v22, %v15430_v18  ;;  %v15433_v35 = vpop.f32.mrb[35].mxu0 }
 0xe98   : > { %18264 = vst [vmem:[#allocation119_spill] sm:$0xff] %v15433_v35  ;;  %v6208_v47 = vmax.f32 %v6206_v42, %v15433_v35 }
 0xe9a   : > { %v15436_v16 = vpop.f32.mrb[36].mxu0 }
 0xe9b   : > { %v6172_v24 = vmax.f32 %v6170_v37, %v15436_v16  ;;  %v15439_v6 = vpop.f32.mrb[37].mxu0 }
 0xe9c   : > { %18265 = vst [vmem:[#allocation122_spill] sm:$0xff] %v15439_v6  ;;  %v6209_v3 = vmax.f32 %v6207_v63, %v15439_v6 }
 0xe9e   : > { %v15442_v20 = vpop.f32.mrb[38].mxu0 }
 0xe9f   : > { %v6173_v7 = vmax.f32 %v6171_v17, %v15442_v20  ;;  %v15445_v56 = vpop.f32.mrb[39].mxu0 }
 0xea0   : > { %18266 = vst [vmem:[#allocation126_spill] sm:$0xff] %v15445_v56  ;;  %v6210_v22 = vmax.f32 %v6208_v47, %v15445_v56 }
 0xea2   : > { %v15448_v10 = vpop.f32.mrb[40].mxu0 }
 0xea3   : > { %v6174_v42 = vmax.f32 %v6172_v24, %v15448_v10  ;;  %v15451_v35 = vpop.f32.mrb[41].mxu0 }
 0xea4   : > { %18267 = vst [vmem:[#allocation129_spill] sm:$0xff] %v15451_v35  ;;  %v6211_v37 = vmax.f32 %v6209_v3, %v15451_v35 }
 0xea6   : > { %v15454_v8 = vpop.f32.mrb[42].mxu0 }
 0xea7   : > { %v6175_v63 = vmax.f32 %v6173_v7, %v15454_v8  ;;  %v15457_v6 = vpop.f32.mrb[43].mxu0 }
 0xea8   : > { %18268 = vst [vmem:[#allocation132_spill] sm:$0xff] %v15457_v6  ;;  %v6212_v17 = vmax.f32 %v6210_v22, %v15457_v6 }
 0xea9   : > { %v6176_v36 = vmax.f32 %v6174_v42, %v6175_v63 }
 0xeaa   : > { %v6213_v45 = vmax.f32 %v6211_v37, %v6212_v17 }
 0xeab   : > { %v6177_v25 = vrot.slane %v6176_v36, 4 }
 0xeac   : > { %v6214_v47 = vrot.slane %v6213_v45, 4 }
 0xead   : > { %v6178_v56 = vmax.f32 %v6176_v36, %v6177_v25 }
 0xeae   : > { %v6215_v31 = vmax.f32 %v6213_v45, %v6214_v47 }
 0xeaf   : > { %v6179_v55 = vrot.slane %v6178_v56, 2 }
 0xeb0   : > { %v6216_v24 = vrot.slane %v6215_v31, 2 }
 0xeb1   : > { %v6180_v51 = vmax.f32 %v6178_v56, %v6179_v55 }
 0xeb2   : > { %v6217_v12 = vmax.f32 %v6215_v31, %v6216_v24 }
 0xeb3   : > { %v6181_v0 = vrot.slane %v6180_v51, 1 }
 0xeb4   : > { %v6218_v3 = vrot.slane %v6217_v12, 1 }
 0xeb5   : > { %v15460_v35 = vmax.f32 %v6180_v51, %v6181_v0 }
 0xeb6   : > { %v15462_v46 = vmax.f32 %v6217_v12, %v6218_v3 }
 0xeb7   : > { %v6220_v7 = vsub.f32 %v15268_v40, %v15460_v35  ;;  %v6222_v22 = vsub.f32 %v15272_v28, %v15460_v35  ;;  %v6224_v25 = vsub.f32 %v15276_v44, %v15460_v35  ;;  %v6226_v45 = vsub.f32 %v15284_v58, %v15460_v35 }
 0xeb8   : > { %v6228_v55 = vsub.f32 %v15292_v43, %v15460_v35  ;;  %v6230_v0 = vsub.f32 %v15298_v2, %v15460_v35  ;;  %v6232_v12 = vsub.f32 %v15304_v59, %v15460_v35  ;;  %v6234_v40 = vsub.f32 %v15310_v4, %v15460_v35 }
 0xeb9   : > { %v6236_v28 = vsub.f32 %v15316_v13, %v15460_v35  ;;  %v6238_v44 = vsub.f32 %v15322_v29, %v15460_v35  ;;  %v6240_v58 = vsub.f32 %v15328_v57, %v15460_v35  ;;  %v6242_v43 = vsub.f32 %v15334_v9, %v15460_v35 }
 0xeba   : > { %v6244_v2 = vsub.f32 %v15340_v1, %v15460_v35  ;;  %v6246_v59 = vsub.f32 %v15346_v54, %v15460_v35  ;;  %v6248_v4 = vsub.f32 %v15352_v49, %v15460_v35  ;;  %v6250_v13 = vsub.f32 %v15358_v27, %v15460_v35 }
 0xebb   : > { %v6252_v29 = vsub.f32 %v15364_v62, %v15460_v35  ;;  %v6254_v57 = vsub.f32 %v15370_v11, %v15460_v35  ;;  %v6256_v9 = vsub.f32 %v15376_v32, %v15460_v35  ;;  %v6258_v1 = vsub.f32 %v15382_v60, %v15460_v35  ;;  %v18288_v62 = vld [vmem:[#allocation129_spill] sm:$0xff] }
 0xebc   : > { %v6260_v54 = vsub.f32 %v15388_v30, %v15460_v35  ;;  %v6262_v49 = vsub.f32 %v15394_v15, %v15460_v35  ;;  %v6264_v51 = vsub.f32 %v15400_v23, %v15460_v35  ;;  %v6266_v27 = vsub.f32 %v15406_v26, %v15460_v35 }
 0xebd   : > { %v6284_v23 = vmul.f32 1.442695, %v6220_v7  ;;  %v6288_v26 = vmul.f32 1.442695, %v6222_v22  ;;  %v6292_v56 = vmul.f32 1.442695, %v6224_v25 }
 0xebe   : > { %v6296_v37 = vmul.f32 1.442695, %v6226_v45  ;;  %v6300_v17 = vmul.f32 1.442695, %v6228_v55  ;;  %v6304_v47 = vmul.f32 1.442695, %v6230_v0 }
 0xebf   : > { %9592 = vpow2.f32 %v6284_v23  ;;  %v6308_v24 = vmul.f32 1.442695, %v6232_v12  ;;  %v6312_v3 = vmul.f32 1.442695, %v6234_v40  ;;  %v6316_v30 = vmul.f32 1.442695, %v6236_v28 }
 0xec0   : > { %9594 = vpow2.f32 %v6288_v26  ;;  %v6320_v15 = vmul.f32 1.442695, %v6238_v44  ;;  %v6324_v7 = vmul.f32 1.442695, %v6240_v58  ;;  %v6328_v22 = vmul.f32 1.442695, %v6242_v43 }
 0xec1   : > { %9596 = vpow2.f32 %v6292_v56  ;;  %v6332_v25 = vmul.f32 1.442695, %v6244_v2  ;;  %v6336_v42 = vmul.f32 1.442695, %v6246_v59  ;;  %v6340_v45 = vmul.f32 1.442695, %v6248_v4 }
 0xec2   : > { %9598 = vpow2.f32 %v6296_v37  ;;  %v6344_v36 = vmul.f32 1.442695, %v6250_v13  ;;  %v6348_v63 = vmul.f32 1.442695, %v6252_v29  ;;  %v6352_v23 = vmul.f32 1.442695, %v6254_v57 }
 0xec3   : > { %9600 = vpow2.f32 %v6300_v17  ;;  %v6356_v55 = vmul.f32 1.442695, %v6256_v9  ;;  %v6360_v0 = vmul.f32 1.442695, %v6258_v1  ;;  %v6364_v26 = vmul.f32 1.442695, %v6260_v54 }
 0xec4   : > { %9602 = vpow2.f32 %v6304_v47  ;;  %v15532_v12 = vmul.f32 1.442695, %v6262_v49  ;;  %v15534_v40 = vmul.f32 1.442695, %v6264_v51  ;;  %v15536_v28 = vmul.f32 1.442695, %v6266_v27 }
 0xec5   : > { %9604 = vpow2.f32 %v6308_v24  ;;  %v18269_v54 = vld [vmem:[#allocation118_spill] sm:$0xff]  ;;  %v18271_v56 = vld [vmem:[#allocation125_spill] sm:$0xff]  ;;  %v18272_v47 = vld [vmem:[#allocation128_spill] sm:$0xff] }
 0xec6   : > { %9606 = vpow2.f32 %v6312_v3  ;;  %v18273_v3 = vld [vmem:[#allocation131_spill] sm:$0xff]  ;;  %v18275_v1 = vld [vmem:[#allocation137_spill] sm:$0xff]  ;;  %v18276_v9 = vld [vmem:[#allocation140_spill] sm:$0xff] }
 0xec7   : > { %9608 = vpow2.f32 %v6316_v30  ;;  %v18270_v30 = vld [vmem:[#allocation121_spill] sm:$0xff]  ;;  %v18277_v24 = vld [vmem:[#allocation143_spill] sm:$0xff]  ;;  %v18278_v13 = vld [vmem:[#allocation146_spill] sm:$0xff] }
 0xec8   : > { %9610 = vpow2.f32 %v6320_v15  ;;  %v18279_v4 = vld [vmem:[#allocation105_spill] sm:$0xff]  ;;  %v18280_v37 = vld [vmem:[#allocation107_spill] sm:$0xff] }
 0xec9   : > { %v15546_v59 = vpop.eup %9592  ;;  %9612 = vpow2.f32 %v6324_v7  ;;  %v18281_v43 = vld [vmem:[#allocation109_spill] sm:$0xff]  ;;  %v18282_v7 = vld [vmem:[#allocation111_spill] sm:$0xff] }
 0xeca   : > { %v15554_v57 = vpop.eup %9594  ;;  %9614 = vpow2.f32 %v6328_v22  ;;  %v18274_v22 = vld [vmem:[#allocation134_spill] sm:$0xff]  ;;  %v18283_v44 = vld [vmem:[#allocation113_spill] sm:$0xff] }
 0xecb   : > { %v15562_v51 = vpop.eup %9596  ;;  %9616 = vpow2.f32 %v6332_v25  ;;  %v6412_v27 = vadd.f32 %v15554_v57, %v15546_v59  ;;  %v18287_v25 = vld [vmem:[#allocation126_spill] sm:$0xff] }
 0xecc   : > { %v15570_v17 = vpop.eup %9598  ;;  %9618 = vpow2.f32 %v6336_v42  ;;  %v18285_v42 = vld [vmem:[#allocation119_spill] sm:$0xff] }
 0xecd   : > { %v15578_v49 = vpop.eup %9600  ;;  %9620 = vpow2.f32 %v6340_v45  ;;  %v6413_v15 = vadd.f32 %v15562_v51, %v6412_v27 }
 0xece   : > { %v15585_v29 = vpop.eup %9602  ;;  %9622 = vpow2.f32 %v6344_v36 }
 0xecf   : > { %v15593_v2 = vpop.eup %9604  ;;  %9624 = vpow2.f32 %v6348_v63  ;;  %v6414_v27 = vadd.f32 %v15570_v17, %v6413_v15 }
 0xed0   : > { %v15600_v58 = vpop.eup %9606  ;;  %9626 = vpow2.f32 %v6352_v23 }
 0xed1   : > { %v15608_v32 = vpop.eup %9608  ;;  %9628 = vpow2.f32 %v6356_v55  ;;  %v6415_v15 = vadd.f32 %v15578_v49, %v6414_v27  ;;  %v18289_v27 = vsub.f32 %v15412_v33, %v15460_v35 }
 0xed2   : > { %v15615_v31 = vpop.eup %9610  ;;  %9630 = vpow2.f32 %v6360_v0  ;;  %v18290_v0 = vsub.f32 %v15418_v14, %v15460_v35 }
 0xed3   : > { %v15623_v60 = vpop.eup %9612  ;;  %9632 = vpow2.f32 %v6364_v26  ;;  %v6380_v36 = vmul.f32 1.442695, %v18289_v27  ;;  %v6416_v23 = vadd.f32 %v15585_v29, %v6415_v15  ;;  %v18291_v26 = vsub.f32 %v15424_v19, %v15460_v35 }
 0xed4   : > { %v15629_v11 = vpop.eup %9614  ;;  %9634 = vpow2.f32 %v15532_v12  ;;  %v6384_v63 = vmul.f32 1.442695, %v18290_v0  ;;  %v18292_v12 = vsub.f32 %v15430_v18, %v15460_v35  ;;  %v18296_v18 = vsub.f32 %v15448_v10, %v15460_v35 }
 0xed5   : > { %v15635_v45 = vpop.eup %9616  ;;  %9636 = vpow2.f32 %v15534_v40  ;;  %v6388_v55 = vmul.f32 1.442695, %v18291_v26  ;;  %v6417_v33 = vadd.f32 %v15593_v2, %v6416_v23  ;;  %v18293_v40 = vsub.f32 %v15436_v16, %v15460_v35 }
 0xed6   : > { %v15642_v27 = vpop.eup %9618  ;;  %9638 = vpow2.f32 %v15536_v28  ;;  %v6392_v15 = vmul.f32 1.442695, %v18292_v12  ;;  %v18294_v23 = vsub.f32 %v15442_v20, %v15460_v35 }
 0xed7   : > { %v15648_v14 = vpop.eup %9620  ;;  %9640 = vpow2.f32 %v6380_v36  ;;  %v6396_v0 = vmul.f32 1.442695, %v18293_v40  ;;  %v6418_v19 = vadd.f32 %v15600_v58, %v6417_v33  ;;  %v6404_v36 = vmul.f32 1.442695, %v18296_v18 }
 0xed8   : > { %v15654_v26 = vpop.eup %9622  ;;  %9642 = vpow2.f32 %v6384_v63  ;;  %v6400_v28 = vmul.f32 1.442695, %v18294_v23  ;;  %v18297_v33 = vsub.f32 %v15454_v8, %v15460_v35  ;;  %v18300_v8 = vsub.f32 %v15280_v34, %v15462_v46 }
 0xed9   : > { %v15659_v6 = vpop.eup %9624  ;;  %9644 = vpow2.f32 %v6388_v55  ;;  %v6419_v12 = vadd.f32 %v15608_v32, %v6418_v19  ;;  %v18298_v55 = vsub.f32 %v15270_v21, %v15462_v46  ;;  %v18299_v19 = vsub.f32 %v15274_v61, %v15462_v46 }
 0xeda   : > { %18295 = vst [vmem:[#allocation135_spill] sm:$0xff] %v15659_v6  ;;  %v15665_v16 = vpop.eup %9626  ;;  %9646 = vpow2.f32 %v6392_v15  ;;  %v6408_v63 = vmul.f32 1.442695, %v18297_v33  ;;  %v6294_v35 = vmul.f32 1.442695, %v18300_v8  ;;  %v18301_v21 = vsub.f32 %v15288_v39, %v15462_v46 }
 0xedb   : > { %v15670_v40 = vpop.eup %9628  ;;  %9648 = vpow2.f32 %v6396_v0  ;;  %v6420_v20 = vadd.f32 %v15615_v31, %v6419_v12  ;;  %v6286_v23 = vmul.f32 1.442695, %v18298_v55  ;;  %v6290_v15 = vmul.f32 1.442695, %v18299_v19 }
 0xedc   : > { %v15676_v10 = vpop.eup %9630  ;;  %9650 = vpow2.f32 %v6400_v28  ;;  %v6298_v12 = vmul.f32 1.442695, %v18301_v21  ;;  %v18302_v28 = vsub.f32 %v15295_v38, %v15462_v46  ;;  %v18303_v61 = vsub.f32 %v15301_v5, %v15462_v46 }
 0xedd   : > { %v15684_v18 = vpop.eup %9632  ;;  %9652 = vpow2.f32 %v6404_v36  ;;  %v6421_v0 = vadd.f32 %v15623_v60, %v6420_v20  ;;  %v18304_v36 = vsub.f32 %v15307_v50, %v15462_v46  ;;  %v18305_v20 = vsub.f32 %v15313_v48, %v15462_v46 }
 0xede   : > { %v6302_v33 = vmul.f32 1.442695, %v18302_v28  ;;  %v15693_v55 = vpop.eup %9634  ;;  %9654 = vpow2.f32 %v6408_v63  ;;  %v6306_v34 = vmul.f32 1.442695, %v18303_v61  ;;  %v18306_v63 = vsub.f32 %v15319_v52, %v15462_v46 }
 0xedf   : > { %v6310_v19 = vmul.f32 1.442695, %v18304_v36  ;;  %v6314_v39 = vmul.f32 1.442695, %v18305_v20  ;;  %v15704_v8 = vpop.eup %9636  ;;  %v6422_v38 = vadd.f32 %v15629_v11, %v6421_v0  ;;  %9656 = vpow2.f32 %v6286_v23 }
 0xee0   : > { %v6318_v21 = vmul.f32 1.442695, %v18306_v63  ;;  %v18307_v5 = vsub.f32 %v15325_v41, %v15462_v46  ;;  %v15713_v61 = vpop.eup %9638  ;;  %9658 = vpow2.f32 %v6290_v15 }
 0xee1   : > { %v15721_v0 = vpop.eup %9640  ;;  %v6423_v52 = vadd.f32 %v15635_v45, %v6422_v38  ;;  %9660 = vpow2.f32 %v6294_v35 }
 0xee2   : > { %v6322_v28 = vmul.f32 1.442695, %v18307_v5  ;;  %v15728_v36 = vpop.eup %9642  ;;  %9662 = vpow2.f32 %v6298_v12  ;;  %v18308_v12 = vsub.f32 %v15331_v53, %v15462_v46  ;;  %v18309_v5 = vsub.f32 %v18269_v54, %v15462_v46 }
 0xee3   : > { %v15736_v38 = vpop.eup %9644  ;;  %v6424_v35 = vadd.f32 %v15642_v27, %v6423_v52  ;;  %9664 = vpow2.f32 %v6302_v33 }
 0xee4   : > { %v15743_v41 = vpop.eup %9646  ;;  %9666 = vpow2.f32 %v6306_v34  ;;  %v6326_v15 = vmul.f32 1.442695, %v18308_v12  ;;  %v6330_v63 = vmul.f32 1.442695, %v18309_v5 }
 0xee5   : > { %v15751_v52 = vpop.eup %9648  ;;  %v6425_v33 = vadd.f32 %v15648_v14, %v6424_v35  ;;  %9668 = vpow2.f32 %v6310_v19  ;;  %v18310_v19 = vsub.f32 %v18270_v30, %v15462_v46  ;;  %v18315_v30 = vsub.f32 %v18275_v1, %v15462_v46 }
 0xee6   : > { %v15759_v23 = vpop.eup %9650  ;;  %9670 = vpow2.f32 %v6314_v39  ;;  %v18311_v39 = vsub.f32 %v18271_v56, %v15462_v46  ;;  %v18314_v56 = vsub.f32 %v18274_v22, %v15462_v46  ;;  %v18318_v1 = vsub.f32 %v18278_v13, %v15462_v46 }
 0xee7   : > { %v15764_v20 = vpop.eup %9652  ;;  %v6426_v48 = vadd.f32 %v15654_v26, %v6425_v33  ;;  %9672 = vpow2.f32 %v6318_v21  ;;  %v6334_v53 = vmul.f32 1.442695, %v18310_v19  ;;  %v18312_v21 = vsub.f32 %v18272_v47, %v15462_v46 }
 0xee8   : > { %v15772_v12 = vpop.eup %9654  ;;  %9674 = vpow2.f32 %v6322_v28  ;;  %v6338_v54 = vmul.f32 1.442695, %v18311_v39  ;;  %v18313_v28 = vsub.f32 %v18273_v3, %v15462_v46  ;;  %v6350_v39 = vmul.f32 1.442695, %v18314_v56 }
 0xee9   : > { %v9657_v5 = vpop.eup %9656  ;;  %v6427_v34 = vadd.f32 %v15659_v6, %v6426_v48  ;;  %9676 = vpow2.f32 %v6326_v15  ;;  %v6342_v33 = vmul.f32 1.442695, %v18312_v21  ;;  %v18316_v3 = vsub.f32 %v18276_v9, %v15462_v46 }
 0xeea   : > { %v9659_v19 = vpop.eup %9658  ;;  %9678 = vpow2.f32 %v6330_v63  ;;  %v6346_v35 = vmul.f32 1.442695, %v18313_v28  ;;  %v6354_v63 = vmul.f32 1.442695, %v18315_v30  ;;  %v6366_v30 = vmul.f32 1.442695, %v18318_v1 }
 0xeeb   : > { %v9661_v50 = vpop.eup %9660  ;;  %v6428_v48 = vadd.f32 %v15665_v16, %v6427_v34  ;;  %9680 = vpow2.f32 %v6334_v53  ;;  %v6449_v15 = vadd.f32 %v9659_v19, %v9657_v5  ;;  %v8569_v47 = vpack.c.bf16 %v9659_v19, %v9657_v5 }
 0xeec   : > { %v9663_v21 = vpop.eup %9662  ;;  %9682 = vpow2.f32 %v6338_v54  ;;  %v6358_v28 = vmul.f32 1.442695, %v18316_v3  ;;  %v18317_v54 = vsub.f32 %v18277_v24, %v15462_v46  ;;  %v18319_v9 = vpack.c.bf16 %v15554_v57, %v15546_v59 }
 0xeed   : > { %v9665_v6 = vpop.eup %9664  ;;  %v6429_v22 = vadd.f32 %v15670_v40, %v6428_v48  ;;  %9684 = vpow2.f32 %v6342_v33  ;;  %v6450_v56 = vadd.f32 %v9661_v50, %v6449_v15  ;;  %8570 = vmatprep.subr.bf16.mxu1 %v8569_v47  ;;  %v8573_v34 = vpack.c.bf16 %v9663_v21, %v9661_v50 }
 0xeee   : > { %v9667_v53 = vpop.eup %9666  ;;  %9686 = vpow2.f32 %v6346_v35  ;;  %v6362_v5 = vmul.f32 1.442695, %v18317_v54  ;;  %8572 = vmatpush1.bf16.msra.mxu1 %v18319_v9  ;;  %v18320_v24 = vsub.f32 %v18279_v4, %v15462_v46  ;;  %v18321_v13 = vsub.f32 %v18280_v37, %v15462_v46  ;;  %v18326_v9 = vld [vmem:[#allocation115_spill] sm:$0xff] }
 0xeef   : > { %v9669_v19 = vpop.eup %9668  ;;  %v6430_v33 = vadd.f32 %v15676_v10, %v6429_v22  ;;  %9688 = vpow2.f32 %v6350_v39  ;;  %v6451_v48 = vadd.f32 %v9663_v21, %v6450_v56  ;;  %8574 = vmatprep.subr.bf16.mxu1 %v8573_v34  ;;  %v8577_v50 = vpack.c.bf16 %v9667_v53, %v9665_v6 }
 0xef0   : > { %v9671_v35 = vpop.eup %9670  ;;  %9690 = vpow2.f32 %v6354_v63  ;;  %v6370_v15 = vmul.f32 1.442695, %v18320_v24  ;;  %v6374_v47 = vmul.f32 1.442695, %v18321_v13  ;;  %v18322_v21 = vsub.f32 %v18281_v43, %v15462_v46 }
 0xef1   : > { %v9673_v3 = vpop.eup %9672  ;;  %v6431_v59 = vadd.f32 %v15684_v18, %v6430_v33  ;;  %9692 = vpow2.f32 %v6358_v28  ;;  %v6452_v57 = vadd.f32 %v9665_v6, %v6451_v48  ;;  %v8581_v22 = vpack.c.bf16 %v9671_v35, %v9669_v19 }
 0xef2   : > { %v9675_v39 = vpop.eup %9674  ;;  %9694 = vpow2.f32 %v6362_v5  ;;  %v6378_v63 = vmul.f32 1.442695, %v18322_v21  ;;  %v18323_v4 = vsub.f32 %v18282_v7, %v15462_v46  ;;  %v18324_v37 = vpack.c.bf16 %v15570_v17, %v15562_v51 }
 0xef3   : > { %v9677_v34 = vpop.eup %9676  ;;  %v6432_v54 = vadd.f32 %v15693_v55, %v6431_v59  ;;  %9696 = vpow2.f32 %v6366_v30  ;;  %v6453_v6 = vadd.f32 %v9667_v53, %v6452_v57  ;;  %v8585_v28 = vpack.c.bf16 %v9675_v39, %v9673_v3 }
 0xef4   : > { %v6382_v56 = vmul.f32 1.442695, %v18323_v4  ;;  %8576 = vmatpush1.bf16.msra.mxu1 %v18324_v37  ;;  %v9679_v5 = vpop.eup %9678  ;;  %9698 = vpow2.f32 %v6370_v15  ;;  %v18325_v43 = vsub.f32 %v18283_v44, %v15462_v46  ;;  %v18327_v7 = vsub.f32 %v18326_v9, %v15462_v46  ;;  %v18329_v15 = vld [vmem:[#allocation122_spill] sm:$0xff] }
 0xef5   : > { %8578 = vmatprep.subr.bf16.mxu1 %v8577_v50  ;;  %v9681_v48 = vpop.eup %9680  ;;  %v6433_v51 = vadd.f32 %v15704_v8, %v6432_v54  ;;  %9700 = vpow2.f32 %v6374_v47  ;;  %v6454_v17 = vadd.f32 %v9669_v19, %v6453_v6  ;;  %v8589_v24 = vpack.c.bf16 %v9679_v5, %v9677_v34 }
 0xef6   : > { %v6386_v1 = vmul.f32 1.442695, %v18325_v43  ;;  %v6390_v33 = vmul.f32 1.442695, %v18327_v7  ;;  %v9683_v30 = vpop.eup %9682  ;;  %9702 = vpow2.f32 %v6378_v63  ;;  %v18328_v53 = vsub.f32 %v18285_v42, %v15462_v46 }
 0xef7   : > { %v18330_v44 = vsub.f32 %v18329_v15, %v15462_v46  ;;  %v18331_v59 = vpack.c.bf16 %v15585_v29, %v15578_v49  ;;  %v9685_v57 = vpop.eup %9684  ;;  %v6434_v21 = vadd.f32 %v15713_v61, %v6433_v51  ;;  %9704 = vpow2.f32 %v6382_v56 }
 0xef8   : > { %v6394_v50 = vmul.f32 1.442695, %v18328_v53  ;;  %v6455_v19 = vadd.f32 %v9671_v35, %v6454_v17  ;;  %v8593_v47 = vpack.c.bf16 %v9683_v30, %v9681_v48  ;;  %v9687_v63 = vpop.eup %9686  ;;  %9706 = vpow2.f32 %v6386_v1  ;;  %v18334_v35 = vld [vmem:[#allocation132_spill] sm:$0xff] }
 0xef9   : > { %v6398_v13 = vmul.f32 1.442695, %v18330_v44  ;;  %8580 = vmatpush1.bf16.msra.mxu1 %v18331_v59  ;;  %v18332_v42 = vsub.f32 %v18287_v25, %v15462_v46  ;;  %v18333_v37 = vsub.f32 %v18288_v62, %v15462_v46  ;;  %v9689_v6 = vpop.eup %9688  ;;  %v6435_v29 = vadd.f32 %v15721_v0, %v6434_v21 }
 0xefa   : > { %8582 = vmatprep.subr.bf16.mxu1 %v8581_v22  ;;  %9708 = vpow2.f32 %v6390_v33  ;;  %v6456_v49 = vadd.f32 %v9673_v3, %v6455_v19  ;;  %v8597_v43 = vpack.c.bf16 %v9687_v63, %v9685_v57  ;;  %v9691_v56 = vpop.eup %9690  ;;  %v18335_v22 = vsub.f32 %v18334_v35, %v15462_v46 }
 0xefb   : > { %v6402_v4 = vmul.f32 1.442695, %v18332_v42  ;;  %v6406_v54 = vmul.f32 1.442695, %v18333_v37  ;;  %9710 = vpow2.f32 %v6394_v50  ;;  %v18336_v25 = vpack.c.bf16 %v15600_v58, %v15593_v2  ;;  %v9693_v9 = vpop.eup %9692 }
 0xefc   : > { %v6410_v1 = vmul.f32 1.442695, %v18335_v22  ;;  %v6436_v62 = vadd.f32 %v15728_v36, %v6435_v29  ;;  %9712 = vpow2.f32 %v6398_v13  ;;  %v6457_v7 = vadd.f32 %v9675_v39, %v6456_v49  ;;  %v9695_v33 = vpop.eup %9694 }
 0xefd   : > { %8584 = vmatpush1.bf16.msra.mxu1 %v18336_v25  ;;  %v8601_v51 = vpack.c.bf16 %v9691_v56, %v9689_v6  ;;  %9714 = vpow2.f32 %v6402_v4  ;;  %v9697_v3 = vpop.eup %9696  ;;  %v8605_v46 = vpack.c.bf16 %v9695_v33, %v9693_v9  ;;  %v18337_v58 = vpack.c.bf16 %v15615_v31, %v15608_v32 }
 0xefe   : > { %8586 = vmatprep.subr.bf16.mxu1 %v8585_v28  ;;  %v6437_v17 = vadd.f32 %v15736_v38, %v6436_v62  ;;  %9716 = vpow2.f32 %v6406_v54  ;;  %v6458_v53 = vadd.f32 %v9677_v34, %v6457_v7  ;;  %v9699_v50 = vpop.eup %9698  ;;  %v18338_v42 = vpack.c.bf16 %v15629_v11, %v15623_v60 }
 0xeff   : > { %9718 = vpow2.f32 %v6410_v1  ;;  %v9701_v2 = vpop.eup %9700  ;;  %v8609_v28 = vpack.c.bf16 %v9699_v50, %v9697_v3  ;;  %v18340_v62 = vpack.c.bf16 %v15654_v26, %v15648_v14  ;;  %v18344_v14 = vpack.c.bf16 %v15693_v55, %v15684_v18 }
 0xf00   : > { %v6438_v15 = vadd.f32 %v15743_v41, %v6437_v17  ;;  %v6459_v39 = vadd.f32 %v9679_v5, %v6458_v53  ;;  %v9703_v44 = vpop.eup %9702  ;;  %v18347_v55 = vpack.c.bf16 %v15743_v41, %v15736_v38  ;;  %v18353_v38 = vld [vmem:[#allocation68_spill] sm:$0xff] }
 0xf01   : > { %8588 = vmatpush1.bf16.msra.mxu1 %v18337_v58  ;;  %v9705_v13 = vpop.eup %9704  ;;  %v8613_v19 = vpack.c.bf16 %v9703_v44, %v9701_v2 }
 0xf02   : > { %8590 = vmatprep.subr.bf16.mxu1 %v8589_v24  ;;  %v6439_v59 = vadd.f32 %v15751_v52, %v6438_v15  ;;  %v6460_v21 = vadd.f32 %v9681_v48, %v6459_v39  ;;  %v9707_v34 = vpop.eup %9706  ;;  %v18339_v48 = vpack.c.bf16 %v15642_v27, %v15635_v45  ;;  %v18341_v45 = vld [vmem:[#allocation135_spill] sm:$0xff]  ;;  %v18351_v15 = vld [vmem:[#allocation37_spill] sm:$0xff] }
 0xf03   : > { %v8617_v37 = vpack.c.bf16 %v9707_v34, %v9705_v13  ;;  %v18342_v27 = vpack.c.bf16 %v15665_v16, %v18341_v45  ;;  %v18345_v16 = vpack.c.bf16 %v15713_v61, %v15704_v8  ;;  %v18348_v61 = vpack.c.bf16 %v15759_v23, %v15751_v52 }
 0xf04   : > { %v9709_v4 = vpop.eup %9708  ;;  %v6440_v31 = vadd.f32 %v15759_v23, %v6439_v59  ;;  %v6461_v32 = vadd.f32 %v9683_v30, %v6460_v21  ;;  %v18356_v23 = vld [vmem:[#allocation36_spill] sm:$0xff]  ;;  %v18359_v59 = vmov 0.0  }
 0xf05   : > { %8592 = vmatpush1.bf16.msra.mxu1 %v18338_v42  ;;  %v9711_v5 = vpop.eup %9710 }
 0xf06   : > { %8594 = vmatprep.subr.bf16.mxu1 %v8593_v47  ;;  %v9713_v24 = vpop.eup %9712  ;;  %v6441_v54 = vadd.f32 %v15764_v20, %v6440_v31  ;;  %v6462_v29 = vadd.f32 %v9685_v57, %v6461_v32  ;;  %v8621_v49 = vpack.c.bf16 %v9711_v5, %v9709_v4 }
 0xf07   : > { %v9715_v35 = vpop.eup %9714 }
 0xf08   : > { %v9717_v22 = vpop.eup %9716  ;;  %v15870_v11 = vadd.f32 %v15772_v12, %v6441_v54  ;;  %v6463_v60 = vadd.f32 %v9687_v63, %v6462_v29  ;;  %v8625_v30 = vpack.c.bf16 %v9715_v35, %v9713_v24  ;;  %v18343_v63 = vpack.c.bf16 %v15676_v10, %v15670_v40 }
 0xf09   : > { %8596 = vmatpush1.bf16.msra.mxu1 %v18339_v48  ;;  %v9719_v47 = vpop.eup %9718  ;;  %v18346_v10 = vpack.c.bf16 %v15728_v36, %v15721_v0  ;;  %v18349_v0 = vpack.c.bf16 %v15772_v12, %v15764_v20  ;;  %v18350_v36 = vld [vmem:[#allocation39_spill] sm:$0xff] }
 0xf0a   : > { %8598 = vmatprep.subr.bf16.mxu1 %v8597_v43  ;;  %v6464_v1 = vadd.f32 %v9689_v6, %v6463_v60  ;;  %v8629_v25 = vpack.c.bf16 %v9719_v47, %v9717_v22  ;;  %v6589_v43 = vpop.trf.xlu0  ;;  %v18352_v39 = vpack.c.bf16 %v18350_v36, %v18351_v15 }
 0xf0c   : > { %v6465_v57 = vadd.f32 %v9691_v56, %v6464_v1 }
 0xf0d   : > { %8600 = vmatpush1.bf16.msra.mxu1 %v18340_v62 }
 0xf0e   : > { %8602 = vmatprep.subr.bf16.mxu1 %v8601_v51  ;;  %v6466_v7 = vadd.f32 %v9693_v9, %v6465_v57  ;;  %v6590_v9 = vpop.trf.xlu0 }
 0xf10   : > { %v6467_v17 = vadd.f32 %v9695_v33, %v6466_v7 }
 0xf11   : > { %8604 = vmatpush1.bf16.msra.mxu1 %v18342_v27  ;;  %v18360_v27 = vld [vmem:[#allocation47_spill] sm:$0xff] }
 0xf12   : > { %8606 = vmatprep.subr.bf16.mxu1 %v8605_v46  ;;  %v6468_v53 = vadd.f32 %v9697_v3, %v6467_v17  ;;  %v6591_v3 = vpop.trf.xlu0  ;;  %v6443_v17 = vrot.slane %v15870_v11, 4 }
 0xf14   : > { %v6469_v6 = vadd.f32 %v9699_v50, %v6468_v53 }
 0xf15   : > { %8608 = vmatpush1.bf16.msra.mxu1 %v18343_v63  ;;  %v6444_v63 = vadd.f32 %v6443_v17, %v15870_v11 }
 0xf16   : > { %8610 = vmatprep.subr.bf16.mxu1 %v8609_v28  ;;  %v6470_v58 = vadd.f32 %v9701_v2, %v6469_v6  ;;  %v6592_v50 = vpop.trf.xlu0  ;;  %v18354_v28 = vld [vmem:[#allocation43_spill] sm:$0xff] }
 0xf18   : > { %v6471_v26 = vadd.f32 %v9703_v44, %v6470_v58  ;;  %v18355_v44 = vld [vmem:[#allocation38_spill] sm:$0xff] }
 0xf19   : > { %8612 = vmatpush1.bf16.msra.mxu1 %v18344_v14  ;;  %v18357_v52 = vpack.c.bf16 %v18355_v44, %v18356_v23 }
 0xf1a   : > { %8614 = vmatprep.subr.bf16.mxu1 %v8613_v19  ;;  %v6472_v56 = vadd.f32 %v9705_v13, %v6471_v26  ;;  %v6593_v41 = vpop.trf.xlu0  ;;  %v18358_v13 = vld [vmem:[#allocation41_spill] sm:$0xff] }
 0xf1c   : > { %v6473_v51 = vadd.f32 %v9707_v34, %v6472_v56 }
 0xf1d   : > { %8616 = vmatpush1.bf16.msra.mxu1 %v18345_v16 }
 0xf1e   : > { %8618 = vmatprep.subr.bf16.mxu1 %v8617_v37  ;;  %v6474_v40 = vadd.f32 %v9709_v4, %v6473_v51  ;;  %v6594_v21 = vpop.trf.xlu0  ;;  %v6621_v4 = vpop.trf.xlu1 }
 0xf20   : > { %v6475_v33 = vadd.f32 %v9711_v5, %v6474_v40 }
 0xf21   : > { %8620 = vmatpush1.bf16.msra.mxu1 %v18346_v10 }
 0xf22   : > { %8622 = vmatprep.subr.bf16.mxu1 %v8621_v49  ;;  %v6476_v18 = vadd.f32 %v9713_v24, %v6475_v33  ;;  %v6595_v20 = vpop.trf.xlu0  ;;  %v6622_v32 = vpop.trf.xlu1 }
 0xf24   : > { %v6477_v46 = vadd.f32 %v9715_v35, %v6476_v18 }
 0xf25   : > { %8624 = vmatpush1.bf16.msra.mxu1 %v18347_v55 }
 0xf26   : > { %8626 = vmatprep.subr.bf16.mxu1 %v8625_v30  ;;  %v6478_v8 = vadd.f32 %v9717_v22, %v6477_v46  ;;  %v6596_v12 = vpop.trf.xlu0  ;;  %v6623_v5 = vpop.trf.xlu1 }
 0xf28   : > { %v15896_v2 = vadd.f32 %v9719_v47, %v6478_v8 }
 0xf29   : > { %8628 = vmatpush1.bf16.msra.mxu1 %v18348_v61 }
 0xf2a   : > { %8630 = vmatprep.subr.bf16.mxu1 %v8629_v25  ;;  %v6597_v19 = vpop.trf.xlu0  ;;  %v6624_v54 = vpop.trf.xlu1  ;;  %v6480_v53 = vrot.slane %v15896_v2, 4 }
 0xf2c   : > { %v6481_v6 = vadd.f32 %v6480_v53, %v15896_v2 }
 0xf2d   : > { %8632 = vmatpush1.bf16.msra.mxu1 %v18349_v0 }
 0xf2e   : > { %8634 = vmatprep.subr.bf16.mxu1 %v18352_v39  ;;  %v6598_v34 = vpop.trf.xlu0  ;;  %v6625_v49 = vpop.trf.xlu1  ;;  %v6482_v58 = vrot.slane %v6481_v6, 2 }
 0xf30   : > { %6551 = vmatmul.mubr.f32.vlgmr.msra.gmra.mrb[12].mxu1 %v18353_v38  ;;  %v6483_v26 = vadd.f32 %v6482_v58, %v6481_v6 }
 0xf31   : > { %6556 = vmatprep.mubr.f32.mxu1 %v18354_v28  ;;  %8636 = vmatpush1.bf16.msra.mxu1 %v18357_v52 }
 0xf32   : > { %v6599_v42 = vpop.trf.xlu0  ;;  %v6626_v48 = vpop.trf.xlu1  ;;  %v6484_v16 = vrot.slane %v6483_v26, 1 }
 0xf34   : > { %6557 = vmatmul.mubr.f32.gmra.mrb[14].mxu1 %v18358_v13  ;;  %v6485_v51 = vadd.f32 %v6484_v16, %v6483_v26 }
 0xf35   : > { %6797 = vmatprep.mubr.f32.mxu1 %v18359_v59 }
 0xf36   : > { %v6600_v31 = vpop.trf.xlu0  ;;  %v6627_v22 = vpop.trf.xlu1 }
 0xf38   : > { %8086 = vmatmul.mubr.msk.f32.vlgmr.msra.gmra.mrb[16].mxu1 %vm728_vm0, %v6589_v43  ;;  %v6445_v43 = vrot.slane %v6444_v63, 2 }
 0xf39   : > { %6803 = vmatprep.mubr.f32.mxu1 %v18359_v59 }
 0xf3a   : > { %v6601_v37 = vpop.trf.xlu0  ;;  %v6628_v60 = vpop.trf.xlu1  ;;  %v6446_v14 = vadd.f32 %v6445_v43, %v6444_v63 }
 0xf3c   : > { %8087 = vmatmul.mubr.msk.f32.gmra.mrb[18].mxu1 %vm728_vm0, %v6590_v9  ;;  %v6447_v56 = vrot.slane %v6446_v14, 1 }
 0xf3d   : > { %6809 = vmatprep.mubr.f32.mxu1 %v18359_v59 }
 0xf3e   : > { %v6602_v24 = vpop.trf.xlu0  ;;  %v6629_v30 = vpop.trf.xlu1  ;;  %v6448_v9 = vadd.f32 %v6447_v56, %v6446_v14 }
 0xf40   : > { %8088 = vmatmul.mubr.msk.f32.gmra.mrb[20].mxu1 %vm728_vm0, %v6591_v3  ;;  %9720 = vrcp.f32 %v6448_v9 }
 0xf41   : > { %6815 = vmatprep.mubr.f32.mxu1 %v18359_v59  ;;  %9722 = vrcp.f32 %v6485_v51 }
 0xf42   : > { %v6603_v29 = vpop.trf.xlu0  ;;  %v6630_v47 = vpop.trf.xlu1 }
 0xf44   : > { %8089 = vmatmul.mubr.msk.f32.gmra.mrb[22].mxu1 %vm728_vm0, %v6592_v50 }
 0xf45   : > { %6821 = vmatprep.mubr.f32.mxu1 %v18359_v59 }
 0xf46   : > { %v6604_v35 = vpop.trf.xlu0  ;;  %v6631_v1 = vpop.trf.xlu1 }
 0xf48   : > { %8090 = vmatmul.mubr.msk.f32.gmra.mrb[24].mxu1 %vm728_vm0, %v6593_v41 }
 0xf49   : > { %6827 = vmatprep.mubr.f32.mxu1 %v18359_v59 }
 0xf4a   : > { %v6632_v25 = vpop.trf.xlu1  ;;  %v9721_v40 = vpop.eup %9720 }
 0xf4b   : > { %v9723_v33 = vpop.eup %9722 }
 0xf4c   : > { %8091 = vmatmul.mubr.msk.f32.gmra.mrb[26].mxu1 %vm728_vm0, %v6594_v21 }
 0xf4d   : > { %6833 = vmatprep.mubr.f32.mxu1 %v18359_v59 }
 0xf4e   : > { %v6633_v62 = vpop.trf.xlu1 }
 0xf50   : > { %8092 = vmatmul.mubr.msk.f32.gmra.mrb[28].mxu1 %vm728_vm0, %v6595_v20 }
 0xf51   : > { %6839 = vmatprep.mubr.f32.mxu1 %v18359_v59 }
 0xf52   : > { %v6634_v57 = vpop.trf.xlu1 }
 0xf54   : > { %8093 = vmatmul.mubr.msk.f32.gmra.mrb[30].mxu1 %vm728_vm0, %v6596_v12 }
 0xf55   : > { %6845 = vmatprep.mubr.f32.mxu1 %v18359_v59 }
 0xf56   : > { %v6635_v7 = vpop.trf.xlu1 }
 0xf58   : > { %8094 = vmatmul.mubr.msk.f32.gmra.mrb[32].mxu1 %vm728_vm0, %v6597_v19 }
 0xf59   : > { %6851 = vmatprep.mubr.f32.mxu1 %v18359_v59 }
 0xf5a   : > { %v6636_v45 = vpop.trf.xlu1 }
 0xf5c   : > { %8095 = vmatmul.mubr.msk.f32.gmra.mrb[34].mxu1 %vm728_vm0, %v6598_v34 }
 0xf5d   : > { %6857 = vmatprep.mubr.f32.mxu1 %v18359_v59 }
 0xf60   : > { %8096 = vmatmul.mubr.msk.f32.gmra.mrb[36].mxu1 %vm728_vm0, %v6599_v42 }
 0xf61   : > { %6863 = vmatprep.mubr.f32.mxu1 %v18359_v59 }
 0xf64   : > { %8097 = vmatmul.mubr.msk.f32.gmra.mrb[38].mxu1 %vm728_vm0, %v6600_v31 }
 0xf65   : > { %6869 = vmatprep.mubr.f32.mxu1 %v18359_v59 }
 0xf68   : > { %8098 = vmatmul.mubr.msk.f32.gmra.mrb[40].mxu1 %vm728_vm0, %v6601_v37 }
 0xf69   : > { %6875 = vmatprep.mubr.f32.mxu1 %v18359_v59 }
 0xf6c   : > { %8099 = vmatmul.mubr.msk.f32.gmra.mrb[42].mxu1 %vm728_vm0, %v6602_v24 }
 0xf6d   : > { %6881 = vmatprep.mubr.f32.mxu1 %v18359_v59 }
 0xf70   : > { %8100 = vmatmul.mubr.msk.f32.gmra.mrb[44].mxu1 %vm728_vm0, %v6603_v29 }
 0xf71   : > { %6887 = vmatprep.mubr.f32.mxu1 %v18359_v59 }
 0xf74   : > { %8101 = vmatmul.mubr.msk.f32.gmra.mrb[46].mxu1 %vm728_vm0, %v6604_v35 }
 0xf75   : > { %6893 = vmatprep.mubr.f32.mxu1 %v18359_v59 }
 0xf78   : > { %8102 = vmatmul.mubr.msk.f32.gmra.mrb[48].mxu1 %vm728_vm0, %v6621_v4 }
 0xf79   : > { %6899 = vmatprep.mubr.f32.mxu1 %v18359_v59 }
 0xf7c   : > { %8103 = vmatmul.mubr.msk.f32.gmra.mrb[50].mxu1 %vm728_vm0, %v6622_v32 }
 0xf7d   : > { %6905 = vmatprep.mubr.f32.mxu1 %v18359_v59 }
 0xf80   : > { %8104 = vmatmul.mubr.msk.f32.gmra.mrb[52].mxu1 %vm728_vm0, %v6623_v5 }
 0xf81   : > { %6911 = vmatprep.mubr.f32.mxu1 %v18359_v59 }
 0xf84   : > { %8105 = vmatmul.mubr.msk.f32.gmra.mrb[54].mxu1 %vm728_vm0, %v6624_v54 }
 0xf85   : > { %6917 = vmatprep.mubr.f32.mxu1 %v18359_v59 }
 0xf88   : > { %8106 = vmatmul.mubr.msk.f32.gmra.mrb[56].mxu1 %vm728_vm0, %v6625_v49 }
 0xf89   : > { %6923 = vmatprep.mubr.f32.mxu1 %v18359_v59 }
 0xf8c   : > { %8107 = vmatmul.mubr.msk.f32.gmra.mrb[58].mxu1 %vm728_vm0, %v6626_v48 }
 0xf8d   : > { %6929 = vmatprep.mubr.f32.mxu1 %v18359_v59 }
 0xf90   : > { %8108 = vmatmul.mubr.msk.f32.gmra.mrb[60].mxu1 %vm728_vm0, %v6627_v22 }
 0xf91   : > { %6935 = vmatprep.mubr.f32.mxu1 %v18359_v59 }
 0xf94   : > { %8109 = vmatmul.mubr.msk.f32.gmra.mrb[62].mxu1 %vm728_vm0, %v6628_v60 }
 0xf95   : > { %6941 = vmatprep.mubr.f32.mxu1 %v18359_v59 }
 0xf98   : > { %8110 = vmatmul.mubr.msk.f32.gmra.mrb[64].mxu1 %vm728_vm0, %v6629_v30 }
 0xf99   : > { %6947 = vmatprep.mubr.f32.mxu1 %v18359_v59 }
 0xf9c   : > { %8111 = vmatmul.mubr.msk.f32.gmra.mrb[66].mxu1 %vm728_vm0, %v6630_v47 }
 0xf9d   : > { %6953 = vmatprep.mubr.f32.mxu1 %v18359_v59 }
 0xfa0   : > { %8112 = vmatmul.mubr.msk.f32.gmra.mrb[68].mxu1 %vm728_vm0, %v6631_v1 }
 0xfa1   : > { %6959 = vmatprep.mubr.f32.mxu1 %v18359_v59 }
 0xfa4   : > { %8113 = vmatmul.mubr.msk.f32.gmra.mrb[70].mxu1 %vm728_vm0, %v6632_v25 }
 0xfa5   : > { %6965 = vmatprep.mubr.f32.mxu1 %v18359_v59 }
 0xfa8   : > { %8114 = vmatmul.mubr.msk.f32.gmra.mrb[72].mxu1 %vm728_vm0, %v6633_v62 }
 0xfa9   : > { %6971 = vmatprep.mubr.f32.mxu1 %v18359_v59 }
 0xfac   : > { %8115 = vmatmul.mubr.msk.f32.gmra.mrb[74].mxu1 %vm728_vm0, %v6634_v57 }
 0xfad   : > { %6977 = vmatprep.mubr.f32.mxu1 %v18359_v59 }
 0xfb0   : > { %8116 = vmatmul.mubr.msk.f32.gmra.mrb[76].mxu1 %vm728_vm0, %v6635_v7 }
 0xfb1   : > { %6983 = vmatprep.mubr.f32.mxu1 %v18359_v59 }
 0xfb4   : > { %8117 = vmatmul.mubr.msk.f32.gmra.mrb[78].mxu1 %vm728_vm0, %v6636_v45 }
 0xfb5   : > { %7394 = vmatprep.mubr.f32.mxu1 %v18360_v27 }
0x1003   : > { %v6552_v10 = vpop.f32.mrb[12].mxu1 }
0x1004   : > { %v6565_v3 = vmul.f32 %v9721_v40, %v6552_v10  ;;  %v6554_v18 = vpop.f32.mrb[13].mxu1 }
0x1005   : > { %v6566_v55 = vmul.f32 %v9723_v33, %v6554_v18 }
0x1007   : > { %v6558_v46 = vpop.f32.mrb[14].mxu1 }
0x1008   : > { %v6567_v11 = vmul.f32 %v9721_v40, %v6558_v46  ;;  %v6560_v8 = vpop.f32.mrb[15].mxu1 }
0x1009   : > { %v6568_v61 = vmul.f32 %v9723_v33, %v6560_v8 }
0x100a   : > { %v8727_v50 = vpack.c.bf16 %v6567_v11, %v6565_v3 }
0x100b   : > { %v8725_v2 = vpack.c.bf16 %v6568_v61, %v6566_v55  ;;  %v15979_v0 = vpop.f32.mrb[16].mxu1 }
0x100c   : > { %v15981_v36 = vpop.f32.mrb[17].mxu1 }
0x100d   : > { %8726 = vmatprep.subr.bf16.mxu0 %v8725_v2 }
0x100e   : > { %8728 = vmatpush1.bf16.msra.mxu0 %v8727_v50 }
0x100f   : > { %v15983_v15 = vpop.f32.mrb[18].mxu1 }
0x1010   : > { %v15985_v39 = vpop.f32.mrb[19].mxu1 }
0x1013   : > { %v15987_v41 = vpop.f32.mrb[20].mxu1 }
0x1014   : > { %v6990_v38 = vmax.f32 %v15979_v0, %v15987_v41  ;;  %v15991_v28 = vpop.f32.mrb[21].mxu1 }
0x1015   : > { %v7027_v44 = vmax.f32 %v15981_v36, %v15991_v28 }
0x1017   : > { %v15995_v23 = vpop.f32.mrb[22].mxu1 }
0x1018   : > { %v6991_v52 = vmax.f32 %v15983_v15, %v15995_v23  ;;  %v15999_v13 = vpop.f32.mrb[23].mxu1 }
0x1019   : > { %v7028_v21 = vmax.f32 %v15985_v39, %v15999_v13 }
0x101b   : > { %v16003_v20 = vpop.f32.mrb[24].mxu1 }
0x101c   : > { %v6992_v12 = vmax.f32 %v6990_v38, %v16003_v20  ;;  %v16006_v19 = vpop.f32.mrb[25].mxu1 }
0x101d   : > { %v7029_v34 = vmax.f32 %v7027_v44, %v16006_v19 }
0x101f   : > { %v16009_v42 = vpop.f32.mrb[26].mxu1 }
0x1020   : > { %v6993_v4 = vmax.f32 %v6991_v52, %v16009_v42  ;;  %v16012_v31 = vpop.f32.mrb[27].mxu1 }
0x1021   : > { %v7030_v32 = vmax.f32 %v7028_v21, %v16012_v31 }
0x1023   : > { %v16015_v37 = vpop.f32.mrb[28].mxu1 }
0x1024   : > { %v6994_v5 = vmax.f32 %v6992_v12, %v16015_v37  ;;  %v16018_v24 = vpop.f32.mrb[29].mxu1 }
0x1025   : > { %v7031_v54 = vmax.f32 %v7029_v34, %v16018_v24 }
0x1027   : > { %v16021_v29 = vpop.f32.mrb[30].mxu1 }
0x1028   : > { %v6995_v49 = vmax.f32 %v6993_v4, %v16021_v29  ;;  %v16024_v35 = vpop.f32.mrb[31].mxu1 }
0x1029   : > { %v7032_v48 = vmax.f32 %v7030_v32, %v16024_v35 }
0x102b   : > { %v16027_v22 = vpop.f32.mrb[32].mxu1 }
0x102c   : > { %v6996_v60 = vmax.f32 %v6994_v5, %v16027_v22  ;;  %v16030_v30 = vpop.f32.mrb[33].mxu1 }
0x102d   : > { %v7033_v47 = vmax.f32 %v7031_v54, %v16030_v30 }
0x102f   : > { %v16033_v1 = vpop.f32.mrb[34].mxu1 }
0x1030   : > { %v6997_v25 = vmax.f32 %v6995_v49, %v16033_v1  ;;  %v16036_v62 = vpop.f32.mrb[35].mxu1 }
0x1031   : > { %v7034_v57 = vmax.f32 %v7032_v48, %v16036_v62 }
0x1033   : > { %v16039_v7 = vpop.f32.mrb[36].mxu1 }
0x1034   : > { %v6998_v45 = vmax.f32 %v6996_v60, %v16039_v7  ;;  %v16042_v27 = vpop.f32.mrb[37].mxu1 }
0x1035   : > { %v7035_v17 = vmax.f32 %v7033_v47, %v16042_v27 }
0x1037   : > { %v16045_v53 = vpop.f32.mrb[38].mxu1 }
0x1038   : > { %v6999_v63 = vmax.f32 %v6997_v25, %v16045_v53  ;;  %v16048_v6 = vpop.f32.mrb[39].mxu1 }
0x1039   : > { %18361 = vst [vmem:[#allocation138_spill] sm:$0xff] %v16048_v6  ;;  %v7036_v43 = vmax.f32 %v7034_v57, %v16048_v6 }
0x103b   : > { %v16051_v58 = vpop.f32.mrb[40].mxu1 }
0x103c   : > { %v7000_v14 = vmax.f32 %v6998_v45, %v16051_v58  ;;  %v16054_v26 = vpop.f32.mrb[41].mxu1 }
0x103d   : > { %18362 = vst [vmem:[#allocation141_spill] sm:$0xff] %v16054_v26  ;;  %v7037_v56 = vmax.f32 %v7035_v17, %v16054_v26 }
0x103f   : > { %v16057_v16 = vpop.f32.mrb[42].mxu1 }
0x1040   : > { %v7001_v9 = vmax.f32 %v6999_v63, %v16057_v16  ;;  %v16060_v51 = vpop.f32.mrb[43].mxu1 }
0x1041   : > { %18363 = vst [vmem:[#allocation144_spill] sm:$0xff] %v16060_v51  ;;  %v7038_v40 = vmax.f32 %v7036_v43, %v16060_v51 }
0x1043   : > { %v16063_v10 = vpop.f32.mrb[44].mxu1 }
0x1044   : > { %v7002_v33 = vmax.f32 %v7000_v14, %v16063_v10  ;;  %v16066_v3 = vpop.f32.mrb[45].mxu1 }
0x1045   : > { %18364 = vst [vmem:[#allocation147_spill] sm:$0xff] %v16066_v3  ;;  %v7039_v18 = vmax.f32 %v7037_v56, %v16066_v3 }
0x1047   : > { %v16069_v55 = vpop.f32.mrb[46].mxu1 }
0x1048   : > { %v7003_v46 = vmax.f32 %v7001_v9, %v16069_v55  ;;  %v16072_v11 = vpop.f32.mrb[47].mxu1 }
0x1049   : > { %18365 = vst [vmem:[#allocation54_spill] sm:$0xff] %v16072_v11  ;;  %v7040_v8 = vmax.f32 %v7038_v40, %v16072_v11 }
0x104b   : > { %v16075_v61 = vpop.f32.mrb[48].mxu1 }
0x104c   : > { %v7004_v50 = vmax.f32 %v7002_v33, %v16075_v61  ;;  %v16078_v2 = vpop.f32.mrb[49].mxu1 }
0x104d   : > { %18366 = vst [vmem:[#allocation19_spill] sm:$0xff] %v16078_v2  ;;  %v7041_v38 = vmax.f32 %v7039_v18, %v16078_v2 }
0x104f   : > { %v16081_v44 = vpop.f32.mrb[50].mxu1 }
0x1050   : > { %v7005_v52 = vmax.f32 %v7003_v46, %v16081_v44  ;;  %v16084_v21 = vpop.f32.mrb[51].mxu1 }
0x1051   : > { %18367 = vst [vmem:[#allocation17_spill] sm:$0xff] %v16084_v21  ;;  %v7042_v12 = vmax.f32 %v7040_v8, %v16084_v21 }
0x1053   : > { %v16087_v34 = vpop.f32.mrb[52].mxu1 }
0x1054   : > { %v7006_v4 = vmax.f32 %v7004_v50, %v16087_v34  ;;  %v16090_v32 = vpop.f32.mrb[53].mxu1 }
0x1055   : > { %18368 = vst [vmem:[#allocation14_spill] sm:$0xff] %v16090_v32  ;;  %v7043_v5 = vmax.f32 %v7041_v38, %v16090_v32 }
0x1057   : > { %v16093_v54 = vpop.f32.mrb[54].mxu1 }
0x1058   : > { %v7007_v49 = vmax.f32 %v7005_v52, %v16093_v54  ;;  %v16096_v48 = vpop.f32.mrb[55].mxu1 }
0x1059   : > { %18369 = vst [vmem:[#allocation18_spill] sm:$0xff] %v16096_v48  ;;  %v7044_v60 = vmax.f32 %v7042_v12, %v16096_v48 }
0x105b   : > { %v16099_v47 = vpop.f32.mrb[56].mxu1 }
0x105c   : > { %v7008_v25 = vmax.f32 %v7006_v4, %v16099_v47  ;;  %v16102_v57 = vpop.f32.mrb[57].mxu1 }
0x105d   : > { %18370 = vst [vmem:[#allocation16_spill] sm:$0xff] %v16102_v57  ;;  %v7045_v45 = vmax.f32 %v7043_v5, %v16102_v57 }
0x105f   : > { %v16105_v17 = vpop.f32.mrb[58].mxu1 }
0x1060   : > { %v7009_v63 = vmax.f32 %v7007_v49, %v16105_v17  ;;  %v16108_v43 = vpop.f32.mrb[59].mxu1 }
0x1061   : > { %18371 = vst [vmem:[#allocation178_spill] sm:$0xff] %v16108_v43  ;;  %v7046_v14 = vmax.f32 %v7044_v60, %v16108_v43 }
0x1063   : > { %v16111_v56 = vpop.f32.mrb[60].mxu1 }
0x1064   : > { %v7010_v9 = vmax.f32 %v7008_v25, %v16111_v56  ;;  %v16114_v40 = vpop.f32.mrb[61].mxu1 }
0x1065   : > { %18372 = vst [vmem:[#allocation12_spill] sm:$0xff] %v16114_v40  ;;  %v7047_v33 = vmax.f32 %v7045_v45, %v16114_v40 }
0x1067   : > { %v16117_v18 = vpop.f32.mrb[62].mxu1 }
0x1068   : > { %v7011_v46 = vmax.f32 %v7009_v63, %v16117_v18  ;;  %v16120_v8 = vpop.f32.mrb[63].mxu1 }
0x1069   : > { %18373 = vst [vmem:[#allocation72_spill] sm:$0xff] %v16120_v8  ;;  %v7048_v50 = vmax.f32 %v7046_v14, %v16120_v8 }
0x106b   : > { %v16123_v38 = vpop.f32.mrb[64].mxu1 }
0x106c   : > { %v7012_v52 = vmax.f32 %v7010_v9, %v16123_v38  ;;  %v16126_v12 = vpop.f32.mrb[65].mxu1 }
0x106d   : > { %18374 = vst [vmem:[#allocation74_spill] sm:$0xff] %v16126_v12  ;;  %v7049_v4 = vmax.f32 %v7047_v33, %v16126_v12 }
0x106f   : > { %v16129_v5 = vpop.f32.mrb[66].mxu1 }
0x1070   : > { %v7013_v49 = vmax.f32 %v7011_v46, %v16129_v5  ;;  %v16132_v60 = vpop.f32.mrb[67].mxu1 }
0x1071   : > { %18375 = vst [vmem:[#allocation76_spill] sm:$0xff] %v16132_v60  ;;  %v7050_v25 = vmax.f32 %v7048_v50, %v16132_v60 }
0x1073   : > { %v16135_v45 = vpop.f32.mrb[68].mxu1 }
0x1074   : > { %v7014_v63 = vmax.f32 %v7012_v52, %v16135_v45  ;;  %v16138_v14 = vpop.f32.mrb[69].mxu1 }
0x1075   : > { %18376 = vst [vmem:[#allocation78_spill] sm:$0xff] %v16138_v14  ;;  %v7051_v9 = vmax.f32 %v7049_v4, %v16138_v14 }
0x1077   : > { %v16141_v59 = vpop.f32.mrb[70].mxu1 }
0x1078   : > { %v7015_v33 = vmax.f32 %v7013_v49, %v16141_v59  ;;  %v16144_v12 = vpop.f32.mrb[71].mxu1 }
0x1079   : > { %18377 = vst [vmem:[#allocation80_spill] sm:$0xff] %v16144_v12  ;;  %v7052_v46 = vmax.f32 %v7050_v25, %v16144_v12 }
0x107b   : > { %v16147_v8 = vpop.f32.mrb[72].mxu1 }
0x107c   : > { %v7016_v50 = vmax.f32 %v7014_v63, %v16147_v8  ;;  %v16150_v60 = vpop.f32.mrb[73].mxu1 }
0x107d   : > { %18378 = vst [vmem:[#allocation82_spill] sm:$0xff] %v16150_v60  ;;  %v7053_v52 = vmax.f32 %v7051_v9, %v16150_v60 }
0x107f   : > { %v16153_v40 = vpop.f32.mrb[74].mxu1 }
0x1080   : > { %v7017_v4 = vmax.f32 %v7015_v33, %v16153_v40  ;;  %v16156_v14 = vpop.f32.mrb[75].mxu1 }
0x1081   : > { %18379 = vst [vmem:[#allocation84_spill] sm:$0xff] %v16156_v14  ;;  %v7054_v49 = vmax.f32 %v7052_v46, %v16156_v14 }
0x1083   : > { %v16159_v43 = vpop.f32.mrb[76].mxu1 }
0x1084   : > { %v7018_v25 = vmax.f32 %v7016_v50, %v16159_v43  ;;  %v16162_v12 = vpop.f32.mrb[77].mxu1 }
0x1085   : > { %18380 = vst [vmem:[#allocation86_spill] sm:$0xff] %v16162_v12  ;;  %v7055_v63 = vmax.f32 %v7053_v52, %v16162_v12 }
0x1087   : > { %v16165_v57 = vpop.f32.mrb[78].mxu1 }
0x1088   : > { %v7019_v9 = vmax.f32 %v7017_v4, %v16165_v57  ;;  %v16168_v60 = vpop.f32.mrb[79].mxu1 }
0x1089   : > { %18381 = vst [vmem:[#allocation90_spill] sm:$0xff] %v16168_v60  ;;  %v7056_v33 = vmax.f32 %v7054_v49, %v16168_v60 }
0x108a   : > { %v7020_v48 = vmax.f32 %v7018_v25, %v7019_v9 }
0x108b   : > { %v7057_v32 = vmax.f32 %v7055_v63, %v7056_v33 }
0x108c   : > { %v7021_v21 = vrot.slane %v7020_v48, 4 }
0x108d   : > { %v7058_v46 = vrot.slane %v7057_v32, 4 }
0x108e   : > { %v7022_v14 = vmax.f32 %v7020_v48, %v7021_v21 }
0x108f   : > { %v7059_v2 = vmax.f32 %v7057_v32, %v7058_v46 }
0x1090   : > { %v7023_v11 = vrot.slane %v7022_v14, 2 }
0x1091   : > { %v7060_v50 = vrot.slane %v7059_v2, 2 }
0x1092   : > { %v7024_v3 = vmax.f32 %v7022_v14, %v7023_v11 }
0x1093   : > { %v7061_v51 = vmax.f32 %v7059_v2, %v7060_v50 }
0x1094   : > { %v7025_v26 = vrot.slane %v7024_v3, 1 }
0x1095   : > { %v7062_v52 = vrot.slane %v7061_v51, 1 }
0x1096   : > { %v16171_v12 = vmax.f32 %v7024_v3, %v7025_v26 }
0x1097   : > { %v16173_v6 = vmax.f32 %v7061_v51, %v7062_v52 }
0x1098   : > { %v7064_v4 = vsub.f32 %v15979_v0, %v16171_v12  ;;  %v7066_v49 = vsub.f32 %v15983_v15, %v16171_v12  ;;  %v7068_v21 = vsub.f32 %v15987_v41, %v16171_v12  ;;  %v7070_v32 = vsub.f32 %v15995_v23, %v16171_v12 }
0x1099   : > { %v7072_v11 = vsub.f32 %v16003_v20, %v16171_v12  ;;  %v7074_v26 = vsub.f32 %v16009_v42, %v16171_v12  ;;  %v7076_v51 = vsub.f32 %v16015_v37, %v16171_v12  ;;  %v7078_v0 = vsub.f32 %v16021_v29, %v16171_v12 }
0x109a   : > { %v7080_v15 = vsub.f32 %v16027_v22, %v16171_v12  ;;  %v7082_v41 = vsub.f32 %v16033_v1, %v16171_v12  ;;  %v7084_v23 = vsub.f32 %v16039_v7, %v16171_v12  ;;  %v7086_v20 = vsub.f32 %v16045_v53, %v16171_v12 }
0x109b   : > { %v7088_v42 = vsub.f32 %v16051_v58, %v16171_v12  ;;  %v7090_v37 = vsub.f32 %v16057_v16, %v16171_v12  ;;  %v7092_v29 = vsub.f32 %v16063_v10, %v16171_v12  ;;  %v7094_v22 = vsub.f32 %v16069_v55, %v16171_v12 }
0x109c   : > { %v7096_v1 = vsub.f32 %v16075_v61, %v16171_v12  ;;  %v7098_v7 = vsub.f32 %v16081_v44, %v16171_v12  ;;  %v7100_v53 = vsub.f32 %v16087_v34, %v16171_v12  ;;  %v7102_v58 = vsub.f32 %v16093_v54, %v16171_v12  ;;  %v18401_v61 = vld [vmem:[#allocation86_spill] sm:$0xff] }
0x109d   : > { %v7104_v16 = vsub.f32 %v16099_v47, %v16171_v12  ;;  %v7106_v10 = vsub.f32 %v16105_v17, %v16171_v12  ;;  %v7108_v3 = vsub.f32 %v16111_v56, %v16171_v12  ;;  %v7110_v55 = vsub.f32 %v16117_v18, %v16171_v12 }
0x109e   : > { %v7128_v56 = vmul.f32 1.442695, %v7064_v4  ;;  %v7132_v18 = vmul.f32 1.442695, %v7066_v49  ;;  %v7136_v14 = vmul.f32 1.442695, %v7068_v21 }
0x109f   : > { %v7140_v63 = vmul.f32 1.442695, %v7070_v32  ;;  %v7144_v33 = vmul.f32 1.442695, %v7072_v11  ;;  %v7148_v46 = vmul.f32 1.442695, %v7074_v26 }
0x10a0   : > { %9724 = vpow2.f32 %v7128_v56  ;;  %v7152_v50 = vmul.f32 1.442695, %v7076_v51  ;;  %v7156_v52 = vmul.f32 1.442695, %v7078_v0  ;;  %v7160_v47 = vmul.f32 1.442695, %v7080_v15 }
0x10a1   : > { %9726 = vpow2.f32 %v7132_v18  ;;  %v7164_v17 = vmul.f32 1.442695, %v7082_v41  ;;  %v7168_v4 = vmul.f32 1.442695, %v7084_v23  ;;  %v7172_v49 = vmul.f32 1.442695, %v7086_v20 }
0x10a2   : > { %9728 = vpow2.f32 %v7136_v14  ;;  %v7176_v21 = vmul.f32 1.442695, %v7088_v42  ;;  %v7180_v25 = vmul.f32 1.442695, %v7090_v37  ;;  %v7184_v32 = vmul.f32 1.442695, %v7092_v29 }
0x10a3   : > { %9730 = vpow2.f32 %v7140_v63  ;;  %v7188_v48 = vmul.f32 1.442695, %v7094_v22  ;;  %v7192_v9 = vmul.f32 1.442695, %v7096_v1  ;;  %v7196_v56 = vmul.f32 1.442695, %v7098_v7 }
0x10a4   : > { %9732 = vpow2.f32 %v7144_v33  ;;  %v7200_v11 = vmul.f32 1.442695, %v7100_v53  ;;  %v7204_v26 = vmul.f32 1.442695, %v7102_v58  ;;  %v7208_v18 = vmul.f32 1.442695, %v7104_v16 }
0x10a5   : > { %9734 = vpow2.f32 %v7148_v46  ;;  %v16243_v51 = vmul.f32 1.442695, %v7106_v10  ;;  %v16245_v0 = vmul.f32 1.442695, %v7108_v3  ;;  %v16247_v15 = vmul.f32 1.442695, %v7110_v55 }
0x10a6   : > { %9736 = vpow2.f32 %v7152_v50  ;;  %v18382_v16 = vld [vmem:[#allocation138_spill] sm:$0xff]  ;;  %v18384_v14 = vld [vmem:[#allocation144_spill] sm:$0xff]  ;;  %v18385_v46 = vld [vmem:[#allocation147_spill] sm:$0xff] }
0x10a7   : > { %9738 = vpow2.f32 %v7156_v52  ;;  %v18386_v52 = vld [vmem:[#allocation54_spill] sm:$0xff]  ;;  %v18388_v58 = vld [vmem:[#allocation17_spill] sm:$0xff]  ;;  %v18391_v22 = vld [vmem:[#allocation16_spill] sm:$0xff] }
0x10a8   : > { %9740 = vpow2.f32 %v7160_v47  ;;  %v18383_v47 = vld [vmem:[#allocation141_spill] sm:$0xff]  ;;  %v18389_v53 = vld [vmem:[#allocation14_spill] sm:$0xff]  ;;  %v18393_v63 = vld [vmem:[#allocation12_spill] sm:$0xff] }
0x10a9   : > { %9742 = vpow2.f32 %v7164_v17  ;;  %v18390_v50 = vld [vmem:[#allocation18_spill] sm:$0xff]  ;;  %v18394_v20 = vld [vmem:[#allocation72_spill] sm:$0xff] }
0x10aa   : > { %v16257_v37 = vpop.eup %9724  ;;  %9744 = vpow2.f32 %v7168_v4  ;;  %v18392_v29 = vld [vmem:[#allocation178_spill] sm:$0xff]  ;;  %v18396_v41 = vld [vmem:[#allocation76_spill] sm:$0xff] }
0x10ab   : > { %v16265_v7 = vpop.eup %9726  ;;  %9746 = vpow2.f32 %v7172_v49  ;;  %v18387_v49 = vld [vmem:[#allocation19_spill] sm:$0xff]  ;;  %v18395_v4 = vld [vmem:[#allocation74_spill] sm:$0xff] }
0x10ac   : > { %v16273_v3 = vpop.eup %9728  ;;  %9748 = vpow2.f32 %v7176_v21  ;;  %v7256_v55 = vadd.f32 %v16265_v7, %v16257_v37  ;;  %v18400_v21 = vld [vmem:[#allocation84_spill] sm:$0xff] }
0x10ad   : > { %v16281_v33 = vpop.eup %9730  ;;  %9750 = vpow2.f32 %v7180_v25  ;;  %v18398_v25 = vld [vmem:[#allocation80_spill] sm:$0xff] }
0x10ae   : > { %v16289_v10 = vpop.eup %9732  ;;  %9752 = vpow2.f32 %v7184_v32  ;;  %v7257_v17 = vadd.f32 %v16273_v3, %v7256_v55 }
0x10af   : > { %v16296_v1 = vpop.eup %9734  ;;  %9754 = vpow2.f32 %v7188_v48 }
0x10b0   : > { %v16304_v42 = vpop.eup %9736  ;;  %9756 = vpow2.f32 %v7192_v9  ;;  %v7258_v55 = vadd.f32 %v16281_v33, %v7257_v17 }
0x10b1   : > { %v16311_v23 = vpop.eup %9738  ;;  %9758 = vpow2.f32 %v7196_v56 }
0x10b2   : > { %v16319_v34 = vpop.eup %9740  ;;  %9760 = vpow2.f32 %v7200_v11  ;;  %v7259_v17 = vadd.f32 %v16289_v10, %v7258_v55  ;;  %v18402_v55 = vsub.f32 %v16123_v38, %v16171_v12 }
0x10b3   : > { %v16326_v2 = vpop.eup %9742  ;;  %9762 = vpow2.f32 %v7204_v26  ;;  %v18403_v26 = vsub.f32 %v16129_v5, %v16171_v12 }
0x10b4   : > { %v16334_v54 = vpop.eup %9744  ;;  %9764 = vpow2.f32 %v7208_v18  ;;  %v7224_v48 = vmul.f32 1.442695, %v18402_v55  ;;  %v7260_v56 = vadd.f32 %v16296_v1, %v7259_v17  ;;  %v18404_v18 = vsub.f32 %v16135_v45, %v16171_v12 }
0x10b5   : > { %v16340_v44 = vpop.eup %9746  ;;  %9766 = vpow2.f32 %v16243_v51  ;;  %v7228_v9 = vmul.f32 1.442695, %v18403_v26  ;;  %v18405_v51 = vsub.f32 %v16141_v59, %v16171_v12  ;;  %v18409_v59 = vsub.f32 %v16159_v43, %v16171_v12 }
0x10b6   : > { %v16346_v32 = vpop.eup %9748  ;;  %9768 = vpow2.f32 %v16245_v0  ;;  %v7232_v11 = vmul.f32 1.442695, %v18404_v18  ;;  %v7261_v38 = vadd.f32 %v16304_v42, %v7260_v56  ;;  %v18406_v0 = vsub.f32 %v16147_v8, %v16171_v12 }
0x10b7   : > { %v16353_v55 = vpop.eup %9750  ;;  %9770 = vpow2.f32 %v16247_v15  ;;  %v7236_v17 = vmul.f32 1.442695, %v18405_v51  ;;  %v18407_v56 = vsub.f32 %v16153_v40, %v16171_v12 }
0x10b8   : > { %v16359_v5 = vpop.eup %9752  ;;  %9772 = vpow2.f32 %v7224_v48  ;;  %v7240_v26 = vmul.f32 1.442695, %v18406_v0  ;;  %v7262_v45 = vadd.f32 %v16311_v23, %v7261_v38  ;;  %v7248_v48 = vmul.f32 1.442695, %v18409_v59 }
0x10b9   : > { %v16365_v18 = vpop.eup %9754  ;;  %9774 = vpow2.f32 %v7228_v9  ;;  %v7244_v15 = vmul.f32 1.442695, %v18407_v56  ;;  %v18410_v38 = vsub.f32 %v16165_v57, %v16171_v12  ;;  %v18413_v57 = vsub.f32 %v15991_v28, %v16173_v6 }
0x10ba   : > { %v16370_v60 = vpop.eup %9756  ;;  %9776 = vpow2.f32 %v7232_v11  ;;  %v7263_v51 = vadd.f32 %v16319_v34, %v7262_v45  ;;  %v18411_v11 = vsub.f32 %v15981_v36, %v16173_v6  ;;  %v18412_v45 = vsub.f32 %v15985_v39, %v16173_v6 }
0x10bb   : > { %18408 = vst [vmem:[#allocation94_spill] sm:$0xff] %v16370_v60  ;;  %v16376_v8 = vpop.eup %9758  ;;  %9778 = vpow2.f32 %v7236_v17  ;;  %v7252_v9 = vmul.f32 1.442695, %v18410_v38  ;;  %v7138_v12 = vmul.f32 1.442695, %v18413_v57  ;;  %v18414_v36 = vsub.f32 %v15999_v13, %v16173_v6 }
0x10bc   : > { %v16381_v0 = vpop.eup %9760  ;;  %9780 = vpow2.f32 %v7240_v26  ;;  %v7264_v40 = vadd.f32 %v16326_v2, %v7263_v51  ;;  %v7130_v56 = vmul.f32 1.442695, %v18411_v11  ;;  %v7134_v17 = vmul.f32 1.442695, %v18412_v45 }
0x10bd   : > { %v16387_v43 = vpop.eup %9762  ;;  %9782 = vpow2.f32 %v7244_v15  ;;  %v7142_v51 = vmul.f32 1.442695, %v18414_v36  ;;  %v18415_v15 = vsub.f32 %v16006_v19, %v16173_v6  ;;  %v18416_v39 = vsub.f32 %v16012_v31, %v16173_v6 }
0x10be   : > { %v16395_v59 = vpop.eup %9764  ;;  %9784 = vpow2.f32 %v7248_v48  ;;  %v7265_v26 = vadd.f32 %v16334_v54, %v7264_v40  ;;  %v18417_v48 = vsub.f32 %v16018_v24, %v16173_v6  ;;  %v18418_v40 = vsub.f32 %v16024_v35, %v16173_v6 }
0x10bf   : > { %v7146_v38 = vmul.f32 1.442695, %v18415_v15  ;;  %v16404_v11 = vpop.eup %9766  ;;  %9786 = vpow2.f32 %v7252_v9  ;;  %v7150_v28 = vmul.f32 1.442695, %v18416_v39  ;;  %v18419_v9 = vsub.f32 %v16030_v30, %v16173_v6 }
0x10c0   : > { %v7154_v45 = vmul.f32 1.442695, %v18417_v48  ;;  %v7158_v13 = vmul.f32 1.442695, %v18418_v40  ;;  %v16415_v57 = vpop.eup %9768  ;;  %v7266_v19 = vadd.f32 %v16340_v44, %v7265_v26  ;;  %9788 = vpow2.f32 %v7130_v56 }
0x10c1   : > { %v7162_v36 = vmul.f32 1.442695, %v18419_v9  ;;  %v18420_v31 = vsub.f32 %v16036_v62, %v16173_v6  ;;  %v16424_v39 = vpop.eup %9770  ;;  %9790 = vpow2.f32 %v7134_v17 }
0x10c2   : > { %v16432_v26 = vpop.eup %9772  ;;  %v7267_v30 = vadd.f32 %v16346_v32, %v7266_v19  ;;  %9792 = vpow2.f32 %v7138_v12 }
0x10c3   : > { %v7166_v15 = vmul.f32 1.442695, %v18420_v31  ;;  %v16439_v48 = vpop.eup %9774  ;;  %9794 = vpow2.f32 %v7142_v51  ;;  %v18421_v51 = vsub.f32 %v16042_v27, %v16173_v6  ;;  %v18422_v31 = vsub.f32 %v18382_v16, %v16173_v6 }
0x10c4   : > { %v16447_v19 = vpop.eup %9776  ;;  %v7268_v12 = vadd.f32 %v16353_v55, %v7267_v30  ;;  %9796 = vpow2.f32 %v7146_v38 }
0x10c5   : > { %v16454_v62 = vpop.eup %9778  ;;  %9798 = vpow2.f32 %v7150_v28  ;;  %v7170_v17 = vmul.f32 1.442695, %v18421_v51  ;;  %v7174_v9 = vmul.f32 1.442695, %v18422_v31 }
0x10c6   : > { %v16462_v30 = vpop.eup %9780  ;;  %v7269_v38 = vadd.f32 %v16359_v5, %v7268_v12  ;;  %9800 = vpow2.f32 %v7154_v45  ;;  %v18423_v45 = vsub.f32 %v18383_v47, %v16173_v6  ;;  %v18428_v47 = vsub.f32 %v18388_v58, %v16173_v6 }
0x10c7   : > { %v16470_v56 = vpop.eup %9782  ;;  %9802 = vpow2.f32 %v7158_v13  ;;  %v18424_v13 = vsub.f32 %v18384_v14, %v16173_v6  ;;  %v18427_v14 = vsub.f32 %v18387_v49, %v16173_v6  ;;  %v18431_v58 = vsub.f32 %v18391_v22, %v16173_v6 }
0x10c8   : > { %v16475_v40 = vpop.eup %9784  ;;  %v7270_v35 = vadd.f32 %v16365_v18, %v7269_v38  ;;  %9804 = vpow2.f32 %v7162_v36  ;;  %v7178_v27 = vmul.f32 1.442695, %v18423_v45  ;;  %v18425_v36 = vsub.f32 %v18385_v46, %v16173_v6 }
0x10c9   : > { %v16483_v51 = vpop.eup %9786  ;;  %9806 = vpow2.f32 %v7166_v15  ;;  %v7182_v16 = vmul.f32 1.442695, %v18424_v13  ;;  %v18426_v15 = vsub.f32 %v18386_v52, %v16173_v6  ;;  %v7194_v13 = vmul.f32 1.442695, %v18427_v14 }
0x10ca   : > { %v9789_v31 = vpop.eup %9788  ;;  %v7271_v28 = vadd.f32 %v16370_v60, %v7270_v35  ;;  %9808 = vpow2.f32 %v7170_v17  ;;  %v7186_v38 = vmul.f32 1.442695, %v18425_v36  ;;  %v18429_v52 = vsub.f32 %v18389_v53, %v16173_v6 }
0x10cb   : > { %v9791_v45 = vpop.eup %9790  ;;  %9810 = vpow2.f32 %v7174_v9  ;;  %v7190_v12 = vmul.f32 1.442695, %v18426_v15  ;;  %v7198_v9 = vmul.f32 1.442695, %v18428_v47  ;;  %v7210_v47 = vmul.f32 1.442695, %v18431_v58 }
0x10cc   : > { %v9793_v24 = vpop.eup %9792  ;;  %v7272_v35 = vadd.f32 %v16376_v8, %v7271_v28  ;;  %9812 = vpow2.f32 %v7178_v27  ;;  %v7293_v17 = vadd.f32 %v9791_v45, %v9789_v31  ;;  %v8637_v46 = vpack.c.bf16 %v9791_v45, %v9789_v31 }
0x10cd   : > { %v9795_v36 = vpop.eup %9794  ;;  %9814 = vpow2.f32 %v7182_v16  ;;  %v7202_v15 = vmul.f32 1.442695, %v18429_v52  ;;  %v18430_v16 = vsub.f32 %v18390_v50, %v16173_v6  ;;  %v18432_v53 = vpack.c.bf16 %v16265_v7, %v16257_v37 }
0x10ce   : > { %v9797_v60 = vpop.eup %9796  ;;  %v7273_v49 = vadd.f32 %v16381_v0, %v7272_v35  ;;  %9816 = vpow2.f32 %v7186_v38  ;;  %v7294_v14 = vadd.f32 %v9793_v24, %v7293_v17  ;;  %8638 = vmatprep.subr.bf16.mxu1 %v8637_v46  ;;  %v8641_v28 = vpack.c.bf16 %v9795_v36, %v9793_v24 }
0x10cf   : > { %v9799_v27 = vpop.eup %9798  ;;  %9818 = vpow2.f32 %v7190_v12  ;;  %v7206_v31 = vmul.f32 1.442695, %v18430_v16  ;;  %8640 = vmatpush1.bf16.msra.mxu1 %v18432_v53  ;;  %v18433_v50 = vsub.f32 %v18392_v29, %v16173_v6  ;;  %v18434_v22 = vsub.f32 %v18393_v63, %v16173_v6  ;;  %v18439_v53 = vld [vmem:[#allocation78_spill] sm:$0xff] }
0x10d0   : > { %v9801_v45 = vpop.eup %9800  ;;  %v7274_v38 = vadd.f32 %v16387_v43, %v7273_v49  ;;  %9820 = vpow2.f32 %v7194_v13  ;;  %v7295_v35 = vadd.f32 %v9795_v36, %v7294_v14  ;;  %8642 = vmatprep.subr.bf16.mxu1 %v8641_v28  ;;  %v8645_v24 = vpack.c.bf16 %v9799_v27, %v9797_v60 }
0x10d1   : > { %v9803_v12 = vpop.eup %9802  ;;  %9822 = vpow2.f32 %v7198_v9  ;;  %v7214_v17 = vmul.f32 1.442695, %v18433_v50  ;;  %v7218_v46 = vmul.f32 1.442695, %v18434_v22  ;;  %v18435_v36 = vsub.f32 %v18394_v20, %v16173_v6 }
0x10d2   : > { %v9805_v52 = vpop.eup %9804  ;;  %v7275_v37 = vadd.f32 %v16395_v59, %v7274_v38  ;;  %9824 = vpow2.f32 %v7202_v15  ;;  %v7296_v7 = vadd.f32 %v9797_v60, %v7295_v35  ;;  %v8649_v49 = vpack.c.bf16 %v9803_v12, %v9801_v45 }
0x10d3   : > { %v9807_v13 = vpop.eup %9806  ;;  %9826 = vpow2.f32 %v7206_v31  ;;  %v7222_v9 = vmul.f32 1.442695, %v18435_v36  ;;  %v18436_v29 = vsub.f32 %v18395_v4, %v16173_v6  ;;  %v18437_v63 = vpack.c.bf16 %v16281_v33, %v16273_v3 }
0x10d4   : > { %v9809_v28 = vpop.eup %9808  ;;  %v7276_v16 = vadd.f32 %v16404_v11, %v7275_v37  ;;  %9828 = vpow2.f32 %v7210_v47  ;;  %v7297_v60 = vadd.f32 %v9799_v27, %v7296_v7  ;;  %v8653_v15 = vpack.c.bf16 %v9807_v13, %v9805_v52 }
0x10d5   : > { %v7226_v14 = vmul.f32 1.442695, %v18436_v29  ;;  %8644 = vmatpush1.bf16.msra.mxu1 %v18437_v63  ;;  %v9811_v31 = vpop.eup %9810  ;;  %9830 = vpow2.f32 %v7214_v17  ;;  %v18438_v20 = vsub.f32 %v18396_v41, %v16173_v6  ;;  %v18440_v4 = vsub.f32 %v18439_v53, %v16173_v6  ;;  %v18442_v17 = vld [vmem:[#allocation82_spill] sm:$0xff] }
0x10d6   : > { %8646 = vmatprep.subr.bf16.mxu1 %v8645_v24  ;;  %v9813_v35 = vpop.eup %9812  ;;  %v7277_v3 = vadd.f32 %v16415_v57, %v7276_v16  ;;  %9832 = vpow2.f32 %v7218_v46  ;;  %v7298_v33 = vadd.f32 %v9801_v45, %v7297_v60  ;;  %v8657_v50 = vpack.c.bf16 %v9811_v31, %v9809_v28 }
0x10d7   : > { %v7230_v58 = vmul.f32 1.442695, %v18438_v20  ;;  %v7234_v38 = vmul.f32 1.442695, %v18440_v4  ;;  %v9815_v47 = vpop.eup %9814  ;;  %9834 = vpow2.f32 %v7222_v9  ;;  %v18441_v27 = vsub.f32 %v18398_v25, %v16173_v6 }
0x10d8   : > { %v18443_v41 = vsub.f32 %v18442_v17, %v16173_v6  ;;  %v18444_v37 = vpack.c.bf16 %v16296_v1, %v16289_v10  ;;  %v9817_v7 = vpop.eup %9816  ;;  %v7278_v36 = vadd.f32 %v16424_v39, %v7277_v3  ;;  %9836 = vpow2.f32 %v7226_v14 }
0x10d9   : > { %v7238_v24 = vmul.f32 1.442695, %v18441_v27  ;;  %v7299_v45 = vadd.f32 %v9803_v12, %v7298_v33  ;;  %v8661_v46 = vpack.c.bf16 %v9815_v47, %v9813_v35  ;;  %v9819_v9 = vpop.eup %9818  ;;  %9838 = vpow2.f32 %v7230_v58  ;;  %v18447_v12 = vld [vmem:[#allocation90_spill] sm:$0xff] }
0x10da   : > { %v7242_v22 = vmul.f32 1.442695, %v18443_v41  ;;  %8648 = vmatpush1.bf16.msra.mxu1 %v18444_v37  ;;  %v18445_v25 = vsub.f32 %v18400_v21, %v16173_v6  ;;  %v18446_v63 = vsub.f32 %v18401_v61, %v16173_v6  ;;  %v9821_v60 = vpop.eup %9820  ;;  %v7279_v1 = vadd.f32 %v16432_v26, %v7278_v36 }
0x10db   : > { %8650 = vmatprep.subr.bf16.mxu1 %v8649_v49  ;;  %9840 = vpow2.f32 %v7234_v38  ;;  %v7300_v10 = vadd.f32 %v9805_v52, %v7299_v45  ;;  %v8665_v20 = vpack.c.bf16 %v9819_v9, %v9817_v7  ;;  %v9823_v14 = vpop.eup %9822  ;;  %v18448_v49 = vsub.f32 %v18447_v12, %v16173_v6 }
0x10dc   : > { %v7246_v29 = vmul.f32 1.442695, %v18445_v25  ;;  %v7250_v16 = vmul.f32 1.442695, %v18446_v63  ;;  %9842 = vpow2.f32 %v7238_v24  ;;  %v18449_v21 = vpack.c.bf16 %v16311_v23, %v16304_v42  ;;  %v9825_v53 = vpop.eup %9824 }
0x10dd   : > { %v7254_v58 = vmul.f32 1.442695, %v18448_v49  ;;  %v7280_v61 = vadd.f32 %v16439_v48, %v7279_v1  ;;  %9844 = vpow2.f32 %v7242_v22  ;;  %v7301_v4 = vadd.f32 %v9807_v13, %v7300_v10  ;;  %v9827_v38 = vpop.eup %9826 }
0x10de   : > { %8652 = vmatpush1.bf16.msra.mxu1 %v18449_v21  ;;  %v8669_v3 = vpack.c.bf16 %v9823_v14, %v9821_v60  ;;  %9846 = vpow2.f32 %v7246_v29  ;;  %v9829_v52 = vpop.eup %9828  ;;  %v8673_v6 = vpack.c.bf16 %v9827_v38, %v9825_v53  ;;  %v18450_v23 = vpack.c.bf16 %v16326_v2, %v16319_v34 }
0x10df   : > { %8654 = vmatprep.subr.bf16.mxu1 %v8653_v15  ;;  %v7281_v33 = vadd.f32 %v16447_v19, %v7280_v61  ;;  %9848 = vpow2.f32 %v7250_v16  ;;  %v7302_v27 = vadd.f32 %v9809_v28, %v7301_v4  ;;  %v9831_v24 = vpop.eup %9830  ;;  %v18451_v25 = vpack.c.bf16 %v16340_v44, %v16334_v54 }
0x10e0   : > { %9850 = vpow2.f32 %v7254_v58  ;;  %v9833_v42 = vpop.eup %9832  ;;  %v8677_v15 = vpack.c.bf16 %v9831_v24, %v9829_v52  ;;  %v18453_v61 = vpack.c.bf16 %v16365_v18, %v16359_v5  ;;  %v18457_v5 = vpack.c.bf16 %v16404_v11, %v16395_v59 }
0x10e1   : > { %v7282_v17 = vadd.f32 %v16454_v62, %v7281_v33  ;;  %v7303_v13 = vadd.f32 %v9811_v31, %v7302_v27  ;;  %v9835_v41 = vpop.eup %9834  ;;  %v18460_v59 = vpack.c.bf16 %v16454_v62, %v16447_v19  ;;  %v7466_v62 = vld [vmem:[%s16816_s3 + $0x8] sm:$0xff]  ;;  %v9993_v19 = vmov 0  }
0x10e2   : > { %8656 = vmatpush1.bf16.msra.mxu1 %v18450_v23  ;;  %v9837_v22 = vpop.eup %9836  ;;  %v8681_v45 = vpack.c.bf16 %v9835_v41, %v9833_v42  ;;  %8799 = vset.pattern.permute.xlu1 %v9993_v19  ;;  %v7472_v23 = vld [vmem:[%s16816_s3 + $0x38] sm:$0xff] }
0x10e3   : > { %8658 = vmatprep.subr.bf16.mxu1 %v8657_v50  ;;  %v7283_v37 = vadd.f32 %v16462_v30, %v7282_v17  ;;  %v7304_v36 = vadd.f32 %v9813_v35, %v7303_v13  ;;  %v9839_v28 = vpop.eup %9838  ;;  %v18452_v35 = vpack.c.bf16 %v16353_v55, %v16346_v32  ;;  %v18454_v32 = vld [vmem:[#allocation94_spill] sm:$0xff]  ;;  %8798 = vset.pattern.permute.xlu0 %v9993_v19  ;;  %v7474_v17 = vld [vmem:[%s16816_s3 + $0x48] sm:$0xff] }
0x10e4   : > { %v8685_v63 = vpack.c.bf16 %v9839_v28, %v9837_v22  ;;  %v18455_v55 = vpack.c.bf16 %v16376_v8, %v18454_v32  ;;  %v18458_v8 = vpack.c.bf16 %v16424_v39, %v16415_v57  ;;  %v18461_v57 = vpack.c.bf16 %v16470_v56, %v16462_v30  ;;  %7488 = vperm.xlu1 %8799, %v7466_v62   ;;  %v7470_v30 = vld [vmem:[%s16816_s3 + $0x28] sm:$0xff]  ;;  %v7471_v13 = vld [vmem:[%s16816_s3 + $0x30] sm:$0xff] }
0x10e5   : > { %v9841_v29 = vpop.eup %9840  ;;  %v7284_v2 = vadd.f32 %v16470_v56, %v7283_v37  ;;  %v7305_v34 = vadd.f32 %v9815_v47, %v7304_v36  ;;  %v7465_v56 = vld [vmem:[%s16816_s3] sm:$0xff] }
0x10e6   : > { %8660 = vmatpush1.bf16.msra.mxu1 %v18451_v25  ;;  %v9843_v31 = vpop.eup %9842  ;;  %7483 = vperm.xlu0 %8798, %v7465_v56  }
0x10e7   : > { %8662 = vmatprep.subr.bf16.mxu1 %v8661_v46  ;;  %v9845_v50 = vpop.eup %9844  ;;  %v7285_v16 = vadd.f32 %v16475_v40, %v7284_v2  ;;  %v7306_v1 = vadd.f32 %v9817_v7, %v7305_v34  ;;  %v8689_v10 = vpack.c.bf16 %v9843_v31, %v9841_v29  ;;  %v7477_v2 = vld [vmem:[%s16816_s3 + $0x60] sm:$0xff] }
0x10e8   : > { %v9847_v12 = vpop.eup %9846 }
0x10e9   : > { %v9849_v49 = vpop.eup %9848  ;;  %v16581_v44 = vadd.f32 %v16483_v51, %v7285_v16  ;;  %v7307_v54 = vadd.f32 %v9819_v9, %v7306_v1  ;;  %v8693_v47 = vpack.c.bf16 %v9847_v12, %v9845_v50  ;;  %v18456_v9 = vpack.c.bf16 %v16387_v43, %v16381_v0 }
0x10ea   : > { %8664 = vmatpush1.bf16.msra.mxu1 %v18452_v35  ;;  %v9851_v46 = vpop.eup %9850  ;;  %v18459_v0 = vpack.c.bf16 %v16439_v48, %v16432_v26  ;;  %v18462_v26 = vpack.c.bf16 %v16483_v51, %v16475_v40  ;;  %v18463_v48 = vld [vmem:[#allocation45_spill] sm:$0xff]  ;;  %v7467_v40 = vld [vmem:[%s16816_s3 + $0x10] sm:$0xff]  ;;  %7508 = vperm.xlu0 %8798, %v7470_v30   ;;  %v7468_v51 = vld [vmem:[%s16816_s3 + $0x18] sm:$0xff] }
0x10eb   : > { %8666 = vmatprep.subr.bf16.mxu1 %v8665_v20  ;;  %v7308_v58 = vadd.f32 %v9821_v60, %v7307_v54  ;;  %v8697_v21 = vpack.c.bf16 %v9851_v46, %v9849_v49  ;;  %7493 = vperm.xlu1 %8799, %v7467_v40   ;;  %v7287_v37 = vrot.slane %v16581_v44, 4 }
0x10ed   : > { %v7309_v7 = vadd.f32 %v9823_v14, %v7308_v58  ;;  %v7288_v25 = vadd.f32 %v7287_v37, %v16581_v44 }
0x10ee   : > { %8668 = vmatpush1.bf16.msra.mxu1 %v18453_v61  ;;  %7518 = vperm.xlu0 %8798, %v7472_v23  }
0x10ef   : > { %8670 = vmatprep.subr.bf16.mxu1 %v8669_v3  ;;  %v7310_v4 = vadd.f32 %v9825_v53, %v7309_v7  ;;  %7498 = vperm.xlu1 %8799, %v7468_v51   ;;  %v7289_v34 = vrot.slane %v7288_v25, 2 }
0x10f1   : > { %v7311_v33 = vadd.f32 %v9827_v38, %v7310_v4 }
0x10f2   : > { %8672 = vmatpush1.bf16.msra.mxu1 %v18455_v55  ;;  %7528 = vperm.xlu0 %8798, %v7474_v17  }
0x10f3   : > { %8674 = vmatprep.subr.bf16.mxu1 %v8673_v6  ;;  %v7312_v27 = vadd.f32 %v9829_v52, %v7311_v33  ;;  %v18464_v6 = vld [vmem:[#allocation51_spill] sm:$0xff]  ;;  %v7417_v33 = vld [vmem:[%s16815_s2] sm:$0xff] }
0x10f5   : > { %v7313_v60 = vadd.f32 %v9831_v24, %v7312_v27  ;;  %v18465_v24 = vld [vmem:[#allocation49_spill] sm:$0xff]  ;;  %v18466_v27 = vmov 0.0  }
0x10f6   : > { %8676 = vmatpush1.bf16.msra.mxu1 %v18456_v9  ;;  %v7418_v9 = vld [vmem:[%s16815_s2 + $0x8] sm:$0xff] }
0x10f7   : > { %8678 = vmatprep.subr.bf16.mxu1 %v8677_v15  ;;  %v7314_v20 = vadd.f32 %v9833_v42, %v7313_v60  ;;  %v7469_v42 = vld [vmem:[%s16816_s3 + $0x20] sm:$0xff]  ;;  %v7476_v15 = vld [vmem:[%s16816_s3 + $0x58] sm:$0xff]  ;;  %v7419_v60 = vld [vmem:[%s16815_s2 + $0x10] sm:$0xff] }
0x10f8   : > { %7503 = vperm.xlu1 %8799, %v7469_v42   ;;  %7538 = vperm.xlu0 %8798, %v7476_v15  }
0x10f9   : > { %v7315_v18 = vadd.f32 %v9835_v41, %v7314_v20  ;;  %v7473_v41 = vld [vmem:[%s16816_s3 + $0x40] sm:$0xff]  ;;  %v7420_v20 = vld [vmem:[%s16815_s2 + $0x18] sm:$0xff] }
0x10fa   : > { %8680 = vmatpush1.bf16.msra.mxu1 %v18457_v5  ;;  %v7421_v5 = vld [vmem:[%s16815_s2 + $0x20] sm:$0xff] }
0x10fb   : > { %8682 = vmatprep.subr.bf16.mxu1 %v8681_v45  ;;  %v7316_v14 = vadd.f32 %v9837_v22, %v7315_v18  ;;  %v7478_v22 = vld [vmem:[%s16816_s3 + $0x68] sm:$0xff]  ;;  %v7475_v45 = vld [vmem:[%s16816_s3 + $0x50] sm:$0xff] }
0x10fc   : > { %7513 = vperm.xlu1 %8799, %v7471_v13   ;;  %7548 = vperm.xlu0 %8798, %v7478_v22   ;;  %v7422_v18 = vld [vmem:[%s16815_s2 + $0x28] sm:$0xff] }
0x10fd   : > { %v7317_v53 = vadd.f32 %v9839_v28, %v7316_v14  ;;  %v7480_v28 = vld [vmem:[%s16816_s3 + $0x78] sm:$0xff]  ;;  %v7423_v14 = vld [vmem:[%s16815_s2 + $0x30] sm:$0xff] }
0x10fe   : > { %8684 = vmatpush1.bf16.msra.mxu1 %v18458_v8  ;;  %v7424_v8 = vld [vmem:[%s16815_s2 + $0x38] sm:$0xff] }
0x10ff   : > { %8686 = vmatprep.subr.bf16.mxu1 %v8685_v63  ;;  %v7318_v3 = vadd.f32 %v9841_v29, %v7317_v53  ;;  %v7425_v53 = vld [vmem:[%s16815_s2 + $0x40] sm:$0xff] }
0x1100   : > { %7523 = vperm.xlu1 %8799, %v7473_v41   ;;  %7558 = vperm.xlu0 %8798, %v7480_v28  }
0x1101   : > { %v7319_v43 = vadd.f32 %v9843_v31, %v7318_v3  ;;  %v7479_v31 = vld [vmem:[%s16816_s3 + $0x70] sm:$0xff]  ;;  %v7426_v3 = vld [vmem:[%s16815_s2 + $0x48] sm:$0xff] }
0x1102   : > { %8688 = vmatpush1.bf16.msra.mxu1 %v18459_v0  ;;  %v7427_v0 = vld [vmem:[%s16815_s2 + $0x50] sm:$0xff] }
0x1103   : > { %8690 = vmatprep.subr.bf16.mxu1 %v8689_v10  ;;  %v7320_v38 = vadd.f32 %v9845_v50, %v7319_v43  ;;  %v7290_v50 = vadd.f32 %v7289_v34, %v7288_v25  ;;  %v7428_v43 = vld [vmem:[%s16815_s2 + $0x58] sm:$0xff] }
0x1104   : > { %7533 = vperm.xlu1 %8799, %v7475_v45  }
0x1105   : > { %v7321_v11 = vadd.f32 %v9847_v12, %v7320_v38  ;;  %v7291_v1 = vrot.slane %v7290_v50, 1  ;;  %v7429_v38 = vld [vmem:[%s16815_s2 + $0x60] sm:$0xff] }
0x1106   : > { %8692 = vmatpush1.bf16.msra.mxu1 %v18460_v59  ;;  %v7430_v59 = vld [vmem:[%s16815_s2 + $0x68] sm:$0xff] }
0x1107   : > { %8694 = vmatprep.subr.bf16.mxu1 %v8693_v47  ;;  %v7322_v52 = vadd.f32 %v9849_v49, %v7321_v11  ;;  %v7292_v12 = vadd.f32 %v7291_v1, %v7290_v50  ;;  %v7431_v11 = vld [vmem:[%s16815_s2 + $0x70] sm:$0xff] }
0x1108   : > { %7543 = vperm.xlu1 %8799, %v7477_v2  }
0x1109   : > { %v7323_v39 = vadd.f32 %v9851_v46, %v7322_v52  ;;  %9852 = vrcp.f32 %v7292_v12  ;;  %v7432_v52 = vld [vmem:[%s16815_s2 + $0x78] sm:$0xff] }
0x110a   : > { %8696 = vmatpush1.bf16.msra.mxu1 %v18461_v57 }
0x110b   : > { %8698 = vmatprep.subr.bf16.mxu1 %v8697_v21  ;;  %v7324_v36 = vrot.slane %v7323_v39, 4 }
0x110c   : > { %7553 = vperm.xlu1 %8799, %v7479_v31  }
0x110d   : > { %v7325_v29 = vadd.f32 %v7324_v36, %v7323_v39 }
0x110e   : > { %8700 = vmatpush1.bf16.msra.mxu1 %v18462_v26 }
0x110f   : > { %v7326_v63 = vrot.slane %v7325_v29, 2 }
0x1111   : > { %7395 = vmatmul.mubr.f32.vlgmr.msra.gmra.mrb[80].mxu1 %v18463_v48  ;;  %v7327_v16 = vadd.f32 %v7326_v63, %v7325_v29 }
0x1112   : > { %7400 = vmatprep.mubr.f32.mxu1 %v18464_v6 }
0x1113   : > { %v7328_v10 = vrot.slane %v7327_v16, 1  ;;  %v9853_v49 = vpop.eup %9852 }
0x1115   : > { %7401 = vmatmul.mubr.f32.gmra.mrb[82].mxu1 %v18465_v24  ;;  %v7329_v35 = vadd.f32 %v7328_v10, %v7327_v16 }
0x1117   : > { %9854 = vrcp.f32 %v7329_v35 }
0x1121   : > { %v9855_v54 = vpop.eup %9854 }
0x1163   : > { %v7489_v57 = vpop.permute.xlu1 %7488 }
0x1165   : > { %v7484_v39 = vpop.permute.xlu0 %7483 }
0x1169   : > { %v7509_v34 = vpop.permute.xlu0 %7508 }
0x116a   : > { %v7494_v62 = vpop.permute.xlu1 %7493 }
0x116e   : > { %v7499_v17 = vpop.permute.xlu1 %7498 }
0x1177   : > { %v7504_v45 = vpop.permute.xlu1 %7503 }
0x117b   : > { %v7514_v1 = vpop.permute.xlu1 %7513 }
0x11e4   : > { %v7396_v44 = vpop.f32.mrb[80].mxu1 }
0x11e5   : > { %v7409_v47 = vmul.f32 %v9853_v49, %v7396_v44  ;;  %v7398_v46 = vpop.f32.mrb[81].mxu1  ;;  %v7519_v44 = vpop.permute.xlu0 %7518 }
0x11e6   : > { %v7410_v58 = vmul.f32 %v9855_v54, %v7398_v46 }
0x11e8   : > { %v7402_v21 = vpop.f32.mrb[82].mxu1 }
0x11e9   : > { %v7411_v61 = vmul.f32 %v9853_v49, %v7402_v21  ;;  %v7404_v7 = vpop.f32.mrb[83].mxu1  ;;  %v7524_v21 = vpop.permute.xlu1 %7523 }
0x11ea   : > { %v7412_v4 = vmul.f32 %v9855_v54, %v7404_v7 }
0x11eb   : > { %v8731_v32 = vpack.c.bf16 %v7411_v61, %v7409_v47 }
0x11ec   : > { %v8729_v55 = vpack.c.bf16 %v7412_v4, %v7410_v58 }
0x11ee   : > { %8730 = vmatprep.subr.bf16.mxu0 %v8729_v55  ;;  %v7529_v55 = vpop.permute.xlu0 %7528 }
0x11ef   : > { %8732 = vmatpush1.bf16.msra.mxu0 %v8731_v32 }
0x11f2   : > { %7626 = vmatmul.mubr.f32.vlgmr.msra.gmra.mrb[44].mxu0 %v7417_v33 }
0x11f3   : > { %7631 = vmatprep.mubr.f32.mxu0 %v18466_v27 }
0x11f6   : > { %7632 = vmatmul.mubr.f32.gmra.mrb[46].mxu0 %v7418_v9 }
0x11f7   : > { %7637 = vmatprep.mubr.f32.mxu0 %v18466_v27 }
0x11fa   : > { %7638 = vmatmul.mubr.f32.gmra.mrb[48].mxu0 %v7419_v60 }
0x11fb   : > { %7643 = vmatprep.mubr.f32.mxu0 %v18466_v27 }
0x11fe   : > { %7644 = vmatmul.mubr.f32.gmra.mrb[50].mxu0 %v7420_v20  ;;  %v7534_v20 = vpop.permute.xlu1 %7533 }
0x11ff   : > { %7649 = vmatprep.mubr.f32.mxu0 %v18466_v27 }
0x1202   : > { %7650 = vmatmul.mubr.f32.gmra.mrb[52].mxu0 %v7421_v5 }
0x1203   : > { %7655 = vmatprep.mubr.f32.mxu0 %v18466_v27 }
0x1206   : > { %7656 = vmatmul.mubr.f32.gmra.mrb[54].mxu0 %v7422_v18 }
0x1207   : > { %7661 = vmatprep.mubr.f32.mxu0 %v18466_v27 }
0x120a   : > { %7662 = vmatmul.mubr.f32.gmra.mrb[56].mxu0 %v7423_v14 }
0x120b   : > { %7667 = vmatprep.mubr.f32.mxu0 %v18466_v27 }
0x120e   : > { %7668 = vmatmul.mubr.f32.gmra.mrb[58].mxu0 %v7424_v8 }
0x120f   : > { %7673 = vmatprep.mubr.f32.mxu0 %v18466_v27 }
0x1212   : > { %7674 = vmatmul.mubr.f32.gmra.mrb[60].mxu0 %v7425_v53  ;;  %v7539_v53 = vpop.permute.xlu0 %7538 }
0x1213   : > { %7679 = vmatprep.mubr.f32.mxu0 %v18466_v27 }
0x1216   : > { %7680 = vmatmul.mubr.f32.gmra.mrb[62].mxu0 %v7426_v3 }
0x1217   : > { %7685 = vmatprep.mubr.f32.mxu0 %v18466_v27 }
0x121a   : > { %7686 = vmatmul.mubr.f32.gmra.mrb[64].mxu0 %v7427_v0 }
0x121b   : > { %7691 = vmatprep.mubr.f32.mxu0 %v18466_v27 }
0x121e   : > { %7692 = vmatmul.mubr.f32.gmra.mrb[66].mxu0 %v7428_v43 }
0x121f   : > { %7697 = vmatprep.mubr.f32.mxu0 %v18466_v27 }
0x1222   : > { %7698 = vmatmul.mubr.f32.gmra.mrb[68].mxu0 %v7429_v38 }
0x1223   : > { %7703 = vmatprep.mubr.f32.mxu0 %v18466_v27 }
0x1226   : > { %7704 = vmatmul.mubr.f32.gmra.mrb[70].mxu0 %v7430_v59  ;;  %v7544_v59 = vpop.permute.xlu1 %7543 }
0x1227   : > { %7709 = vmatprep.mubr.f32.mxu0 %v18466_v27 }
0x122a   : > { %7710 = vmatmul.mubr.f32.gmra.mrb[72].mxu0 %v7431_v11 }
0x122b   : > { %7715 = vmatprep.mubr.f32.mxu0 %v18466_v27 }
0x122e   : > { %7716 = vmatmul.mubr.f32.gmra.mrb[74].mxu0 %v7432_v52 }
0x12c5   : > { %v7627_v26 = vpop.f32.mrb[44].mxu0 }
0x12c6   : > { %v7628_v48 = vadd.f32 %v7627_v26, %v7484_v39  ;;  %v7629_v6 = vpop.f32.mrb[45].mxu0  ;;  %v7549_v26 = vpop.permute.xlu0 %7548 }
0x12c7   : > { %v7630_v24 = vadd.f32 %v7629_v6, %v7484_v39 }
0x12c8   : > { %7722 = vst [vmem:[%s16728_s29] sm:$0xff] %v7628_v48 }
0x12c9   : > { %7723 = vst [vmem:[%s16728_s29 + $0x8] sm:$0xff] %v7630_v24  ;;  %v7633_v56 = vpop.f32.mrb[46].mxu0 }
0x12ca   : > { %v7634_v19 = vadd.f32 %v7633_v56, %v7489_v57  ;;  %v7635_v40 = vpop.f32.mrb[47].mxu0  ;;  %v7554_v56 = vpop.permute.xlu1 %7553 }
0x12cb   : > { %v7636_v30 = vadd.f32 %v7635_v40, %v7489_v57 }
0x12cc   : > { %7724 = vst [vmem:[%s16728_s29 + $0x10] sm:$0xff] %v7634_v19 }
0x12cd   : > { %7725 = vst [vmem:[%s16728_s29 + $0x18] sm:$0xff] %v7636_v30  ;;  %v7639_v51 = vpop.f32.mrb[48].mxu0 }
0x12ce   : > { %v7640_v23 = vadd.f32 %v7639_v51, %v7494_v62  ;;  %v7641_v42 = vpop.f32.mrb[49].mxu0 }
0x12cf   : > { %v7642_v13 = vadd.f32 %v7641_v42, %v7494_v62 }
0x12d0   : > { %7726 = vst [vmem:[%s16728_s29 + $0x20] sm:$0xff] %v7640_v23  ;;  %v7559_v23 = vpop.permute.xlu0 %7558 }
0x12d1   : > { %7727 = vst [vmem:[%s16728_s29 + $0x28] sm:$0xff] %v7642_v13  ;;  %v7645_v15 = vpop.f32.mrb[50].mxu0 }
0x12d2   : > { %v7646_v41 = vadd.f32 %v7645_v15, %v7499_v17  ;;  %v7647_v22 = vpop.f32.mrb[51].mxu0 }
0x12d3   : > { %v7648_v37 = vadd.f32 %v7647_v22, %v7499_v17 }
0x12d4   : > { %7728 = vst [vmem:[%s16728_s29 + $0x30] sm:$0xff] %v7646_v41 }
0x12d5   : > { %7729 = vst [vmem:[%s16728_s29 + $0x38] sm:$0xff] %v7648_v37  ;;  %v7651_v36 = vpop.f32.mrb[52].mxu0 }
0x12d6   : > { %v7652_v28 = vadd.f32 %v7651_v36, %v7504_v45  ;;  %v7653_v25 = vpop.f32.mrb[53].mxu0 }
0x12d7   : > { %v7654_v29 = vadd.f32 %v7653_v25, %v7504_v45 }
0x12d8   : > { %7730 = vst [vmem:[%s16728_s29 + $0x40] sm:$0xff] %v7652_v28 }
0x12d9   : > { %7731 = vst [vmem:[%s16728_s29 + $0x48] sm:$0xff] %v7654_v29  ;;  %v7657_v2 = vpop.f32.mrb[54].mxu0 }
0x12da   : > { %v7659_v63 = vpop.f32.mrb[55].mxu0  ;;  %v7658_v31 = vadd.f32 %v7657_v2, %v7509_v34 }
0x12db   : > { %v7660_v50 = vadd.f32 %v7659_v63, %v7509_v34 }
0x12dc   : > { %7732 = vst [vmem:[%s16728_s29 + $0x50] sm:$0xff] %v7658_v31 }
0x12dd   : > { %v7663_v16 = vpop.f32.mrb[56].mxu0  ;;  %7733 = vst [vmem:[%s16728_s29 + $0x58] sm:$0xff] %v7660_v50 }
0x12de   : > { %v7664_v10 = vadd.f32 %v7663_v16, %v7514_v1  ;;  %v7665_v12 = vpop.f32.mrb[57].mxu0 }
0x12df   : > { %v7666_v35 = vadd.f32 %v7665_v12, %v7514_v1 }
0x12e0   : > { %7734 = vst [vmem:[%s16728_s29 + $0x60] sm:$0xff] %v7664_v10 }
0x12e1   : > { %7735 = vst [vmem:[%s16728_s29 + $0x68] sm:$0xff] %v7666_v35  ;;  %v7669_v49 = vpop.f32.mrb[58].mxu0 }
0x12e2   : > { %v7671_v54 = vpop.f32.mrb[59].mxu0  ;;  %v7670_v47 = vadd.f32 %v7669_v49, %v7519_v44 }
0x12e3   : > { %v7672_v46 = vadd.f32 %v7671_v54, %v7519_v44 }
0x12e4   : > { %7736 = vst [vmem:[%s16728_s29 + $0x70] sm:$0xff] %v7670_v47 }
0x12e5   : > { %v7675_v58 = vpop.f32.mrb[60].mxu0  ;;  %7737 = vst [vmem:[%s16728_s29 + $0x78] sm:$0xff] %v7672_v46 }
0x12e6   : > { %v7676_v61 = vadd.f32 %v7675_v58, %v7524_v21  ;;  %v7677_v7 = vpop.f32.mrb[61].mxu0 }
0x12e7   : > { %v7678_v4 = vadd.f32 %v7677_v7, %v7524_v21 }
0x12e8   : > { %7738 = vst [vmem:[%s16728_s29 + $0x80] sm:$0xff] %v7676_v61 }
0x12e9   : > { %7739 = vst [vmem:[%s16728_s29 + $0x88] sm:$0xff] %v7678_v4  ;;  %v7681_v32 = vpop.f32.mrb[62].mxu0 }
0x12ea   : > { %v7683_v33 = vpop.f32.mrb[63].mxu0  ;;  %v7682_v27 = vadd.f32 %v7681_v32, %v7529_v55 }
0x12eb   : > { %v7684_v9 = vadd.f32 %v7683_v33, %v7529_v55 }
0x12ec   : > { %7740 = vst [vmem:[%s16728_s29 + $0x90] sm:$0xff] %v7682_v27 }
0x12ed   : > { %v7687_v60 = vpop.f32.mrb[64].mxu0  ;;  %7741 = vst [vmem:[%s16728_s29 + $0x98] sm:$0xff] %v7684_v9 }
0x12ee   : > { %v7688_v5 = vadd.f32 %v7687_v60, %v7534_v20  ;;  %v7689_v18 = vpop.f32.mrb[65].mxu0 }
0x12ef   : > { %v7690_v14 = vadd.f32 %v7689_v18, %v7534_v20 }
0x12f0   : > { %7742 = vst [vmem:[%s16728_s29 + $0xa0] sm:$0xff] %v7688_v5 }
0x12f1   : > { %7743 = vst [vmem:[%s16728_s29 + $0xa8] sm:$0xff] %v7690_v14  ;;  %v7693_v8 = vpop.f32.mrb[66].mxu0 }
0x12f2   : > { %v7695_v3 = vpop.f32.mrb[67].mxu0  ;;  %v7694_v0 = vadd.f32 %v7693_v8, %v7539_v53 }
0x12f3   : > { %v7696_v43 = vadd.f32 %v7695_v3, %v7539_v53 }
0x12f4   : > { %7744 = vst [vmem:[%s16728_s29 + $0xb0] sm:$0xff] %v7694_v0 }
0x12f5   : > { %v7699_v38 = vpop.f32.mrb[68].mxu0  ;;  %7745 = vst [vmem:[%s16728_s29 + $0xb8] sm:$0xff] %v7696_v43 }
0x12f6   : > { %v7700_v11 = vadd.f32 %v7699_v38, %v7544_v59  ;;  %v7701_v52 = vpop.f32.mrb[69].mxu0 }
0x12f7   : > { %v7702_v57 = vadd.f32 %v7701_v52, %v7544_v59 }
0x12f8   : > { %7746 = vst [vmem:[%s16728_s29 + $0xc0] sm:$0xff] %v7700_v11 }
0x12f9   : > { %7747 = vst [vmem:[%s16728_s29 + $0xc8] sm:$0xff] %v7702_v57  ;;  %v7705_v39 = vpop.f32.mrb[70].mxu0 }
0x12fa   : > { %v7707_v48 = vpop.f32.mrb[71].mxu0  ;;  %v7706_v6 = vadd.f32 %v7705_v39, %v7549_v26 }
0x12fb   : > { %v7708_v24 = vadd.f32 %v7707_v48, %v7549_v26 }
0x12fc   : > { %7748 = vst [vmem:[%s16728_s29 + $0xd0] sm:$0xff] %v7706_v6 }
0x12fd   : > { %v7711_v62 = vpop.f32.mrb[72].mxu0  ;;  %7749 = vst [vmem:[%s16728_s29 + $0xd8] sm:$0xff] %v7708_v24 }
0x12fe   : > { %v7712_v19 = vadd.f32 %v7711_v62, %v7554_v56  ;;  %v7713_v40 = vpop.f32.mrb[73].mxu0 }
0x12ff   : > { %v7714_v30 = vadd.f32 %v7713_v40, %v7554_v56 }
0x1300   : > { %7750 = vst [vmem:[%s16728_s29 + $0xe0] sm:$0xff] %v7712_v19 }
0x1301   : > { %7751 = vst [vmem:[%s16728_s29 + $0xe8] sm:$0xff] %v7714_v30  ;;  %v7717_v51 = vpop.f32.mrb[74].mxu0 }
0x1302   : > { %v7718_v42 = vadd.f32 %v7717_v51, %v7559_v23  ;;  %v7719_v17 = vpop.f32.mrb[75].mxu0 }
0x1303   : > { %v7720_v13 = vadd.f32 %v7719_v17, %v7559_v23 }
0x1304   : > { %7752 = vst [vmem:[%s16728_s29 + $0xf0] sm:$0xff] %v7718_v42 }
0x1305   : > { %7753 = vst [vmem:[%s16728_s29 + $0xf8] sm:$0xff] %v7720_v13 }
0x1306   : > { %9927 = shalt.err (!%p9924_p7)
}
0x1307   : > { %s9928_s14 = scalar_lea.hbm %s16765_s7, 4096  ;;  %s9932_s23 = scalar_lea.hbm %s16817_s4, 8192 }
0x1308   : > { %p9929_p9 = scmp.ne.s32.totalorder %s16765_s7, %s9928_s14  ;;  %p9933_p5 = scmp.lt.u32.totalorder %s16765_s7, %s16817_s4 }
0x1309   : > { %p9934_p11 = scmp.lt.u32.totalorder %s9932_s23, %s9928_s14  ;;  %p9936_p4 = scmp.lt.u32.totalorder %s9928_s14, %s16765_s7 }
0x130a   : > { %p9930_p2 = pnand %p9929_p9, %p10113_p12 }
0x130b   : > { %p9935_p1 = por %p9934_p11, %p9933_p5 }
0x130c   : > { %p9931_p0 = pneg %p9930_p2 }
0x130d   : > { %p9937_p6 = por %p9936_p4, %p9935_p1 }
0x130f   : > { %p9938_p8 = pnand %p9937_p6, %p9931_p0 }
0x1311   : > { %9941 = shalt.err (!%p9938_p8)
}
0x1312   : > { %s9995_s29 = smov 256   ;;  %s9996_s13 = smov 16  }
0x1313   : > { %8739 = dma.vmem_to_hbm [thread:$0]  (%p10113_p12), %s16767_s10, 4096, %s16765_s7, %s7755_s19, %s9995_s29, %s9995_s29, %s9996_s13  }
0x1314 PF: > { %s7783_s6 = sand.u32 1, %s9972_s15   ;;  %p18467_p10 = scmp.ne.s32.totalorder %s17210_s22, 0 }
0x1315   : > { %p18468_p13 = scmp.ge.s32.totalorder %s9984_s18, 2  ;;  %s7784_s5 = scalar_lea.sflag [#allocation5], %s7783_s6 }
0x1317   : > { %p8750_p3 = pnand %p18468_p13, %p18467_p10 }
0x1319   : > { %9967 = dma.done.wait (!%p8750_p3), %s7784_s5, 4096  }
0x131a   : > { %9969 = vsyncadd (!%p8750_p3), %s7784_s5, 4294963200  ;;  %p18_p7 = scmp.ge.s32.totalorder %s10078_s27, 4   ;;  %s18469_s15 = smov %s9976_s16 }
0x131b   : > { %s18470_s16 = smov %s9980_s17  ;;  %s18471_s17 = smov %s10109_s24 }
0x131c   : > { %s18472_s18 = smov %s10078_s27  ;;  %20 = sbr.rel (!%p18_p7) target bundleno = 6 (0x6), region = 85 }
0x1323   :  { %7789 = vsyncpa [#allocation4], 1 }
0x1324   :  { %7791 = vsyncpa [#allocation4 + $0x1], 1 }
0x1325   :  { %7792 = vsyncpa [#allocation7], 1 }
0x1326   :  { %7793 = vsyncpa [#allocation5], 1 }
0x1327   :  { %7795 = vsyncpa [#allocation5 + $0x1], 1 }

</bundles_post_ra>
